<compile_context>
chip_gen: v6e
topology: v6e:2x2x1
jax: 0.10.0
libtpu: 0.0.40
codegen_flags: <defaults>
</compile_context>

<pallas_src>
import functools

import jax
import jax.numpy as jnp
from jax.experimental import pallas as pl
from jax.experimental.pallas import tpu as pltpu


def _round_up(x, m):
    return (x + m - 1) // m * m


# ----------------------------- Pallas kernels -----------------------------

def _conv_lrelu_kernel(w_ref, p_ref, b_ref, o_ref):
    # y = W @ P + b ; out = leaky_relu(y)          (layer 0: no BatchNorm)
    y = jnp.dot(w_ref[...], p_ref[...], preferred_element_type=jnp.float32)
    y = y + b_ref[...]                                   # (Cout,1) lane-bcast
    o_ref[...] = jnp.where(y >= 0.0, y, 0.01 * y).astype(o_ref.dtype)


def _bn_lrelu_epilogue(y, g, t, *, m_true, eps):
    # BatchNorm (batch stats over the masked lane axis) + leaky_relu, all f32.
    mp = y.shape[1]
    if mp != m_true:
        # exclude zero-padded voxel columns from the batch statistics
        col = jax.lax.broadcasted_iota(jnp.int32, y.shape, 1)
        ym = jnp.where(col < m_true, y, 0.0)
    else:
        ym = y
    inv_n = 1.0 / float(m_true)
    mean = jnp.sum(ym, axis=1, keepdims=True) * inv_n          # (Cout, 1)
    var = jnp.sum(ym * ym, axis=1, keepdims=True) * inv_n - mean * mean
    var = jnp.maximum(var, 0.0)                                # biased var
    scale = g * jax.lax.rsqrt(var + eps)
    shift = t - mean * scale
    z = y * scale + shift
    return jnp.where(z >= 0.0, z, 0.01 * z)


def _conv_bn_lrelu_kernel(w_ref, p_ref, b_ref, g_ref, t_ref, o_ref, *,
                          m_true, eps):
    y = jnp.dot(w_ref[...], p_ref[...], preferred_element_type=jnp.float32)
    y = y + b_ref[...]
    z = _bn_lrelu_epilogue(y, g_ref[...], t_ref[...], m_true=m_true, eps=eps)
    o_ref[...] = z.astype(o_ref.dtype)


def _conv_bn_lrelu_colsum_kernel(w_ref, p_ref, b_ref, g_ref, t_ref, o_ref, *,
                                 m_true, eps):
    # Same as above, but the activation is only needed for the final mean:
    # emit per-column channel-sums (1, Mp) instead of the full activation.
    y = jnp.dot(w_ref[...], p_ref[...], preferred_element_type=jnp.float32)
    y = y + b_ref[...]
    z = _bn_lrelu_epilogue(y, g_ref[...], t_ref[...], m_true=m_true, eps=eps)
    o_ref[...] = jnp.sum(z, axis=0, keepdims=True).astype(o_ref.dtype)


# ---------------------------- Pallas wrappers ------------------------------

def conv_lrelu_pallas(w, pat, b, out_dtype):
    """leaky_relu(W(Cout,K) @ P(K,Mp) + b) -> (Cout, Mp), tiled over Mp."""
    Cout, Kp = w.shape
    Kp2, Mp = pat.shape
    assert Kp == Kp2
    tm = 512 if (Mp > 512 and Mp % 512 == 0) else Mp
    return pl.pallas_call(
        _conv_lrelu_kernel,
        out_shape=jax.ShapeDtypeStruct((Cout, Mp), out_dtype),
        grid=(Mp // tm,),
        in_specs=[
            pl.BlockSpec((Cout, Kp), lambda i: (0, 0)),
            pl.BlockSpec((Kp, tm), lambda i: (0, i)),
            pl.BlockSpec((Cout, 1), lambda i: (0, 0)),
        ],
        out_specs=pl.BlockSpec((Cout, tm), lambda i: (0, i)),
        compiler_params=pltpu.CompilerParams(
            dimension_semantics=("parallel",)),
    )(w, pat, b)


def conv_bn_lrelu_pallas(w, pat, b, gamma, beta, *, m_true, out_dtype,
                         eps=1e-5):
    """Fused conv(matmul)+bias+BatchNorm(batch stats)+leaky_relu -> (Cout, Mp)."""
    Cout, Kp = w.shape
    Kp2, Mp = pat.shape
    assert Kp == Kp2
    kernel = functools.partial(_conv_bn_lrelu_kernel, m_true=m_true, eps=eps)
    return pl.pallas_call(
        kernel,
        out_shape=jax.ShapeDtypeStruct((Cout, Mp), out_dtype),
        grid=(1,),
        in_specs=[
            pl.BlockSpec((Cout, Kp), lambda i: (0, 0)),
            pl.BlockSpec((Kp, Mp), lambda i: (0, 0)),
            pl.BlockSpec((Cout, 1), lambda i: (0, 0)),
            pl.BlockSpec((Cout, 1), lambda i: (0, 0)),
            pl.BlockSpec((Cout, 1), lambda i: (0, 0)),
        ],
        out_specs=pl.BlockSpec((Cout, Mp), lambda i: (0, 0)),
        compiler_params=pltpu.CompilerParams(
            dimension_semantics=("arbitrary",)),
    )(w, pat, b, gamma, beta)


def conv_bn_lrelu_colsum_pallas(w, pat, b, gamma, beta, *, m_true, eps=1e-5):
    """Last layer: fused conv+BN+leaky_relu, emits per-column channel sums
    (1, Mp) in f32 for the final per-batch mean."""
    Cout, Kp = w.shape
    Kp2, Mp = pat.shape
    assert Kp == Kp2
    kernel = functools.partial(_conv_bn_lrelu_colsum_kernel,
                               m_true=m_true, eps=eps)
    return pl.pallas_call(
        kernel,
        out_shape=jax.ShapeDtypeStruct((1, Mp), jnp.float32),
        grid=(1,),
        in_specs=[
            pl.BlockSpec((Cout, Kp), lambda i: (0, 0)),
            pl.BlockSpec((Kp, Mp), lambda i: (0, 0)),
            pl.BlockSpec((Cout, 1), lambda i: (0, 0)),
            pl.BlockSpec((Cout, 1), lambda i: (0, 0)),
            pl.BlockSpec((Cout, 1), lambda i: (0, 0)),
        ],
        out_specs=pl.BlockSpec((1, Mp), lambda i: (0, 0)),
        compiler_params=pltpu.CompilerParams(
            dimension_semantics=("arbitrary",)),
    )(w, pat, b, gamma, beta)


# ------------------------------- JAX glue ----------------------------------

def im2col_cfirst(x, k=4, s=2, p=1):
    """x: (C, B, D, H, W) -> patches (C*k^3, B*Do*Ho*Wo).

    K-order is (C, kd, kh, kw), matching PyTorch Conv3d weight
    (Cout, Cin, kd, kh, kw).reshape(Cout, -1).  No transposes: the trailing
    reshape is contiguous.
    """
    # TODO(synk): gather the (kd,kh,kw) taps inside the kernel (K-axis grid)
    # instead of materializing 64 strided slices in XLA.
    C, B, D, H, W = x.shape
    Do = (D + 2 * p - k) // s + 1
    Ho = (H + 2 * p - k) // s + 1
    Wo = (W + 2 * p - k) // s + 1
    xp = jnp.pad(x, ((0, 0), (0, 0), (p, p), (p, p), (p, p)))
    taps = []
    for kd in range(k):
        for kh in range(k):
            for kw in range(k):
                taps.append(xp[:, :,
                               kd:kd + s * Do:s,
                               kh:kh + s * Ho:s,
                               kw:kw + s * Wo:s])
    pat = jnp.stack(taps, axis=1)                    # (C, k^3, B, Do, Ho, Wo)
    pat = pat.reshape(C * k * k * k, B * Do * Ho * Wo)
    return pat, (B, Do, Ho, Wo)


def prepare_params(params):
    """One-time (un-jitted) prep: GEMM-ready, Cin-padded, bf16 weights and
    (Cout, 1)-shaped f32 bias / BN affine parameters."""
    pp = {}
    for i in range(4):
        w = params[f"w{i}"]                          # (Cout, Cin, 4, 4, 4)
        cout, cin = w.shape[0], w.shape[1]
        cin_p = _round_up(cin, 2)                    # K = cin_p*64 % 128 == 0
        wm = w.reshape(cout, cin, 64)
        if cin_p != cin:
            wm = jnp.pad(wm, ((0, 0), (0, cin_p - cin), (0, 0)))
        pp[f"w{i}"] = wm.reshape(cout, cin_p * 64).astype(jnp.bfloat16)
        pp[f"b{i}"] = params[f"b{i}"].reshape(cout, 1).astype(jnp.float32)
        if i >= 1:
            pp[f"gamma{i}"] = params[f"gamma{i}"].reshape(cout, 1).astype(jnp.float32)
            pp[f"beta{i}"] = params[f"beta{i}"].reshape(cout, 1).astype(jnp.float32)
    return pp


def model_forward(x, pp, eps=1e-5):
    """x: (B, seq, C, H, W) -> (B,)."""
    # (B, seq, C, H, W) -> channels-first GEMM-row layout (C, B, D, H, W).
    x = jnp.transpose(x, (2, 0, 1, 3, 4)).astype(jnp.bfloat16)

    num_layers = 4
    for i in range(num_layers):
        w = pp[f"w{i}"]
        b = pp[f"b{i}"]
        cout, kp = w.shape
        cin_needed = kp // 64
        c = x.shape[0]
        if c < cin_needed:                 # layer 0: pad Cin 3 -> 4 (K%128==0)
            x = jnp.pad(x, ((0, cin_needed - c),) + ((0, 0),) * 4)

        pat, (B, Do, Ho, Wo) = im2col_cfirst(x)
        m_true = B * Do * Ho * Wo
        mp = _round_up(m_true, 128)
        if mp != m_true:                   # only hits the tiny late layers
            pat = jnp.pad(pat, ((0, 0), (0, mp - m_true)))
        pat = pat.astype(jnp.bfloat16)

        if i == 0:
            h = conv_lrelu_pallas(w, pat, b, jnp.bfloat16)
        elif i < num_layers - 1:
            h = conv_bn_lrelu_pallas(w, pat, b, pp[f"gamma{i}"],
                                     pp[f"beta{i}"], m_true=m_true,
                                     out_dtype=jnp.bfloat16, eps=eps)
        else:
            # Last layer: fused conv+BN+lrelu+channel-sum; finish the mean
            # on a tiny (B, spatial) slab (mean is layout-invariant).
            colsum = conv_bn_lrelu_colsum_pallas(
                w, pat, b, pp[f"gamma{i}"], pp[f"beta{i}"],
                m_true=m_true, eps=eps)                        # (1, Mp) f32
            spatial = Do * Ho * Wo
            per_batch = colsum[0, :m_true].reshape(B, spatial).sum(axis=1)
            return per_batch / float(cout * spatial)

        x = h[:, :m_true].reshape(cout, B, Do, Ho, Wo)


def init_params(key, in_channels=3, mid_ch=16):
    chans = [in_channels, mid_ch, mid_ch * 2, mid_ch * 4, mid_ch * 8]
    params = {}
    keys = jax.random.split(key, 8)
    for i in range(4):
        cin, cout = chans[i], chans[i + 1]
        fan_in = cin * 4 * 4 * 4
        bound = 1.0 / jnp.sqrt(fan_in)
        params[f"w{i}"] = jax.random.uniform(
            keys[2 * i], (cout, cin, 4, 4, 4), jnp.float32, -bound, bound)
        params[f"b{i}"] = jax.random.uniform(
            keys[2 * i + 1], (cout,), jnp.float32, -bound, bound)
        if i >= 1:  # PyTorch BatchNorm3d default affine init
            params[f"gamma{i}"] = jnp.ones((cout,), jnp.float32)
            params[f"beta{i}"] = jnp.zeros((cout,), jnp.float32)
    return params


if __name__ == "__main__":
    key = jax.random.PRNGKey(0)
    kp, kx = jax.random.split(key)

    in_channels, mid_ch = 3, 16
    params = init_params(kp, in_channels=in_channels, mid_ch=mid_ch)
    pp = prepare_params(params)            # one-time weight prep (pre-padded)

    # (B, seq, C, H, W); 16 along seq/H/W so four stride-2 convs remain valid
    x = jax.random.normal(kx, (2, 16, in_channels, 16, 16), jnp.float32)

    out = jax.jit(model_forward)(x, pp)
    out = jax.block_until_ready(out)
    assert out.shape == (2,)
    print("KERNEL_OK")
</pallas_src>

<mosaic_0001>
module attributes {stable_mosaic.version = 11 : i64} {
  func.func @_conv_lrelu_kernel(%arg0: i32, %arg1: memref<16x256xbf16, #tpu.memory_space<vmem>>, %arg2: memref<256x512xbf16, #tpu.memory_space<vmem>>, %arg3: memref<16x1xf32, #tpu.memory_space<vmem>>, %arg4: memref<16x512xbf16, #tpu.memory_space<vmem>>) attributes {dimension_semantics = [#tpu.dimension_semantics<parallel>], iteration_bounds = array<i64: 2>, scalar_prefetch = 0 : i64, scratch_operands = 0 : i64, tpu.core_type = #tpu.core_type<tc>, window_params = [{pipeline_mode = #tpu.pipeline_mode<synchronous>, transform_indices = @transform_0, window_bounds = array<i64: 16, 256>}, {transform_indices = @transform_1, window_bounds = array<i64: 256, 512>}, {pipeline_mode = #tpu.pipeline_mode<synchronous>, transform_indices = @transform_2, window_bounds = array<i64: 16, 1>}, {transform_indices = @transform_3, window_bounds = array<i64: 16, 512>}]} {
    %c0 = arith.constant 0 : index
    %c0_0 = arith.constant 0 : index
    %0 = vector.load %arg1[%c0, %c0_0] : memref<16x256xbf16, #tpu.memory_space<vmem>>, vector<16x256xbf16>
    %c0_1 = arith.constant 0 : index
    %c0_2 = arith.constant 0 : index
    %1 = vector.load %arg2[%c0_1, %c0_2] : memref<256x512xbf16, #tpu.memory_space<vmem>>, vector<256x512xbf16>
    %cst = arith.constant dense<0.000000e+00> : vector<16x512xf32>
    %2 = tpu.matmul %0, %1, %cst {dimension_numbers = #tpu.dot_dimension_numbers<[1], [0], [0], [1], [0, 0, 1, 1], [], []>} : vector<16x256xbf16>, vector<256x512xbf16>, vector<16x512xf32> -> vector<16x512xf32>
    %c0_3 = arith.constant 0 : index
    %c0_4 = arith.constant 0 : index
    %3 = vector.load %arg3[%c0_3, %c0_4] : memref<16x1xf32, #tpu.memory_space<vmem>>, vector<16x1xf32>
    %4 = vector.broadcast %3 : vector<16x1xf32> to vector<16x512xf32>
    %5 = arith.addf %2, %4 : vector<16x512xf32>
    %cst_5 = arith.constant 0.000000e+00 : f32
    %6 = vector.broadcast %cst_5 : f32 to vector<16x512xf32>
    %7 = arith.cmpf oge, %5, %6 : vector<16x512xf32>
    %cst_6 = arith.constant 0.00999999977 : f32
    %8 = vector.broadcast %cst_6 : f32 to vector<16x512xf32>
    %9 = arith.mulf %8, %5 : vector<16x512xf32>
    %10 = arith.select %7, %5, %9 : vector<16x512xi1>, vector<16x512xf32>
    %11 = arith.truncf %10 : vector<16x512xf32> to vector<16x512xbf16>
    %c0_7 = arith.constant 0 : index
    %c0_8 = arith.constant 0 : index
    %12 = vector.load %arg4[%c0_7, %c0_8] : memref<16x512xbf16, #tpu.memory_space<vmem>>, vector<16x512xbf16>
    tpu.vector_store %arg4[%c0_7, %c0_8], %11 {strides = array<i32>} : memref<16x512xbf16, #tpu.memory_space<vmem>>, vector<16x512xbf16>,
    return
  }
  func.func @transform_0(%arg0: i32) -> (i32, i32) {
    %c0_i32 = arith.constant 0 : i32
    %c0_i32_0 = arith.constant 0 : i32
    %c0_i32_1 = arith.constant 0 : i32
    return %c0_i32, %c0_i32_0 : i32, i32
  }
  func.func @transform_1(%arg0: i32) -> (i32, i32) {
    %c0_i32 = arith.constant 0 : i32
    %c0_i32_0 = arith.constant 0 : i32
    return %c0_i32, %arg0 : i32, i32
  }
  func.func @transform_2(%arg0: i32) -> (i32, i32) {
    %c0_i32 = arith.constant 0 : i32
    %c0_i32_0 = arith.constant 0 : i32
    %c0_i32_1 = arith.constant 0 : i32
    return %c0_i32, %c0_i32_0 : i32, i32
  }
  func.func @transform_3(%arg0: i32) -> (i32, i32) {
    %c0_i32 = arith.constant 0 : i32
    %c0_i32_0 = arith.constant 0 : i32
    return %c0_i32, %arg0 : i32, i32
  }
}

module attributes {stable_mosaic.version = 11 : i64} {
  func.func @_conv_bn_lrelu_kernel(%arg0: i32, %arg1: memref<32x1024xbf16, #tpu.memory_space<vmem>>, %arg2: memref<1024x128xbf16, #tpu.memory_space<vmem>>, %arg3: memref<32x1xf32, #tpu.memory_space<vmem>>, %arg4: memref<32x1xf32, #tpu.memory_space<vmem>>, %arg5: memref<32x1xf32, #tpu.memory_space<vmem>>, %arg6: memref<32x128xbf16, #tpu.memory_space<vmem>>) attributes {dimension_semantics = [#tpu.dimension_semantics<arbitrary>], iteration_bounds = array<i64: 1>, scalar_prefetch = 0 : i64, scratch_operands = 0 : i64, tpu.core_type = #tpu.core_type<tc>, window_params = [{pipeline_mode = #tpu.pipeline_mode<synchronous>, transform_indices = @transform_0, window_bounds = array<i64: 32, 1024>}, {pipeline_mode = #tpu.pipeline_mode<synchronous>, transform_indices = @transform_1, window_bounds = array<i64: 1024, 128>}, {pipeline_mode = #tpu.pipeline_mode<synchronous>, transform_indices = @transform_2, window_bounds = array<i64: 32, 1>}, {pipeline_mode = #tpu.pipeline_mode<synchronous>, transform_indices = @transform_3, window_bounds = array<i64: 32, 1>}, {pipeline_mode = #tpu.pipeline_mode<synchronous>, transform_indices = @transform_4, window_bounds = array<i64: 32, 1>}, {pipeline_mode = #tpu.pipeline_mode<synchronous>, transform_indices = @transform_5, window_bounds = array<i64: 32, 128>}]} {
    %c0 = arith.constant 0 : index
    %c0_0 = arith.constant 0 : index
    %0 = vector.load %arg1[%c0, %c0_0] : memref<32x1024xbf16, #tpu.memory_space<vmem>>, vector<32x1024xbf16>
    %c0_1 = arith.constant 0 : index
    %c0_2 = arith.constant 0 : index
    %1 = vector.load %arg2[%c0_1, %c0_2] : memref<1024x128xbf16, #tpu.memory_space<vmem>>, vector<1024x128xbf16>
    %cst = arith.constant dense<0.000000e+00> : vector<32x128xf32>
    %2 = tpu.matmul %0, %1, %cst {dimension_numbers = #tpu.dot_dimension_numbers<[1], [0], [0], [1], [0, 0, 1, 1], [], []>} : vector<32x1024xbf16>, vector<1024x128xbf16>, vector<32x128xf32> -> vector<32x128xf32>
    %c0_3 = arith.constant 0 : index
    %c0_4 = arith.constant 0 : index
    %3 = vector.load %arg3[%c0_3, %c0_4] : memref<32x1xf32, #tpu.memory_space<vmem>>, vector<32x1xf32>
    %4 = vector.broadcast %3 : vector<32x1xf32> to vector<32x128xf32>
    %5 = arith.addf %2, %4 : vector<32x128xf32>
    %c0_5 = arith.constant 0 : index
    %c0_6 = arith.constant 0 : index
    %6 = vector.load %arg4[%c0_5, %c0_6] : memref<32x1xf32, #tpu.memory_space<vmem>>, vector<32x1xf32>
    %c0_7 = arith.constant 0 : index
    %c0_8 = arith.constant 0 : index
    %7 = vector.load %arg5[%c0_7, %c0_8] : memref<32x1xf32, #tpu.memory_space<vmem>>, vector<32x1xf32>
    %cst_9 = arith.constant dense<0.000000e+00> : vector<32xf32>
    %8 = vector.multi_reduction <add>, %5, %cst_9 [1] : vector<32x128xf32> to vector<32xf32>
    %9 = vector.shape_cast %8 : vector<32xf32> to vector<32x1xf32>
    %cst_10 = arith.constant 7.812500e-03 : f32
    %10 = vector.broadcast %cst_10 : f32 to vector<32x1xf32>
    %11 = arith.mulf %9, %10 : vector<32x1xf32>
    %12 = arith.mulf %5, %5 : vector<32x128xf32>
    %cst_11 = arith.constant dense<0.000000e+00> : vector<32xf32>
    %13 = vector.multi_reduction <add>, %12, %cst_11 [1] : vector<32x128xf32> to vector<32xf32>
    %14 = vector.shape_cast %13 : vector<32xf32> to vector<32x1xf32>
    %cst_12 = arith.constant 7.812500e-03 : f32
    %15 = vector.broadcast %cst_12 : f32 to vector<32x1xf32>
    %16 = arith.mulf %14, %15 : vector<32x1xf32>
    %17 = arith.mulf %11, %11 : vector<32x1xf32>
    %18 = arith.subf %16, %17 : vector<32x1xf32>
    %cst_13 = arith.constant 0.000000e+00 : f32
    %19 = vector.broadcast %cst_13 : f32 to vector<32x1xf32>
    %20 = arith.maximumf %18, %19 : vector<32x1xf32>
    %cst_14 = arith.constant 9.99999974E-6 : f32
    %21 = vector.broadcast %cst_14 : f32 to vector<32x1xf32>
    %22 = arith.addf %20, %21 : vector<32x1xf32>
    %23 = math.rsqrt %22 : vector<32x1xf32>
    %24 = arith.mulf %6, %23 : vector<32x1xf32>
    %25 = arith.mulf %11, %24 : vector<32x1xf32>
    %26 = arith.subf %7, %25 : vector<32x1xf32>
    %27 = vector.broadcast %24 : vector<32x1xf32> to vector<32x128xf32>
    %28 = arith.mulf %5, %27 : vector<32x128xf32>
    %29 = vector.broadcast %26 : vector<32x1xf32> to vector<32x128xf32>
    %30 = arith.addf %28, %29 : vector<32x128xf32>
    %cst_15 = arith.constant 0.000000e+00 : f32
    %31 = vector.broadcast %cst_15 : f32 to vector<32x128xf32>
    %32 = arith.cmpf oge, %30, %31 : vector<32x128xf32>
    %cst_16 = arith.constant 0.00999999977 : f32
    %33 = vector.broadcast %cst_16 : f32 to vector<32x128xf32>
    %34 = arith.mulf %33, %30 : vector<32x128xf32>
    %35 = arith.select %32, %30, %34 : vector<32x128xi1>, vector<32x128xf32>
    %36 = arith.truncf %35 : vector<32x128xf32> to vector<32x128xbf16>
    %c0_17 = arith.constant 0 : index
    %c0_18 = arith.constant 0 : index
    %37 = vector.load %arg6[%c0_17, %c0_18] : memref<32x128xbf16, #tpu.memory_space<vmem>>, vector<32x128xbf16>
    tpu.vector_store %arg6[%c0_17, %c0_18], %36 {strides = array<i32>} : memref<32x128xbf16, #tpu.memory_space<vmem>>, vector<32x128xbf16>,
    return
  }
  func.func @transform_0(%arg0: i32) -> (i32, i32) {
    %c0_i32 = arith.constant 0 : i32
    %c0_i32_0 = arith.constant 0 : i32
    %c0_i32_1 = arith.constant 0 : i32
    return %c0_i32, %c0_i32_0 : i32, i32
  }
  func.func @transform_1(%arg0: i32) -> (i32, i32) {
    %c0_i32 = arith.constant 0 : i32
    %c0_i32_0 = arith.constant 0 : i32
    %c0_i32_1 = arith.constant 0 : i32
    return %c0_i32, %c0_i32_0 : i32, i32
  }
  func.func @transform_2(%arg0: i32) -> (i32, i32) {
    %c0_i32 = arith.constant 0 : i32
    %c0_i32_0 = arith.constant 0 : i32
    %c0_i32_1 = arith.constant 0 : i32
    return %c0_i32, %c0_i32_0 : i32, i32
  }
  func.func @transform_3(%arg0: i32) -> (i32, i32) {
    %c0_i32 = arith.constant 0 : i32
    %c0_i32_0 = arith.constant 0 : i32
    %c0_i32_1 = arith.constant 0 : i32
    return %c0_i32, %c0_i32_0 : i32, i32
  }
  func.func @transform_4(%arg0: i32) -> (i32, i32) {
    %c0_i32 = arith.constant 0 : i32
    %c0_i32_0 = arith.constant 0 : i32
    %c0_i32_1 = arith.constant 0 : i32
    return %c0_i32, %c0_i32_0 : i32, i32
  }
  func.func @transform_5(%arg0: i32) -> (i32, i32) {
    %c0_i32 = arith.constant 0 : i32
    %c0_i32_0 = arith.constant 0 : i32
    %c0_i32_1 = arith.constant 0 : i32
    return %c0_i32, %c0_i32_0 : i32, i32
  }
}

module attributes {stable_mosaic.version = 11 : i64} {
  func.func @_conv_bn_lrelu_kernel(%arg0: i32, %arg1: memref<64x2048xbf16, #tpu.memory_space<vmem>>, %arg2: memref<2048x128xbf16, #tpu.memory_space<vmem>>, %arg3: memref<64x1xf32, #tpu.memory_space<vmem>>, %arg4: memref<64x1xf32, #tpu.memory_space<vmem>>, %arg5: memref<64x1xf32, #tpu.memory_space<vmem>>, %arg6: memref<64x128xbf16, #tpu.memory_space<vmem>>) attributes {dimension_semantics = [#tpu.dimension_semantics<arbitrary>], iteration_bounds = array<i64: 1>, scalar_prefetch = 0 : i64, scratch_operands = 0 : i64, tpu.core_type = #tpu.core_type<tc>, window_params = [{pipeline_mode = #tpu.pipeline_mode<synchronous>, transform_indices = @transform_0, window_bounds = array<i64: 64, 2048>}, {pipeline_mode = #tpu.pipeline_mode<synchronous>, transform_indices = @transform_1, window_bounds = array<i64: 2048, 128>}, {pipeline_mode = #tpu.pipeline_mode<synchronous>, transform_indices = @transform_2, window_bounds = array<i64: 64, 1>}, {pipeline_mode = #tpu.pipeline_mode<synchronous>, transform_indices = @transform_3, window_bounds = array<i64: 64, 1>}, {pipeline_mode = #tpu.pipeline_mode<synchronous>, transform_indices = @transform_4, window_bounds = array<i64: 64, 1>}, {pipeline_mode = #tpu.pipeline_mode<synchronous>, transform_indices = @transform_5, window_bounds = array<i64: 64, 128>}]} {
    %c0 = arith.constant 0 : index
    %c0_0 = arith.constant 0 : index
    %0 = vector.load %arg1[%c0, %c0_0] : memref<64x2048xbf16, #tpu.memory_space<vmem>>, vector<64x2048xbf16>
    %c0_1 = arith.constant 0 : index
    %c0_2 = arith.constant 0 : index
    %1 = vector.load %arg2[%c0_1, %c0_2] : memref<2048x128xbf16, #tpu.memory_space<vmem>>, vector<2048x128xbf16>
    %cst = arith.constant dense<0.000000e+00> : vector<64x128xf32>
    %2 = tpu.matmul %0, %1, %cst {dimension_numbers = #tpu.dot_dimension_numbers<[1], [0], [0], [1], [0, 0, 1, 1], [], []>} : vector<64x2048xbf16>, vector<2048x128xbf16>, vector<64x128xf32> -> vector<64x128xf32>
    %c0_3 = arith.constant 0 : index
    %c0_4 = arith.constant 0 : index
    %3 = vector.load %arg3[%c0_3, %c0_4] : memref<64x1xf32, #tpu.memory_space<vmem>>, vector<64x1xf32>
    %4 = vector.broadcast %3 : vector<64x1xf32> to vector<64x128xf32>
    %5 = arith.addf %2, %4 : vector<64x128xf32>
    %c0_5 = arith.constant 0 : index
    %c0_6 = arith.constant 0 : index
    %6 = vector.load %arg4[%c0_5, %c0_6] : memref<64x1xf32, #tpu.memory_space<vmem>>, vector<64x1xf32>
    %c0_7 = arith.constant 0 : index
    %c0_8 = arith.constant 0 : index
    %7 = vector.load %arg5[%c0_7, %c0_8] : memref<64x1xf32, #tpu.memory_space<vmem>>, vector<64x1xf32>
    %8 = tpu.iota {dimensions = array<i32: 1>} : vector<64x128xi32>
    %c16_i32 = arith.constant 16 : i32
    %9 = vector.broadcast %c16_i32 : i32 to vector<64x128xi32>
    %10 = arith.cmpi slt, %8, %9 : vector<64x128xi32>
    %cst_9 = arith.constant 0.000000e+00 : f32
    %11 = vector.broadcast %cst_9 : f32 to vector<64x128xf32>
    %12 = arith.select %10, %5, %11 : vector<64x128xi1>, vector<64x128xf32>
    %cst_10 = arith.constant dense<0.000000e+00> : vector<64xf32>
    %13 = vector.multi_reduction <add>, %12, %cst_10 [1] : vector<64x128xf32> to vector<64xf32>
    %14 = vector.shape_cast %13 : vector<64xf32> to vector<64x1xf32>
    %cst_11 = arith.constant 6.250000e-02 : f32
    %15 = vector.broadcast %cst_11 : f32 to vector<64x1xf32>
    %16 = arith.mulf %14, %15 : vector<64x1xf32>
    %17 = arith.mulf %12, %12 : vector<64x128xf32>
    %cst_12 = arith.constant dense<0.000000e+00> : vector<64xf32>
    %18 = vector.multi_reduction <add>, %17, %cst_12 [1] : vector<64x128xf32> to vector<64xf32>
    %19 = vector.shape_cast %18 : vector<64xf32> to vector<64x1xf32>
    %cst_13 = arith.constant 6.250000e-02 : f32
    %20 = vector.broadcast %cst_13 : f32 to vector<64x1xf32>
    %21 = arith.mulf %19, %20 : vector<64x1xf32>
    %22 = arith.mulf %16, %16 : vector<64x1xf32>
    %23 = arith.subf %21, %22 : vector<64x1xf32>
    %cst_14 = arith.constant 0.000000e+00 : f32
    %24 = vector.broadcast %cst_14 : f32 to vector<64x1xf32>
    %25 = arith.maximumf %23, %24 : vector<64x1xf32>
    %cst_15 = arith.constant 9.99999974E-6 : f32
    %26 = vector.broadcast %cst_15 : f32 to vector<64x1xf32>
    %27 = arith.addf %25, %26 : vector<64x1xf32>
    %28 = math.rsqrt %27 : vector<64x1xf32>
    %29 = arith.mulf %6, %28 : vector<64x1xf32>
    %30 = arith.mulf %16, %29 : vector<64x1xf32>
    %31 = arith.subf %7, %30 : vector<64x1xf32>
    %32 = vector.broadcast %29 : vector<64x1xf32> to vector<64x128xf32>
    %33 = arith.mulf %5, %32 : vector<64x128xf32>
    %34 = vector.broadcast %31 : vector<64x1xf32> to vector<64x128xf32>
    %35 = arith.addf %33, %34 : vector<64x128xf32>
    %cst_16 = arith.constant 0.000000e+00 : f32
    %36 = vector.broadcast %cst_16 : f32 to vector<64x128xf32>
    %37 = arith.cmpf oge, %35, %36 : vector<64x128xf32>
    %cst_17 = arith.constant 0.00999999977 : f32
    %38 = vector.broadcast %cst_17 : f32 to vector<64x128xf32>
    %39 = arith.mulf %38, %35 : vector<64x128xf32>
    %40 = arith.select %37, %35, %39 : vector<64x128xi1>, vector<64x128xf32>
    %41 = arith.truncf %40 : vector<64x128xf32> to vector<64x128xbf16>
    %c0_18 = arith.constant 0 : index
    %c0_19 = arith.constant 0 : index
    %42 = vector.load %arg6[%c0_18, %c0_19] : memref<64x128xbf16, #tpu.memory_space<vmem>>, vector<64x128xbf16>
    tpu.vector_store %arg6[%c0_18, %c0_19], %41 {strides = array<i32>} : memref<64x128xbf16, #tpu.memory_space<vmem>>, vector<64x128xbf16>,
    return
  }
  func.func @transform_0(%arg0: i32) -> (i32, i32) {
    %c0_i32 = arith.constant 0 : i32
    %c0_i32_0 = arith.constant 0 : i32
    %c0_i32_1 = arith.constant 0 : i32
    return %c0_i32, %c0_i32_0 : i32, i32
  }
  func.func @transform_1(%arg0: i32) -> (i32, i32) {
    %c0_i32 = arith.constant 0 : i32
    %c0_i32_0 = arith.constant 0 : i32
    %c0_i32_1 = arith.constant 0 : i32
    return %c0_i32, %c0_i32_0 : i32, i32
  }
  func.func @transform_2(%arg0: i32) -> (i32, i32) {
    %c0_i32 = arith.constant 0 : i32
    %c0_i32_0 = arith.constant 0 : i32
    %c0_i32_1 = arith.constant 0 : i32
    return %c0_i32, %c0_i32_0 : i32, i32
  }
  func.func @transform_3(%arg0: i32) -> (i32, i32) {
    %c0_i32 = arith.constant 0 : i32
    %c0_i32_0 = arith.constant 0 : i32
    %c0_i32_1 = arith.constant 0 : i32
    return %c0_i32, %c0_i32_0 : i32, i32
  }
  func.func @transform_4(%arg0: i32) -> (i32, i32) {
    %c0_i32 = arith.constant 0 : i32
    %c0_i32_0 = arith.constant 0 : i32
    %c0_i32_1 = arith.constant 0 : i32
    return %c0_i32, %c0_i32_0 : i32, i32
  }
  func.func @transform_5(%arg0: i32) -> (i32, i32) {
    %c0_i32 = arith.constant 0 : i32
    %c0_i32_0 = arith.constant 0 : i32
    %c0_i32_1 = arith.constant 0 : i32
    return %c0_i32, %c0_i32_0 : i32, i32
  }
}

module attributes {stable_mosaic.version = 11 : i64} {
  func.func @_conv_bn_lrelu_colsum_kernel(%arg0: i32, %arg1: memref<128x4096xbf16, #tpu.memory_space<vmem>>, %arg2: memref<4096x128xbf16, #tpu.memory_space<vmem>>, %arg3: memref<128x1xf32, #tpu.memory_space<vmem>>, %arg4: memref<128x1xf32, #tpu.memory_space<vmem>>, %arg5: memref<128x1xf32, #tpu.memory_space<vmem>>, %arg6: memref<1x128xf32, #tpu.memory_space<vmem>>) attributes {dimension_semantics = [#tpu.dimension_semantics<arbitrary>], iteration_bounds = array<i64: 1>, scalar_prefetch = 0 : i64, scratch_operands = 0 : i64, tpu.core_type = #tpu.core_type<tc>, window_params = [{pipeline_mode = #tpu.pipeline_mode<synchronous>, transform_indices = @transform_0, window_bounds = array<i64: 128, 4096>}, {pipeline_mode = #tpu.pipeline_mode<synchronous>, transform_indices = @transform_1, window_bounds = array<i64: 4096, 128>}, {pipeline_mode = #tpu.pipeline_mode<synchronous>, transform_indices = @transform_2, window_bounds = array<i64: 128, 1>}, {pipeline_mode = #tpu.pipeline_mode<synchronous>, transform_indices = @transform_3, window_bounds = array<i64: 128, 1>}, {pipeline_mode = #tpu.pipeline_mode<synchronous>, transform_indices = @transform_4, window_bounds = array<i64: 128, 1>}, {pipeline_mode = #tpu.pipeline_mode<synchronous>, transform_indices = @transform_5, window_bounds = array<i64: 1, 128>}]} {
    %c0 = arith.constant 0 : index
    %c0_0 = arith.constant 0 : index
    %0 = vector.load %arg1[%c0, %c0_0] : memref<128x4096xbf16, #tpu.memory_space<vmem>>, vector<128x4096xbf16>
    %c0_1 = arith.constant 0 : index
    %c0_2 = arith.constant 0 : index
    %1 = vector.load %arg2[%c0_1, %c0_2] : memref<4096x128xbf16, #tpu.memory_space<vmem>>, vector<4096x128xbf16>
    %cst = arith.constant dense<0.000000e+00> : vector<128x128xf32>
    %2 = tpu.matmul %0, %1, %cst {dimension_numbers = #tpu.dot_dimension_numbers<[1], [0], [0], [1], [0, 0, 1, 1], [], []>} : vector<128x4096xbf16>, vector<4096x128xbf16>, vector<128x128xf32> -> vector<128x128xf32>
    %c0_3 = arith.constant 0 : index
    %c0_4 = arith.constant 0 : index
    %3 = vector.load %arg3[%c0_3, %c0_4] : memref<128x1xf32, #tpu.memory_space<vmem>>, vector<128x1xf32>
    %4 = vector.broadcast %3 : vector<128x1xf32> to vector<128x128xf32>
    %5 = arith.addf %2, %4 : vector<128x128xf32>
    %c0_5 = arith.constant 0 : index
    %c0_6 = arith.constant 0 : index
    %6 = vector.load %arg4[%c0_5, %c0_6] : memref<128x1xf32, #tpu.memory_space<vmem>>, vector<128x1xf32>
    %c0_7 = arith.constant 0 : index
    %c0_8 = arith.constant 0 : index
    %7 = vector.load %arg5[%c0_7, %c0_8] : memref<128x1xf32, #tpu.memory_space<vmem>>, vector<128x1xf32>
    %8 = tpu.iota {dimensions = array<i32: 1>} : vector<128x128xi32>
    %c2_i32 = arith.constant 2 : i32
    %9 = vector.broadcast %c2_i32 : i32 to vector<128x128xi32>
    %10 = arith.cmpi slt, %8, %9 : vector<128x128xi32>
    %cst_9 = arith.constant 0.000000e+00 : f32
    %11 = vector.broadcast %cst_9 : f32 to vector<128x128xf32>
    %12 = arith.select %10, %5, %11 : vector<128x128xi1>, vector<128x128xf32>
    %cst_10 = arith.constant dense<0.000000e+00> : vector<128xf32>
    %13 = vector.multi_reduction <add>, %12, %cst_10 [1] : vector<128x128xf32> to vector<128xf32>
    %14 = vector.shape_cast %13 : vector<128xf32> to vector<128x1xf32>
    %cst_11 = arith.constant 5.000000e-01 : f32
    %15 = vector.broadcast %cst_11 : f32 to vector<128x1xf32>
    %16 = arith.mulf %14, %15 : vector<128x1xf32>
    %17 = arith.mulf %12, %12 : vector<128x128xf32>
    %cst_12 = arith.constant dense<0.000000e+00> : vector<128xf32>
    %18 = vector.multi_reduction <add>, %17, %cst_12 [1] : vector<128x128xf32> to vector<128xf32>
    %19 = vector.shape_cast %18 : vector<128xf32> to vector<128x1xf32>
    %cst_13 = arith.constant 5.000000e-01 : f32
    %20 = vector.broadcast %cst_13 : f32 to vector<128x1xf32>
    %21 = arith.mulf %19, %20 : vector<128x1xf32>
    %22 = arith.mulf %16, %16 : vector<128x1xf32>
    %23 = arith.subf %21, %22 : vector<128x1xf32>
    %cst_14 = arith.constant 0.000000e+00 : f32
    %24 = vector.broadcast %cst_14 : f32 to vector<128x1xf32>
    %25 = arith.maximumf %23, %24 : vector<128x1xf32>
    %cst_15 = arith.constant 9.99999974E-6 : f32
    %26 = vector.broadcast %cst_15 : f32 to vector<128x1xf32>
    %27 = arith.addf %25, %26 : vector<128x1xf32>
    %28 = math.rsqrt %27 : vector<128x1xf32>
    %29 = arith.mulf %6, %28 : vector<128x1xf32>
    %30 = arith.mulf %16, %29 : vector<128x1xf32>
    %31 = arith.subf %7, %30 : vector<128x1xf32>
    %32 = vector.broadcast %29 : vector<128x1xf32> to vector<128x128xf32>
    %33 = arith.mulf %5, %32 : vector<128x128xf32>
    %34 = vector.broadcast %31 : vector<128x1xf32> to vector<128x128xf32>
    %35 = arith.addf %33, %34 : vector<128x128xf32>
    %cst_16 = arith.constant 0.000000e+00 : f32
    %36 = vector.broadcast %cst_16 : f32 to vector<128x128xf32>
    %37 = arith.cmpf oge, %35, %36 : vector<128x128xf32>
    %cst_17 = arith.constant 0.00999999977 : f32
    %38 = vector.broadcast %cst_17 : f32 to vector<128x128xf32>
    %39 = arith.mulf %38, %35 : vector<128x128xf32>
    %40 = arith.select %37, %35, %39 : vector<128x128xi1>, vector<128x128xf32>
    %cst_18 = arith.constant dense<0.000000e+00> : vector<128xf32>
    %41 = vector.multi_reduction <add>, %40, %cst_18 [0] : vector<128x128xf32> to vector<128xf32>
    %42 = vector.shape_cast %41 : vector<128xf32> to vector<1x128xf32>
    %c0_19 = arith.constant 0 : index
    %c0_20 = arith.constant 0 : index
    %43 = vector.load %arg6[%c0_19, %c0_20] : memref<1x128xf32, #tpu.memory_space<vmem>>, vector<1x128xf32>
    tpu.vector_store %arg6[%c0_19, %c0_20], %42 {strides = array<i32>} : memref<1x128xf32, #tpu.memory_space<vmem>>, vector<1x128xf32>,
    return
  }
  func.func @transform_0(%arg0: i32) -> (i32, i32) {
    %c0_i32 = arith.constant 0 : i32
    %c0_i32_0 = arith.constant 0 : i32
    %c0_i32_1 = arith.constant 0 : i32
    return %c0_i32, %c0_i32_0 : i32, i32
  }
  func.func @transform_1(%arg0: i32) -> (i32, i32) {
    %c0_i32 = arith.constant 0 : i32
    %c0_i32_0 = arith.constant 0 : i32
    %c0_i32_1 = arith.constant 0 : i32
    return %c0_i32, %c0_i32_0 : i32, i32
  }
  func.func @transform_2(%arg0: i32) -> (i32, i32) {
    %c0_i32 = arith.constant 0 : i32
    %c0_i32_0 = arith.constant 0 : i32
    %c0_i32_1 = arith.constant 0 : i32
    return %c0_i32, %c0_i32_0 : i32, i32
  }
  func.func @transform_3(%arg0: i32) -> (i32, i32) {
    %c0_i32 = arith.constant 0 : i32
    %c0_i32_0 = arith.constant 0 : i32
    %c0_i32_1 = arith.constant 0 : i32
    return %c0_i32, %c0_i32_0 : i32, i32
  }
  func.func @transform_4(%arg0: i32) -> (i32, i32) {
    %c0_i32 = arith.constant 0 : i32
    %c0_i32_0 = arith.constant 0 : i32
    %c0_i32_1 = arith.constant 0 : i32
    return %c0_i32, %c0_i32_0 : i32, i32
  }
  func.func @transform_5(%arg0: i32) -> (i32, i32) {
    %c0_i32 = arith.constant 0 : i32
    %c0_i32_0 = arith.constant 0 : i32
    %c0_i32_1 = arith.constant 0 : i32
    return %c0_i32, %c0_i32_0 : i32, i32
  }
}

</mosaic_0001>

<bundles_post_ra>
// kernel: model_forward.4
= control target key start
LH: loop header
LB: loop body
LE: loop exit
PB: predicated region body
PF: predicated region fallthrough
CT: control target
= control target key end

     0   :  { %s1209_s12 = smov 0   ;;  %s1211_s13 = smov 0   ;;  %s1483_s0 = inlined_call_operand.vmem [shape: bf16[16,256], index: 0, kind: input, shape index: {}]   ;;  %s1484_s1 = inlined_call_operand.vmem [shape: bf16[256,1024], index: 1, kind: input, shape index: {}]   ;;  %s1485_s2 = inlined_call_operand.vmem [shape: f32[16,1], index: 2, kind: input, shape index: {}]   ;;  %s1486_s3 = inlined_call_operand.vmem [shape: bf16[16,1024], index: 3, kind: output, shape index: {}]  }
   0x1   :  { %s1213_s14 = smov 0  }
   0x2 LB: > { %s948_s15 = sadd.s32 4294967295, %s1186_s14   ;;  %s1226_s16 = sadd.s32 1, %s1186_s14   ;;  %s1186_s14 = sphi %s1213_s14, %s1490_s14   ;;  %s1182_s13 = sphi %s1211_s13, %s1489_s13   ;;  %s1178_s12 = sphi %s1209_s12, %s1488_s12  }
   0x3   : > { %s38_s17 = ssub.s32 %s1186_s14, %s1226_s16  ;;  %s41_s18 = sadd.s32 1, %s1182_s13 }
   0x4   : > { %p39_p0 = scmp.eq.s32.totalorder %s38_s17, 0  ;;  %p48_p1 = scmp.ne.s32.totalorder %s1182_s13, %s1178_s12 }
   0x5   : > { %p49_p2 = scmp.eq.s32.totalorder %s1186_s14, 0  ;;  %p99_p3 = scmp.eq.s32.totalorder %s948_s15, 1 }
   0x6   : > { %s1237_s19 = scalar_select %p39_p0, %s1182_s13, %s41_s18  }
   0x7   : > { %p50_p4 = por %p49_p2, %p48_p1  ;;  %p1239_p5 = por %p99_p3, %p48_p1 }
   0x8   : > { %p951_p6 = scmp.ge.s32.totalorder %s1186_s14, 2 }
   0xa   : > { %127 = sbr.rel (%p951_p6) target bundleno = 51 (0x33), region = 24 }
   0xf   : > { %130 = sbr.rel (!%p50_p4) target bundleno = 51 (0x33), region = 28  ;;  %s132_s21 = sand.u32 (%p50_p4), 1, %s1182_s13  }
  0x10   : > { %s1033_s22 = sshll.u32 (%p50_p4), %s1186_s14, 4  ;;  %s952_s23 = sshll.u32 (%p50_p4), %s132_s21, 9 }
  0x11   : > { %s1249_s26 = scalar_lea.vmem (%p50_p4), %s1484_s1, %s1033_s22  ;;  %s1254_s27 = scalar_lea.vmem (%p50_p4), [#allocation2], %s952_s23 }
  0x12   : > { %v150_v0 = vld [vmem:[%s1249_s26] sm:$0xff] (%p50_p4)  ;;  %v152_v1 = vld [vmem:[%s1249_s26 + $0x8] sm:$0xff] (%p50_p4) }
  0x13   : > { %v154_v2 = vld [vmem:[%s1249_s26 + $0x20] sm:$0xff] (%p50_p4)  ;;  %151 = vst [vmem:[%s1254_s27] sm:$0xff] (%p50_p4), %v150_v0  ;;  %153 = vst [vmem:[%s1254_s27 + $0x8] sm:$0xff] (%p50_p4), %v152_v1  ;;  %v156_v3 = vld [vmem:[%s1249_s26 + $0x28] sm:$0xff] (%p50_p4) }
  0x14   : > { %155 = vst [vmem:[%s1254_s27 + $0x10] sm:$0xff] %v154_v2  ;;  %v158_v4 = vld [vmem:[%s1249_s26 + $0x40] sm:$0xff]  ;;  %v160_v5 = vld [vmem:[%s1249_s26 + $0x48] sm:$0xff]  ;;  %157 = vst [vmem:[%s1254_s27 + $0x18] sm:$0xff] %v156_v3 }
  0x15   : > { %159 = vst [vmem:[%s1254_s27 + $0x20] sm:$0xff] %v158_v4  ;;  %161 = vst [vmem:[%s1254_s27 + $0x28] sm:$0xff] %v160_v5  ;;  %v162_v6 = vld [vmem:[%s1249_s26 + $0x60] sm:$0xff]  ;;  %v164_v7 = vld [vmem:[%s1249_s26 + $0x68] sm:$0xff] }
  0x16   : > { %v166_v8 = vld [vmem:[%s1249_s26 + $0x80] sm:$0xff]  ;;  %163 = vst [vmem:[%s1254_s27 + $0x30] sm:$0xff] %v162_v6  ;;  %165 = vst [vmem:[%s1254_s27 + $0x38] sm:$0xff] %v164_v7  ;;  %v168_v9 = vld [vmem:[%s1249_s26 + $0x88] sm:$0xff] }
  0x17   : > { %167 = vst [vmem:[%s1254_s27 + $0x40] sm:$0xff] %v166_v8  ;;  %v170_v10 = vld [vmem:[%s1249_s26 + $0xa0] sm:$0xff]  ;;  %v172_v11 = vld [vmem:[%s1249_s26 + $0xa8] sm:$0xff]  ;;  %169 = vst [vmem:[%s1254_s27 + $0x48] sm:$0xff] %v168_v9 }
  0x18   : > { %171 = vst [vmem:[%s1254_s27 + $0x50] sm:$0xff] %v170_v10  ;;  %173 = vst [vmem:[%s1254_s27 + $0x58] sm:$0xff] %v172_v11  ;;  %v174_v12 = vld [vmem:[%s1249_s26 + $0xc0] sm:$0xff]  ;;  %v176_v13 = vld [vmem:[%s1249_s26 + $0xc8] sm:$0xff] }
  0x19   : > { %v178_v14 = vld [vmem:[%s1249_s26 + $0xe0] sm:$0xff]  ;;  %175 = vst [vmem:[%s1254_s27 + $0x60] sm:$0xff] %v174_v12  ;;  %177 = vst [vmem:[%s1254_s27 + $0x68] sm:$0xff] %v176_v13  ;;  %v180_v15 = vld [vmem:[%s1249_s26 + $0xe8] sm:$0xff] }
  0x1a   : > { %179 = vst [vmem:[%s1254_s27 + $0x70] sm:$0xff] %v178_v14  ;;  %v182_v16 = vld [vmem:[%s1249_s26 + $0x100] sm:$0xff]  ;;  %v184_v17 = vld [vmem:[%s1249_s26 + $0x108] sm:$0xff]  ;;  %181 = vst [vmem:[%s1254_s27 + $0x78] sm:$0xff] %v180_v15 }
  0x1b   : > { %183 = vst [vmem:[%s1254_s27 + $0x80] sm:$0xff] %v182_v16  ;;  %185 = vst [vmem:[%s1254_s27 + $0x88] sm:$0xff] %v184_v17  ;;  %v186_v18 = vld [vmem:[%s1249_s26 + $0x120] sm:$0xff]  ;;  %v188_v19 = vld [vmem:[%s1249_s26 + $0x128] sm:$0xff] }
  0x1c   : > { %v190_v20 = vld [vmem:[%s1249_s26 + $0x140] sm:$0xff]  ;;  %187 = vst [vmem:[%s1254_s27 + $0x90] sm:$0xff] %v186_v18  ;;  %189 = vst [vmem:[%s1254_s27 + $0x98] sm:$0xff] %v188_v19  ;;  %v192_v21 = vld [vmem:[%s1249_s26 + $0x148] sm:$0xff] }
  0x1d   : > { %191 = vst [vmem:[%s1254_s27 + $0xa0] sm:$0xff] %v190_v20  ;;  %v194_v22 = vld [vmem:[%s1249_s26 + $0x160] sm:$0xff]  ;;  %v196_v23 = vld [vmem:[%s1249_s26 + $0x168] sm:$0xff]  ;;  %193 = vst [vmem:[%s1254_s27 + $0xa8] sm:$0xff] %v192_v21 }
  0x1e   : > { %195 = vst [vmem:[%s1254_s27 + $0xb0] sm:$0xff] %v194_v22  ;;  %197 = vst [vmem:[%s1254_s27 + $0xb8] sm:$0xff] %v196_v23  ;;  %v198_v24 = vld [vmem:[%s1249_s26 + $0x180] sm:$0xff]  ;;  %v200_v25 = vld [vmem:[%s1249_s26 + $0x188] sm:$0xff] }
  0x1f   : > { %v202_v26 = vld [vmem:[%s1249_s26 + $0x1a0] sm:$0xff]  ;;  %199 = vst [vmem:[%s1254_s27 + $0xc0] sm:$0xff] %v198_v24  ;;  %201 = vst [vmem:[%s1254_s27 + $0xc8] sm:$0xff] %v200_v25  ;;  %v204_v27 = vld [vmem:[%s1249_s26 + $0x1a8] sm:$0xff] }
  0x20   : > { %203 = vst [vmem:[%s1254_s27 + $0xd0] sm:$0xff] %v202_v26  ;;  %v206_v28 = vld [vmem:[%s1249_s26 + $0x1c0] sm:$0xff]  ;;  %v208_v29 = vld [vmem:[%s1249_s26 + $0x1c8] sm:$0xff]  ;;  %205 = vst [vmem:[%s1254_s27 + $0xd8] sm:$0xff] %v204_v27 }
  0x21   : > { %207 = vst [vmem:[%s1254_s27 + $0xe0] sm:$0xff] %v206_v28  ;;  %209 = vst [vmem:[%s1254_s27 + $0xe8] sm:$0xff] %v208_v29  ;;  %v210_v30 = vld [vmem:[%s1249_s26 + $0x1e0] sm:$0xff]  ;;  %v212_v31 = vld [vmem:[%s1249_s26 + $0x1e8] sm:$0xff] }
  0x22   : > { %v214_v32 = vld [vmem:[%s1249_s26 + $0x200] sm:$0xff]  ;;  %211 = vst [vmem:[%s1254_s27 + $0xf0] sm:$0xff] %v210_v30  ;;  %213 = vst [vmem:[%s1254_s27 + $0xf8] sm:$0xff] %v212_v31  ;;  %v216_v33 = vld [vmem:[%s1249_s26 + $0x208] sm:$0xff] }
  0x23   : > { %215 = vst [vmem:[%s1254_s27 + $0x100] sm:$0xff] %v214_v32  ;;  %v218_v34 = vld [vmem:[%s1249_s26 + $0x220] sm:$0xff]  ;;  %v220_v35 = vld [vmem:[%s1249_s26 + $0x228] sm:$0xff]  ;;  %217 = vst [vmem:[%s1254_s27 + $0x108] sm:$0xff] %v216_v33 }
  0x24   : > { %219 = vst [vmem:[%s1254_s27 + $0x110] sm:$0xff] %v218_v34  ;;  %221 = vst [vmem:[%s1254_s27 + $0x118] sm:$0xff] %v220_v35  ;;  %v222_v36 = vld [vmem:[%s1249_s26 + $0x240] sm:$0xff]  ;;  %v224_v37 = vld [vmem:[%s1249_s26 + $0x248] sm:$0xff] }
  0x25   : > { %v226_v38 = vld [vmem:[%s1249_s26 + $0x260] sm:$0xff]  ;;  %223 = vst [vmem:[%s1254_s27 + $0x120] sm:$0xff] %v222_v36  ;;  %225 = vst [vmem:[%s1254_s27 + $0x128] sm:$0xff] %v224_v37  ;;  %v228_v39 = vld [vmem:[%s1249_s26 + $0x268] sm:$0xff] }
  0x26   : > { %227 = vst [vmem:[%s1254_s27 + $0x130] sm:$0xff] %v226_v38  ;;  %v230_v40 = vld [vmem:[%s1249_s26 + $0x280] sm:$0xff]  ;;  %v232_v41 = vld [vmem:[%s1249_s26 + $0x288] sm:$0xff]  ;;  %229 = vst [vmem:[%s1254_s27 + $0x138] sm:$0xff] %v228_v39 }
  0x27   : > { %231 = vst [vmem:[%s1254_s27 + $0x140] sm:$0xff] %v230_v40  ;;  %233 = vst [vmem:[%s1254_s27 + $0x148] sm:$0xff] %v232_v41  ;;  %v234_v42 = vld [vmem:[%s1249_s26 + $0x2a0] sm:$0xff]  ;;  %v236_v43 = vld [vmem:[%s1249_s26 + $0x2a8] sm:$0xff] }
  0x28   : > { %v238_v44 = vld [vmem:[%s1249_s26 + $0x2c0] sm:$0xff]  ;;  %235 = vst [vmem:[%s1254_s27 + $0x150] sm:$0xff] %v234_v42  ;;  %237 = vst [vmem:[%s1254_s27 + $0x158] sm:$0xff] %v236_v43  ;;  %v240_v45 = vld [vmem:[%s1249_s26 + $0x2c8] sm:$0xff] }
  0x29   : > { %239 = vst [vmem:[%s1254_s27 + $0x160] sm:$0xff] %v238_v44  ;;  %v242_v46 = vld [vmem:[%s1249_s26 + $0x2e0] sm:$0xff]  ;;  %v244_v47 = vld [vmem:[%s1249_s26 + $0x2e8] sm:$0xff]  ;;  %241 = vst [vmem:[%s1254_s27 + $0x168] sm:$0xff] %v240_v45 }
  0x2a   : > { %243 = vst [vmem:[%s1254_s27 + $0x170] sm:$0xff] %v242_v46  ;;  %245 = vst [vmem:[%s1254_s27 + $0x178] sm:$0xff] %v244_v47  ;;  %v246_v48 = vld [vmem:[%s1249_s26 + $0x300] sm:$0xff]  ;;  %v248_v49 = vld [vmem:[%s1249_s26 + $0x308] sm:$0xff] }
  0x2b   : > { %v250_v50 = vld [vmem:[%s1249_s26 + $0x320] sm:$0xff]  ;;  %247 = vst [vmem:[%s1254_s27 + $0x180] sm:$0xff] %v246_v48  ;;  %249 = vst [vmem:[%s1254_s27 + $0x188] sm:$0xff] %v248_v49  ;;  %v252_v51 = vld [vmem:[%s1249_s26 + $0x328] sm:$0xff] }
  0x2c   : > { %251 = vst [vmem:[%s1254_s27 + $0x190] sm:$0xff] %v250_v50  ;;  %v254_v52 = vld [vmem:[%s1249_s26 + $0x340] sm:$0xff]  ;;  %v256_v53 = vld [vmem:[%s1249_s26 + $0x348] sm:$0xff]  ;;  %253 = vst [vmem:[%s1254_s27 + $0x198] sm:$0xff] %v252_v51 }
  0x2d   : > { %255 = vst [vmem:[%s1254_s27 + $0x1a0] sm:$0xff] %v254_v52  ;;  %257 = vst [vmem:[%s1254_s27 + $0x1a8] sm:$0xff] %v256_v53  ;;  %v258_v54 = vld [vmem:[%s1249_s26 + $0x360] sm:$0xff]  ;;  %v260_v55 = vld [vmem:[%s1249_s26 + $0x368] sm:$0xff] }
  0x2e   : > { %v262_v56 = vld [vmem:[%s1249_s26 + $0x380] sm:$0xff]  ;;  %259 = vst [vmem:[%s1254_s27 + $0x1b0] sm:$0xff] %v258_v54  ;;  %261 = vst [vmem:[%s1254_s27 + $0x1b8] sm:$0xff] %v260_v55  ;;  %v264_v57 = vld [vmem:[%s1249_s26 + $0x388] sm:$0xff] }
  0x2f   : > { %263 = vst [vmem:[%s1254_s27 + $0x1c0] sm:$0xff] %v262_v56  ;;  %v266_v58 = vld [vmem:[%s1249_s26 + $0x3a0] sm:$0xff]  ;;  %v268_v59 = vld [vmem:[%s1249_s26 + $0x3a8] sm:$0xff]  ;;  %265 = vst [vmem:[%s1254_s27 + $0x1c8] sm:$0xff] %v264_v57 }
  0x30   : > { %267 = vst [vmem:[%s1254_s27 + $0x1d0] sm:$0xff] %v266_v58  ;;  %269 = vst [vmem:[%s1254_s27 + $0x1d8] sm:$0xff] %v268_v59  ;;  %v270_v60 = vld [vmem:[%s1249_s26 + $0x3c0] sm:$0xff]  ;;  %v272_v61 = vld [vmem:[%s1249_s26 + $0x3c8] sm:$0xff] }
  0x31   : > { %v274_v62 = vld [vmem:[%s1249_s26 + $0x3e0] sm:$0xff]  ;;  %271 = vst [vmem:[%s1254_s27 + $0x1e0] sm:$0xff] %v270_v60  ;;  %273 = vst [vmem:[%s1254_s27 + $0x1e8] sm:$0xff] %v272_v61  ;;  %v276_v63 = vld [vmem:[%s1249_s26 + $0x3e8] sm:$0xff] }
  0x32   : > { %275 = vst [vmem:[%s1254_s27 + $0x1f0] sm:$0xff] %v274_v62  ;;  %277 = vst [vmem:[%s1254_s27 + $0x1f8] sm:$0xff] %v276_v63 }
  0x33 PF: > { %p955_p7 = scmp.ge.s32.totalorder %s1186_s14, 1  ;;  %p282_p8 = scmp.lt.s32.totalorder %s1186_s14, 3 }
  0x35   : > { %p283_p9 = pnand %p955_p7, %p282_p8 }
  0x36   : > { %s289_s28 = sand.u32 (!%p283_p9), 1, %s1178_s12  }
  0x37   : > { %286 = sbr.rel (%p283_p9) target bundleno = 343 (0x157), region = 51  ;;  %s956_s29 = sshll.u32 (!%p283_p9), %s289_s28, 9 }
  0x38   : > { %s1395_s9 = scalar_lea.vmem (!%p283_p9), [#allocation2], %s956_s29  ;;  %s957_s17 = sshll.u32 (!%p283_p9), %s289_s28, 5 }
  0x39   : > { %s310_s12 = scalar_lea.vmem (!%p283_p9), [#allocation3], %s957_s17 }
  0x3c   : > { %v1163_v0 = vld [vmem:[%s1483_s0 + $0x4] ss:$8 sps:$4 sm:$0xff]   ;;  %v1188_v1 = vmov 0   ;;  %v1069_v6 = vld [vmem:[%s1395_s9 + $0xe0] ss:$16 sps:$4 sm:$0xff]   ;;  %s1038_s18 = sshll.u32 (%p1239_p5), %s948_s15, 4 }
  0x3d   : > { %1064 = vset.pattern.permute.xlu0 %v1188_v1  ;;  %v379_v2 = vld [vmem:[%s1485_s2] sm:$0xff]  ;;  %v380_v3 = vld [vmem:[%s1485_s2 + $0x8] sm:$0xff]  ;;  %753 = vmatprep.mubr.bf16.mxu0 %v1163_v0  ;;  %s868_s23 = scalar_lea.vmem (%p1239_p5), %s1486_s3, %s1038_s18 }
  0x3e   : > { %383 = vperm.xlu0 %1064, %v379_v2   ;;  %v1065_v4 = vld [vmem:[%s1395_s9 + $0xe4] ss:$16 sps:$4 sm:$0xff]   ;;  %796 = vmatprep.mubr.bf16.mxu1 %v1163_v0  ;;  %v1067_v5 = vld [vmem:[%s1395_s9 + $0xec] ss:$16 sps:$4 sm:$0xff]   ;;  %v1070_v7 = vld [vmem:[%s1395_s9 + $0xe8] ss:$16 sps:$4 sm:$0xff]  }
  0x3f   : > { %721 = vmatprep.subr.bf16.mxu0 %v1065_v4  ;;  %764 = vmatprep.subr.bf16.mxu1 %v1067_v5  ;;  %v1071_v8 = vld [vmem:[%s1395_s9 + $0xc4] ss:$16 sps:$4 sm:$0xff]   ;;  %v1073_v9 = vld [vmem:[%s1395_s9 + $0xcc] ss:$16 sps:$4 sm:$0xff]   ;;  %v1075_v10 = vld [vmem:[%s1395_s9 + $0xc0] ss:$16 sps:$4 sm:$0xff]  }
  0x40   : > { %722 = vmatpush1.bf16.msra.mxu0 %v1069_v6  ;;  %765 = vmatpush1.bf16.msra.mxu1 %v1070_v7  ;;  %v1076_v11 = vld [vmem:[%s1395_s9 + $0xc8] ss:$16 sps:$4 sm:$0xff]   ;;  %v1077_v12 = vld [vmem:[%s1395_s9 + $0xa4] ss:$16 sps:$4 sm:$0xff]   ;;  %v1079_v13 = vld [vmem:[%s1395_s9 + $0xac] ss:$16 sps:$4 sm:$0xff]  }
  0x41   : > { %723 = vmatprep.subr.bf16.mxu0 %v1071_v8  ;;  %766 = vmatprep.subr.bf16.mxu1 %v1073_v9  ;;  %v1081_v14 = vld [vmem:[%s1395_s9 + $0xa0] ss:$16 sps:$4 sm:$0xff]   ;;  %v1082_v15 = vld [vmem:[%s1395_s9 + $0xa8] ss:$16 sps:$4 sm:$0xff]   ;;  %v1083_v16 = vld [vmem:[%s1395_s9 + $0x84] ss:$16 sps:$4 sm:$0xff]  }
  0x42   : > { %388 = vperm.xlu0 %1064, %v380_v3   ;;  %v1085_v17 = vld [vmem:[%s1395_s9 + $0x8c] ss:$16 sps:$4 sm:$0xff]   ;;  %v1087_v18 = vld [vmem:[%s1395_s9 + $0x80] ss:$16 sps:$4 sm:$0xff]   ;;  %v1088_v19 = vld [vmem:[%s1395_s9 + $0x88] ss:$16 sps:$4 sm:$0xff]  }
  0x43   : > { %v1089_v20 = vld [vmem:[%s1395_s9 + $0x64] ss:$16 sps:$4 sm:$0xff]   ;;  %v1091_v21 = vld [vmem:[%s1395_s9 + $0x6c] ss:$16 sps:$4 sm:$0xff]   ;;  %v1093_v22 = vld [vmem:[%s1395_s9 + $0x60] ss:$16 sps:$4 sm:$0xff]  }
  0x44   : > { %724 = vmatpush1.bf16.msra.mxu0 %v1075_v10  ;;  %767 = vmatpush1.bf16.msra.mxu1 %v1076_v11  ;;  %v1094_v23 = vld [vmem:[%s1395_s9 + $0x68] ss:$16 sps:$4 sm:$0xff]   ;;  %v1095_v24 = vld [vmem:[%s1395_s9 + $0x44] ss:$16 sps:$4 sm:$0xff]   ;;  %v1097_v25 = vld [vmem:[%s1395_s9 + $0x4c] ss:$16 sps:$4 sm:$0xff]  }
  0x45   : > { %725 = vmatprep.subr.bf16.mxu0 %v1077_v12  ;;  %768 = vmatprep.subr.bf16.mxu1 %v1079_v13  ;;  %v1099_v26 = vld [vmem:[%s1395_s9 + $0x40] ss:$16 sps:$4 sm:$0xff]   ;;  %v1100_v27 = vld [vmem:[%s1395_s9 + $0x48] ss:$16 sps:$4 sm:$0xff]   ;;  %v1101_v28 = vld [vmem:[%s1395_s9 + $0x24] ss:$16 sps:$4 sm:$0xff]  }
  0x46   : > { %v1103_v29 = vld [vmem:[%s1395_s9 + $0x2c] ss:$16 sps:$4 sm:$0xff]   ;;  %v1105_v30 = vld [vmem:[%s1395_s9 + $0x20] ss:$16 sps:$4 sm:$0xff]   ;;  %v1106_v31 = vld [vmem:[%s1395_s9 + $0x28] ss:$16 sps:$4 sm:$0xff]  }
  0x47   : > { %v1107_v32 = vld [vmem:[%s1395_s9 + $0x4] ss:$16 sps:$4 sm:$0xff]   ;;  %v1109_v33 = vld [vmem:[%s1395_s9 + $0xc] ss:$16 sps:$4 sm:$0xff]   ;;  %v1111_v34 = vld [vmem:[%s1395_s9] ss:$16 sps:$4 sm:$0xff]  }
  0x48   : > { %726 = vmatpush1.bf16.msra.mxu0 %v1081_v14  ;;  %769 = vmatpush1.bf16.msra.mxu1 %v1082_v15  ;;  %v1112_v35 = vld [vmem:[%s1395_s9 + $0x8] ss:$16 sps:$4 sm:$0xff]   ;;  %v1113_v36 = vld [vmem:[%s1395_s9 + $0x1e4] ss:$16 sps:$4 sm:$0xff]   ;;  %v1115_v37 = vld [vmem:[%s1395_s9 + $0x1ec] ss:$16 sps:$4 sm:$0xff]  }
  0x49   : > { %727 = vmatprep.subr.bf16.mxu0 %v1083_v16  ;;  %770 = vmatprep.subr.bf16.mxu1 %v1085_v17  ;;  %v1117_v38 = vld [vmem:[%s1395_s9 + $0x1e0] ss:$16 sps:$4 sm:$0xff]   ;;  %v1118_v39 = vld [vmem:[%s1395_s9 + $0x1e8] ss:$16 sps:$4 sm:$0xff]   ;;  %v1119_v40 = vld [vmem:[%s1395_s9 + $0x1c4] ss:$16 sps:$4 sm:$0xff]  }
  0x4a   : > { %v1121_v41 = vld [vmem:[%s1395_s9 + $0x1cc] ss:$16 sps:$4 sm:$0xff]   ;;  %v1123_v42 = vld [vmem:[%s1395_s9 + $0x1c0] ss:$16 sps:$4 sm:$0xff]   ;;  %v1124_v43 = vld [vmem:[%s1395_s9 + $0x1c8] ss:$16 sps:$4 sm:$0xff]  }
  0x4b   : > { %v1125_v44 = vld [vmem:[%s1395_s9 + $0x1a4] ss:$16 sps:$4 sm:$0xff]   ;;  %v1127_v45 = vld [vmem:[%s1395_s9 + $0x1ac] ss:$16 sps:$4 sm:$0xff]   ;;  %v1129_v46 = vld [vmem:[%s1395_s9 + $0x1a0] ss:$16 sps:$4 sm:$0xff]  }
  0x4c   : > { %728 = vmatpush1.bf16.msra.mxu0 %v1087_v18  ;;  %771 = vmatpush1.bf16.msra.mxu1 %v1088_v19  ;;  %v1130_v47 = vld [vmem:[%s1395_s9 + $0x1a8] ss:$16 sps:$4 sm:$0xff]   ;;  %v1131_v48 = vld [vmem:[%s1395_s9 + $0x184] ss:$16 sps:$4 sm:$0xff]   ;;  %v1133_v49 = vld [vmem:[%s1395_s9 + $0x18c] ss:$16 sps:$4 sm:$0xff]  }
  0x4d   : > { %729 = vmatprep.subr.bf16.mxu0 %v1089_v20  ;;  %772 = vmatprep.subr.bf16.mxu1 %v1091_v21  ;;  %v1135_v50 = vld [vmem:[%s1395_s9 + $0x180] ss:$16 sps:$4 sm:$0xff]   ;;  %v1136_v51 = vld [vmem:[%s1395_s9 + $0x188] ss:$16 sps:$4 sm:$0xff]   ;;  %v1137_v52 = vld [vmem:[%s1395_s9 + $0x164] ss:$16 sps:$4 sm:$0xff]  }
  0x4e   : > { %v1139_v53 = vld [vmem:[%s1395_s9 + $0x16c] ss:$16 sps:$4 sm:$0xff]   ;;  %v1141_v54 = vld [vmem:[%s1395_s9 + $0x160] ss:$16 sps:$4 sm:$0xff]   ;;  %v1142_v55 = vld [vmem:[%s1395_s9 + $0x168] ss:$16 sps:$4 sm:$0xff]  }
  0x4f   : > { %v1143_v56 = vld [vmem:[%s1395_s9 + $0x144] ss:$16 sps:$4 sm:$0xff]   ;;  %v1145_v57 = vld [vmem:[%s1395_s9 + $0x14c] ss:$16 sps:$4 sm:$0xff]   ;;  %v1147_v58 = vld [vmem:[%s1395_s9 + $0x140] ss:$16 sps:$4 sm:$0xff]  }
  0x50   : > { %730 = vmatpush1.bf16.msra.mxu0 %v1093_v22  ;;  %773 = vmatpush1.bf16.msra.mxu1 %v1094_v23  ;;  %v1148_v59 = vld [vmem:[%s1395_s9 + $0x148] ss:$16 sps:$4 sm:$0xff]   ;;  %v1149_v60 = vld [vmem:[%s1395_s9 + $0x124] ss:$16 sps:$4 sm:$0xff]   ;;  %v1151_v61 = vld [vmem:[%s1395_s9 + $0x12c] ss:$16 sps:$4 sm:$0xff]  }
  0x51   : > { %731 = vmatprep.subr.bf16.mxu0 %v1095_v24  ;;  %774 = vmatprep.subr.bf16.mxu1 %v1097_v25  ;;  %v1153_v62 = vld [vmem:[%s1395_s9 + $0x120] ss:$16 sps:$4 sm:$0xff]   ;;  %v1154_v63 = vld [vmem:[%s1395_s9 + $0x128] ss:$16 sps:$4 sm:$0xff]   ;;  %v1155_v0 = vld [vmem:[%s1395_s9 + $0x104] ss:$16 sps:$4 sm:$0xff]  }
  0x52   : > { %v1157_v1 = vld [vmem:[%s1395_s9 + $0x10c] ss:$16 sps:$4 sm:$0xff]   ;;  %v1159_v2 = vld [vmem:[%s1395_s9 + $0x100] ss:$16 sps:$4 sm:$0xff]   ;;  %v1160_v3 = vld [vmem:[%s1395_s9 + $0x108] ss:$16 sps:$4 sm:$0xff]  }
  0x53   : > { %v1161_v4 = vld [vmem:[%s1483_s0] ss:$8 sps:$4 sm:$0xff]  }
  0x54   : > { %732 = vmatpush1.bf16.msra.mxu0 %v1099_v26  ;;  %775 = vmatpush1.bf16.msra.mxu1 %v1100_v27 }
  0x55   : > { %733 = vmatprep.subr.bf16.mxu0 %v1101_v28  ;;  %776 = vmatprep.subr.bf16.mxu1 %v1103_v29 }
  0x58   : > { %734 = vmatpush1.bf16.msra.mxu0 %v1105_v30  ;;  %777 = vmatpush1.bf16.msra.mxu1 %v1106_v31 }
  0x59   : > { %735 = vmatprep.subr.bf16.mxu0 %v1107_v32  ;;  %778 = vmatprep.subr.bf16.mxu1 %v1109_v33 }
  0x5c   : > { %736 = vmatpush1.bf16.msra.mxu0 %v1111_v34  ;;  %779 = vmatpush1.bf16.msra.mxu1 %v1112_v35 }
  0x5d   : > { %737 = vmatprep.subr.bf16.mxu0 %v1113_v36  ;;  %780 = vmatprep.subr.bf16.mxu1 %v1115_v37 }
  0x60   : > { %738 = vmatpush2.bf16.msra.mxu0 %v1117_v38  ;;  %781 = vmatpush2.bf16.msra.mxu1 %v1118_v39 }
  0x61   : > { %739 = vmatprep.subr.bf16.mxu0 %v1119_v40  ;;  %782 = vmatprep.subr.bf16.mxu1 %v1121_v41 }
  0x64   : > { %740 = vmatpush2.bf16.msra.mxu0 %v1123_v42  ;;  %783 = vmatpush2.bf16.msra.mxu1 %v1124_v43 }
  0x65   : > { %741 = vmatprep.subr.bf16.mxu0 %v1125_v44  ;;  %784 = vmatprep.subr.bf16.mxu1 %v1127_v45 }
  0x68   : > { %742 = vmatpush2.bf16.msra.mxu0 %v1129_v46  ;;  %785 = vmatpush2.bf16.msra.mxu1 %v1130_v47 }
  0x69   : > { %743 = vmatprep.subr.bf16.mxu0 %v1131_v48  ;;  %786 = vmatprep.subr.bf16.mxu1 %v1133_v49 }
  0x6c   : > { %744 = vmatpush2.bf16.msra.mxu0 %v1135_v50  ;;  %787 = vmatpush2.bf16.msra.mxu1 %v1136_v51 }
  0x6d   : > { %745 = vmatprep.subr.bf16.mxu0 %v1137_v52  ;;  %788 = vmatprep.subr.bf16.mxu1 %v1139_v53 }
  0x70   : > { %746 = vmatpush2.bf16.msra.mxu0 %v1141_v54  ;;  %789 = vmatpush2.bf16.msra.mxu1 %v1142_v55 }
  0x71   : > { %747 = vmatprep.subr.bf16.mxu0 %v1143_v56  ;;  %790 = vmatprep.subr.bf16.mxu1 %v1145_v57 }
  0x74   : > { %748 = vmatpush2.bf16.msra.mxu0 %v1147_v58  ;;  %791 = vmatpush2.bf16.msra.mxu1 %v1148_v59 }
  0x75   : > { %749 = vmatprep.subr.bf16.mxu0 %v1149_v60  ;;  %792 = vmatprep.subr.bf16.mxu1 %v1151_v61 }
  0x78   : > { %750 = vmatpush2.bf16.msra.mxu0 %v1153_v62  ;;  %793 = vmatpush2.bf16.msra.mxu1 %v1154_v63 }
  0x79   : > { %751 = vmatprep.subr.bf16.mxu0 %v1155_v0  ;;  %794 = vmatprep.subr.bf16.mxu1 %v1157_v1 }
  0x7c   : > { %752 = vmatpush2.bf16.msra.mxu0 %v1159_v2  ;;  %795 = vmatpush2.bf16.msra.mxu1 %v1160_v3 }
  0x7f   : > { %754 = vmatmul.mubr.bf16.vlgmr.msra.gmra.mxu0 %v1161_v4  ;;  %797 = vmatmul.mubr.bf16.vlgmr.msra.gmra.mxu1 %v1161_v4 }
  0xb9   : > { %v384_v5 = vpop.permute.xlu0 %383 }
  0xbd   : > { %v389_v14 = vpop.permute.xlu0 %388 }
 0x13f   : > { %v755_v6 = vpop.f32.mrf.mxu0  ;;  %v798_v7 = vpop.f32.mrf.mxu1 }
 0x140   : > { %v756_v8 = vadd.f32 %v755_v6, %v384_v5  ;;  %v799_v9 = vadd.f32 %v798_v7, %v384_v5 }
 0x141   : > { %v757_v10 = vpop.f32.mrf.mxu0  ;;  %v800_v11 = vpop.f32.mrf.mxu1 }
 0x142   : > { %v815_v12 = vmul.f32 0.01, %v756_v8  ;;  %v817_v13 = vmul.f32 0.01, %v799_v9  ;;  %vm807_vm0 = vcmp.ge.f32.partialorder %v756_v8, 0.0  ;;  %vm809_vm1 = vcmp.ge.f32.partialorder %v799_v9, 0.0 }
 0x143   : > { %v758_v15 = vadd.f32 %v757_v10, %v384_v5  ;;  %v801_v16 = vadd.f32 %v800_v11, %v384_v5  ;;  %v759_v17 = vpop.f32.mrf.mxu0  ;;  %v802_v18 = vpop.f32.mrf.mxu1 }
 0x144   : > { %v760_v19 = vadd.f32 %v759_v17, %v389_v14  ;;  %v803_v20 = vadd.f32 %v802_v18, %v389_v14  ;;  %v823_v25 = vsel %vm807_vm0, %v756_v8, %v815_v12  ;;  %v825_v26 = vsel %vm809_vm1, %v799_v9, %v817_v13 }
 0x145   : > { %vm808_vm2 = vcmp.ge.f32.partialorder %v758_v15, 0.0  ;;  %v816_v21 = vmul.f32 0.01, %v758_v15  ;;  %vm810_vm3 = vcmp.ge.f32.partialorder %v801_v16, 0.0  ;;  %v818_v22 = vmul.f32 0.01, %v801_v16  ;;  %v761_v23 = vpop.f32.mrf.mxu0  ;;  %v804_v24 = vpop.f32.mrf.mxu1 }
 0x146   : > { %v819_v27 = vmul.f32 0.01, %v760_v19  ;;  %v821_v28 = vmul.f32 0.01, %v803_v20  ;;  %v762_v31 = vadd.f32 %v761_v23, %v389_v14  ;;  %v805_v32 = vadd.f32 %v804_v24, %v389_v14 }
 0x147   : > { %v824_v29 = vsel %vm808_vm2, %v758_v15, %v816_v21  ;;  %v826_v30 = vsel %vm810_vm3, %v801_v16, %v818_v22  ;;  %vm811_vm4 = vcmp.ge.f32.partialorder %v760_v19, 0.0  ;;  %vm813_vm5 = vcmp.ge.f32.partialorder %v803_v20, 0.0 }
 0x148   : > { %v1034_v33 = vpack.c.bf16 %v824_v29, %v823_v25  ;;  %v1035_v34 = vpack.c.bf16 %v826_v30, %v825_v26  ;;  %vm812_vm6 = vcmp.ge.f32.partialorder %v762_v31, 0.0  ;;  %v820_v35 = vmul.f32 0.01, %v762_v31 }
 0x149   : > { %vm814_vm7 = vcmp.ge.f32.partialorder %v805_v32, 0.0  ;;  %v822_v36 = vmul.f32 0.01, %v805_v32  ;;  %v827_v37 = vsel %vm811_vm4, %v760_v19, %v819_v27  ;;  %v829_v38 = vsel %vm813_vm5, %v803_v20, %v821_v28 }
 0x14a   : > { %855 = vst [vmem:[%s310_s12] sm:$0xff] %v1034_v33  ;;  %856 = vst [vmem:[%s310_s12 + $0x8] sm:$0xff] %v1035_v34  ;;  %v828_v39 = vsel %vm812_vm6, %v762_v31, %v820_v35  ;;  %865 = sbr.rel (!%p1239_p5) target bundleno = 343 (0x157), region = 59 }
 0x14b   : > { %v830_v40 = vsel %vm814_vm7, %v805_v32, %v822_v36  ;;  %v1036_v41 = vpack.c.bf16 %v828_v39, %v827_v37 }
 0x14c   : > { %v1037_v42 = vpack.c.bf16 %v830_v40, %v829_v38 }
 0x14d   : > { %857 = vst [vmem:[%s310_s12 + $0x10] sm:$0xff] %v1036_v41 }
 0x14e   : > { %858 = vst [vmem:[%s310_s12 + $0x18] sm:$0xff] %v1037_v42 }
 0x151   : > { %v881_v43 = vld [vmem:[%s310_s12] sm:$0xff]  ;;  %v883_v44 = vld [vmem:[%s310_s12 + $0x8] sm:$0xff] }
 0x152   : > { %882 = vst [vmem:[%s868_s23] sm:$0xff] %v881_v43  ;;  %884 = vst [vmem:[%s868_s23 + $0x8] sm:$0xff] %v883_v44 }
 0x154   : > { %v885_v45 = vld [vmem:[%s310_s12 + $0x10] sm:$0xff] }
 0x155   : > { %v887_v46 = vld [vmem:[%s310_s12 + $0x18] sm:$0xff]  ;;  %886 = vst [vmem:[%s868_s23 + $0x20] sm:$0xff] %v885_v45 }
 0x156   : > { %888 = vst [vmem:[%s868_s23 + $0x28] sm:$0xff] %v887_v46 }
 0x157 PF: > { %p10_p10 = scmp.ge.s32.totalorder %s1226_s16, 4   ;;  %s1488_s12 = smov %s1182_s13 }
 0x158   : > { %s1489_s13 = smov %s1237_s19  ;;  %s1490_s14 = smov %s1226_s16 }
 0x159   :  { %12 = sbr.rel (!%p10_p10) target bundleno = 2 (0x2), region = 113 }

// kernel: model_forward.5
= control target key start
LH: loop header
LB: loop body
LE: loop exit
PB: predicated region body
PF: predicated region fallthrough
CT: control target
= control target key end

     0   :  { %v1287_v1 = vmov 0   ;;  %s1624_s1 = inlined_call_operand.vmem [shape: bf16[1024,128], index: 1, kind: input, shape index: {}]   ;;  %s1625_s0 = inlined_call_operand.vmem [shape: bf16[32,1024], index: 0, kind: input, shape index: {}]   ;;  %s1626_s2 = inlined_call_operand.vmem [shape: f32[32,1], index: 2, kind: input, shape index: {}]   ;;  %s1627_s3 = inlined_call_operand.vmem [shape: f32[32,1], index: 3, kind: input, shape index: {}]   ;;  %s1628_s4 = inlined_call_operand.vmem [shape: f32[32,1], index: 4, kind: input, shape index: {}]   ;;  %s1629_s5 = inlined_call_operand.vmem [shape: bf16[32,128], index: 5, kind: output, shape index: {}]  }
   0x1   :  { %v1215_v0 = vld [vmem:[%s1624_s1 + $0x78] sm:$0xff]   ;;  %1213 = vset.pattern.permute.xlu0 %v1287_v1  ;;  %1214 = vset.pattern.permute.xlu1 %v1287_v1  ;;  %v1219_v5 = vld [vmem:[%s1624_s1 + $0x70] sm:$0xff]   ;;  %v1223_v9 = vld [vmem:[%s1624_s1 + $0x68] sm:$0xff]  }
   0x2   :  { %v1216_v2 = vld [vmem:[%s1624_s1 + $0xf8] sm:$0xff]   ;;  %1100 = vmatprep.subr.bf16.mxu0 %v1215_v0  ;;  %v1220_v6 = vld [vmem:[%s1624_s1 + $0xf0] sm:$0xff]   ;;  %v1224_v10 = vld [vmem:[%s1624_s1 + $0xe8] sm:$0xff]  }
   0x3   :  { %v1217_v3 = vld [vmem:[%s1624_s1 + $0x38] sm:$0xff]   ;;  %1128 = vmatprep.subr.bf16.mxu1 %v1216_v2  ;;  %v1221_v7 = vld [vmem:[%s1624_s1 + $0x30] sm:$0xff]   ;;  %v1225_v11 = vld [vmem:[%s1624_s1 + $0x28] sm:$0xff]  }
   0x4   :  { %v1218_v4 = vld [vmem:[%s1624_s1 + $0xb8] sm:$0xff]   ;;  %1101 = vmatpush3.bf16.msra.mxu0 %v1217_v3  ;;  %v1222_v8 = vld [vmem:[%s1624_s1 + $0xb0] sm:$0xff]   ;;  %v1226_v12 = vld [vmem:[%s1624_s1 + $0xa8] sm:$0xff]  }
   0x5   :  { %1129 = vmatpush3.bf16.msra.mxu1 %v1218_v4  ;;  %1102 = vmatprep.subr.bf16.mxu0 %v1219_v5  ;;  %v1227_v13 = vld [vmem:[%s1624_s1 + $0x60] sm:$0xff]   ;;  %v1231_v17 = vld [vmem:[%s1624_s1 + $0x58] sm:$0xff]   ;;  %v1235_v21 = vld [vmem:[%s1624_s1 + $0x50] sm:$0xff]  }
   0x6   :  { %1130 = vmatprep.subr.bf16.mxu1 %v1220_v6  ;;  %v1228_v14 = vld [vmem:[%s1624_s1 + $0xe0] sm:$0xff]   ;;  %v1232_v18 = vld [vmem:[%s1624_s1 + $0xd8] sm:$0xff]   ;;  %v1236_v22 = vld [vmem:[%s1624_s1 + $0xd0] sm:$0xff]  }
   0x7   :  { %v1229_v15 = vld [vmem:[%s1624_s1 + $0x20] sm:$0xff]   ;;  %v1233_v19 = vld [vmem:[%s1624_s1 + $0x18] sm:$0xff]   ;;  %v1237_v23 = vld [vmem:[%s1624_s1 + $0x10] sm:$0xff]  }
   0x8   :  { %1103 = vmatpush3.bf16.msra.mxu0 %v1221_v7  ;;  %v1230_v16 = vld [vmem:[%s1624_s1 + $0xa0] sm:$0xff]   ;;  %v1234_v20 = vld [vmem:[%s1624_s1 + $0x98] sm:$0xff]   ;;  %v1238_v24 = vld [vmem:[%s1624_s1 + $0x90] sm:$0xff]  }
   0x9   :  { %1131 = vmatpush3.bf16.msra.mxu1 %v1222_v8  ;;  %1104 = vmatprep.subr.bf16.mxu0 %v1223_v9  ;;  %v1239_v25 = vld [vmem:[%s1624_s1 + $0x48] sm:$0xff]   ;;  %v1243_v29 = vld [vmem:[%s1624_s1 + $0x40] sm:$0xff]   ;;  %v1247_v41 = vld [vmem:[%s1624_s1 + $0x178] sm:$0xff]  }
   0xa   :  { %1132 = vmatprep.subr.bf16.mxu1 %v1224_v10  ;;  %v1240_v26 = vld [vmem:[%s1624_s1 + $0xc8] sm:$0xff]   ;;  %v1244_v30 = vld [vmem:[%s1624_s1 + $0xc0] sm:$0xff]   ;;  %v1248_v42 = vld [vmem:[%s1624_s1 + $0x1f8] sm:$0xff]  }
   0xb   :  { %v1241_v27 = vld [vmem:[%s1624_s1 + $0x8] sm:$0xff]   ;;  %v1245_v31 = vld [vmem:[%s1624_s1] sm:$0xff]   ;;  %v1249_v43 = vld [vmem:[%s1624_s1 + $0x138] sm:$0xff]  }
   0xc   :  { %1105 = vmatpush3.bf16.msra.mxu0 %v1225_v11  ;;  %v1242_v28 = vld [vmem:[%s1624_s1 + $0x88] sm:$0xff]   ;;  %v1246_v32 = vld [vmem:[%s1624_s1 + $0x80] sm:$0xff]   ;;  %v1250_v44 = vld [vmem:[%s1624_s1 + $0x1b8] sm:$0xff]  }
   0xd   :  { %1133 = vmatpush3.bf16.msra.mxu1 %v1226_v12  ;;  %1106 = vmatprep.subr.bf16.mxu0 %v1227_v13  ;;  %v21_v33 = vld [vmem:[%s1625_s0] sm:$0xff]  ;;  %v22_v35 = vld [vmem:[%s1625_s0 + $0x8] sm:$0xff]  ;;  %v1251_v45 = vld [vmem:[%s1624_s1 + $0x170] sm:$0xff]  }
   0xe   :  { %1134 = vmatprep.subr.bf16.mxu1 %v1228_v14  ;;  %v25_v34 = vld [vmem:[%s1625_s0 + $0x20] sm:$0xff]  ;;  %v26_v38 = vld [vmem:[%s1625_s0 + $0x28] sm:$0xff]  ;;  %v1252_v46 = vld [vmem:[%s1624_s1 + $0x1f0] sm:$0xff]  }
   0xf   :  { %v1001_v36 = vcombine.low %v21_v33, %v25_v34  ;;  %v1002_v37 = vcombine.high %v21_v33, %v25_v34  ;;  %v1003_v39 = vcombine.low %v22_v35, %v26_v38  ;;  %v1004_v40 = vcombine.high %v22_v35, %v26_v38  ;;  %v1253_v47 = vld [vmem:[%s1624_s1 + $0x130] sm:$0xff]   ;;  %v1255_v49 = vld [vmem:[%s1624_s1 + $0x168] sm:$0xff]   ;;  %v1259_v53 = vld [vmem:[%s1624_s1 + $0x160] sm:$0xff]  }
  0x10   :  { %1107 = vmatpush3.bf16.msra.mxu0 %v1229_v15  ;;  %v1254_v48 = vld [vmem:[%s1624_s1 + $0x1b0] sm:$0xff]   ;;  %v1256_v50 = vld [vmem:[%s1624_s1 + $0x1e8] sm:$0xff]   ;;  %v1260_v54 = vld [vmem:[%s1624_s1 + $0x1e0] sm:$0xff]  }
  0x11   :  { %1135 = vmatpush3.bf16.msra.mxu1 %v1230_v16  ;;  %1108 = vmatprep.subr.bf16.mxu0 %v1231_v17  ;;  %v1257_v51 = vld [vmem:[%s1624_s1 + $0x128] sm:$0xff]   ;;  %v1261_v55 = vld [vmem:[%s1624_s1 + $0x120] sm:$0xff]   ;;  %v1263_v57 = vld [vmem:[%s1624_s1 + $0x158] sm:$0xff]  }
  0x12   :  { %1136 = vmatprep.subr.bf16.mxu1 %v1232_v18  ;;  %685 = vmatprep.mubr.bf16.mxu0 %v1002_v37  ;;  %v1258_v52 = vld [vmem:[%s1624_s1 + $0x1a8] sm:$0xff]   ;;  %v1262_v56 = vld [vmem:[%s1624_s1 + $0x1a0] sm:$0xff]   ;;  %v1264_v58 = vld [vmem:[%s1624_s1 + $0x1d8] sm:$0xff]  }
  0x13   :  { %734 = vmatprep.mubr.bf16.mxu1 %v1004_v40  ;;  %v29_v59 = vld [vmem:[%s1625_s0 + $0x40] sm:$0xff]  ;;  %v1265_v62 = vld [vmem:[%s1624_s1 + $0x118] sm:$0xff]   ;;  %v30_v1 = vld [vmem:[%s1625_s0 + $0x48] sm:$0xff] }
  0x14   :  { %1109 = vmatpush3.bf16.msra.mxu0 %v1233_v19  ;;  %v33_v60 = vld [vmem:[%s1625_s0 + $0x60] sm:$0xff]  ;;  %v1266_v0 = vld [vmem:[%s1624_s1 + $0x198] sm:$0xff]   ;;  %v34_v2 = vld [vmem:[%s1625_s0 + $0x68] sm:$0xff] }
  0x15   :  { %1137 = vmatpush3.bf16.msra.mxu1 %v1234_v20  ;;  %1110 = vmatprep.subr.bf16.mxu0 %v1235_v21  ;;  %v1010_v61 = vcombine.high %v29_v59, %v33_v60  ;;  %v1009_v63 = vcombine.low %v29_v59, %v33_v60  ;;  %v1012_v3 = vcombine.high %v30_v1, %v34_v2  ;;  %v1267_v5 = vld [vmem:[%s1624_s1 + $0x150] sm:$0xff]   ;;  %v1271_v9 = vld [vmem:[%s1624_s1 + $0x148] sm:$0xff]   ;;  %v1275_v13 = vld [vmem:[%s1624_s1 + $0x140] sm:$0xff]  }
  0x16   :  { %1138 = vmatprep.subr.bf16.mxu1 %v1236_v22  ;;  %v1011_v4 = vcombine.low %v30_v1, %v34_v2  ;;  %v1268_v6 = vld [vmem:[%s1624_s1 + $0x1d0] sm:$0xff]   ;;  %v1272_v10 = vld [vmem:[%s1624_s1 + $0x1c8] sm:$0xff]   ;;  %v1276_v14 = vld [vmem:[%s1624_s1 + $0x1c0] sm:$0xff]  }
  0x17   :  { %v1269_v7 = vld [vmem:[%s1624_s1 + $0x110] sm:$0xff]   ;;  %v1273_v11 = vld [vmem:[%s1624_s1 + $0x108] sm:$0xff]   ;;  %v1277_v15 = vld [vmem:[%s1624_s1 + $0x100] sm:$0xff]  }
  0x18   :  { %1111 = vmatpush3.bf16.msra.mxu0 %v1237_v23  ;;  %v1270_v8 = vld [vmem:[%s1624_s1 + $0x190] sm:$0xff]   ;;  %v1274_v12 = vld [vmem:[%s1624_s1 + $0x188] sm:$0xff]   ;;  %v1278_v16 = vld [vmem:[%s1624_s1 + $0x180] sm:$0xff]  }
  0x19   :  { %1139 = vmatpush3.bf16.msra.mxu1 %v1238_v24  ;;  %1112 = vmatprep.subr.bf16.mxu0 %v1239_v25  ;;  %v23_v17 = vld [vmem:[%s1625_s0 + $0x10] sm:$0xff]  ;;  %v24_v19 = vld [vmem:[%s1625_s0 + $0x18] sm:$0xff]  ;;  %v166_v33 = vld [vmem:[%s1626_s2 + $0x8] sm:$0xff] }
  0x1a   :  { %1140 = vmatprep.subr.bf16.mxu1 %v1240_v26  ;;  %v27_v18 = vld [vmem:[%s1625_s0 + $0x30] sm:$0xff]  ;;  %v28_v20 = vld [vmem:[%s1625_s0 + $0x38] sm:$0xff] }
  0x1b   :  { %v1005_v21 = vcombine.low %v23_v17, %v27_v18  ;;  %v1006_v22 = vcombine.high %v23_v17, %v27_v18  ;;  %v1007_v23 = vcombine.low %v24_v19, %v28_v20  ;;  %v1008_v24 = vcombine.high %v24_v19, %v28_v20  ;;  %v31_v25 = vld [vmem:[%s1625_s0 + $0x50] sm:$0xff]  ;;  %v168_v34 = vld [vmem:[%s1626_s2 + $0x18] sm:$0xff] }
  0x1c   :  { %1113 = vmatpush3.bf16.msra.mxu0 %v1241_v27  ;;  %v35_v26 = vld [vmem:[%s1625_s0 + $0x70] sm:$0xff]  ;;  %v32_v27 = vld [vmem:[%s1625_s0 + $0x58] sm:$0xff] }
  0x1d   :  { %1141 = vmatpush3.bf16.msra.mxu1 %v1242_v28  ;;  %1114 = vmatprep.subr.bf16.mxu0 %v1243_v29  ;;  %v1014_v28 = vcombine.high %v31_v25, %v35_v26  ;;  %v36_v29 = vld [vmem:[%s1625_s0 + $0x78] sm:$0xff]  ;;  %v1013_v35 = vcombine.low %v31_v25, %v35_v26 }
  0x1e   :  { %1142 = vmatprep.subr.bf16.mxu1 %v1244_v30  ;;  %v1016_v30 = vcombine.high %v32_v27, %v36_v29 }
  0x20   :  { %1115 = vmatpush3.bf16.msra.mxu0 %v1245_v31  ;;  %v165_v31 = vld [vmem:[%s1626_s2] sm:$0xff] }
  0x21   :  { %1143 = vmatpush3.bf16.msra.mxu1 %v1246_v32  ;;  %1156 = vmatprep.subr.bf16.mxu0 %v1247_v41  ;;  %v167_v32 = vld [vmem:[%s1626_s2 + $0x10] sm:$0xff] }
  0x22   :  { %1184 = vmatprep.subr.bf16.mxu1 %v1248_v42  ;;  %171 = vperm.xlu0 %1213, %v165_v31  }
  0x23   :  { %686 = vmatmul.mubr.bf16.vlgmr.msra.gmra.mxu0 %v1001_v36  ;;  %181 = vperm.xlu1 %1214, %v167_v32   ;;  %v1015_v36 = vcombine.low %v32_v27, %v36_v29 }
  0x24   :  { %735 = vmatmul.mubr.bf16.vlgmr.msra.gmra.mxu1 %v1003_v39  ;;  %1157 = vmatpush3.bf16.msra.mxu0 %v1249_v43 }
  0x25   :  { %1185 = vmatpush3.bf16.msra.mxu1 %v1250_v44  ;;  %1158 = vmatprep.subr.bf16.mxu0 %v1251_v45 }
  0x26   :  { %1186 = vmatprep.subr.bf16.mxu1 %v1252_v46  ;;  %693 = vmatprep.mubr.bf16.mxu0 %v1010_v61 }
  0x27   :  { %742 = vmatprep.mubr.bf16.mxu1 %v1012_v3  ;;  %176 = vperm.xlu0 %1213, %v166_v33  }
  0x28   :  { %1159 = vmatpush3.bf16.msra.mxu0 %v1253_v47  ;;  %186 = vperm.xlu1 %1214, %v168_v34  }
  0x29   :  { %1187 = vmatpush3.bf16.msra.mxu1 %v1254_v48  ;;  %1160 = vmatprep.subr.bf16.mxu0 %v1255_v49 }
  0x2a   :  { %1188 = vmatprep.subr.bf16.mxu1 %v1256_v50 }
  0x2b   :  { %694 = vmatmul.mubr.bf16.gmra.mxu0 %v1009_v63 }
  0x2c   :  { %1161 = vmatpush3.bf16.msra.mxu0 %v1257_v51  ;;  %743 = vmatmul.mubr.bf16.gmra.mxu1 %v1011_v4 }
  0x2d   :  { %1189 = vmatpush3.bf16.msra.mxu1 %v1258_v52  ;;  %1162 = vmatprep.subr.bf16.mxu0 %v1259_v53 }
  0x2e   :  { %1190 = vmatprep.subr.bf16.mxu1 %v1260_v54  ;;  %783 = vmatprep.mubr.bf16.mxu0 %v1006_v22 }
  0x2f   :  { %832 = vmatprep.mubr.bf16.mxu1 %v1008_v24 }
  0x30   :  { %1163 = vmatpush3.bf16.msra.mxu0 %v1261_v55 }
  0x31   :  { %1191 = vmatpush3.bf16.msra.mxu1 %v1262_v56  ;;  %1164 = vmatprep.subr.bf16.mxu0 %v1263_v57 }
  0x32   :  { %1192 = vmatprep.subr.bf16.mxu1 %v1264_v58 }
  0x34   :  { %1165 = vmatpush3.bf16.msra.mxu0 %v1265_v62 }
  0x35   :  { %1193 = vmatpush3.bf16.msra.mxu1 %v1266_v0  ;;  %1166 = vmatprep.subr.bf16.mxu0 %v1267_v5 }
  0x36   :  { %1194 = vmatprep.subr.bf16.mxu1 %v1268_v6 }
  0x38   :  { %1167 = vmatpush3.bf16.msra.mxu0 %v1269_v7 }
  0x39   :  { %1195 = vmatpush3.bf16.msra.mxu1 %v1270_v8  ;;  %1168 = vmatprep.subr.bf16.mxu0 %v1271_v9 }
  0x3a   :  { %1196 = vmatprep.subr.bf16.mxu1 %v1272_v10 }
  0x3c   :  { %1169 = vmatpush3.bf16.msra.mxu0 %v1273_v11 }
  0x3d   :  { %1197 = vmatpush3.bf16.msra.mxu1 %v1274_v12  ;;  %1170 = vmatprep.subr.bf16.mxu0 %v1275_v13 }
  0x3e   :  { %1198 = vmatprep.subr.bf16.mxu1 %v1276_v14 }
  0x40   :  { %1171 = vmatpush3.bf16.msra.mxu0 %v1277_v15 }
  0x41   :  { %1199 = vmatpush3.bf16.msra.mxu1 %v1278_v16 }
  0x43   :  { %784 = vmatmul.mubr.bf16.vlgmr.msra.gmra.mxu0 %v1005_v21 }
  0x44   :  { %833 = vmatmul.mubr.bf16.vlgmr.msra.gmra.mxu1 %v1007_v23  ;;  %791 = vmatprep.mubr.bf16.mxu0 %v1014_v28 }
  0x45   :  { %840 = vmatprep.mubr.bf16.mxu1 %v1016_v30 }
  0x4b   :  { %792 = vmatmul.mubr.bf16.gmra.mxu0 %v1013_v35 }
  0x4c   :  { %841 = vmatmul.mubr.bf16.gmra.mxu1 %v1015_v36 }
  0x9d   :  { %v172_v49 = vpop.permute.xlu0 %171 }
  0x9e   :  { %v182_v61 = vpop.permute.xlu1 %181 }
  0xa2   :  { %v177_v58 = vpop.permute.xlu0 %176 }
  0xa3   :  { %v187_v15 = vpop.permute.xlu1 %186 }
  0xe3   :  { %v1116_v37 = vpop.f32.mrf.mxu0 }
  0xe4   :  { %v1144_v38 = vpop.f32.mrf.mxu1 }
  0xe5   :  { %v1117_v39 = vpop.f32.mrf.mxu0 }
  0xe6   :  { %v1145_v40 = vpop.f32.mrf.mxu1  ;;  %v1118_v52 = vadd.f32 %v1117_v39, %v1116_v37 }
  0xe7   :  { %v1119_v41 = vpop.f32.mrf.mxu0  ;;  %v1146_v55 = vadd.f32 %v1145_v40, %v1144_v38 }
  0xe8   :  { %v1147_v42 = vpop.f32.mrf.mxu1  ;;  %v688_v56 = vadd.f32 %v1118_v52, %v172_v49 }
  0xe9   :  { %v1120_v43 = vpop.f32.mrf.mxu0 }
  0xea   :  { %v1148_v44 = vpop.f32.mrf.mxu1  ;;  %v1121_v57 = vadd.f32 %v1120_v43, %v1119_v41  ;;  %v737_v1 = vadd.f32 %v1146_v55, %v688_v56 }
  0xeb   :  { %v1122_v45 = vpop.f32.mrf.mxu0  ;;  %v1149_v6 = vadd.f32 %v1148_v44, %v1147_v42 }
  0xec   :  { %v1150_v46 = vpop.f32.mrf.mxu1  ;;  %v691_v2 = vadd.f32 %v1121_v57, %v177_v58 }
  0xed   :  { %v1123_v47 = vpop.f32.mrf.mxu0 }
  0xee   :  { %v1151_v48 = vpop.f32.mrf.mxu1  ;;  %v1124_v62 = vadd.f32 %v1123_v47, %v1122_v45  ;;  %v740_v14 = vadd.f32 %v1149_v6, %v691_v2 }
  0xef   :  { %v1125_v50 = vpop.f32.mrf.mxu0  ;;  %v1152_v10 = vadd.f32 %v1151_v48, %v1150_v46 }
  0xf0   :  { %v1153_v51 = vpop.f32.mrf.mxu1  ;;  %v696_v9 = vadd.f32 %v1124_v62, %v182_v61 }
  0xf1   :  { %v1126_v53 = vpop.f32.mrf.mxu0 }
  0xf2   :  { %v1154_v54 = vpop.f32.mrf.mxu1  ;;  %v1127_v11 = vadd.f32 %v1126_v53, %v1125_v50  ;;  %v745_v23 = vadd.f32 %v1152_v10, %v696_v9 }
  0xf3   :  { %v1155_v27 = vadd.f32 %v1154_v54, %v1153_v51 }
  0xf4   :  { %v699_v24 = vadd.f32 %v1127_v11, %v187_v15  ;;  %v849_v11 = vld [vmem:[%s1627_s3] sm:$0xff] }
  0xf6   :  { %v748_v36 = vadd.f32 %v1155_v27, %v699_v24  ;;  %v854_v27 = vld [vmem:[%s1628_s4 + $0x8] sm:$0xff] }
 0x103   :  { %v1172_v59 = vpop.f32.mrf.mxu0 }
 0x104   :  { %v1200_v60 = vpop.f32.mrf.mxu1 }
 0x105   :  { %v1173_v63 = vpop.f32.mrf.mxu0 }
 0x106   :  { %v1201_v0 = vpop.f32.mrf.mxu1  ;;  %v1174_v3 = vadd.f32 %v1173_v63, %v1172_v59 }
 0x107   :  { %v1175_v4 = vpop.f32.mrf.mxu0  ;;  %v1202_v8 = vadd.f32 %v1201_v0, %v1200_v60 }
 0x108   :  { %v1203_v5 = vpop.f32.mrf.mxu1  ;;  %v786_v7 = vadd.f32 %v1174_v3, %v737_v1 }
 0x109   :  { %v1176_v12 = vpop.f32.mrf.mxu0 }
 0x10a   :  { %v1204_v13 = vpop.f32.mrf.mxu1  ;;  %v1570_v16 = vadd.f32 %v1202_v8, %v786_v7  ;;  %v1177_v17 = vadd.f32 %v1176_v12, %v1175_v4 }
 0x10b   :  { %v1178_v18 = vpop.f32.mrf.mxu0  ;;  %v1205_v21 = vadd.f32 %v1204_v13, %v1203_v5 }
 0x10c   :  { %v1206_v19 = vpop.f32.mrf.mxu1  ;;  %v789_v20 = vadd.f32 %v1177_v17, %v740_v14  ;;  %857 = vadd.xlane.f32.xlu0 %v1570_v16  ;;  %v869_v22 = vmul.f32 %v1570_v16, %v1570_v16  ;;  %v850_v17 = vld [vmem:[%s1627_s3 + $0x8] sm:$0xff] }
 0x10d   :  { %v1179_v25 = vpop.f32.mrf.mxu0 }
 0x10e   :  { %v1207_v26 = vpop.f32.mrf.mxu1  ;;  %v1575_v28 = vadd.f32 %v1205_v21, %v789_v20  ;;  %v1180_v29 = vadd.f32 %v1179_v25, %v1178_v18  ;;  %873 = vadd.xlane.f32.xlu1 %v869_v22  ;;  %v853_v21 = vld [vmem:[%s1628_s4] sm:$0xff]  ;;  %v851_v22 = vld [vmem:[%s1627_s3 + $0x10] sm:$0xff] }
 0x10f   :  { %v1208_v30 = vadd.f32 %v1207_v26, %v1206_v19  ;;  %v1181_v31 = vpop.f32.mrf.mxu0 }
 0x110   :  { %v1209_v32 = vpop.f32.mrf.mxu1  ;;  %v794_v33 = vadd.f32 %v1180_v29, %v745_v23  ;;  %v870_v34 = vmul.f32 %v1575_v28, %v1575_v28  ;;  %v855_v29 = vld [vmem:[%s1628_s4 + $0x10] sm:$0xff] }
 0x111   :  { %v1182_v35 = vpop.f32.mrf.mxu0 }
 0x112   :  { %v1579_v37 = vadd.f32 %v1208_v30, %v794_v33  ;;  %v1183_v38 = vadd.f32 %v1182_v35, %v1181_v31  ;;  %875 = vadd.xlane.f32.xlu0 %v870_v34  ;;  %859 = vadd.xlane.f32.xlu1 %v1575_v28  ;;  %v1210_v39 = vpop.f32.mrf.mxu1  ;;  %v852_v31 = vld [vmem:[%s1627_s3 + $0x18] sm:$0xff] }
 0x113   :  { %v1211_v42 = vadd.f32 %v1210_v39, %v1209_v32 }
 0x114   :  { %v797_v40 = vadd.f32 %v1183_v38, %v748_v36  ;;  %v871_v41 = vmul.f32 %v1579_v37, %v1579_v37  ;;  %v856_v38 = vld [vmem:[%s1628_s4 + $0x18] sm:$0xff] }
 0x116   :  { %861 = vadd.xlane.f32.xlu0 %v1579_v37  ;;  %877 = vadd.xlane.f32.xlu1 %v871_v41  ;;  %v1585_v43 = vadd.f32 %v1211_v42, %v797_v40 }
 0x118   :  { %v872_v44 = vmul.f32 %v1585_v43, %v1585_v43 }
 0x11a   :  { %863 = vadd.xlane.f32.xlu0 %v1585_v43 }
 0x11e   :  { %879 = vadd.xlane.f32.xlu0 %v872_v44 }
 0x195   :  { %v858_v45 = vpop.xlane.xlu0 %857 }
 0x196   :  { %v865_v46 = vmul.f32 0.0078125, %v858_v45 }
 0x197   :  { %v874_v47 = vpop.xlane.xlu1 %873 }
 0x198   :  { %v885_v48 = vmul.f32 %v865_v46, %v865_v46  ;;  %v881_v49 = vmul.f32 0.0078125, %v874_v47 }
 0x19a   :  { %v889_v50 = vsub.f32 %v881_v49, %v885_v48 }
 0x19b   :  { %v876_v51 = vpop.xlane.xlu0 %875  ;;  %v860_v52 = vpop.xlane.xlu1 %859 }
 0x19c   :  { %v893_v53 = vmax.f32 %v889_v50, 0.0  ;;  %v866_v54 = vmul.f32 0.0078125, %v860_v52  ;;  %v882_v56 = vmul.f32 0.0078125, %v876_v51 }
 0x19e   :  { %v897_v55 = vadd.f32 1e-05, %v893_v53  ;;  %v886_v57 = vmul.f32 %v866_v54, %v866_v54 }
 0x19f   :  { %v862_v58 = vpop.xlane.xlu0 %861  ;;  %v878_v59 = vpop.xlane.xlu1 %877 }
 0x1a0   :  { %1279 = vrsqrt.f32 %v897_v55  ;;  %v890_v60 = vsub.f32 %v882_v56, %v886_v57  ;;  %v867_v61 = vmul.f32 0.0078125, %v862_v58  ;;  %v883_v0 = vmul.f32 0.0078125, %v878_v59 }
 0x1a2   :  { %v894_v62 = vmax.f32 %v890_v60, 0.0  ;;  %v887_v63 = vmul.f32 %v867_v61, %v867_v61 }
 0x1a3   :  { %v864_v1 = vpop.xlane.xlu0 %863 }
 0x1a4   :  { %v898_v2 = vadd.f32 1e-05, %v894_v62  ;;  %v891_v3 = vsub.f32 %v883_v0, %v887_v63  ;;  %v868_v4 = vmul.f32 0.0078125, %v864_v1 }
 0x1a6   :  { %1281 = vrsqrt.f32 %v898_v2  ;;  %v895_v5 = vmax.f32 %v891_v3, 0.0  ;;  %v888_v8 = vmul.f32 %v868_v4, %v868_v4 }
 0x1a7   :  { %v880_v6 = vpop.xlane.xlu0 %879 }
 0x1a8   :  { %v899_v7 = vadd.f32 1e-05, %v895_v5  ;;  %v884_v9 = vmul.f32 0.0078125, %v880_v6 }
 0x1aa   :  { %1283 = vrsqrt.f32 %v899_v7  ;;  %v892_v10 = vsub.f32 %v884_v9, %v888_v8 }
 0x1ac   :  { %v896_v12 = vmax.f32 %v892_v10, 0.0 }
 0x1ad   :  { %v1280_v13 = vpop.eup %1279 }
 0x1ae   :  { %v900_v14 = vadd.f32 1e-05, %v896_v12  ;;  %v905_v15 = vmul.f32 %v1280_v13, %v849_v11 }
 0x1b0   :  { %1285 = vrsqrt.f32 %v900_v14  ;;  %919 = vperm.xlu1 %1214, %v905_v15   ;;  %v909_v20 = vmul.f32 %v905_v15, %v865_v46 }
 0x1b2   :  { %v913_v25 = vsub.f32 %v853_v21, %v909_v20 }
 0x1b3   :  { %v1282_v18 = vpop.eup %1281 }
 0x1b4   :  { %v906_v19 = vmul.f32 %v1282_v18, %v850_v17 }
 0x1b6   :  { %924 = vperm.xlu0 %1213, %v906_v19   ;;  %v910_v24 = vmul.f32 %v906_v19, %v866_v54 }
 0x1b7   :  { %v1284_v23 = vpop.eup %1283 }
 0x1b8   :  { %v907_v26 = vmul.f32 %v1284_v23, %v851_v22  ;;  %v914_v32 = vsub.f32 %v854_v27, %v910_v24 }
 0x1ba   :  { %943 = vperm.xlu0 %1213, %v913_v25   ;;  %929 = vperm.xlu1 %1214, %v907_v26   ;;  %v911_v30 = vmul.f32 %v907_v26, %v867_v61 }
 0x1bc   :  { %v915_v33 = vsub.f32 %v855_v29, %v911_v30 }
 0x1bd   :  { %v1286_v34 = vpop.eup %1285 }
 0x1be   :  { %948 = vperm.xlu1 %1214, %v914_v32   ;;  %953 = vperm.xlu0 %1213, %v915_v33   ;;  %v908_v35 = vmul.f32 %v1286_v34, %v852_v31 }
 0x1c0   :  { %v912_v36 = vmul.f32 %v908_v35, %v868_v4 }
 0x1c2   :  { %934 = vperm.xlu1 %1214, %v908_v35   ;;  %v916_v39 = vsub.f32 %v856_v38, %v912_v36 }
 0x1c6   :  { %958 = vperm.xlu1 %1214, %v916_v39  }
 0x22b   :  { %v920_v40 = vpop.permute.xlu1 %919 }
 0x22c   :  { %v937_v42 = vmul.f32 %v920_v40, %v1570_v16 }
 0x231   :  { %v925_v41 = vpop.permute.xlu0 %924 }
 0x232   :  { %v938_v47 = vmul.f32 %v925_v41, %v1575_v28 }
 0x235   :  { %v944_v44 = vpop.permute.xlu0 %943  ;;  %v930_v45 = vpop.permute.xlu1 %929 }
 0x236   :  { %v961_v46 = vadd.f32 %v944_v44, %v937_v42  ;;  %v939_v52 = vmul.f32 %v930_v45, %v1579_v37 }
 0x238   :  { %v969_v49 = vmul.f32 0.01, %v961_v46  ;;  %vm965_vm0 = vcmp.ge.f32.partialorder %v961_v46, 0.0 }
 0x239   :  { %v949_v48 = vpop.permute.xlu1 %948  ;;  %v954_v51 = vpop.permute.xlu0 %953 }
 0x23a   :  { %v962_v50 = vadd.f32 %v949_v48, %v938_v47  ;;  %v973_v55 = vsel %vm965_vm0, %v961_v46, %v969_v49  ;;  %v963_v56 = vadd.f32 %v954_v51, %v939_v52 }
 0x23c   :  { %vm966_vm1 = vcmp.ge.f32.partialorder %v962_v50, 0.0  ;;  %v970_v53 = vmul.f32 0.01, %v962_v50  ;;  %v971_v59 = vmul.f32 0.01, %v963_v56  ;;  %vm967_vm2 = vcmp.ge.f32.partialorder %v963_v56, 0.0 }
 0x23d   :  { %v935_v54 = vpop.permute.xlu1 %934 }
 0x23e   :  { %v974_v57 = vsel %vm966_vm1, %v962_v50, %v970_v53  ;;  %v940_v16 = vmul.f32 %v935_v54, %v1585_v43  ;;  %v975_v37 = vsel %vm967_vm2, %v963_v56, %v971_v59 }
 0x23f   :  { %v1092_v58 = vpack.c.bf16 %v974_v57, %v973_v55 }
 0x241   :  { %1093 = vst [vmem:[%s1629_s5] sm:$0xff] %v1092_v58   ;;  %v959_v28 = vpop.permute.xlu1 %958 }
 0x242   :  { %v964_v60 = vadd.f32 %v959_v28, %v940_v16 }
 0x244   :  { %vm968_vm3 = vcmp.ge.f32.partialorder %v964_v60, 0.0  ;;  %v972_v61 = vmul.f32 0.01, %v964_v60 }
 0x246   :  { %v976_v62 = vsel %vm968_vm3, %v964_v60, %v972_v61 }
 0x247   :  { %v1097_v63 = vpack.c.bf16 %v976_v62, %v975_v37 }
 0x249   :  { %1099 = vst [vmem:[%s1629_s5 + $0x8] sm:$0xff] %v1097_v63  }

// kernel: model_forward.6
= control target key start
LH: loop header
LB: loop body
LE: loop exit
PB: predicated region body
PF: predicated region fallthrough
CT: control target
= control target key end

     0   :  { %v3006_v1 = vmov 0   ;;  %s3959_s1 = inlined_call_operand.vmem [shape: bf16[2048,128], index: 1, kind: input, shape index: {}]   ;;  %s3960_s0 = inlined_call_operand.vmem [shape: bf16[64,2048], index: 0, kind: input, shape index: {}]   ;;  %s3961_s2 = inlined_call_operand.vmem [shape: f32[64,1], index: 2, kind: input, shape index: {}]   ;;  %s3962_s3 = inlined_call_operand.vmem [shape: f32[64,1], index: 3, kind: input, shape index: {}]   ;;  %s3963_s4 = inlined_call_operand.vmem [shape: f32[64,1], index: 4, kind: input, shape index: {}]   ;;  %s3964_s5 = inlined_call_operand.vmem [shape: bf16[64,128], index: 5, kind: output, shape index: {}]  }
   0x1   :  { %v2862_v0 = vld [vmem:[%s3959_s1 + $0x78] sm:$0xff]   ;;  %2860 = vset.pattern.permute.xlu0 %v3006_v1  ;;  %2861 = vset.pattern.permute.xlu1 %v3006_v1  ;;  %v2866_v5 = vld [vmem:[%s3959_s1 + $0x70] sm:$0xff]   ;;  %v2870_v9 = vld [vmem:[%s3959_s1 + $0x68] sm:$0xff]  }
   0x2   :  { %v2863_v2 = vld [vmem:[%s3959_s1 + $0xf8] sm:$0xff]   ;;  %2539 = vmatprep.subr.bf16.mxu0 %v2862_v0  ;;  %v2867_v6 = vld [vmem:[%s3959_s1 + $0xf0] sm:$0xff]   ;;  %v2871_v10 = vld [vmem:[%s3959_s1 + $0xe8] sm:$0xff]  }
   0x3   :  { %v2864_v3 = vld [vmem:[%s3959_s1 + $0x38] sm:$0xff]   ;;  %2579 = vmatprep.subr.bf16.mxu1 %v2863_v2  ;;  %v2868_v7 = vld [vmem:[%s3959_s1 + $0x30] sm:$0xff]   ;;  %v2872_v11 = vld [vmem:[%s3959_s1 + $0x28] sm:$0xff]  }
   0x4   :  { %v2865_v4 = vld [vmem:[%s3959_s1 + $0xb8] sm:$0xff]   ;;  %2540 = vmatpush3.bf16.msra.mxu0 %v2864_v3  ;;  %v2869_v8 = vld [vmem:[%s3959_s1 + $0xb0] sm:$0xff]   ;;  %v2873_v12 = vld [vmem:[%s3959_s1 + $0xa8] sm:$0xff]  }
   0x5   :  { %2580 = vmatpush3.bf16.msra.mxu1 %v2865_v4  ;;  %2541 = vmatprep.subr.bf16.mxu0 %v2866_v5  ;;  %v2874_v13 = vld [vmem:[%s3959_s1 + $0x60] sm:$0xff]   ;;  %v2878_v17 = vld [vmem:[%s3959_s1 + $0x58] sm:$0xff]   ;;  %v2882_v21 = vld [vmem:[%s3959_s1 + $0x50] sm:$0xff]  }
   0x6   :  { %2581 = vmatprep.subr.bf16.mxu1 %v2867_v6  ;;  %v2875_v14 = vld [vmem:[%s3959_s1 + $0xe0] sm:$0xff]   ;;  %v2879_v18 = vld [vmem:[%s3959_s1 + $0xd8] sm:$0xff]   ;;  %v2883_v22 = vld [vmem:[%s3959_s1 + $0xd0] sm:$0xff]  }
   0x7   :  { %v2876_v15 = vld [vmem:[%s3959_s1 + $0x20] sm:$0xff]   ;;  %v2880_v19 = vld [vmem:[%s3959_s1 + $0x18] sm:$0xff]   ;;  %v2884_v23 = vld [vmem:[%s3959_s1 + $0x10] sm:$0xff]  }
   0x8   :  { %2542 = vmatpush3.bf16.msra.mxu0 %v2868_v7  ;;  %v2877_v16 = vld [vmem:[%s3959_s1 + $0xa0] sm:$0xff]   ;;  %v2881_v20 = vld [vmem:[%s3959_s1 + $0x98] sm:$0xff]   ;;  %v2885_v24 = vld [vmem:[%s3959_s1 + $0x90] sm:$0xff]  }
   0x9   :  { %2582 = vmatpush3.bf16.msra.mxu1 %v2869_v8  ;;  %2543 = vmatprep.subr.bf16.mxu0 %v2870_v9  ;;  %v2886_v25 = vld [vmem:[%s3959_s1 + $0x48] sm:$0xff]   ;;  %v2890_v29 = vld [vmem:[%s3959_s1 + $0x40] sm:$0xff]   ;;  %v2894_v41 = vld [vmem:[%s3959_s1 + $0x178] sm:$0xff]  }
   0xa   :  { %2583 = vmatprep.subr.bf16.mxu1 %v2871_v10  ;;  %v2887_v26 = vld [vmem:[%s3959_s1 + $0xc8] sm:$0xff]   ;;  %v2891_v30 = vld [vmem:[%s3959_s1 + $0xc0] sm:$0xff]   ;;  %v2895_v42 = vld [vmem:[%s3959_s1 + $0x1f8] sm:$0xff]  }
   0xb   :  { %v2888_v27 = vld [vmem:[%s3959_s1 + $0x8] sm:$0xff]   ;;  %v2892_v31 = vld [vmem:[%s3959_s1] sm:$0xff]   ;;  %v2896_v43 = vld [vmem:[%s3959_s1 + $0x138] sm:$0xff]  }
   0xc   :  { %2544 = vmatpush3.bf16.msra.mxu0 %v2872_v11  ;;  %v2889_v28 = vld [vmem:[%s3959_s1 + $0x88] sm:$0xff]   ;;  %v2893_v32 = vld [vmem:[%s3959_s1 + $0x80] sm:$0xff]   ;;  %v2897_v44 = vld [vmem:[%s3959_s1 + $0x1b8] sm:$0xff]  }
   0xd   :  { %2584 = vmatpush3.bf16.msra.mxu1 %v2873_v12  ;;  %2545 = vmatprep.subr.bf16.mxu0 %v2874_v13  ;;  %v21_v33 = vld [vmem:[%s3960_s0] sm:$0xff]  ;;  %v22_v35 = vld [vmem:[%s3960_s0 + $0x8] sm:$0xff]  ;;  %v2898_v45 = vld [vmem:[%s3959_s1 + $0x170] sm:$0xff]  }
   0xe   :  { %2585 = vmatprep.subr.bf16.mxu1 %v2875_v14  ;;  %v29_v34 = vld [vmem:[%s3960_s0 + $0x40] sm:$0xff]  ;;  %v30_v38 = vld [vmem:[%s3960_s0 + $0x48] sm:$0xff]  ;;  %v2899_v46 = vld [vmem:[%s3959_s1 + $0x1f0] sm:$0xff]  }
   0xf   :  { %v2308_v36 = vcombine.low %v21_v33, %v29_v34  ;;  %v2309_v37 = vcombine.high %v21_v33, %v29_v34  ;;  %v2310_v39 = vcombine.low %v22_v35, %v30_v38  ;;  %v2311_v40 = vcombine.high %v22_v35, %v30_v38  ;;  %v2900_v47 = vld [vmem:[%s3959_s1 + $0x130] sm:$0xff]   ;;  %v37_v49 = vld [vmem:[%s3960_s0 + $0x80] sm:$0xff]  ;;  %v38_v52 = vld [vmem:[%s3960_s0 + $0x88] sm:$0xff] }
  0x10   :  { %2546 = vmatpush3.bf16.msra.mxu0 %v2876_v15  ;;  %v2901_v48 = vld [vmem:[%s3959_s1 + $0x1b0] sm:$0xff]   ;;  %v45_v50 = vld [vmem:[%s3960_s0 + $0xc0] sm:$0xff]  ;;  %v46_v53 = vld [vmem:[%s3960_s0 + $0xc8] sm:$0xff] }
  0x11   :  { %2586 = vmatpush3.bf16.msra.mxu1 %v2877_v16  ;;  %2547 = vmatprep.subr.bf16.mxu0 %v2878_v17  ;;  %v2325_v51 = vcombine.high %v37_v49, %v45_v50  ;;  %v2324_v54 = vcombine.low %v37_v49, %v45_v50  ;;  %v2327_v55 = vcombine.high %v38_v52, %v46_v53  ;;  %v2902_v57 = vld [vmem:[%s3959_s1 + $0x168] sm:$0xff]   ;;  %v2906_v61 = vld [vmem:[%s3959_s1 + $0x160] sm:$0xff]   ;;  %v2910_v9 = vld [vmem:[%s3959_s1 + $0x158] sm:$0xff]  }
  0x12   :  { %2587 = vmatprep.subr.bf16.mxu1 %v2879_v18  ;;  %1509 = vmatprep.mubr.bf16.mxu0 %v2309_v37  ;;  %v2326_v56 = vcombine.low %v38_v52, %v46_v53  ;;  %v2903_v58 = vld [vmem:[%s3959_s1 + $0x1e8] sm:$0xff]   ;;  %v2907_v62 = vld [vmem:[%s3959_s1 + $0x1e0] sm:$0xff]   ;;  %v2911_v10 = vld [vmem:[%s3959_s1 + $0x1d8] sm:$0xff]  }
  0x13   :  { %1574 = vmatprep.mubr.bf16.mxu1 %v2311_v40  ;;  %v2904_v59 = vld [vmem:[%s3959_s1 + $0x128] sm:$0xff]   ;;  %v2908_v63 = vld [vmem:[%s3959_s1 + $0x120] sm:$0xff]   ;;  %v2912_v11 = vld [vmem:[%s3959_s1 + $0x118] sm:$0xff]  }
  0x14   :  { %2548 = vmatpush3.bf16.msra.mxu0 %v2880_v19  ;;  %v2905_v60 = vld [vmem:[%s3959_s1 + $0x1a8] sm:$0xff]   ;;  %v2909_v0 = vld [vmem:[%s3959_s1 + $0x1a0] sm:$0xff]   ;;  %v2913_v12 = vld [vmem:[%s3959_s1 + $0x198] sm:$0xff]  }
  0x15   :  { %2588 = vmatpush3.bf16.msra.mxu1 %v2881_v20  ;;  %2549 = vmatprep.subr.bf16.mxu0 %v2882_v21  ;;  %v53_v1 = vld [vmem:[%s3960_s0 + $0x100] sm:$0xff]  ;;  %v54_v3 = vld [vmem:[%s3960_s0 + $0x108] sm:$0xff]  ;;  %v2914_v13 = vld [vmem:[%s3959_s1 + $0x150] sm:$0xff]  }
  0x16   :  { %2589 = vmatprep.subr.bf16.mxu1 %v2883_v22  ;;  %v61_v2 = vld [vmem:[%s3960_s0 + $0x140] sm:$0xff]  ;;  %v62_v4 = vld [vmem:[%s3960_s0 + $0x148] sm:$0xff]  ;;  %v2915_v14 = vld [vmem:[%s3959_s1 + $0x1d0] sm:$0xff]  }
  0x17   :  { %v2341_v5 = vcombine.high %v53_v1, %v61_v2  ;;  %v2343_v6 = vcombine.high %v54_v3, %v62_v4  ;;  %v2340_v7 = vcombine.low %v53_v1, %v61_v2  ;;  %v2342_v8 = vcombine.low %v54_v3, %v62_v4  ;;  %v2916_v15 = vld [vmem:[%s3959_s1 + $0x110] sm:$0xff]   ;;  %v69_v17 = vld [vmem:[%s3960_s0 + $0x180] sm:$0xff]  ;;  %v70_v19 = vld [vmem:[%s3960_s0 + $0x188] sm:$0xff] }
  0x18   :  { %2550 = vmatpush3.bf16.msra.mxu0 %v2884_v23  ;;  %v2917_v16 = vld [vmem:[%s3959_s1 + $0x190] sm:$0xff]   ;;  %v77_v18 = vld [vmem:[%s3960_s0 + $0x1c0] sm:$0xff]  ;;  %v78_v21 = vld [vmem:[%s3960_s0 + $0x1c8] sm:$0xff] }
  0x19   :  { %2590 = vmatpush3.bf16.msra.mxu1 %v2885_v24  ;;  %2551 = vmatprep.subr.bf16.mxu0 %v2886_v25  ;;  %v2357_v20 = vcombine.high %v69_v17, %v77_v18  ;;  %v2356_v22 = vcombine.low %v69_v17, %v77_v18  ;;  %v2359_v23 = vcombine.high %v70_v19, %v78_v21  ;;  %v2918_v25 = vld [vmem:[%s3959_s1 + $0x148] sm:$0xff]   ;;  %v23_v33 = vld [vmem:[%s3960_s0 + $0x10] sm:$0xff]  ;;  %v24_v37 = vld [vmem:[%s3960_s0 + $0x18] sm:$0xff] }
  0x1a   :  { %2591 = vmatprep.subr.bf16.mxu1 %v2887_v26  ;;  %v2358_v24 = vcombine.low %v70_v19, %v78_v21  ;;  %v2919_v26 = vld [vmem:[%s3959_s1 + $0x1c8] sm:$0xff]   ;;  %v31_v34 = vld [vmem:[%s3960_s0 + $0x50] sm:$0xff]  ;;  %v32_v38 = vld [vmem:[%s3960_s0 + $0x58] sm:$0xff] }
  0x1b   :  { %v2312_v35 = vcombine.low %v23_v33, %v31_v34  ;;  %v2315_v40 = vcombine.high %v24_v37, %v32_v38  ;;  %v39_v49 = vld [vmem:[%s3960_s0 + $0x90] sm:$0xff]  ;;  %v48_v52 = vld [vmem:[%s3960_s0 + $0xd8] sm:$0xff] }
  0x1c   :  { %2552 = vmatpush3.bf16.msra.mxu0 %v2888_v27  ;;  %v2920_v27 = vld [vmem:[%s3959_s1 + $0x108] sm:$0xff]   ;;  %v47_v50 = vld [vmem:[%s3960_s0 + $0xd0] sm:$0xff]  ;;  %v56_v3 = vld [vmem:[%s3960_s0 + $0x118] sm:$0xff] }
  0x1d   :  { %2592 = vmatpush3.bf16.msra.mxu1 %v2889_v28  ;;  %2553 = vmatprep.subr.bf16.mxu0 %v2890_v29  ;;  %v2921_v28 = vld [vmem:[%s3959_s1 + $0x188] sm:$0xff]   ;;  %v2922_v29 = vld [vmem:[%s3959_s1 + $0x140] sm:$0xff]   ;;  %v2329_v53 = vcombine.high %v39_v49, %v47_v50  ;;  %v55_v1 = vld [vmem:[%s3960_s0 + $0x110] sm:$0xff] }
  0x1e   :  { %2593 = vmatprep.subr.bf16.mxu1 %v2891_v30  ;;  %v2923_v30 = vld [vmem:[%s3959_s1 + $0x1c0] sm:$0xff]   ;;  %v63_v2 = vld [vmem:[%s3960_s0 + $0x150] sm:$0xff]  ;;  %v80_v21 = vld [vmem:[%s3960_s0 + $0x1d8] sm:$0xff] }
  0x1f   :  { %v2345_v4 = vcombine.high %v55_v1, %v63_v2  ;;  %v71_v17 = vld [vmem:[%s3960_s0 + $0x190] sm:$0xff] }
  0x20   :  { %2554 = vmatpush3.bf16.msra.mxu0 %v2892_v31  ;;  %v2924_v31 = vld [vmem:[%s3959_s1 + $0x100] sm:$0xff]   ;;  %v79_v18 = vld [vmem:[%s3960_s0 + $0x1d0] sm:$0xff] }
  0x21   :  { %2594 = vmatpush3.bf16.msra.mxu1 %v2893_v32  ;;  %2619 = vmatprep.subr.bf16.mxu0 %v2894_v41  ;;  %v2925_v32 = vld [vmem:[%s3959_s1 + $0x180] sm:$0xff]   ;;  %v2926_v41 = vld [vmem:[%s3959_s1 + $0x278] sm:$0xff]   ;;  %v2361_v19 = vcombine.high %v71_v17, %v79_v18 }
  0x22   :  { %2659 = vmatprep.subr.bf16.mxu1 %v2895_v42  ;;  %v2927_v42 = vld [vmem:[%s3959_s1 + $0x2f8] sm:$0xff]  }
  0x23   :  { %1510 = vmatmul.mubr.bf16.vlgmr.msra.gmra.mxu0 %v2308_v36  ;;  %v2313_v36 = vcombine.high %v23_v33, %v31_v34  ;;  %v25_v33 = vld [vmem:[%s3960_s0 + $0x20] sm:$0xff] }
  0x24   :  { %1575 = vmatmul.mubr.bf16.vlgmr.msra.gmra.mxu1 %v2310_v39  ;;  %2620 = vmatpush3.bf16.msra.mxu0 %v2896_v43  ;;  %v2314_v39 = vcombine.low %v24_v37, %v32_v38  ;;  %v2928_v43 = vld [vmem:[%s3959_s1 + $0x238] sm:$0xff]   ;;  %v33_v34 = vld [vmem:[%s3960_s0 + $0x60] sm:$0xff] }
  0x25   :  { %2660 = vmatpush3.bf16.msra.mxu1 %v2897_v44  ;;  %2621 = vmatprep.subr.bf16.mxu0 %v2898_v45  ;;  %v2929_v44 = vld [vmem:[%s3959_s1 + $0x2b8] sm:$0xff]   ;;  %v2930_v45 = vld [vmem:[%s3959_s1 + $0x270] sm:$0xff]   ;;  %v2316_v37 = vcombine.low %v25_v33, %v33_v34  ;;  %v2317_v38 = vcombine.high %v25_v33, %v33_v34  ;;  %v2985_v33 = vld [vmem:[%s3959_s1 + $0x388] sm:$0xff]  }
  0x26   :  { %2661 = vmatprep.subr.bf16.mxu1 %v2899_v46  ;;  %1517 = vmatprep.mubr.bf16.mxu0 %v2325_v51  ;;  %v2931_v46 = vld [vmem:[%s3959_s1 + $0x2f0] sm:$0xff]   ;;  %v40_v51 = vld [vmem:[%s3960_s0 + $0x98] sm:$0xff]  ;;  %v2986_v34 = vld [vmem:[%s3959_s1 + $0x340] sm:$0xff]  }
  0x27   :  { %1582 = vmatprep.mubr.bf16.mxu1 %v2327_v55  ;;  %v2328_v55 = vcombine.low %v39_v49, %v47_v50  ;;  %v41_v49 = vld [vmem:[%s3960_s0 + $0xa0] sm:$0xff] }
  0x28   :  { %2622 = vmatpush3.bf16.msra.mxu0 %v2900_v47  ;;  %v2932_v47 = vld [vmem:[%s3959_s1 + $0x230] sm:$0xff]   ;;  %v49_v50 = vld [vmem:[%s3960_s0 + $0xe0] sm:$0xff] }
  0x29   :  { %2662 = vmatpush3.bf16.msra.mxu1 %v2901_v48  ;;  %2623 = vmatprep.subr.bf16.mxu0 %v2902_v57  ;;  %v2933_v48 = vld [vmem:[%s3959_s1 + $0x2b0] sm:$0xff]   ;;  %v2934_v57 = vld [vmem:[%s3959_s1 + $0x268] sm:$0xff]  }
  0x2a   :  { %2663 = vmatprep.subr.bf16.mxu1 %v2903_v58  ;;  %v2935_v58 = vld [vmem:[%s3959_s1 + $0x2e8] sm:$0xff]  }
  0x2b   :  { %1518 = vmatmul.mubr.bf16.gmra.mxu0 %v2324_v54  ;;  %v2331_v54 = vcombine.high %v40_v51, %v48_v52 }
  0x2c   :  { %1583 = vmatmul.mubr.bf16.gmra.mxu1 %v2326_v56  ;;  %2624 = vmatpush3.bf16.msra.mxu0 %v2904_v59  ;;  %v2330_v56 = vcombine.low %v40_v51, %v48_v52  ;;  %v2936_v59 = vld [vmem:[%s3959_s1 + $0x228] sm:$0xff]   ;;  %v2333_v52 = vcombine.high %v41_v49, %v49_v50 }
  0x2d   :  { %2664 = vmatpush3.bf16.msra.mxu1 %v2905_v60  ;;  %2625 = vmatprep.subr.bf16.mxu0 %v2906_v61  ;;  %v2937_v60 = vld [vmem:[%s3959_s1 + $0x2a8] sm:$0xff]   ;;  %v2938_v61 = vld [vmem:[%s3959_s1 + $0x260] sm:$0xff]  }
  0x2e   :  { %2665 = vmatprep.subr.bf16.mxu1 %v2907_v62  ;;  %1525 = vmatprep.mubr.bf16.mxu0 %v2341_v5  ;;  %v2939_v62 = vld [vmem:[%s3959_s1 + $0x2e0] sm:$0xff]   ;;  %v64_v5 = vld [vmem:[%s3960_s0 + $0x158] sm:$0xff]  ;;  %v42_v51 = vld [vmem:[%s3960_s0 + $0xa8] sm:$0xff] }
  0x2f   :  { %1590 = vmatprep.mubr.bf16.mxu1 %v2343_v6  ;;  %v2344_v6 = vcombine.low %v55_v1, %v63_v2  ;;  %v2972_v1 = vld [vmem:[%s3959_s1 + $0x320] sm:$0xff]  }
  0x30   :  { %2626 = vmatpush3.bf16.msra.mxu0 %v2908_v63  ;;  %v2940_v63 = vld [vmem:[%s3959_s1 + $0x220] sm:$0xff]  }
  0x31   :  { %2666 = vmatpush3.bf16.msra.mxu1 %v2909_v0  ;;  %2627 = vmatprep.subr.bf16.mxu0 %v2910_v9  ;;  %v2941_v0 = vld [vmem:[%s3959_s1 + $0x2a0] sm:$0xff]   ;;  %v2942_v9 = vld [vmem:[%s3959_s1 + $0x258] sm:$0xff]  }
  0x32   :  { %2667 = vmatprep.subr.bf16.mxu1 %v2911_v10  ;;  %v2943_v10 = vld [vmem:[%s3959_s1 + $0x2d8] sm:$0xff]   ;;  %v2973_v2 = vld [vmem:[%s3959_s1 + $0x3a0] sm:$0xff]  }
  0x33   :  { %1526 = vmatmul.mubr.bf16.gmra.mxu0 %v2340_v7  ;;  %v2347_v7 = vcombine.high %v56_v3, %v64_v5 }
  0x34   :  { %1591 = vmatmul.mubr.bf16.gmra.mxu1 %v2342_v8  ;;  %2628 = vmatpush3.bf16.msra.mxu0 %v2912_v11  ;;  %v2346_v8 = vcombine.low %v56_v3, %v64_v5  ;;  %v2944_v11 = vld [vmem:[%s3959_s1 + $0x218] sm:$0xff]   ;;  %v57_v3 = vld [vmem:[%s3960_s0 + $0x120] sm:$0xff]  ;;  %v58_v5 = vld [vmem:[%s3960_s0 + $0x128] sm:$0xff] }
  0x35   :  { %2668 = vmatpush3.bf16.msra.mxu1 %v2913_v12  ;;  %2629 = vmatprep.subr.bf16.mxu0 %v2914_v13  ;;  %v2945_v12 = vld [vmem:[%s3959_s1 + $0x298] sm:$0xff]   ;;  %v2946_v13 = vld [vmem:[%s3959_s1 + $0x250] sm:$0xff]  }
  0x36   :  { %2669 = vmatprep.subr.bf16.mxu1 %v2915_v14  ;;  %1533 = vmatprep.mubr.bf16.mxu0 %v2357_v20  ;;  %v2947_v14 = vld [vmem:[%s3959_s1 + $0x2d0] sm:$0xff]   ;;  %v72_v20 = vld [vmem:[%s3960_s0 + $0x198] sm:$0xff] }
  0x37   :  { %1598 = vmatprep.mubr.bf16.mxu1 %v2359_v23  ;;  %v2363_v23 = vcombine.high %v72_v20, %v80_v21 }
  0x38   :  { %2630 = vmatpush3.bf16.msra.mxu0 %v2916_v15  ;;  %v2948_v15 = vld [vmem:[%s3959_s1 + $0x210] sm:$0xff]  }
  0x39   :  { %2670 = vmatpush3.bf16.msra.mxu1 %v2917_v16  ;;  %2631 = vmatprep.subr.bf16.mxu0 %v2918_v25  ;;  %v2949_v16 = vld [vmem:[%s3959_s1 + $0x290] sm:$0xff]   ;;  %v2950_v25 = vld [vmem:[%s3959_s1 + $0x248] sm:$0xff]  }
  0x3a   :  { %2671 = vmatprep.subr.bf16.mxu1 %v2919_v26  ;;  %v2951_v26 = vld [vmem:[%s3959_s1 + $0x2c8] sm:$0xff]  }
  0x3b   :  { %1534 = vmatmul.mubr.bf16.gmra.mxu0 %v2356_v22  ;;  %v2360_v22 = vcombine.low %v71_v17, %v79_v18  ;;  %v2979_v17 = vld [vmem:[%s3959_s1 + $0x3d0] sm:$0xff]   ;;  %v344_v18 = vld [vmem:[%s3961_s2 + $0x18] sm:$0xff] }
  0x3c   :  { %1599 = vmatmul.mubr.bf16.gmra.mxu1 %v2358_v24  ;;  %2632 = vmatpush3.bf16.msra.mxu0 %v2920_v27  ;;  %v2362_v24 = vcombine.low %v72_v20, %v80_v21  ;;  %v2952_v27 = vld [vmem:[%s3959_s1 + $0x208] sm:$0xff]   ;;  %v2981_v20 = vld [vmem:[%s3959_s1 + $0x390] sm:$0xff]   ;;  %v73_v21 = vld [vmem:[%s3960_s0 + $0x1a0] sm:$0xff] }
  0x3d   :  { %2672 = vmatpush3.bf16.msra.mxu1 %v2921_v28  ;;  %2633 = vmatprep.subr.bf16.mxu0 %v2922_v29  ;;  %v2953_v28 = vld [vmem:[%s3959_s1 + $0x288] sm:$0xff]   ;;  %v2954_v29 = vld [vmem:[%s3959_s1 + $0x240] sm:$0xff]  }
  0x3e   :  { %2673 = vmatprep.subr.bf16.mxu1 %v2923_v30  ;;  %1639 = vmatprep.mubr.bf16.mxu0 %v2313_v36  ;;  %v2955_v30 = vld [vmem:[%s3959_s1 + $0x2c0] sm:$0xff]   ;;  %v34_v36 = vld [vmem:[%s3960_s0 + $0x68] sm:$0xff] }
  0x3f   :  { %1704 = vmatprep.mubr.bf16.mxu1 %v2315_v40 }
  0x40   :  { %2634 = vmatpush3.bf16.msra.mxu0 %v2924_v31  ;;  %v2956_v31 = vld [vmem:[%s3959_s1 + $0x200] sm:$0xff]  }
  0x41   :  { %2674 = vmatpush3.bf16.msra.mxu1 %v2925_v32  ;;  %2699 = vmatprep.subr.bf16.mxu0 %v2926_v41  ;;  %v2957_v32 = vld [vmem:[%s3959_s1 + $0x280] sm:$0xff]   ;;  %v2958_v41 = vld [vmem:[%s3959_s1 + $0x378] sm:$0xff]  }
  0x42   :  { %2739 = vmatprep.subr.bf16.mxu1 %v2927_v42  ;;  %v2959_v42 = vld [vmem:[%s3959_s1 + $0x3f8] sm:$0xff]  }
  0x43   :  { %1640 = vmatmul.mubr.bf16.vlgmr.msra.gmra.mxu0 %v2312_v35  ;;  %v26_v35 = vld [vmem:[%s3960_s0 + $0x28] sm:$0xff] }
  0x44   :  { %1705 = vmatmul.mubr.bf16.vlgmr.msra.gmra.mxu1 %v2314_v39  ;;  %2700 = vmatpush3.bf16.msra.mxu0 %v2928_v43  ;;  %v2318_v39 = vcombine.low %v26_v35, %v34_v36  ;;  %v2319_v40 = vcombine.high %v26_v35, %v34_v36  ;;  %v2960_v43 = vld [vmem:[%s3959_s1 + $0x338] sm:$0xff]   ;;  %v2987_v35 = vld [vmem:[%s3959_s1 + $0x3c0] sm:$0xff]   ;;  %v346_v36 = vld [vmem:[%s3961_s2 + $0x28] sm:$0xff] }
  0x45   :  { %2740 = vmatpush3.bf16.msra.mxu1 %v2929_v44  ;;  %2701 = vmatprep.subr.bf16.mxu0 %v2930_v45  ;;  %v2961_v44 = vld [vmem:[%s3959_s1 + $0x3b8] sm:$0xff]   ;;  %v2962_v45 = vld [vmem:[%s3959_s1 + $0x370] sm:$0xff]  }
  0x46   :  { %2741 = vmatprep.subr.bf16.mxu1 %v2931_v46  ;;  %1647 = vmatprep.mubr.bf16.mxu0 %v2329_v53  ;;  %v2963_v46 = vld [vmem:[%s3959_s1 + $0x3f0] sm:$0xff]   ;;  %v50_v53 = vld [vmem:[%s3960_s0 + $0xe8] sm:$0xff] }
  0x47   :  { %1712 = vmatprep.mubr.bf16.mxu1 %v2331_v54  ;;  %v2332_v54 = vcombine.low %v41_v49, %v49_v50  ;;  %v43_v49 = vld [vmem:[%s3960_s0 + $0xb0] sm:$0xff] }
  0x48   :  { %2702 = vmatpush3.bf16.msra.mxu0 %v2932_v47  ;;  %v2964_v47 = vld [vmem:[%s3959_s1 + $0x330] sm:$0xff]  }
  0x49   :  { %2742 = vmatpush3.bf16.msra.mxu1 %v2933_v48  ;;  %2703 = vmatprep.subr.bf16.mxu0 %v2934_v57  ;;  %v2965_v48 = vld [vmem:[%s3959_s1 + $0x3b0] sm:$0xff]   ;;  %v2966_v57 = vld [vmem:[%s3959_s1 + $0x368] sm:$0xff]  }
  0x4a   :  { %2743 = vmatprep.subr.bf16.mxu1 %v2935_v58  ;;  %v2967_v58 = vld [vmem:[%s3959_s1 + $0x3e8] sm:$0xff]   ;;  %v51_v50 = vld [vmem:[%s3960_s0 + $0xf0] sm:$0xff] }
  0x4b   :  { %1648 = vmatmul.mubr.bf16.gmra.mxu0 %v2328_v55  ;;  %v2335_v55 = vcombine.high %v42_v51, %v50_v53 }
  0x4c   :  { %1713 = vmatmul.mubr.bf16.gmra.mxu1 %v2330_v56  ;;  %2704 = vmatpush3.bf16.msra.mxu0 %v2936_v59  ;;  %v2334_v56 = vcombine.low %v42_v51, %v50_v53  ;;  %v341_v59 = vld [vmem:[%s3961_s2] sm:$0xff]  ;;  %v44_v51 = vld [vmem:[%s3960_s0 + $0xb8] sm:$0xff] }
  0x4d   :  { %2744 = vmatpush3.bf16.msra.mxu1 %v2937_v60  ;;  %2705 = vmatprep.subr.bf16.mxu0 %v2938_v61  ;;  %v2968_v60 = vld [vmem:[%s3959_s1 + $0x328] sm:$0xff]   ;;  %v52_v53 = vld [vmem:[%s3960_s0 + $0xf8] sm:$0xff] }
  0x4e   :  { %2745 = vmatprep.subr.bf16.mxu1 %v2939_v62  ;;  %1655 = vmatprep.mubr.bf16.mxu0 %v2345_v4  ;;  %v2969_v61 = vld [vmem:[%s3959_s1 + $0x3a8] sm:$0xff]   ;;  %v2970_v62 = vld [vmem:[%s3959_s1 + $0x360] sm:$0xff]  }
  0x4f   :  { %1720 = vmatprep.mubr.bf16.mxu1 %v2347_v7  ;;  %351 = vperm.xlu0 %2860, %v341_v59   ;;  %v65_v4 = vld [vmem:[%s3960_s0 + $0x160] sm:$0xff]  ;;  %v66_v7 = vld [vmem:[%s3960_s0 + $0x168] sm:$0xff]  ;;  %v2336_v59 = vcombine.low %v43_v49, %v51_v50 }
  0x50   :  { %2706 = vmatpush3.bf16.msra.mxu0 %v2940_v63  ;;  %v2971_v63 = vld [vmem:[%s3959_s1 + $0x3e0] sm:$0xff]  }
  0x51   :  { %2746 = vmatpush3.bf16.msra.mxu1 %v2941_v0  ;;  %2707 = vmatprep.subr.bf16.mxu0 %v2942_v9  ;;  %v342_v0 = vld [vmem:[%s3961_s2 + $0x8] sm:$0xff]  ;;  %v2351_v9 = vcombine.high %v58_v5, %v66_v7 }
  0x52   :  { %2747 = vmatprep.subr.bf16.mxu1 %v2943_v10  ;;  %v2350_v10 = vcombine.low %v58_v5, %v66_v7 }
  0x53   :  { %1656 = vmatmul.mubr.bf16.gmra.mxu0 %v2344_v6  ;;  %356 = vperm.xlu0 %2860, %v342_v0   ;;  %v2349_v6 = vcombine.high %v57_v3, %v65_v4  ;;  %v83_v0 = vld [vmem:[%s3960_s0 + $0x1f0] sm:$0xff] }
  0x54   :  { %1721 = vmatmul.mubr.bf16.gmra.mxu1 %v2346_v8  ;;  %2708 = vmatpush3.bf16.msra.mxu0 %v2944_v11  ;;  %v2348_v8 = vcombine.low %v57_v3, %v65_v4  ;;  %v2974_v11 = vld [vmem:[%s3959_s1 + $0x358] sm:$0xff]  }
  0x55   :  { %2748 = vmatpush3.bf16.msra.mxu1 %v2945_v12  ;;  %2709 = vmatprep.subr.bf16.mxu0 %v2946_v13  ;;  %v2975_v12 = vld [vmem:[%s3959_s1 + $0x3d8] sm:$0xff]   ;;  %v343_v13 = vld [vmem:[%s3961_s2 + $0x10] sm:$0xff] }
  0x56   :  { %2749 = vmatprep.subr.bf16.mxu1 %v2947_v14  ;;  %1663 = vmatprep.mubr.bf16.mxu0 %v2361_v19  ;;  %v2976_v14 = vld [vmem:[%s3959_s1 + $0x318] sm:$0xff]   ;;  %v2980_v19 = vld [vmem:[%s3959_s1 + $0x310] sm:$0xff]  }
  0x57   :  { %1728 = vmatprep.mubr.bf16.mxu1 %v2363_v23  ;;  %361 = vperm.xlu1 %2861, %v343_v13   ;;  %v74_v23 = vld [vmem:[%s3960_s0 + $0x1a8] sm:$0xff] }
  0x58   :  { %2710 = vmatpush3.bf16.msra.mxu0 %v2948_v15  ;;  %v2977_v15 = vld [vmem:[%s3959_s1 + $0x398] sm:$0xff]  }
  0x59   :  { %2750 = vmatpush3.bf16.msra.mxu1 %v2949_v16  ;;  %2711 = vmatprep.subr.bf16.mxu0 %v2950_v25  ;;  %v2978_v16 = vld [vmem:[%s3959_s1 + $0x350] sm:$0xff]   ;;  %v82_v25 = vld [vmem:[%s3960_s0 + $0x1e8] sm:$0xff] }
  0x5a   :  { %2751 = vmatprep.subr.bf16.mxu1 %v2951_v26 }
  0x5b   :  { %1664 = vmatmul.mubr.bf16.gmra.mxu0 %v2360_v22  ;;  %366 = vperm.xlu1 %2861, %v344_v18   ;;  %v81_v22 = vld [vmem:[%s3960_s0 + $0x1e0] sm:$0xff] }
  0x5c   :  { %1729 = vmatmul.mubr.bf16.gmra.mxu1 %v2362_v24  ;;  %2712 = vmatpush3.bf16.msra.mxu0 %v2952_v27  ;;  %v2365_v24 = vcombine.high %v73_v21, %v81_v22  ;;  %v2364_v26 = vcombine.low %v73_v21, %v81_v22  ;;  %v2367_v27 = vcombine.high %v74_v23, %v82_v25 }
  0x5d   :  { %2752 = vmatpush3.bf16.msra.mxu1 %v2953_v28  ;;  %2713 = vmatprep.subr.bf16.mxu0 %v2954_v29  ;;  %v2366_v28 = vcombine.low %v74_v23, %v82_v25  ;;  %v2982_v29 = vld [vmem:[%s3959_s1 + $0x348] sm:$0xff]  }
  0x5e   :  { %2753 = vmatprep.subr.bf16.mxu1 %v2955_v30  ;;  %1769 = vmatprep.mubr.bf16.mxu0 %v2317_v38  ;;  %v2983_v30 = vld [vmem:[%s3959_s1 + $0x3c8] sm:$0xff]   ;;  %v2989_v38 = vld [vmem:[%s3959_s1 + $0x380] sm:$0xff]  }
  0x5f   :  { %1834 = vmatprep.mubr.bf16.mxu1 %v2319_v40  ;;  %376 = vperm.xlu1 %2861, %v346_v36   ;;  %v35_v40 = vld [vmem:[%s3960_s0 + $0x70] sm:$0xff] }
  0x60   :  { %2714 = vmatpush3.bf16.msra.mxu0 %v2956_v31  ;;  %v345_v31 = vld [vmem:[%s3961_s2 + $0x20] sm:$0xff] }
  0x61   :  { %2754 = vmatpush3.bf16.msra.mxu1 %v2957_v32  ;;  %2779 = vmatprep.subr.bf16.mxu0 %v2958_v41  ;;  %v2984_v32 = vld [vmem:[%s3959_s1 + $0x308] sm:$0xff]   ;;  %v28_v41 = vld [vmem:[%s3960_s0 + $0x38] sm:$0xff] }
  0x62   :  { %2819 = vmatprep.subr.bf16.mxu1 %v2959_v42  ;;  %371 = vperm.xlu0 %2860, %v345_v31  }
  0x63   :  { %1770 = vmatmul.mubr.bf16.vlgmr.msra.gmra.mxu0 %v2316_v37  ;;  %v2988_v37 = vld [vmem:[%s3959_s1 + $0x300] sm:$0xff]  }
  0x64   :  { %1835 = vmatmul.mubr.bf16.vlgmr.msra.gmra.mxu1 %v2318_v39  ;;  %2780 = vmatpush3.bf16.msra.mxu0 %v2960_v43  ;;  %v27_v39 = vld [vmem:[%s3960_s0 + $0x30] sm:$0xff] }
  0x65   :  { %2820 = vmatpush3.bf16.msra.mxu1 %v2961_v44  ;;  %2781 = vmatprep.subr.bf16.mxu0 %v2962_v45  ;;  %v2320_v42 = vcombine.low %v27_v39, %v35_v40  ;;  %v2321_v43 = vcombine.high %v27_v39, %v35_v40  ;;  %v36_v44 = vld [vmem:[%s3960_s0 + $0x78] sm:$0xff]  ;;  %v347_v45 = vld [vmem:[%s3961_s2 + $0x30] sm:$0xff] }
  0x66   :  { %2821 = vmatprep.subr.bf16.mxu1 %v2963_v46  ;;  %1777 = vmatprep.mubr.bf16.mxu0 %v2333_v52  ;;  %v348_v46 = vld [vmem:[%s3961_s2 + $0x38] sm:$0xff]  ;;  %v2337_v52 = vcombine.high %v43_v49, %v51_v50 }
  0x67   :  { %1842 = vmatprep.mubr.bf16.mxu1 %v2335_v55  ;;  %381 = vperm.xlu0 %2860, %v347_v45   ;;  %v59_v55 = vld [vmem:[%s3960_s0 + $0x130] sm:$0xff] }
  0x68   :  { %2782 = vmatpush3.bf16.msra.mxu0 %v2964_v47  ;;  %v2322_v47 = vcombine.low %v28_v41, %v36_v44  ;;  %386 = vperm.xlu1 %2861, %v348_v46  }
  0x69   :  { %2822 = vmatpush3.bf16.msra.mxu1 %v2965_v48  ;;  %2783 = vmatprep.subr.bf16.mxu0 %v2966_v57  ;;  %v2323_v48 = vcombine.high %v28_v41, %v36_v44  ;;  %v60_v57 = vld [vmem:[%s3960_s0 + $0x138] sm:$0xff] }
  0x6a   :  { %2823 = vmatprep.subr.bf16.mxu1 %v2967_v58  ;;  %v68_v58 = vld [vmem:[%s3960_s0 + $0x178] sm:$0xff] }
  0x6b   :  { %1778 = vmatmul.mubr.bf16.gmra.mxu0 %v2332_v54  ;;  %v2339_v54 = vcombine.high %v44_v51, %v52_v53  ;;  %v2354_v4 = vcombine.low %v60_v57, %v68_v58 }
  0x6c   :  { %1843 = vmatmul.mubr.bf16.gmra.mxu1 %v2334_v56  ;;  %2784 = vmatpush3.bf16.msra.mxu0 %v2968_v60  ;;  %v67_v56 = vld [vmem:[%s3960_s0 + $0x170] sm:$0xff]  ;;  %v2338_v60 = vcombine.low %v44_v51, %v52_v53 }
  0x6d   :  { %2824 = vmatpush3.bf16.msra.mxu1 %v2969_v61  ;;  %2785 = vmatprep.subr.bf16.mxu0 %v2970_v62  ;;  %v2353_v61 = vcombine.high %v59_v55, %v67_v56  ;;  %v2355_v62 = vcombine.high %v60_v57, %v68_v58  ;;  %v2352_v3 = vcombine.low %v59_v55, %v67_v56 }
  0x6e   :  { %2825 = vmatprep.subr.bf16.mxu1 %v2971_v63  ;;  %1785 = vmatprep.mubr.bf16.mxu0 %v2349_v6  ;;  %v75_v63 = vld [vmem:[%s3960_s0 + $0x1b0] sm:$0xff] }
  0x6f   :  { %1850 = vmatprep.mubr.bf16.mxu1 %v2351_v9  ;;  %v2369_v5 = vcombine.high %v75_v63, %v83_v0  ;;  %v2368_v7 = vcombine.low %v75_v63, %v83_v0 }
  0x70   :  { %2786 = vmatpush3.bf16.msra.mxu0 %v2972_v1  ;;  %v76_v1 = vld [vmem:[%s3960_s0 + $0x1b8] sm:$0xff] }
  0x71   :  { %2826 = vmatpush3.bf16.msra.mxu1 %v2973_v2  ;;  %2787 = vmatprep.subr.bf16.mxu0 %v2974_v11  ;;  %v84_v2 = vld [vmem:[%s3960_s0 + $0x1f8] sm:$0xff] }
  0x72   :  { %2827 = vmatprep.subr.bf16.mxu1 %v2975_v12  ;;  %v2371_v6 = vcombine.high %v76_v1, %v84_v2 }
  0x73   :  { %1786 = vmatmul.mubr.bf16.gmra.mxu0 %v2348_v8  ;;  %v2370_v8 = vcombine.low %v76_v1, %v84_v2 }
  0x74   :  { %1851 = vmatmul.mubr.bf16.gmra.mxu1 %v2350_v10  ;;  %2788 = vmatpush3.bf16.msra.mxu0 %v2976_v14 }
  0x75   :  { %2828 = vmatpush3.bf16.msra.mxu1 %v2977_v15  ;;  %2789 = vmatprep.subr.bf16.mxu0 %v2978_v16 }
  0x76   :  { %2829 = vmatprep.subr.bf16.mxu1 %v2979_v17  ;;  %1793 = vmatprep.mubr.bf16.mxu0 %v2365_v24 }
  0x77   :  { %1858 = vmatprep.mubr.bf16.mxu1 %v2367_v27 }
  0x78   :  { %2790 = vmatpush3.bf16.msra.mxu0 %v2980_v19 }
  0x79   :  { %2830 = vmatpush3.bf16.msra.mxu1 %v2981_v20  ;;  %2791 = vmatprep.subr.bf16.mxu0 %v2982_v29 }
  0x7a   :  { %2831 = vmatprep.subr.bf16.mxu1 %v2983_v30 }
  0x7b   :  { %1794 = vmatmul.mubr.bf16.gmra.mxu0 %v2364_v26 }
  0x7c   :  { %1859 = vmatmul.mubr.bf16.gmra.mxu1 %v2366_v28  ;;  %2792 = vmatpush3.bf16.msra.mxu0 %v2984_v32 }
  0x7d   :  { %2832 = vmatpush3.bf16.msra.mxu1 %v2985_v33  ;;  %2793 = vmatprep.subr.bf16.mxu0 %v2986_v34 }
  0x7e   :  { %2833 = vmatprep.subr.bf16.mxu1 %v2987_v35  ;;  %1899 = vmatprep.mubr.bf16.mxu0 %v2321_v43 }
  0x7f   :  { %1964 = vmatprep.mubr.bf16.mxu1 %v2323_v48 }
  0x80   :  { %2794 = vmatpush3.bf16.msra.mxu0 %v2988_v37 }
  0x81   :  { %2834 = vmatpush3.bf16.msra.mxu1 %v2989_v38 }
  0x83   :  { %1900 = vmatmul.mubr.bf16.vlgmr.msra.gmra.mxu0 %v2320_v42 }
  0x84   :  { %1965 = vmatmul.mubr.bf16.vlgmr.msra.gmra.mxu1 %v2322_v47  ;;  %1907 = vmatprep.mubr.bf16.mxu0 %v2337_v52 }
  0x85   :  { %1972 = vmatprep.mubr.bf16.mxu1 %v2339_v54 }
  0x8b   :  { %1908 = vmatmul.mubr.bf16.gmra.mxu0 %v2336_v59 }
  0x8c   :  { %1973 = vmatmul.mubr.bf16.gmra.mxu1 %v2338_v60  ;;  %1915 = vmatprep.mubr.bf16.mxu0 %v2353_v61 }
  0x8d   :  { %1980 = vmatprep.mubr.bf16.mxu1 %v2355_v62 }
  0x93   :  { %1916 = vmatmul.mubr.bf16.gmra.mxu0 %v2352_v3 }
  0x94   :  { %1981 = vmatmul.mubr.bf16.gmra.mxu1 %v2354_v4  ;;  %1923 = vmatprep.mubr.bf16.mxu0 %v2369_v5 }
  0x95   :  { %1988 = vmatprep.mubr.bf16.mxu1 %v2371_v6 }
  0x9b   :  { %1924 = vmatmul.mubr.bf16.gmra.mxu0 %v2368_v7 }
  0x9c   :  { %1989 = vmatmul.mubr.bf16.gmra.mxu1 %v2370_v8 }
  0xca   :  { %v352_v32 = vpop.permute.xlu0 %351 }
  0xce   :  { %v357_v38 = vpop.permute.xlu0 %356 }
  0xd2   :  { %v362_v50 = vpop.permute.xlu1 %361 }
  0xd6   :  { %v367_v57 = vpop.permute.xlu1 %366 }
  0xdd   :  { %v372_v5 = vpop.permute.xlu0 %371 }
  0xe3   :  { %v2555_v9 = vpop.f32.mrf.mxu0 }
  0xe4   :  { %v2595_v10 = vpop.f32.mrf.mxu1 }
  0xe5   :  { %v2556_v11 = vpop.f32.mrf.mxu0 }
  0xe6   :  { %v2557_v12 = vadd.f32 %v2556_v11, %v2555_v9  ;;  %v2596_v13 = vpop.f32.mrf.mxu1  ;;  %v377_v9 = vpop.permute.xlu1 %376 }
  0xe7   :  { %v2597_v14 = vadd.f32 %v2596_v13, %v2595_v10  ;;  %v2558_v15 = vpop.f32.mrf.mxu0 }
  0xe8   :  { %v2598_v16 = vpop.f32.mrf.mxu1  ;;  %v1512_v34 = vadd.f32 %v2557_v12, %v352_v32 }
  0xe9   :  { %v2559_v17 = vpop.f32.mrf.mxu0 }
  0xea   :  { %v2560_v18 = vadd.f32 %v2559_v17, %v2558_v15  ;;  %v2599_v19 = vpop.f32.mrf.mxu1  ;;  %v3637_v37 = vadd.f32 %v2597_v14, %v1512_v34  ;;  %v382_v17 = vpop.permute.xlu0 %381 }
  0xeb   :  { %v2600_v20 = vadd.f32 %v2599_v19, %v2598_v16  ;;  %v2561_v21 = vpop.f32.mrf.mxu0 }
  0xec   :  { %v2601_v22 = vpop.f32.mrf.mxu1  ;;  %v1515_v40 = vadd.f32 %v2560_v18, %v357_v38  ;;  %v387_v18 = vpop.permute.xlu1 %386 }
  0xed   :  { %v2562_v23 = vpop.f32.mrf.mxu0 }
  0xee   :  { %v2563_v24 = vadd.f32 %v2562_v23, %v2561_v21  ;;  %v2602_v25 = vpop.f32.mrf.mxu1  ;;  %v3639_v45 = vadd.f32 %v2600_v20, %v1515_v40 }
  0xef   :  { %v2603_v26 = vadd.f32 %v2602_v25, %v2601_v22  ;;  %v2564_v27 = vpop.f32.mrf.mxu0 }
  0xf0   :  { %v2604_v28 = vpop.f32.mrf.mxu1  ;;  %v1520_v52 = vadd.f32 %v2563_v24, %v362_v50 }
  0xf1   :  { %v2565_v29 = vpop.f32.mrf.mxu0 }
  0xf2   :  { %v2566_v30 = vadd.f32 %v2565_v29, %v2564_v27  ;;  %v2605_v31 = vpop.f32.mrf.mxu1  ;;  %v3641_v55 = vadd.f32 %v2603_v26, %v1520_v52 }
  0xf3   :  { %v2606_v33 = vadd.f32 %v2605_v31, %v2604_v28  ;;  %v2567_v35 = vpop.f32.mrf.mxu0 }
  0xf4   :  { %v2607_v36 = vpop.f32.mrf.mxu1  ;;  %v1523_v60 = vadd.f32 %v2566_v30, %v367_v57 }
  0xf5   :  { %v2568_v39 = vpop.f32.mrf.mxu0 }
  0xf6   :  { %v2569_v41 = vadd.f32 %v2568_v39, %v2567_v35  ;;  %v2608_v42 = vpop.f32.mrf.mxu1  ;;  %v3643_v0 = vadd.f32 %v2606_v33, %v1523_v60 }
  0xf7   :  { %v2609_v43 = vadd.f32 %v2608_v42, %v2607_v36  ;;  %v2570_v44 = vpop.f32.mrf.mxu0 }
  0xf8   :  { %v2610_v46 = vpop.f32.mrf.mxu1  ;;  %v1528_v7 = vadd.f32 %v2569_v41, %v372_v5 }
  0xf9   :  { %v2571_v47 = vpop.f32.mrf.mxu0 }
  0xfa   :  { %v2572_v48 = vadd.f32 %v2571_v47, %v2570_v44  ;;  %v2611_v49 = vpop.f32.mrf.mxu1  ;;  %v3651_v11 = vadd.f32 %v2609_v43, %v1528_v7 }
  0xfb   :  { %v2612_v51 = vadd.f32 %v2611_v49, %v2610_v46  ;;  %v2573_v53 = vpop.f32.mrf.mxu0 }
  0xfc   :  { %v2613_v54 = vpop.f32.mrf.mxu1  ;;  %v1531_v12 = vadd.f32 %v2572_v48, %v377_v9 }
  0xfd   :  { %v2574_v56 = vpop.f32.mrf.mxu0 }
  0xfe   :  { %v2575_v58 = vadd.f32 %v2574_v56, %v2573_v53  ;;  %v2614_v59 = vpop.f32.mrf.mxu1  ;;  %v3657_v15 = vadd.f32 %v2612_v51, %v1531_v12 }
  0xff   :  { %v2615_v61 = vadd.f32 %v2614_v59, %v2613_v54  ;;  %v2576_v62 = vpop.f32.mrf.mxu0 }
 0x100   :  { %v2616_v63 = vpop.f32.mrf.mxu1  ;;  %v1536_v19 = vadd.f32 %v2575_v58, %v382_v17 }
 0x101   :  { %v2577_v1 = vpop.f32.mrf.mxu0 }
 0x102   :  { %v2578_v2 = vadd.f32 %v2577_v1, %v2576_v62  ;;  %v2617_v3 = vpop.f32.mrf.mxu1  ;;  %v3663_v23 = vadd.f32 %v2615_v61, %v1536_v19 }
 0x103   :  { %v2618_v4 = vadd.f32 %v2617_v3, %v2616_v63  ;;  %v3645_v6 = vpop.f32.mrf.mxu0 }
 0x104   :  { %v3647_v8 = vpop.f32.mrf.mxu1  ;;  %v1539_v20 = vadd.f32 %v2578_v2, %v387_v18 }
 0x105   :  { %v3649_v10 = vpop.f32.mrf.mxu0 }
 0x106   :  { %v3653_v13 = vpop.f32.mrf.mxu1  ;;  %v3665_v24 = vadd.f32 %v2618_v4, %v1539_v20 }
 0x107   :  { %v3655_v14 = vpop.f32.mrf.mxu0 }
 0x108   :  { %v3659_v16 = vpop.f32.mrf.mxu1  ;;  %3965 = vst [vmem:[#allocation2_spill] sm:$0xff] %v3665_v24 }
 0x109   :  { %v2639_v21 = vpop.f32.mrf.mxu0 }
 0x10a   :  { %v3661_v22 = vpop.f32.mrf.mxu1 }
 0x10b   :  { %v2641_v25 = vpop.f32.mrf.mxu0 }
 0x10c   :  { %v3667_v26 = vpop.f32.mrf.mxu1 }
 0x10d   :  { %v2642_v27 = vpop.f32.mrf.mxu0 }
 0x10e   :  { %v3669_v28 = vpop.f32.mrf.mxu1 }
 0x10f   :  { %v3671_v29 = vpop.f32.mrf.mxu0 }
 0x110   :  { %v3673_v30 = vpop.f32.mrf.mxu1 }
 0x111   :  { %v3675_v31 = vpop.f32.mrf.mxu0 }
 0x112   :  { %v3677_v32 = vpop.f32.mrf.mxu1 }
 0x113   :  { %v3679_v33 = vpop.f32.mrf.mxu0 }
 0x114   :  { %v3681_v34 = vpop.f32.mrf.mxu1 }
 0x115   :  { %v3683_v35 = vpop.f32.mrf.mxu0 }
 0x116   :  { %v3685_v36 = vpop.f32.mrf.mxu1 }
 0x117   :  { %v3687_v38 = vpop.f32.mrf.mxu0 }
 0x118   :  { %v3689_v39 = vpop.f32.mrf.mxu1 }
 0x119   :  { %v3691_v40 = vpop.f32.mrf.mxu0 }
 0x11a   :  { %v3693_v41 = vpop.f32.mrf.mxu1 }
 0x11b   :  { %v3695_v42 = vpop.f32.mrf.mxu0 }
 0x11c   :  { %v3697_v43 = vpop.f32.mrf.mxu1 }
 0x11d   :  { %3966 = vst [vmem:[#allocation3_spill] sm:$0xff] %v3697_v43  ;;  %v3699_v44 = vpop.f32.mrf.mxu0 }
 0x11e   :  { %v3701_v46 = vpop.f32.mrf.mxu1 }
 0x11f   :  { %3967 = vst [vmem:[#allocation4_spill] sm:$0xff] %v3701_v46  ;;  %v3703_v47 = vpop.f32.mrf.mxu0 }
 0x120   :  { %3968 = vst [vmem:[#allocation5_spill] sm:$0xff] %v3703_v47  ;;  %v3705_v48 = vpop.f32.mrf.mxu1 }
 0x121   :  { %3969 = vst [vmem:[#allocation6_spill] sm:$0xff] %v3705_v48  ;;  %v3707_v49 = vpop.f32.mrf.mxu0 }
 0x122   :  { %3970 = vst [vmem:[#allocation7_spill] sm:$0xff] %v3707_v49  ;;  %v3709_v50 = vpop.f32.mrf.mxu1 }
 0x123   :  { %3971 = vst [vmem:[#allocation8_spill] sm:$0xff] %v3709_v50  ;;  %v2715_v51 = vpop.f32.mrf.mxu0  ;;  %v2637_v50 = vadd.f32 %v3649_v10, %v3645_v6  ;;  %v2643_v6 = vadd.f32 %v2642_v27, %v2641_v25 }
 0x124   :  { %v2755_v52 = vpop.f32.mrf.mxu1 }
 0x125   :  { %v2716_v53 = vpop.f32.mrf.mxu0  ;;  %v1642_v49 = vadd.f32 %v2637_v50, %v3637_v37  ;;  %v2013_v37 = vlaneseq }
 0x126   :  { %v2756_v54 = vpop.f32.mrf.mxu1  ;;  %v2717_v46 = vadd.f32 %v2716_v53, %v2715_v51 }
 0x127   :  { %v2718_v56 = vpop.f32.mrf.mxu0  ;;  %v2757_v27 = vadd.f32 %v2756_v54, %v2755_v52 }
 0x128   :  { %v2758_v57 = vpop.f32.mrf.mxu1 }
 0x129   :  { %v2719_v58 = vpop.f32.mrf.mxu0 }
 0x12a   :  { %v2759_v59 = vpop.f32.mrf.mxu1  ;;  %v2720_v50 = vadd.f32 %v2719_v58, %v2718_v56 }
 0x12b   :  { %v2721_v60 = vpop.f32.mrf.mxu0 }
 0x12c   :  { %v3711_v61 = vpop.f32.mrf.mxu1 }
 0x12d   :  { %v2722_v62 = vpop.f32.mrf.mxu0 }
 0x12e   :  { %v3713_v63 = vpop.f32.mrf.mxu1 }
 0x12f   :  { %v2724_v1 = vpop.f32.mrf.mxu0 }
 0x130   :  { %v3715_v2 = vpop.f32.mrf.mxu1 }
 0x131   :  { %v2725_v3 = vpop.f32.mrf.mxu0 }
 0x132   :  { %v3717_v4 = vpop.f32.mrf.mxu1 }
 0x133   :  { %v3719_v5 = vpop.f32.mrf.mxu0 }
 0x134   :  { %v3721_v7 = vpop.f32.mrf.mxu1 }
 0x135   :  { %3972 = vst [vmem:[#allocation9_spill] sm:$0xff] %v3721_v7  ;;  %v3723_v9 = vpop.f32.mrf.mxu0 }
 0x136   :  { %v3725_v12 = vpop.f32.mrf.mxu1 }
 0x137   :  { %3973 = vst [vmem:[#allocation10_spill] sm:$0xff] %v3725_v12  ;;  %v3727_v17 = vpop.f32.mrf.mxu0  ;;  %v2640_v12 = vadd.f32 %v2639_v21, %v3655_v14  ;;  %v2680_v14 = vadd.f32 %v3661_v22, %v3659_v16 }
 0x138   :  { %v3729_v18 = vpop.f32.mrf.mxu1 }
 0x139   :  { %3974 = vst [vmem:[#allocation11_spill] sm:$0xff] %v3729_v18  ;;  %v3731_v19 = vpop.f32.mrf.mxu0 }
 0x13a   :  { %v3733_v20 = vpop.f32.mrf.mxu1 }
 0x13b   :  { %3975 = vst [vmem:[#allocation12_spill] sm:$0xff] %v3733_v20  ;;  %v3737_v48 = vpop.f32.mrf.mxu0  ;;  %v2677_v20 = vadd.f32 %v3653_v13, %v3647_v8  ;;  %v2646_v8 = vadd.f32 %v3675_v31, %v3671_v29  ;;  %v2649_v29 = vadd.f32 %v3683_v35, %v3679_v33  ;;  %v2760_v31 = vadd.f32 %v2759_v59, %v2758_v57 }
 0x13c   :  { %3976 = vst [vmem:[#allocation13_spill] sm:$0xff] %v3737_v48  ;;  %v3739_v24 = vpop.f32.mrf.mxu1  ;;  %v2652_v33 = vadd.f32 %v3691_v40, %v3687_v38  ;;  %v2763_v35 = vadd.f32 %v3713_v63, %v3711_v61 }
 0x13d   :  { %3977 = vst [vmem:[#allocation14_spill] sm:$0xff] %v3739_v24  ;;  %v3741_v7 = vpop.f32.mrf.mxu0  ;;  %v1707_v24 = vadd.f32 %v2677_v20, %v1642_v49  ;;  %v2723_v49 = vadd.f32 %v2722_v62, %v2721_v60 }
 0x13e   :  { %3978 = vst [vmem:[#allocation15_spill] sm:$0xff] %v3741_v7  ;;  %v3745_v47 = vpop.f32.mrf.mxu1  ;;  %v1645_v7 = vadd.f32 %v2640_v12, %v3639_v45  ;;  %v2683_v45 = vadd.f32 %v3669_v28, %v3667_v26  ;;  %v3765_v12 = vand.u32 127, %v2013_v37  ;;  %v2686_v26 = vadd.f32 %v3677_v32, %v3673_v30 }
 0x13f   :  { %3979 = vst [vmem:[#allocation16_spill] sm:$0xff] %v3745_v47  ;;  %v3747_v18 = vpop.f32.mrf.mxu0  ;;  %v1772_v21 = vadd.f32 %v2717_v46, %v1707_v24  ;;  %v1650_v47 = vadd.f32 %v2643_v6, %v3641_v55  ;;  %v1653_v55 = vadd.f32 %v2646_v8, %v3643_v0  ;;  %v1658_v30 = vadd.f32 %v2649_v29, %v3651_v11  ;;  %v3982_v29 = vld [vmem:[#allocation5_spill] sm:$0xff] }
 0x140   :  { %v3751_v43 = vpop.f32.mrf.mxu1  ;;  %v1710_v25 = vadd.f32 %v2680_v14, %v1645_v7  ;;  %vm2015_vm0 = vcmp.lt.s32.totalorder %v3765_v12, 16  ;;  %v2726_v7 = vadd.f32 %v2725_v3, %v2724_v1  ;;  %v2689_v3 = vadd.f32 %v3685_v36, %v3681_v34 }
 0x141   :  { %v3753_v10 = vpop.f32.mrf.mxu0  ;;  %v1837_v20 = vadd.f32 %v2757_v27, %v1772_v21  ;;  %v1715_v46 = vadd.f32 %v2683_v45, %v1650_v47  ;;  %v1718_v37 = vadd.f32 %v2686_v26, %v1653_v55  ;;  %v2655_v21 = vadd.f32 %v3699_v44, %v3695_v42  ;;  %v3981_v55 = vld [vmem:[#allocation4_spill] sm:$0xff] }
 0x142   :  { %v3756_v48 = vpop.f32.mrf.mxu1  ;;  %v1775_v16 = vadd.f32 %v2720_v50, %v1710_v25  ;;  %v2729_v11 = vadd.f32 %v3723_v9, %v3719_v5  ;;  %v1661_v25 = vadd.f32 %v2652_v33, %v3657_v15  ;;  %v1723_v34 = vadd.f32 %v2689_v3, %v1658_v30 }
 0x143   :  { %v2795_v13 = vpop.f32.mrf.mxu0  ;;  %v1780_v28 = vadd.f32 %v2723_v49, %v1715_v46  ;;  %v1783_v63 = vadd.f32 %v2726_v7, %v1718_v37  ;;  %v2766_v36 = vadd.f32 %v3717_v4, %v3715_v2  ;;  %v2692_v5 = vadd.f32 %v3693_v41, %v3689_v39  ;;  %v3980_v46 = vld [vmem:[#allocation3_spill] sm:$0xff] }
 0x144   :  { %v2835_v51 = vpop.f32.mrf.mxu1  ;;  %v1840_v62 = vadd.f32 %v2760_v31, %v1775_v16  ;;  %v1666_v9 = vadd.f32 %v2655_v21, %v3663_v23  ;;  %v2732_v15 = vadd.f32 %v3731_v19, %v3727_v17  ;;  %v1788_v16 = vadd.f32 %v2729_v11, %v1723_v34  ;;  %v3983_v31 = vld [vmem:[#allocation7_spill] sm:$0xff]  ;;  %v3984_v23 = vld [vmem:[#allocation9_spill] sm:$0xff]  ;;  %v3985_v17 = vld [vmem:[#allocation10_spill] sm:$0xff] }
 0x145   :  { %v2796_v53 = vpop.f32.mrf.mxu0  ;;  %v1845_v38 = vadd.f32 %v2763_v35, %v1780_v28  ;;  %v2658_v39 = vadd.f32 %v3983_v31, %v3982_v29  ;;  %v2769_v19 = vadd.f32 %v3985_v17, %v3984_v23  ;;  %v3992_v11 = vld [vmem:[#allocation8_spill] sm:$0xff] }
 0x146   :  { %v2797_v22 = vadd.f32 %v2796_v53, %v2795_v13  ;;  %v2836_v24 = vpop.f32.mrf.mxu1 }
 0x147   :  { %v2798_v56 = vpop.f32.mrf.mxu0  ;;  %v2837_v54 = vadd.f32 %v2836_v24, %v2835_v51  ;;  %v1726_v24 = vadd.f32 %v2692_v5, %v1661_v25  ;;  %v1853_v33 = vadd.f32 %v2769_v19, %v1788_v16 }
 0x148   :  { %v1902_v52 = vadd.f32 %v2797_v22, %v1837_v20  ;;  %v2838_v58 = vpop.f32.mrf.mxu1  ;;  %v1848_v20 = vadd.f32 %v2766_v36, %v1783_v63  ;;  %v3991_v63 = vld [vmem:[#allocation6_spill] sm:$0xff] }
 0x149   :  { %v2799_v60 = vpop.f32.mrf.mxu0  ;;  %v1791_v28 = vadd.f32 %v2732_v15, %v1726_v24  ;;  %v3994_v15 = vld [vmem:[#allocation16_spill] sm:$0xff] }
 0x14a   :  { %v2800_v47 = vadd.f32 %v2799_v60, %v2798_v56  ;;  %v2839_v6 = vpop.f32.mrf.mxu1  ;;  %v3773_v0 = vadd.f32 %v2837_v54, %v1902_v52  ;;  %v2695_v56 = vadd.f32 %v3981_v55, %v3980_v46  ;;  %v3986_v60 = vld [vmem:[#allocation13_spill] sm:$0xff] }
 0x14b   :  { %v2801_v57 = vpop.f32.mrf.mxu0  ;;  %v2840_v59 = vadd.f32 %v2839_v6, %v2838_v58 }
 0x14c   :  { %v1905_v32 = vadd.f32 %v2800_v47, %v1840_v62  ;;  %v2841_v14 = vpop.f32.mrf.mxu1  ;;  %v2016_v1 = vsel %vm2015_vm0, %v3773_v0, 0.0  ;;  %v3987_v62 = vld [vmem:[#allocation15_spill] sm:$0xff]  ;;  %v1731_v37 = vadd.f32 %v2695_v56, %v1666_v9  ;;  %v3993_v9 = vld [vmem:[#allocation14_spill] sm:$0xff] }
 0x14d   :  { %v2802_v40 = vpop.f32.mrf.mxu0  ;;  %2024 = vadd.xlane.f32.xlu0 %v2016_v1  ;;  %v2048_v61 = vmul.f32 %v2016_v1, %v2016_v1  ;;  %v2735_v7 = vadd.f32 %v3987_v62, %v3986_v60  ;;  %v3990_v1 = vld [vmem:[#allocation12_spill] sm:$0xff] }
 0x14e   :  { %v3789_v50 = vadd.f32 %v2840_v59, %v1905_v32  ;;  %v2803_v8 = vadd.f32 %v2802_v40, %v2801_v57  ;;  %v2842_v13 = vpop.f32.mrf.mxu1  ;;  %v3988_v32 = vld [vmem:[#allocation2_spill] sm:$0xff] }
 0x14f   :  { %v2843_v27 = vadd.f32 %v2842_v13, %v2841_v14  ;;  %v2804_v51 = vpop.f32.mrf.mxu0  ;;  %2056 = vadd.xlane.f32.xlu1 %v2048_v61  ;;  %v1669_v59 = vadd.f32 %v2658_v39, %v3988_v32  ;;  %v3989_v14 = vld [vmem:[#allocation11_spill] sm:$0xff]  ;;  %v1796_v25 = vadd.f32 %v2735_v7, %v1731_v37 }
 0x150   :  { %v1910_v42 = vadd.f32 %v2803_v8, %v1845_v38  ;;  %v2844_v44 = vpop.f32.mrf.mxu1  ;;  %v2017_v45 = vsel %vm2015_vm0, %v3789_v50, 0.0  ;;  %v2772_v3 = vadd.f32 %v3990_v1, %v3989_v14  ;;  %v2698_v8 = vadd.f32 %v3992_v11, %v3991_v63 }
 0x151   :  { %v2805_v49 = vpop.f32.mrf.mxu0  ;;  %v2049_v53 = vmul.f32 %v2017_v45, %v2017_v45 }
 0x152   :  { %v2806_v22 = vadd.f32 %v2805_v49, %v2804_v51  ;;  %v2845_v2 = vpop.f32.mrf.mxu1  ;;  %v3802_v4 = vadd.f32 %v2843_v27, %v1910_v42  ;;  %v1856_v13 = vadd.f32 %v2772_v3, %v1791_v28  ;;  %v2738_v51 = vadd.f32 %v3753_v10, %v3747_v18 }
 0x153   :  { %v2807_v41 = vpop.f32.mrf.mxu0  ;;  %2058 = vadd.xlane.f32.xlu0 %v2049_v53  ;;  %2026 = vadd.xlane.f32.xlu1 %v2017_v45  ;;  %v2846_v54 = vadd.f32 %v2845_v2, %v2844_v44  ;;  %v1734_v45 = vadd.f32 %v2698_v8, %v1669_v59  ;;  %v2775_v49 = vadd.f32 %v3994_v15, %v3993_v9 }
 0x154   :  { %v1913_v52 = vadd.f32 %v2806_v22, %v1848_v20  ;;  %v2847_v58 = vpop.f32.mrf.mxu1  ;;  %v2018_v26 = vsel %vm2015_vm0, %v3802_v4, 0.0 }
 0x155   :  { %v2808_v47 = vpop.f32.mrf.mxu0  ;;  %v2050_v6 = vmul.f32 %v2018_v26, %v2018_v26  ;;  %v1861_v2 = vadd.f32 %v2775_v49, %v1796_v25  ;;  %v1799_v24 = vadd.f32 %v2738_v51, %v1734_v45 }
 0x156   :  { %v2809_v35 = vadd.f32 %v2808_v47, %v2807_v41  ;;  %v2848_v57 = vpop.f32.mrf.mxu1  ;;  %v3815_v30 = vadd.f32 %v2846_v54, %v1913_v52  ;;  %v2778_v41 = vadd.f32 %v3756_v48, %v3751_v43 }
 0x157   :  { %v2849_v21 = vadd.f32 %v2848_v57, %v2847_v58  ;;  %v2810_v38 = vpop.f32.mrf.mxu0  ;;  %2028 = vadd.xlane.f32.xlu0 %v2018_v26  ;;  %2060 = vadd.xlane.f32.xlu1 %v2050_v6 }
 0x158   :  { %v1918_v40 = vadd.f32 %v2809_v35, %v1853_v33  ;;  %v2850_v61 = vpop.f32.mrf.mxu1  ;;  %v2019_v42 = vsel %vm2015_vm0, %v3815_v30, 0.0  ;;  %v1864_v52 = vadd.f32 %v2778_v41, %v1799_v24 }
 0x159   :  { %v2811_v27 = vpop.f32.mrf.mxu0  ;;  %v2051_v22 = vmul.f32 %v2019_v42, %v2019_v42 }
 0x15a   :  { %v2812_v34 = vadd.f32 %v2811_v27, %v2810_v38  ;;  %v2851_v36 = vpop.f32.mrf.mxu1  ;;  %v3827_v44 = vadd.f32 %v2849_v21, %v1918_v40 }
 0x15b   :  { %v2813_v5 = vpop.f32.mrf.mxu0  ;;  %2030 = vadd.xlane.f32.xlu0 %v2019_v42  ;;  %v2852_v20 = vadd.f32 %v2851_v36, %v2850_v61 }
 0x15c   :  { %v1921_v53 = vadd.f32 %v2812_v34, %v1856_v13  ;;  %v2853_v16 = vpop.f32.mrf.mxu1  ;;  %v2020_v18 = vsel %vm2015_vm0, %v3827_v44, 0.0 }
 0x15d   :  { %v2814_v10 = vpop.f32.mrf.mxu0  ;;  %2032 = vadd.xlane.f32.xlu1 %v2020_v18  ;;  %v2052_v39 = vmul.f32 %v2020_v18, %v2020_v18 }
 0x15e   :  { %v2815_v46 = vadd.f32 %v2814_v10, %v2813_v5  ;;  %v2854_v55 = vpop.f32.mrf.mxu1  ;;  %v3834_v56 = vadd.f32 %v2852_v20, %v1921_v53 }
 0x15f   :  { %v2855_v29 = vadd.f32 %v2854_v55, %v2853_v16  ;;  %v2816_v31 = vpop.f32.mrf.mxu0  ;;  %2062 = vadd.xlane.f32.xlu0 %v2051_v22 }
 0x160   :  { %v1926_v23 = vadd.f32 %v2815_v46, %v1861_v2  ;;  %v2856_v17 = vpop.f32.mrf.mxu1  ;;  %v2021_v26 = vsel %vm2015_vm0, %v3834_v56, 0.0 }
 0x161   :  { %v2817_v19 = vpop.f32.mrf.mxu0  ;;  %2064 = vadd.xlane.f32.xlu1 %v2052_v39  ;;  %v2053_v48 = vmul.f32 %v2021_v26, %v2021_v26 }
 0x162   :  { %v2818_v54 = vadd.f32 %v2817_v19, %v2816_v31  ;;  %v2857_v58 = vpop.f32.mrf.mxu1  ;;  %v3841_v28 = vadd.f32 %v2855_v29, %v1926_v23  ;;  %v1997_v31 = vld [vmem:[%s3962_s3] sm:$0xff] }
 0x163   :  { %2034 = vadd.xlane.f32.xlu0 %v2021_v26  ;;  %v2858_v62 = vadd.f32 %v2857_v58, %v2856_v17 }
 0x164   :  { %v1929_v60 = vadd.f32 %v2818_v54, %v1864_v52  ;;  %v2022_v43 = vsel %vm2015_vm0, %v3841_v28, 0.0 }
 0x165   :  { %2036 = vadd.xlane.f32.xlu1 %v2022_v43  ;;  %v2054_v47 = vmul.f32 %v2022_v43, %v2022_v43 }
 0x166   :  { %v3846_v7 = vadd.f32 %v2858_v62, %v1929_v60  ;;  %v1998_v62 = vld [vmem:[%s3962_s3 + $0x8] sm:$0xff] }
 0x167   :  { %2066 = vadd.xlane.f32.xlu0 %v2053_v48 }
 0x168   :  { %v2023_v6 = vsel %vm2015_vm0, %v3846_v7, 0.0 }
 0x169   :  { %2068 = vadd.xlane.f32.xlu1 %v2054_v47  ;;  %v2055_v37 = vmul.f32 %v2023_v6, %v2023_v6 }
 0x16b   :  { %2038 = vadd.xlane.f32.xlu0 %v2023_v6 }
 0x16f   :  { %2070 = vadd.xlane.f32.xlu0 %v2055_v37 }
 0x1d6   :  { %v2025_v33 = vpop.xlane.xlu0 %2024 }
 0x1d7   :  { %v3851_v35 = vmul.f32 0.0625, %v2025_v33 }
 0x1d8   :  { %v2057_v57 = vpop.xlane.xlu1 %2056 }
 0x1d9   :  { %v2080_v32 = vmul.f32 %v3851_v35, %v3851_v35  ;;  %v2072_v59 = vmul.f32 0.0625, %v2057_v57 }
 0x1db   :  { %v2088_v14 = vsub.f32 %v2072_v59, %v2080_v32 }
 0x1dc   :  { %v2059_v1 = vpop.xlane.xlu0 %2058  ;;  %v2027_v3 = vpop.xlane.xlu1 %2026 }
 0x1dd   :  { %v2096_v21 = vmax.f32 %v2088_v14, 0.0  ;;  %v3855_v38 = vmul.f32 0.0625, %v2027_v3  ;;  %v2073_v12 = vmul.f32 0.0625, %v2059_v1  ;;  %v2005_v3 = vld [vmem:[%s3963_s4] sm:$0xff] }
 0x1df   :  { %v2104_v40 = vadd.f32 1e-05, %v2096_v21  ;;  %v2081_v61 = vmul.f32 %v3855_v38, %v3855_v38  ;;  %v1999_v21 = vld [vmem:[%s3962_s3 + $0x10] sm:$0xff] }
 0x1e0   :  { %v2029_v63 = vpop.xlane.xlu0 %2028  ;;  %v2061_v11 = vpop.xlane.xlu1 %2060 }
 0x1e1   :  { %2990 = vrsqrt.f32 %v2104_v40  ;;  %v2089_v8 = vsub.f32 %v2073_v12, %v2081_v61  ;;  %v3859_v13 = vmul.f32 0.0625, %v2029_v63  ;;  %v2074_v51 = vmul.f32 0.0625, %v2061_v11 }
 0x1e3   :  { %v2097_v25 = vmax.f32 %v2089_v8, 0.0  ;;  %v2082_v27 = vmul.f32 %v3859_v13, %v3859_v13 }
 0x1e4   :  { %v2031_v34 = vpop.xlane.xlu0 %2030 }
 0x1e5   :  { %v2105_v36 = vadd.f32 1e-05, %v2097_v25  ;;  %v2090_v42 = vsub.f32 %v2074_v51, %v2082_v27  ;;  %v3863_v45 = vmul.f32 0.0625, %v2031_v34  ;;  %v2006_v34 = vld [vmem:[%s3963_s4 + $0x8] sm:$0xff] }
 0x1e6   :  { %v2033_v5 = vpop.xlane.xlu1 %2032 }
 0x1e7   :  { %2992 = vrsqrt.f32 %v2105_v36  ;;  %v2098_v9 = vmax.f32 %v2090_v42, 0.0  ;;  %v3865_v15 = vmul.f32 0.0625, %v2033_v5  ;;  %v2083_v20 = vmul.f32 %v3863_v45, %v3863_v45  ;;  %v2007_v36 = vld [vmem:[%s3963_s4 + $0x10] sm:$0xff]  ;;  %v2000_v5 = vld [vmem:[%s3962_s3 + $0x18] sm:$0xff] }
 0x1e8   :  { %v2063_v49 = vpop.xlane.xlu0 %2062 }
 0x1e9   :  { %v2106_v53 = vadd.f32 1e-05, %v2098_v9  ;;  %v2075_v16 = vmul.f32 0.0625, %v2063_v49  ;;  %v2084_v10 = vmul.f32 %v3865_v15, %v3865_v15 }
 0x1ea   :  { %v2065_v18 = vpop.xlane.xlu1 %2064 }
 0x1eb   :  { %2994 = vrsqrt.f32 %v2106_v53  ;;  %v2091_v22 = vsub.f32 %v2075_v16, %v2083_v20  ;;  %v2076_v2 = vmul.f32 0.0625, %v2065_v18  ;;  %v2001_v16 = vld [vmem:[%s3962_s3 + $0x20] sm:$0xff] }
 0x1ec   :  { %v2035_v24 = vpop.xlane.xlu0 %2034 }
 0x1ed   :  { %v2099_v46 = vmax.f32 %v2091_v22, 0.0  ;;  %v2092_v55 = vsub.f32 %v2076_v2, %v2084_v10  ;;  %v3871_v29 = vmul.f32 0.0625, %v2035_v24  ;;  %v2008_v24 = vld [vmem:[%s3963_s4 + $0x18] sm:$0xff] }
 0x1ee   :  { %v2991_v39 = vpop.eup %2990  ;;  %v2037_v41 = vpop.xlane.xlu1 %2036 }
 0x1ef   :  { %v2107_v23 = vadd.f32 1e-05, %v2099_v46  ;;  %v2100_v17 = vmax.f32 %v2092_v55, 0.0  ;;  %v3876_v19 = vmul.f32 0.0625, %v2037_v41  ;;  %v2120_v54 = vmul.f32 %v2991_v39, %v1997_v31  ;;  %v2009_v46 = vld [vmem:[%s3963_s4 + $0x20] sm:$0xff]  ;;  %v2002_v31 = vld [vmem:[%s3962_s3 + $0x28] sm:$0xff] }
 0x1f0   :  { %v2067_v52 = vpop.xlane.xlu0 %2066  ;;  %v2085_v26 = vmul.f32 %v3871_v29, %v3871_v29 }
 0x1f1   :  { %2996 = vrsqrt.f32 %v2107_v23  ;;  %v2108_v58 = vadd.f32 1e-05, %v2100_v17  ;;  %v2077_v60 = vmul.f32 0.0625, %v2067_v52  ;;  %2146 = vperm.xlu1 %2861, %v2120_v54   ;;  %v2086_v48 = vmul.f32 %v3876_v19, %v3876_v19 }
 0x1f2   :  { %v2069_v43 = vpop.xlane.xlu1 %2068  ;;  %v2128_v57 = vmul.f32 %v2120_v54, %v3851_v35 }
 0x1f3   :  { %2998 = vrsqrt.f32 %v2108_v58  ;;  %v2093_v47 = vsub.f32 %v2077_v60, %v2085_v26  ;;  %v2078_v6 = vmul.f32 0.0625, %v2069_v43  ;;  %v2011_v26 = vld [vmem:[%s3963_s4 + $0x30] sm:$0xff] }
 0x1f4   :  { %v2993_v37 = vpop.eup %2992  ;;  %v2039_v33 = vpop.xlane.xlu0 %2038  ;;  %v2136_v8 = vsub.f32 %v2005_v3, %v2128_v57 }
 0x1f5   :  { %v2121_v32 = vmul.f32 %v2993_v37, %v1998_v62  ;;  %v2101_v59 = vmax.f32 %v2093_v47, 0.0  ;;  %v2094_v14 = vsub.f32 %v2078_v6, %v2086_v48  ;;  %v3886_v1 = vmul.f32 0.0625, %v2039_v33  ;;  %v2004_v62 = vld [vmem:[%s3962_s3 + $0x38] sm:$0xff] }
 0x1f6   :  { %v2012_v37 = vld [vmem:[%s3963_s4 + $0x38] sm:$0xff] }
 0x1f7   :  { %v2109_v40 = vadd.f32 1e-05, %v2101_v59  ;;  %v2102_v12 = vmax.f32 %v2094_v14, 0.0  ;;  %2151 = vperm.xlu0 %2860, %v2121_v32   ;;  %v2129_v63 = vmul.f32 %v2121_v32, %v3855_v38  ;;  %v2087_v35 = vmul.f32 %v3886_v1, %v3886_v1 }
 0x1f8   :  { %v2995_v61 = vpop.eup %2994  ;;  %v2071_v11 = vpop.xlane.xlu0 %2070 }
 0x1f9   :  { %3000 = vrsqrt.f32 %v2109_v40  ;;  %v2110_v25 = vadd.f32 1e-05, %v2102_v12  ;;  %v2079_v27 = vmul.f32 0.0625, %v2071_v11  ;;  %v2122_v51 = vmul.f32 %v2995_v61, %v1999_v21 }
 0x1fa   :  { %v2137_v49 = vsub.f32 %v2006_v34, %v2129_v63 }
 0x1fb   :  { %3002 = vrsqrt.f32 %v2110_v25  ;;  %v2095_v42 = vsub.f32 %v2079_v27, %v2087_v35  ;;  %2194 = vperm.xlu0 %2860, %v2136_v8   ;;  %2156 = vperm.xlu1 %2861, %v2122_v51   ;;  %v2130_v38 = vmul.f32 %v2122_v51, %v3859_v13 }
 0x1fd   :  { %v2103_v9 = vmax.f32 %v2095_v42, 0.0  ;;  %v2138_v53 = vsub.f32 %v2007_v36, %v2130_v38 }
 0x1fe   :  { %v2997_v20 = vpop.eup %2996 }
 0x1ff   :  { %v2111_v18 = vadd.f32 1e-05, %v2103_v9  ;;  %2199 = vperm.xlu1 %2861, %v2137_v49   ;;  %2204 = vperm.xlu0 %2860, %v2138_v53   ;;  %v2123_v10 = vmul.f32 %v2997_v20, %v2000_v5 }
 0x200   :  { %v2999_v22 = vpop.eup %2998 }
 0x201   :  { %3004 = vrsqrt.f32 %v2111_v18  ;;  %v2124_v2 = vmul.f32 %v2999_v22, %v2001_v16  ;;  %v2131_v13 = vmul.f32 %v2123_v10, %v3863_v45  ;;  %v2003_v45 = vld [vmem:[%s3962_s3 + $0x30] sm:$0xff] }
 0x203   :  { %2161 = vperm.xlu1 %2861, %v2123_v10   ;;  %2166 = vperm.xlu0 %2860, %v2124_v2   ;;  %v2132_v55 = vmul.f32 %v2124_v2, %v3865_v15  ;;  %v2139_v39 = vsub.f32 %v2008_v24, %v2131_v13  ;;  %v2010_v15 = vld [vmem:[%s3963_s4 + $0x28] sm:$0xff] }
 0x205   :  { %v2140_v41 = vsub.f32 %v2009_v46, %v2132_v55 }
 0x206   :  { %v3001_v23 = vpop.eup %3000 }
 0x207   :  { %2209 = vperm.xlu1 %2861, %v2139_v39   ;;  %2214 = vperm.xlu0 %2860, %v2140_v41   ;;  %v2125_v17 = vmul.f32 %v3001_v23, %v2002_v31 }
 0x208   :  { %v3003_v52 = vpop.eup %3002 }
 0x209   :  { %v2126_v54 = vmul.f32 %v3003_v52, %v2003_v45  ;;  %v2133_v58 = vmul.f32 %v2125_v17, %v3871_v29 }
 0x20b   :  { %2171 = vperm.xlu1 %2861, %v2125_v17   ;;  %2176 = vperm.xlu0 %2860, %v2126_v54   ;;  %v2134_v60 = vmul.f32 %v2126_v54, %v3876_v19  ;;  %v2141_v43 = vsub.f32 %v2010_v15, %v2133_v58 }
 0x20d   :  { %v2142_v48 = vsub.f32 %v2011_v26, %v2134_v60 }
 0x20e   :  { %v3005_v47 = vpop.eup %3004 }
 0x20f   :  { %2219 = vperm.xlu1 %2861, %v2141_v43   ;;  %2224 = vperm.xlu0 %2860, %v2142_v48   ;;  %v2127_v29 = vmul.f32 %v3005_v47, %v2004_v62 }
 0x211   :  { %v2135_v6 = vmul.f32 %v2127_v29, %v3886_v1 }
 0x213   :  { %2181 = vperm.xlu1 %2861, %v2127_v29   ;;  %v2143_v33 = vsub.f32 %v2012_v37, %v2135_v6 }
 0x217   :  { %2229 = vperm.xlu1 %2861, %v2143_v33  }
 0x26c   :  { %v2147_v19 = vpop.permute.xlu1 %2146 }
 0x26d   :  { %v2184_v32 = vmul.f32 %v2147_v19, %v3773_v0 }
 0x272   :  { %v2152_v57 = vpop.permute.xlu0 %2151 }
 0x273   :  { %v2185_v21 = vmul.f32 %v2152_v57, %v3789_v50 }
 0x276   :  { %v2195_v59 = vpop.permute.xlu0 %2194  ;;  %v2157_v14 = vpop.permute.xlu1 %2156 }
 0x277   :  { %v2232_v3 = vadd.f32 %v2195_v59, %v2184_v32  ;;  %v2186_v63 = vmul.f32 %v2157_v14, %v3802_v4 }
 0x279   :  { %v2248_v61 = vmul.f32 0.01, %v2232_v3  ;;  %vm2240_vm1 = vcmp.ge.f32.partialorder %v2232_v3, 0.0 }
 0x27a   :  { %v2205_v40 = vpop.permute.xlu0 %2204  ;;  %v2200_v12 = vpop.permute.xlu1 %2199 }
 0x27b   :  { %v2233_v1 = vadd.f32 %v2200_v12, %v2185_v21  ;;  %v2256_v25 = vsel %vm2240_vm1, %v2232_v3, %v2248_v61  ;;  %v2234_v27 = vadd.f32 %v2205_v40, %v2186_v63 }
 0x27d   :  { %vm2241_vm2 = vcmp.ge.f32.partialorder %v2233_v1, 0.0  ;;  %v2249_v35 = vmul.f32 0.01, %v2233_v1  ;;  %v2250_v42 = vmul.f32 0.01, %v2234_v27  ;;  %vm2242_vm3 = vcmp.ge.f32.partialorder %v2234_v27, 0.0 }
 0x27e   :  { %v2167_v11 = vpop.permute.xlu0 %2166  ;;  %v2162_v8 = vpop.permute.xlu1 %2161 }
 0x27f   :  { %v2257_v51 = vsel %vm2241_vm2, %v2233_v1, %v2249_v35  ;;  %v2187_v34 = vmul.f32 %v2162_v8, %v3815_v30  ;;  %v2188_v4 = vmul.f32 %v2167_v11, %v3827_v44  ;;  %v2258_v53 = vsel %vm2242_vm3, %v2234_v27, %v2250_v42 }
 0x280   :  { %v2519_v0 = vpack.c.bf16 %v2257_v51, %v2256_v25 }
 0x282   :  { %2520 = vst [vmem:[%s3964_s5] sm:$0xff] %v2519_v0   ;;  %v2215_v50 = vpop.permute.xlu0 %2214  ;;  %v2210_v36 = vpop.permute.xlu1 %2209 }
 0x283   :  { %v2235_v38 = vadd.f32 %v2210_v36, %v2187_v34  ;;  %v2236_v20 = vadd.f32 %v2215_v50, %v2188_v4 }
 0x285   :  { %vm2243_vm4 = vcmp.ge.f32.partialorder %v2235_v38, 0.0  ;;  %v2251_v5 = vmul.f32 0.01, %v2235_v38  ;;  %v2252_v22 = vmul.f32 0.01, %v2236_v20  ;;  %vm2244_vm5 = vcmp.ge.f32.partialorder %v2236_v20, 0.0 }
 0x286   :  { %v2177_v9 = vpop.permute.xlu0 %2176  ;;  %v2172_v49 = vpop.permute.xlu1 %2171 }
 0x287   :  { %v2259_v16 = vsel %vm2243_vm4, %v2235_v38, %v2251_v5  ;;  %v2189_v30 = vmul.f32 %v2172_v49, %v3834_v56  ;;  %v2190_v44 = vmul.f32 %v2177_v9, %v3841_v28  ;;  %v2260_v55 = vsel %vm2244_vm5, %v2236_v20, %v2252_v22 }
 0x288   :  { %v2524_v18 = vpack.c.bf16 %v2259_v16, %v2258_v53 }
 0x28a   :  { %2536 = vst [vmem:[%s3964_s5 + $0x8] sm:$0xff] %v2524_v18   ;;  %v2220_v10 = vpop.permute.xlu1 %2219  ;;  %v2225_v13 = vpop.permute.xlu0 %2224 }
 0x28b   :  { %v2237_v2 = vadd.f32 %v2220_v10, %v2189_v30  ;;  %v2238_v31 = vadd.f32 %v2225_v13, %v2190_v44 }
 0x28d   :  { %vm2245_vm6 = vcmp.ge.f32.partialorder %v2237_v2, 0.0  ;;  %v2253_v24 = vmul.f32 0.01, %v2237_v2  ;;  %v2254_v45 = vmul.f32 0.01, %v2238_v31  ;;  %vm2246_vm7 = vcmp.ge.f32.partialorder %v2238_v31, 0.0 }
 0x28e   :  { %v2182_v46 = vpop.permute.xlu1 %2181 }
 0x28f   :  { %v2261_v39 = vsel %vm2245_vm6, %v2237_v2, %v2253_v24  ;;  %v2191_v56 = vmul.f32 %v2182_v46, %v3846_v7  ;;  %v2262_v28 = vsel %vm2246_vm7, %v2238_v31, %v2254_v45 }
 0x290   :  { %v2529_v41 = vpack.c.bf16 %v2261_v39, %v2260_v55 }
 0x292   :  { %2537 = vst [vmem:[%s3964_s5 + $0x10] sm:$0xff] %v2529_v41   ;;  %v2230_v23 = vpop.permute.xlu1 %2229 }
 0x293   :  { %v2239_v17 = vadd.f32 %v2230_v23, %v2191_v56 }
 0x295   :  { %vm2247_vm8 = vcmp.ge.f32.partialorder %v2239_v17, 0.0  ;;  %v2255_v52 = vmul.f32 0.01, %v2239_v17 }
 0x297   :  { %v2263_v54 = vsel %vm2247_vm8, %v2239_v17, %v2255_v52 }
 0x298   :  { %v2534_v58 = vpack.c.bf16 %v2263_v54, %v2262_v28 }
 0x29a   :  { %2538 = vst [vmem:[%s3964_s5 + $0x18] sm:$0xff] %v2534_v58  }

// kernel: model_forward.7
= control target key start
LH: loop header
LB: loop body
LE: loop exit
PB: predicated region body
PF: predicated region fallthrough
CT: control target
= control target key end

     0   :  { %v7637_v1 = vmov 0   ;;  %s10282_s1 = inlined_call_operand.vmem [shape: bf16[4096,128], index: 1, kind: input, shape index: {}]   ;;  %s10283_s0 = inlined_call_operand.vmem [shape: bf16[128,4096], index: 0, kind: input, shape index: {}]   ;;  %s10284_s2 = inlined_call_operand.vmem [shape: f32[128,1], index: 2, kind: input, shape index: {}]   ;;  %s10285_s3 = inlined_call_operand.vmem [shape: f32[128,1], index: 3, kind: input, shape index: {}]   ;;  %s10286_s4 = inlined_call_operand.vmem [shape: f32[128,1], index: 4, kind: input, shape index: {}]   ;;  %s10287_s5 = inlined_call_operand.vmem [shape: f32[1,128], index: 5, kind: output, shape index: {}]  }
   0x1   :  { %v7349_v0 = vld [vmem:[%s10282_s1 + $0x78] sm:$0xff]   ;;  %7347 = vset.pattern.permute.xlu0 %v7637_v1  ;;  %7348 = vset.pattern.permute.xlu1 %v7637_v1  ;;  %v7353_v5 = vld [vmem:[%s10282_s1 + $0x70] sm:$0xff]   ;;  %v7357_v9 = vld [vmem:[%s10282_s1 + $0x68] sm:$0xff]  }
   0x2   :  { %v7350_v2 = vld [vmem:[%s10282_s1 + $0xf8] sm:$0xff]   ;;  %6322 = vmatprep.subr.bf16.mxu0 %v7349_v0  ;;  %v7354_v6 = vld [vmem:[%s10282_s1 + $0xf0] sm:$0xff]   ;;  %v7358_v10 = vld [vmem:[%s10282_s1 + $0xe8] sm:$0xff]  }
   0x3   :  { %v7351_v3 = vld [vmem:[%s10282_s1 + $0x38] sm:$0xff]   ;;  %6386 = vmatprep.subr.bf16.mxu1 %v7350_v2  ;;  %v7355_v7 = vld [vmem:[%s10282_s1 + $0x30] sm:$0xff]   ;;  %v7359_v11 = vld [vmem:[%s10282_s1 + $0x28] sm:$0xff]  }
   0x4   :  { %v7352_v4 = vld [vmem:[%s10282_s1 + $0xb8] sm:$0xff]   ;;  %6323 = vmatpush3.bf16.msra.mxu0 %v7351_v3  ;;  %v7356_v8 = vld [vmem:[%s10282_s1 + $0xb0] sm:$0xff]   ;;  %v7360_v12 = vld [vmem:[%s10282_s1 + $0xa8] sm:$0xff]  }
   0x5   :  { %6387 = vmatpush3.bf16.msra.mxu1 %v7352_v4  ;;  %6324 = vmatprep.subr.bf16.mxu0 %v7353_v5  ;;  %v7361_v13 = vld [vmem:[%s10282_s1 + $0x60] sm:$0xff]   ;;  %v7365_v17 = vld [vmem:[%s10282_s1 + $0x58] sm:$0xff]   ;;  %v7369_v21 = vld [vmem:[%s10282_s1 + $0x50] sm:$0xff]  }
   0x6   :  { %6388 = vmatprep.subr.bf16.mxu1 %v7354_v6  ;;  %v7362_v14 = vld [vmem:[%s10282_s1 + $0xe0] sm:$0xff]   ;;  %v7366_v18 = vld [vmem:[%s10282_s1 + $0xd8] sm:$0xff]   ;;  %v7370_v22 = vld [vmem:[%s10282_s1 + $0xd0] sm:$0xff]  }
   0x7   :  { %v7363_v15 = vld [vmem:[%s10282_s1 + $0x20] sm:$0xff]   ;;  %v7367_v19 = vld [vmem:[%s10282_s1 + $0x18] sm:$0xff]   ;;  %v7371_v23 = vld [vmem:[%s10282_s1 + $0x10] sm:$0xff]  }
   0x8   :  { %6325 = vmatpush3.bf16.msra.mxu0 %v7355_v7  ;;  %v7364_v16 = vld [vmem:[%s10282_s1 + $0xa0] sm:$0xff]   ;;  %v7368_v20 = vld [vmem:[%s10282_s1 + $0x98] sm:$0xff]   ;;  %v7372_v24 = vld [vmem:[%s10282_s1 + $0x90] sm:$0xff]  }
   0x9   :  { %6389 = vmatpush3.bf16.msra.mxu1 %v7356_v8  ;;  %6326 = vmatprep.subr.bf16.mxu0 %v7357_v9  ;;  %v7373_v25 = vld [vmem:[%s10282_s1 + $0x48] sm:$0xff]   ;;  %v7377_v29 = vld [vmem:[%s10282_s1 + $0x40] sm:$0xff]   ;;  %v7381_v41 = vld [vmem:[%s10282_s1 + $0x178] sm:$0xff]  }
   0xa   :  { %6390 = vmatprep.subr.bf16.mxu1 %v7358_v10  ;;  %v7374_v26 = vld [vmem:[%s10282_s1 + $0xc8] sm:$0xff]   ;;  %v7378_v30 = vld [vmem:[%s10282_s1 + $0xc0] sm:$0xff]   ;;  %v7382_v42 = vld [vmem:[%s10282_s1 + $0x138] sm:$0xff]  }
   0xb   :  { %v7375_v27 = vld [vmem:[%s10282_s1 + $0x8] sm:$0xff]   ;;  %v7379_v31 = vld [vmem:[%s10282_s1] sm:$0xff]   ;;  %v7383_v43 = vld [vmem:[%s10282_s1 + $0x1f8] sm:$0xff]  }
   0xc   :  { %6327 = vmatpush3.bf16.msra.mxu0 %v7359_v11  ;;  %v7376_v28 = vld [vmem:[%s10282_s1 + $0x88] sm:$0xff]   ;;  %v7380_v32 = vld [vmem:[%s10282_s1 + $0x80] sm:$0xff]   ;;  %v7384_v44 = vld [vmem:[%s10282_s1 + $0x1b8] sm:$0xff]  }
   0xd   :  { %6391 = vmatpush3.bf16.msra.mxu1 %v7360_v12  ;;  %6328 = vmatprep.subr.bf16.mxu0 %v7361_v13  ;;  %v21_v33 = vld [vmem:[%s10283_s0] sm:$0xff]  ;;  %v22_v35 = vld [vmem:[%s10283_s0 + $0x8] sm:$0xff]  ;;  %v7385_v51 = vld [vmem:[%s10282_s1 + $0x170] sm:$0xff]  }
   0xe   :  { %6392 = vmatprep.subr.bf16.mxu1 %v7362_v14  ;;  %v37_v34 = vld [vmem:[%s10283_s0 + $0x80] sm:$0xff]  ;;  %v38_v38 = vld [vmem:[%s10283_s0 + $0x88] sm:$0xff]  ;;  %v7386_v53 = vld [vmem:[%s10282_s1 + $0x130] sm:$0xff]  }
   0xf   :  { %v5810_v36 = vcombine.low %v21_v33, %v37_v34  ;;  %v5811_v37 = vcombine.high %v21_v33, %v37_v34  ;;  %v5812_v39 = vcombine.low %v22_v35, %v38_v38  ;;  %v5813_v40 = vcombine.high %v22_v35, %v38_v38  ;;  %v53_v45 = vld [vmem:[%s10283_s0 + $0x100] sm:$0xff]  ;;  %v54_v48 = vld [vmem:[%s10283_s0 + $0x108] sm:$0xff]  ;;  %v7387_v55 = vld [vmem:[%s10282_s1 + $0x1f0] sm:$0xff]  }
  0x10   :  { %6329 = vmatpush3.bf16.msra.mxu0 %v7363_v15  ;;  %v69_v46 = vld [vmem:[%s10283_s0 + $0x180] sm:$0xff]  ;;  %v70_v49 = vld [vmem:[%s10283_s0 + $0x188] sm:$0xff]  ;;  %v7388_v56 = vld [vmem:[%s10282_s1 + $0x1b0] sm:$0xff]  }
  0x11   :  { %6393 = vmatpush3.bf16.msra.mxu1 %v7364_v16  ;;  %6330 = vmatprep.subr.bf16.mxu0 %v7365_v17  ;;  %v5843_v47 = vcombine.high %v53_v45, %v69_v46  ;;  %v5845_v50 = vcombine.high %v54_v48, %v70_v49  ;;  %v5842_v52 = vcombine.low %v53_v45, %v69_v46  ;;  %v85_v57 = vld [vmem:[%s10283_s0 + $0x200] sm:$0xff]  ;;  %v86_v59 = vld [vmem:[%s10283_s0 + $0x208] sm:$0xff]  ;;  %v7403_v33 = vld [vmem:[%s10282_s1 + $0x1d0] sm:$0xff]  }
  0x12   :  { %6394 = vmatprep.subr.bf16.mxu1 %v7366_v18  ;;  %3733 = vmatprep.mubr.bf16.mxu0 %v5811_v37  ;;  %v5844_v54 = vcombine.low %v54_v48, %v70_v49  ;;  %v101_v58 = vld [vmem:[%s10283_s0 + $0x280] sm:$0xff]  ;;  %v102_v60 = vld [vmem:[%s10283_s0 + $0x288] sm:$0xff]  ;;  %v7404_v34 = vld [vmem:[%s10282_s1 + $0x190] sm:$0xff]  }
  0x13   :  { %3830 = vmatprep.mubr.bf16.mxu1 %v5813_v40  ;;  %v5875_v61 = vcombine.high %v85_v57, %v101_v58  ;;  %v5877_v62 = vcombine.high %v86_v59, %v102_v60  ;;  %v7389_v63 = vld [vmem:[%s10282_s1 + $0x168] sm:$0xff]   ;;  %v5874_v3 = vcombine.low %v85_v57, %v101_v58  ;;  %v117_v4 = vld [vmem:[%s10283_s0 + $0x300] sm:$0xff]  ;;  %v5876_v7 = vcombine.low %v86_v59, %v102_v60  ;;  %v7413_v57 = vld [vmem:[%s10282_s1 + $0x278] sm:$0xff]  }
  0x14   :  { %6331 = vmatpush3.bf16.msra.mxu0 %v7367_v19  ;;  %v7390_v0 = vld [vmem:[%s10282_s1 + $0x128] sm:$0xff]   ;;  %v133_v5 = vld [vmem:[%s10283_s0 + $0x380] sm:$0xff]  ;;  %v7397_v19 = vld [vmem:[%s10282_s1 + $0x158] sm:$0xff]  }
  0x15   :  { %6395 = vmatpush3.bf16.msra.mxu1 %v7368_v20  ;;  %6332 = vmatprep.subr.bf16.mxu0 %v7369_v21  ;;  %v7391_v1 = vld [vmem:[%s10282_s1 + $0x1e8] sm:$0xff]   ;;  %v5907_v8 = vcombine.high %v117_v4, %v133_v5  ;;  %v7393_v11 = vld [vmem:[%s10282_s1 + $0x160] sm:$0xff]   ;;  %v5906_v20 = vcombine.low %v117_v4, %v133_v5  ;;  %v7398_v21 = vld [vmem:[%s10282_s1 + $0x118] sm:$0xff]  }
  0x16   :  { %6396 = vmatprep.subr.bf16.mxu1 %v7370_v22  ;;  %v7392_v2 = vld [vmem:[%s10282_s1 + $0x1a8] sm:$0xff]   ;;  %v7394_v12 = vld [vmem:[%s10282_s1 + $0x120] sm:$0xff]   ;;  %v7415_v59 = vld [vmem:[%s10282_s1 + $0x2f8] sm:$0xff]  }
  0x17   :  { %v118_v6 = vld [vmem:[%s10283_s0 + $0x308] sm:$0xff]  ;;  %v7395_v13 = vld [vmem:[%s10282_s1 + $0x1e0] sm:$0xff]   ;;  %v39_v4 = vld [vmem:[%s10283_s0 + $0x90] sm:$0xff] }
  0x18   :  { %6333 = vmatpush3.bf16.msra.mxu0 %v7371_v23  ;;  %v134_v9 = vld [vmem:[%s10283_s0 + $0x388] sm:$0xff]  ;;  %v7396_v14 = vld [vmem:[%s10282_s1 + $0x1a0] sm:$0xff]   ;;  %v24_v5 = vld [vmem:[%s10283_s0 + $0x18] sm:$0xff] }
  0x19   :  { %6397 = vmatpush3.bf16.msra.mxu1 %v7372_v24  ;;  %6334 = vmatprep.subr.bf16.mxu0 %v7373_v25  ;;  %v5909_v10 = vcombine.high %v118_v6, %v134_v9  ;;  %v149_v15 = vld [vmem:[%s10283_s0 + $0x400] sm:$0xff]  ;;  %v150_v17 = vld [vmem:[%s10283_s0 + $0x408] sm:$0xff]  ;;  %v5908_v22 = vcombine.low %v118_v6, %v134_v9  ;;  %v7399_v24 = vld [vmem:[%s10282_s1 + $0x1d8] sm:$0xff]  }
  0x1a   :  { %6398 = vmatprep.subr.bf16.mxu1 %v7374_v26  ;;  %v165_v16 = vld [vmem:[%s10283_s0 + $0x480] sm:$0xff]  ;;  %v166_v18 = vld [vmem:[%s10283_s0 + $0x488] sm:$0xff]  ;;  %v7400_v26 = vld [vmem:[%s10282_s1 + $0x198] sm:$0xff]  }
  0x1b   :  { %v5939_v23 = vcombine.high %v149_v15, %v165_v16  ;;  %v5941_v25 = vcombine.high %v150_v17, %v166_v18  ;;  %v5938_v35 = vcombine.low %v149_v15, %v165_v16  ;;  %v7406_v40 = vld [vmem:[%s10282_s1 + $0x108] sm:$0xff]   ;;  %v7410_v49 = vld [vmem:[%s10282_s1 + $0x100] sm:$0xff]   ;;  %v40_v6 = vld [vmem:[%s10283_s0 + $0x98] sm:$0xff] }
  0x1c   :  { %6335 = vmatpush3.bf16.msra.mxu0 %v7375_v27  ;;  %v181_v27 = vld [vmem:[%s10283_s0 + $0x500] sm:$0xff]  ;;  %v214_v45 = vld [vmem:[%s10283_s0 + $0x608] sm:$0xff]  ;;  %v56_v16 = vld [vmem:[%s10283_s0 + $0x118] sm:$0xff] }
  0x1d   :  { %6399 = vmatpush3.bf16.msra.mxu1 %v7376_v28  ;;  %6336 = vmatprep.subr.bf16.mxu0 %v7377_v29  ;;  %v197_v28 = vld [vmem:[%s10283_s0 + $0x580] sm:$0xff]  ;;  %v7401_v29 = vld [vmem:[%s10282_s1 + $0x150] sm:$0xff]   ;;  %v230_v46 = vld [vmem:[%s10283_s0 + $0x688] sm:$0xff] }
  0x1e   :  { %6400 = vmatprep.subr.bf16.mxu1 %v7378_v30  ;;  %v182_v30 = vld [vmem:[%s10283_s0 + $0x508] sm:$0xff]  ;;  %v5971_v37 = vcombine.high %v181_v27, %v197_v28  ;;  %v5970_v48 = vcombine.low %v181_v27, %v197_v28  ;;  %v793_v15 = vld [vmem:[%s10284_s2 + $0x20] sm:$0xff]  ;;  %v7419_v27 = vld [vmem:[%s10282_s1 + $0x2f0] sm:$0xff]  }
  0x1f   :  { %v246_v58 = vld [vmem:[%s10283_s0 + $0x708] sm:$0xff]  ;;  %v7420_v28 = vld [vmem:[%s10282_s1 + $0x2b0] sm:$0xff]  }
  0x20   :  { %6337 = vmatpush3.bf16.msra.mxu0 %v7379_v31  ;;  %v198_v31 = vld [vmem:[%s10283_s0 + $0x588] sm:$0xff] }
  0x21   :  { %6401 = vmatpush3.bf16.msra.mxu1 %v7380_v32  ;;  %6450 = vmatprep.subr.bf16.mxu0 %v7381_v41  ;;  %v7402_v32 = vld [vmem:[%s10282_s1 + $0x110] sm:$0xff]   ;;  %v5973_v38 = vcombine.high %v182_v30, %v198_v31  ;;  %v7407_v41 = vld [vmem:[%s10282_s1 + $0x1c8] sm:$0xff]  }
  0x22   :  { %6514 = vmatprep.subr.bf16.mxu1 %v7383_v43  ;;  %v229_v43 = vld [vmem:[%s10283_s0 + $0x680] sm:$0xff]  ;;  %v262_v60 = vld [vmem:[%s10283_s0 + $0x788] sm:$0xff] }
  0x23   :  { %3734 = vmatmul.mubr.bf16.vlgmr.msra.gmra.mxu0 %v5810_v36  ;;  %v5940_v36 = vcombine.low %v150_v17, %v166_v18  ;;  %v6036_v9 = vcombine.low %v246_v58, %v262_v60  ;;  %v72_v18 = vld [vmem:[%s10283_s0 + $0x198] sm:$0xff] }
  0x24   :  { %3831 = vmatmul.mubr.bf16.vlgmr.msra.gmra.mxu1 %v5812_v39  ;;  %6451 = vmatpush3.bf16.msra.mxu0 %v7382_v42  ;;  %v7405_v39 = vld [vmem:[%s10282_s1 + $0x148] sm:$0xff]   ;;  %v213_v42 = vld [vmem:[%s10283_s0 + $0x600] sm:$0xff] }
  0x25   :  { %6515 = vmatpush3.bf16.msra.mxu1 %v7384_v44  ;;  %3741 = vmatprep.mubr.bf16.mxu0 %v5843_v47  ;;  %v7408_v44 = vld [vmem:[%s10282_s1 + $0x188] sm:$0xff]   ;;  %v7409_v47 = vld [vmem:[%s10282_s1 + $0x140] sm:$0xff]  }
  0x26   :  { %3838 = vmatprep.mubr.bf16.mxu1 %v5845_v50  ;;  %6452 = vmatprep.subr.bf16.mxu0 %v7385_v51  ;;  %v5972_v50 = vcombine.low %v182_v30, %v198_v31  ;;  %v6003_v51 = vcombine.high %v213_v42, %v229_v43  ;;  %v103_v30 = vld [vmem:[%s10283_s0 + $0x290] sm:$0xff]  ;;  %v8031_v31 = vld [vmem:[%s10283_s0 + $0x218] sm:$0xff] }
  0x27   :  { %6516 = vmatprep.subr.bf16.mxu1 %v7387_v55  ;;  %v245_v55 = vld [vmem:[%s10283_s0 + $0x700] sm:$0xff] }
  0x28   :  { %6453 = vmatpush3.bf16.msra.mxu0 %v7386_v53  ;;  %v6005_v53 = vcombine.high %v214_v45, %v230_v46 }
  0x29   :  { %6517 = vmatpush3.bf16.msra.mxu1 %v7388_v56  ;;  %6454 = vmatprep.subr.bf16.mxu0 %v7389_v63  ;;  %v261_v56 = vld [vmem:[%s10283_s0 + $0x780] sm:$0xff] }
  0x2a   :  { %6518 = vmatprep.subr.bf16.mxu1 %v7391_v1  ;;  %v6035_v63 = vcombine.high %v245_v55, %v261_v56  ;;  %v789_v1 = vld [vmem:[%s10284_s2] sm:$0xff] }
  0x2b   :  { %3742 = vmatmul.mubr.bf16.gmra.mxu0 %v5842_v52  ;;  %v7411_v52 = vld [vmem:[%s10282_s1 + $0x1c0] sm:$0xff]   ;;  %807 = vperm.xlu0 %7347, %v789_v1   ;;  %v7434_v1 = vld [vmem:[%s10282_s1 + $0x210] sm:$0xff]  }
  0x2c   :  { %3839 = vmatmul.mubr.bf16.gmra.mxu1 %v5844_v54  ;;  %3749 = vmatprep.mubr.bf16.mxu0 %v5875_v61  ;;  %v7412_v54 = vld [vmem:[%s10282_s1 + $0x180] sm:$0xff]   ;;  %v6002_v61 = vcombine.low %v213_v42, %v229_v43  ;;  %v7424_v42 = vld [vmem:[%s10282_s1 + $0x2a8] sm:$0xff]  }
  0x2d   :  { %3846 = vmatprep.mubr.bf16.mxu1 %v5877_v62  ;;  %6455 = vmatpush3.bf16.msra.mxu0 %v7390_v0  ;;  %v6004_v62 = vcombine.low %v214_v45, %v230_v46  ;;  %v6037_v0 = vcombine.high %v246_v58, %v262_v60  ;;  %v797_v43 = vld [vmem:[%s10284_s2 + $0x40] sm:$0xff]  ;;  %v8064_v45 = vld [vmem:[%s10283_s0 + $0x310] sm:$0xff]  ;;  %v7430_v60 = vld [vmem:[%s10282_s1 + $0x218] sm:$0xff]  }
  0x2e   :  { %6519 = vmatpush3.bf16.msra.mxu1 %v7392_v2  ;;  %6456 = vmatprep.subr.bf16.mxu0 %v7393_v11  ;;  %v790_v2 = vld [vmem:[%s10284_s2 + $0x8] sm:$0xff]  ;;  %v5817_v11 = vcombine.high %v24_v5, %v40_v6  ;;  %v135_v46 = vld [vmem:[%s10283_s0 + $0x390] sm:$0xff] }
  0x2f   :  { %6520 = vmatprep.subr.bf16.mxu1 %v7395_v13  ;;  %812 = vperm.xlu0 %7347, %v790_v2   ;;  %v55_v13 = vld [vmem:[%s10283_s0 + $0x110] sm:$0xff]  ;;  %v5911_v58 = vcombine.high %v8064_v45, %v135_v46 }
  0x30   :  { %v7435_v2 = vld [vmem:[%s10282_s1 + $0x2d0] sm:$0xff]  }
  0x31   :  { %6457 = vmatpush3.bf16.msra.mxu0 %v7394_v12  ;;  %v792_v12 = vld [vmem:[%s10284_s2 + $0x18] sm:$0xff] }
  0x32   :  { %6521 = vmatpush3.bf16.msra.mxu1 %v7396_v14  ;;  %6458 = vmatprep.subr.bf16.mxu0 %v7397_v19  ;;  %v71_v14 = vld [vmem:[%s10283_s0 + $0x190] sm:$0xff]  ;;  %v5816_v19 = vcombine.low %v24_v5, %v40_v6  ;;  %v800_v5 = vld [vmem:[%s10284_s2 + $0x58] sm:$0xff] }
  0x33   :  { %3750 = vmatmul.mubr.bf16.gmra.mxu0 %v5874_v3  ;;  %6522 = vmatprep.subr.bf16.mxu1 %v7399_v24  ;;  %v23_v3 = vld [vmem:[%s10283_s0 + $0x10] sm:$0xff] }
  0x34   :  { %3847 = vmatmul.mubr.bf16.gmra.mxu1 %v5876_v7  ;;  %3757 = vmatprep.mubr.bf16.mxu0 %v5907_v8  ;;  %v6034_v7 = vcombine.low %v245_v55, %v261_v56  ;;  %v791_v8 = vld [vmem:[%s10284_s2 + $0x10] sm:$0xff]  ;;  %v5814_v17 = vcombine.low %v23_v3, %v39_v4  ;;  %v7431_v55 = vld [vmem:[%s10282_s1 + $0x2d8] sm:$0xff]  }
  0x35   :  { %3854 = vmatprep.mubr.bf16.mxu1 %v5909_v10  ;;  %6459 = vmatpush3.bf16.msra.mxu0 %v7398_v21  ;;  %v5815_v10 = vcombine.high %v23_v3, %v39_v4  ;;  %v794_v21 = vld [vmem:[%s10284_s2 + $0x28] sm:$0xff]  ;;  %v7417_v24 = vld [vmem:[%s10282_s1 + $0x270] sm:$0xff]   ;;  %v152_v3 = vld [vmem:[%s10283_s0 + $0x418] sm:$0xff] }
  0x36   :  { %6523 = vmatpush3.bf16.msra.mxu1 %v7400_v26  ;;  %6460 = vmatprep.subr.bf16.mxu0 %v7401_v29  ;;  %v7418_v26 = vld [vmem:[%s10282_s1 + $0x230] sm:$0xff]   ;;  %v168_v4 = vld [vmem:[%s10283_s0 + $0x498] sm:$0xff] }
  0x37   :  { %6524 = vmatprep.subr.bf16.mxu1 %v7403_v33  ;;  %817 = vperm.xlu1 %7348, %v791_v8   ;;  %v87_v29 = vld [vmem:[%s10283_s0 + $0x210] sm:$0xff]  ;;  %v7437_v8 = vld [vmem:[%s10282_s1 + $0x248] sm:$0xff]  }
  0x38   :  { %827 = vperm.xlu0 %7347, %v793_v15   ;;  %v795_v33 = vld [vmem:[%s10284_s2 + $0x30] sm:$0xff]  ;;  %v7440_v15 = vld [vmem:[%s10282_s1 + $0x288] sm:$0xff]  }
  0x39   :  { %6461 = vmatpush3.bf16.msra.mxu0 %v7402_v32  ;;  %v104_v32 = vld [vmem:[%s10283_s0 + $0x298] sm:$0xff]  ;;  %v799_v56 = vld [vmem:[%s10284_s2 + $0x50] sm:$0xff] }
  0x3a   :  { %6525 = vmatpush3.bf16.msra.mxu1 %v7404_v34  ;;  %6462 = vmatprep.subr.bf16.mxu0 %v7405_v39  ;;  %v7421_v34 = vld [vmem:[%s10282_s1 + $0x268] sm:$0xff]   ;;  %v5879_v39 = vcombine.high %v87_v29, %v103_v30  ;;  %v7436_v6 = vld [vmem:[%s10282_s1 + $0x290] sm:$0xff]  }
  0x3b   :  { %3758 = vmatmul.mubr.bf16.gmra.mxu0 %v5906_v20  ;;  %6526 = vmatprep.subr.bf16.mxu1 %v7407_v41  ;;  %v7414_v20 = vld [vmem:[%s10282_s1 + $0x238] sm:$0xff]   ;;  %v5881_v41 = vcombine.high %v8031_v31, %v104_v32 }
  0x3c   :  { %3855 = vmatmul.mubr.bf16.gmra.mxu1 %v5908_v22  ;;  %3765 = vmatprep.mubr.bf16.mxu0 %v5939_v23  ;;  %v7416_v22 = vld [vmem:[%s10282_s1 + $0x2b8] sm:$0xff]   ;;  %v5847_v23 = vcombine.high %v55_v13, %v71_v14 }
  0x3d   :  { %3862 = vmatprep.mubr.bf16.mxu1 %v5941_v25  ;;  %6463 = vmatpush3.bf16.msra.mxu0 %v7406_v40  ;;  %v5849_v25 = vcombine.high %v56_v16, %v72_v18  ;;  %v7422_v40 = vld [vmem:[%s10282_s1 + $0x228] sm:$0xff]  }
  0x3e   :  { %6527 = vmatpush3.bf16.msra.mxu1 %v7408_v44  ;;  %6464 = vmatprep.subr.bf16.mxu0 %v7409_v47  ;;  %v7425_v44 = vld [vmem:[%s10282_s1 + $0x260] sm:$0xff]  }
  0x3f   :  { %6528 = vmatprep.subr.bf16.mxu1 %v7411_v52  ;;  %822 = vperm.xlu1 %7348, %v792_v12   ;;  %v7427_v47 = vld [vmem:[%s10282_s1 + $0x2e0] sm:$0xff]  }
  0x40   :  { %837 = vperm.xlu0 %7347, %v795_v33   ;;  %v7428_v52 = vld [vmem:[%s10282_s1 + $0x2a0] sm:$0xff]   ;;  %v215_v33 = vld [vmem:[%s10283_s0 + $0x610] sm:$0xff] }
  0x41   :  { %6465 = vmatpush3.bf16.msra.mxu0 %v7410_v49  ;;  %v798_v49 = vld [vmem:[%s10284_s2 + $0x48] sm:$0xff] }
  0x42   :  { %6529 = vmatpush3.bf16.msra.mxu1 %v7412_v54  ;;  %6578 = vmatprep.subr.bf16.mxu0 %v7413_v57  ;;  %v5878_v54 = vcombine.low %v87_v29, %v103_v30  ;;  %v5880_v57 = vcombine.low %v8031_v31, %v104_v32  ;;  %v5944_v29 = vcombine.low %v152_v3, %v168_v4  ;;  %v804_v32 = vld [vmem:[%s10284_s2 + $0x78] sm:$0xff] }
  0x43   :  { %3766 = vmatmul.mubr.bf16.gmra.mxu0 %v5938_v35  ;;  %6642 = vmatprep.subr.bf16.mxu1 %v7415_v59  ;;  %v7423_v35 = vld [vmem:[%s10282_s1 + $0x2e8] sm:$0xff]  }
  0x44   :  { %3863 = vmatmul.mubr.bf16.gmra.mxu1 %v5940_v36  ;;  %3773 = vmatprep.mubr.bf16.mxu0 %v5971_v37  ;;  %v796_v36 = vld [vmem:[%s10284_s2 + $0x38] sm:$0xff]  ;;  %v5846_v37 = vcombine.low %v55_v13, %v71_v14  ;;  %v5945_v13 = vcombine.high %v152_v3, %v168_v4  ;;  %v7438_v14 = vld [vmem:[%s10282_s1 + $0x208] sm:$0xff]   ;;  %v7450_v4 = vld [vmem:[%s10282_s1 + $0x330] sm:$0xff]  }
  0x45   :  { %3870 = vmatprep.mubr.bf16.mxu1 %v5973_v38  ;;  %832 = vperm.xlu1 %7348, %v794_v21   ;;  %v5848_v38 = vcombine.low %v56_v16, %v72_v18  ;;  %v7441_v16 = vld [vmem:[%s10282_s1 + $0x240] sm:$0xff]   ;;  %v199_v18 = vld [vmem:[%s10283_s0 + $0x590] sm:$0xff]  ;;  %v184_v21 = vld [vmem:[%s10283_s0 + $0x518] sm:$0xff] }
  0x46   :  { %847 = vperm.xlu0 %7347, %v797_v43   ;;  %v248_v43 = vld [vmem:[%s10283_s0 + $0x718] sm:$0xff] }
  0x49   :  { %842 = vperm.xlu1 %7348, %v796_v36   ;;  %v232_v36 = vld [vmem:[%s10283_s0 + $0x698] sm:$0xff] }
  0x4a   :  { %857 = vperm.xlu0 %7347, %v799_v56  }
  0x4b   :  { %3774 = vmatmul.mubr.bf16.gmra.mxu0 %v5970_v48  ;;  %v8075_v48 = vld [vmem:[%s10283_s0 + $0x318] sm:$0xff] }
  0x4c   :  { %3871 = vmatmul.mubr.bf16.gmra.mxu1 %v5972_v50  ;;  %3781 = vmatprep.mubr.bf16.mxu0 %v6003_v51  ;;  %v136_v50 = vld [vmem:[%s10283_s0 + $0x398] sm:$0xff]  ;;  %v7426_v51 = vld [vmem:[%s10282_s1 + $0x220] sm:$0xff]  }
  0x4d   :  { %3878 = vmatprep.mubr.bf16.mxu1 %v6005_v53  ;;  %v7429_v53 = vld [vmem:[%s10282_s1 + $0x258] sm:$0xff]   ;;  %852 = vperm.xlu1 %7348, %v798_v49   ;;  %v5913_v59 = vcombine.high %v8075_v48, %v136_v50  ;;  %v25_v49 = vld [vmem:[%s10283_s0 + $0x20] sm:$0xff] }
  0x51   :  { %862 = vperm.xlu1 %7348, %v800_v5   ;;  %v7451_v5 = vld [vmem:[%s10282_s1 + $0x3f0] sm:$0xff]  }
  0x53   :  { %3782 = vmatmul.mubr.bf16.gmra.mxu0 %v6002_v61  ;;  %v7432_v61 = vld [vmem:[%s10282_s1 + $0x298] sm:$0xff]  }
  0x54   :  { %3879 = vmatmul.mubr.bf16.gmra.mxu1 %v6004_v62  ;;  %3789 = vmatprep.mubr.bf16.mxu0 %v6035_v63  ;;  %v7433_v62 = vld [vmem:[%s10282_s1 + $0x250] sm:$0xff]  }
  0x55   :  { %3886 = vmatprep.mubr.bf16.mxu1 %v6037_v0  ;;  %v151_v63 = vld [vmem:[%s10283_s0 + $0x410] sm:$0xff] }
  0x56   :  { %v167_v0 = vld [vmem:[%s10283_s0 + $0x490] sm:$0xff] }
  0x57   :  { %v5943_v12 = vcombine.high %v151_v63, %v167_v0 }
  0x5b   :  { %3790 = vmatmul.mubr.bf16.gmra.mxu0 %v6034_v7  ;;  %v801_v7 = vld [vmem:[%s10284_s2 + $0x60] sm:$0xff] }
  0x5c   :  { %3887 = vmatmul.mubr.bf16.gmra.mxu1 %v6036_v9  ;;  %3927 = vmatprep.mubr.bf16.mxu0 %v5815_v10  ;;  %v5910_v9 = vcombine.low %v8064_v45, %v135_v46  ;;  %v7439_v10 = vld [vmem:[%s10282_s1 + $0x2c8] sm:$0xff]  }
  0x5d   :  { %4024 = vmatprep.mubr.bf16.mxu1 %v5817_v11  ;;  %v5912_v11 = vcombine.low %v8075_v48, %v136_v50  ;;  %867 = vperm.xlu0 %7347, %v801_v7   ;;  %v41_v50 = vld [vmem:[%s10283_s0 + $0xa0] sm:$0xff] }
  0x5e   :  { %v89_v7 = vld [vmem:[%s10283_s0 + $0x220] sm:$0xff] }
  0x63   :  { %3928 = vmatmul.mubr.bf16.vlgmr.msra.gmra.mxu0 %v5814_v17  ;;  %v183_v17 = vld [vmem:[%s10283_s0 + $0x510] sm:$0xff] }
  0x64   :  { %4025 = vmatmul.mubr.bf16.vlgmr.msra.gmra.mxu1 %v5816_v19  ;;  %6579 = vmatpush3.bf16.msra.mxu0 %v7414_v20  ;;  %v7442_v19 = vld [vmem:[%s10282_s1 + $0x200] sm:$0xff]   ;;  %v5975_v30 = vcombine.high %v183_v17, %v199_v18 }
  0x65   :  { %6643 = vmatpush3.bf16.msra.mxu1 %v7416_v22  ;;  %3935 = vmatprep.mubr.bf16.mxu0 %v5847_v23  ;;  %v7443_v20 = vld [vmem:[%s10282_s1 + $0x2c0] sm:$0xff]   ;;  %v200_v22 = vld [vmem:[%s10283_s0 + $0x598] sm:$0xff]  ;;  %v802_v23 = vld [vmem:[%s10284_s2 + $0x68] sm:$0xff] }
  0x66   :  { %4032 = vmatprep.mubr.bf16.mxu1 %v5849_v25  ;;  %6580 = vmatprep.subr.bf16.mxu0 %v7417_v24  ;;  %v803_v24 = vld [vmem:[%s10284_s2 + $0x70] sm:$0xff]  ;;  %v7444_v25 = vld [vmem:[%s10282_s1 + $0x280] sm:$0xff]   ;;  %v5977_v31 = vcombine.high %v184_v21, %v200_v22 }
  0x67   :  { %6644 = vmatprep.subr.bf16.mxu1 %v7419_v27  ;;  %v5942_v27 = vcombine.low %v151_v63, %v167_v0  ;;  %872 = vperm.xlu1 %7348, %v802_v23   ;;  %v7448_v0 = vld [vmem:[%s10282_s1 + $0x3b8] sm:$0xff]   ;;  %v122_v23 = vld [vmem:[%s10283_s0 + $0x328] sm:$0xff] }
  0x68   :  { %6581 = vmatpush3.bf16.msra.mxu0 %v7418_v26  ;;  %v7445_v26 = vld [vmem:[%s10282_s1 + $0x378] sm:$0xff]   ;;  %877 = vperm.xlu0 %7347, %v803_v24   ;;  %v138_v24 = vld [vmem:[%s10283_s0 + $0x3a8] sm:$0xff] }
  0x69   :  { %6645 = vmatpush3.bf16.msra.mxu1 %v7420_v28  ;;  %6582 = vmatprep.subr.bf16.mxu0 %v7421_v34  ;;  %v7447_v28 = vld [vmem:[%s10282_s1 + $0x3f8] sm:$0xff]   ;;  %v231_v34 = vld [vmem:[%s10283_s0 + $0x690] sm:$0xff] }
  0x6a   :  { %6646 = vmatprep.subr.bf16.mxu1 %v7423_v35  ;;  %v216_v35 = vld [vmem:[%s10283_s0 + $0x618] sm:$0xff]  ;;  %v6006_v45 = vcombine.low %v215_v33, %v231_v34 }
  0x6b   :  { %3936 = vmatmul.mubr.bf16.gmra.mxu0 %v5846_v37  ;;  %882 = vperm.xlu1 %7348, %v804_v32   ;;  %v5974_v37 = vcombine.low %v183_v17, %v199_v18  ;;  %v6008_v46 = vcombine.low %v216_v35, %v232_v36  ;;  %v7454_v17 = vld [vmem:[%s10282_s1 + $0x328] sm:$0xff]   ;;  %v7462_v32 = vld [vmem:[%s10282_s1 + $0x318] sm:$0xff]  }
  0x6c   :  { %4033 = vmatmul.mubr.bf16.gmra.mxu1 %v5848_v38  ;;  %3943 = vmatprep.mubr.bf16.mxu0 %v5879_v39  ;;  %v5976_v38 = vcombine.low %v184_v21, %v200_v22  ;;  %v6007_v39 = vcombine.high %v215_v33, %v231_v34  ;;  %v7456_v18 = vld [vmem:[%s10282_s1 + $0x3a8] sm:$0xff]   ;;  %v137_v21 = vld [vmem:[%s10283_s0 + $0x3a0] sm:$0xff]  ;;  %v5917_v33 = vcombine.high %v122_v23, %v138_v24  ;;  %v7464_v34 = vld [vmem:[%s10282_s1 + $0x398] sm:$0xff]  }
  0x6d   :  { %4040 = vmatprep.mubr.bf16.mxu1 %v5881_v41  ;;  %6583 = vmatpush3.bf16.msra.mxu0 %v7422_v40  ;;  %v6009_v40 = vcombine.high %v216_v35, %v232_v36  ;;  %v247_v41 = vld [vmem:[%s10283_s0 + $0x710] sm:$0xff]  ;;  %v7459_v22 = vld [vmem:[%s10282_s1 + $0x3e0] sm:$0xff]  }
  0x6e   :  { %6647 = vmatpush3.bf16.msra.mxu1 %v7424_v42  ;;  %6584 = vmatprep.subr.bf16.mxu0 %v7425_v44  ;;  %v263_v42 = vld [vmem:[%s10283_s0 + $0x790] sm:$0xff]  ;;  %v264_v44 = vld [vmem:[%s10283_s0 + $0x798] sm:$0xff]  ;;  %v153_v36 = vld [vmem:[%s10283_s0 + $0x420] sm:$0xff] }
  0x6f   :  { %6648 = vmatprep.subr.bf16.mxu1 %v7427_v47  ;;  %v6039_v47 = vcombine.high %v247_v41, %v263_v42  ;;  %v6041_v48 = vcombine.high %v248_v43, %v264_v44  ;;  %v7465_v35 = vld [vmem:[%s10282_s1 + $0x350] sm:$0xff]  }
  0x71   :  { %6585 = vmatpush3.bf16.msra.mxu0 %v7426_v51  ;;  %v26_v51 = vld [vmem:[%s10283_s0 + $0x28] sm:$0xff] }
  0x72   :  { %6649 = vmatpush3.bf16.msra.mxu1 %v7428_v52  ;;  %6586 = vmatprep.subr.bf16.mxu0 %v7429_v53  ;;  %v42_v52 = vld [vmem:[%s10283_s0 + $0xa8] sm:$0xff]  ;;  %v6038_v53 = vcombine.low %v247_v41, %v263_v42  ;;  %v7466_v41 = vld [vmem:[%s10282_s1 + $0x310] sm:$0xff]  }
  0x73   :  { %3944 = vmatmul.mubr.bf16.gmra.mxu0 %v5878_v54  ;;  %6650 = vmatprep.subr.bf16.mxu1 %v7431_v55  ;;  %v6040_v54 = vcombine.low %v248_v43, %v264_v44  ;;  %v5819_v55 = vcombine.high %v25_v49, %v41_v50  ;;  %v5821_v56 = vcombine.high %v26_v51, %v42_v52  ;;  %v7468_v42 = vld [vmem:[%s10282_s1 + $0x390] sm:$0xff]   ;;  %v7469_v43 = vld [vmem:[%s10282_s1 + $0x348] sm:$0xff]  }
  0x74   :  { %4041 = vmatmul.mubr.bf16.gmra.mxu1 %v5880_v57  ;;  %3951 = vmatprep.mubr.bf16.mxu0 %v5911_v58  ;;  %v57_v57 = vld [vmem:[%s10283_s0 + $0x120] sm:$0xff]  ;;  %v5820_v63 = vcombine.low %v26_v51, %v42_v52 }
  0x75   :  { %4048 = vmatprep.mubr.bf16.mxu1 %v5913_v59  ;;  %6587 = vmatpush3.bf16.msra.mxu0 %v7430_v60  ;;  %v73_v58 = vld [vmem:[%s10283_s0 + $0x1a0] sm:$0xff]  ;;  %v5818_v59 = vcombine.low %v25_v49, %v41_v50  ;;  %v7446_v60 = vld [vmem:[%s10282_s1 + $0x338] sm:$0xff]   ;;  %v7470_v49 = vld [vmem:[%s10282_s1 + $0x308] sm:$0xff]  }
  0x76   :  { %6651 = vmatpush3.bf16.msra.mxu1 %v7432_v61  ;;  %6588 = vmatprep.subr.bf16.mxu0 %v7433_v62  ;;  %v58_v61 = vld [vmem:[%s10283_s0 + $0x128] sm:$0xff]  ;;  %v7473_v51 = vld [vmem:[%s10282_s1 + $0x340] sm:$0xff]  }
  0x77   :  { %6652 = vmatprep.subr.bf16.mxu1 %v7435_v2  ;;  %v74_v62 = vld [vmem:[%s10283_s0 + $0x1a8] sm:$0xff]  ;;  %v7449_v2 = vld [vmem:[%s10282_s1 + $0x370] sm:$0xff]   ;;  %v185_v52 = vld [vmem:[%s10283_s0 + $0x520] sm:$0xff] }
  0x78   :  { %v5853_v3 = vcombine.high %v58_v61, %v74_v62  ;;  %v7472_v50 = vld [vmem:[%s10282_s1 + $0x388] sm:$0xff]  }
  0x79   :  { %6589 = vmatpush3.bf16.msra.mxu0 %v7434_v1  ;;  %v5851_v1 = vcombine.high %v57_v57, %v73_v58 }
  0x7a   :  { %6653 = vmatpush3.bf16.msra.mxu1 %v7436_v6  ;;  %6590 = vmatprep.subr.bf16.mxu0 %v7437_v8  ;;  %v7452_v6 = vld [vmem:[%s10282_s1 + $0x3b0] sm:$0xff]   ;;  %v105_v8 = vld [vmem:[%s10283_s0 + $0x2a0] sm:$0xff] }
  0x7b   :  { %3952 = vmatmul.mubr.bf16.gmra.mxu0 %v5910_v9  ;;  %6654 = vmatprep.subr.bf16.mxu1 %v7439_v10  ;;  %v90_v9 = vld [vmem:[%s10283_s0 + $0x228] sm:$0xff] }
  0x7c   :  { %4049 = vmatmul.mubr.bf16.gmra.mxu1 %v5912_v11  ;;  %3959 = vmatprep.mubr.bf16.mxu0 %v5943_v12  ;;  %v106_v10 = vld [vmem:[%s10283_s0 + $0x2a8] sm:$0xff] }
  0x7d   :  { %4056 = vmatprep.mubr.bf16.mxu1 %v5945_v13  ;;  %6591 = vmatpush3.bf16.msra.mxu0 %v7438_v14  ;;  %v7453_v11 = vld [vmem:[%s10282_s1 + $0x368] sm:$0xff]   ;;  %v5850_v13 = vcombine.low %v57_v57, %v73_v58  ;;  %v5852_v14 = vcombine.low %v58_v61, %v74_v62  ;;  %v7474_v57 = vld [vmem:[%s10282_s1 + $0x300] sm:$0xff]   ;;  %v7479_v61 = vld [vmem:[%s10282_s1 + $0x4f8] sm:$0xff]  }
  0x7e   :  { %6655 = vmatpush3.bf16.msra.mxu1 %v7440_v15  ;;  %6592 = vmatprep.subr.bf16.mxu0 %v7441_v16  ;;  %v7455_v12 = vld [vmem:[%s10282_s1 + $0x3e8] sm:$0xff]   ;;  %v5883_v15 = vcombine.high %v89_v7, %v105_v8  ;;  %v5885_v16 = vcombine.high %v90_v9, %v106_v10  ;;  %v7476_v58 = vld [vmem:[%s10282_s1 + $0x380] sm:$0xff]  }
  0x7f   :  { %6656 = vmatprep.subr.bf16.mxu1 %v7443_v20  ;;  %v121_v20 = vld [vmem:[%s10283_s0 + $0x320] sm:$0xff] }
  0x80   :  { %v5914_v44 = vcombine.low %v121_v20, %v137_v21 }
  0x81   :  { %6593 = vmatpush3.bf16.msra.mxu0 %v7442_v19  ;;  %v7457_v19 = vld [vmem:[%s10282_s1 + $0x360] sm:$0xff]  }
  0x82   :  { %6657 = vmatpush3.bf16.msra.mxu1 %v7444_v25  ;;  %6706 = vmatprep.subr.bf16.mxu0 %v7445_v26  ;;  %v7458_v25 = vld [vmem:[%s10282_s1 + $0x320] sm:$0xff]  }
  0x83   :  { %3960 = vmatmul.mubr.bf16.gmra.mxu0 %v5942_v27  ;;  %6770 = vmatprep.subr.bf16.mxu1 %v7447_v28  ;;  %v7460_v26 = vld [vmem:[%s10282_s1 + $0x3a0] sm:$0xff]   ;;  %v7461_v27 = vld [vmem:[%s10282_s1 + $0x358] sm:$0xff]   ;;  %v5882_v28 = vcombine.low %v89_v7, %v105_v8 }
  0x84   :  { %4057 = vmatmul.mubr.bf16.gmra.mxu1 %v5944_v29  ;;  %3967 = vmatprep.mubr.bf16.mxu0 %v5975_v30  ;;  %v7463_v29 = vld [vmem:[%s10282_s1 + $0x3d8] sm:$0xff]   ;;  %v5884_v30 = vcombine.low %v90_v9, %v106_v10  ;;  %v249_v9 = vld [vmem:[%s10283_s0 + $0x720] sm:$0xff] }
  0x85   :  { %4064 = vmatprep.mubr.bf16.mxu1 %v5977_v31  ;;  %v5915_v31 = vcombine.high %v121_v20, %v137_v21  ;;  %v265_v10 = vld [vmem:[%s10283_s0 + $0x7a0] sm:$0xff]  ;;  %v44_v20 = vld [vmem:[%s10283_s0 + $0xb8] sm:$0xff] }
  0x86   :  { %v6042_v21 = vcombine.low %v249_v9, %v265_v10 }
  0x8b   :  { %3968 = vmatmul.mubr.bf16.gmra.mxu0 %v5974_v37  ;;  %v7467_v37 = vld [vmem:[%s10282_s1 + $0x3d0] sm:$0xff]  }
  0x8c   :  { %4065 = vmatmul.mubr.bf16.gmra.mxu1 %v5976_v38  ;;  %3975 = vmatprep.mubr.bf16.mxu0 %v6007_v39  ;;  %v169_v38 = vld [vmem:[%s10283_s0 + $0x4a0] sm:$0xff]  ;;  %v154_v39 = vld [vmem:[%s10283_s0 + $0x428] sm:$0xff] }
  0x8d   :  { %4072 = vmatprep.mubr.bf16.mxu1 %v6009_v40  ;;  %v170_v40 = vld [vmem:[%s10283_s0 + $0x4a8] sm:$0xff] }
  0x8e   :  { %v5948_v62 = vcombine.low %v154_v39, %v170_v40 }
  0x93   :  { %3976 = vmatmul.mubr.bf16.gmra.mxu0 %v6006_v45  ;;  %v7471_v45 = vld [vmem:[%s10282_s1 + $0x3c8] sm:$0xff]  }
  0x94   :  { %4073 = vmatmul.mubr.bf16.gmra.mxu1 %v6008_v46  ;;  %3983 = vmatprep.mubr.bf16.mxu0 %v6039_v47  ;;  %v5916_v46 = vcombine.low %v122_v23, %v138_v24  ;;  %v5947_v47 = vcombine.high %v153_v36, %v169_v38 }
  0x95   :  { %4080 = vmatprep.mubr.bf16.mxu1 %v6041_v48  ;;  %v5949_v48 = vcombine.high %v154_v39, %v170_v40  ;;  %v7484_v40 = vld [vmem:[%s10282_s1 + $0x4b0] sm:$0xff]  }
  0x9b   :  { %3984 = vmatmul.mubr.bf16.gmra.mxu0 %v6038_v53  ;;  %v201_v53 = vld [vmem:[%s10283_s0 + $0x5a0] sm:$0xff] }
  0x9c   :  { %4081 = vmatmul.mubr.bf16.gmra.mxu1 %v6040_v54  ;;  %4121 = vmatprep.mubr.bf16.mxu0 %v5819_v55  ;;  %v7475_v54 = vld [vmem:[%s10282_s1 + $0x3c0] sm:$0xff]   ;;  %v186_v55 = vld [vmem:[%s10283_s0 + $0x528] sm:$0xff] }
  0x9d   :  { %4218 = vmatprep.mubr.bf16.mxu1 %v5821_v56  ;;  %v202_v56 = vld [vmem:[%s10283_s0 + $0x5a8] sm:$0xff] }
  0xa3   :  { %4122 = vmatmul.mubr.bf16.vlgmr.msra.gmra.mxu0 %v5818_v59  ;;  %v7477_v59 = vld [vmem:[%s10282_s1 + $0x478] sm:$0xff]  }
  0xa4   :  { %4219 = vmatmul.mubr.bf16.vlgmr.msra.gmra.mxu1 %v5820_v63  ;;  %6707 = vmatpush3.bf16.msra.mxu0 %v7446_v60  ;;  %v5946_v60 = vcombine.low %v153_v36, %v169_v38  ;;  %v5979_v63 = vcombine.high %v185_v52, %v201_v53  ;;  %v7482_v36 = vld [vmem:[%s10282_s1 + $0x430] sm:$0xff]  }
  0xa5   :  { %6771 = vmatpush3.bf16.msra.mxu1 %v7448_v0  ;;  %4129 = vmatprep.mubr.bf16.mxu0 %v5851_v1  ;;  %v5981_v0 = vcombine.high %v186_v55, %v202_v56  ;;  %v217_v1 = vld [vmem:[%s10283_s0 + $0x620] sm:$0xff] }
  0xa6   :  { %4226 = vmatprep.mubr.bf16.mxu1 %v5853_v3  ;;  %6708 = vmatprep.subr.bf16.mxu0 %v7449_v2  ;;  %v233_v2 = vld [vmem:[%s10283_s0 + $0x6a0] sm:$0xff]  ;;  %v218_v3 = vld [vmem:[%s10283_s0 + $0x628] sm:$0xff]  ;;  %v808_v39 = vpop.permute.xlu0 %807 }
  0xa7   :  { %6772 = vmatprep.subr.bf16.mxu1 %v7451_v5  ;;  %v5978_v5 = vcombine.low %v185_v52, %v201_v53  ;;  %v6011_v7 = vcombine.high %v217_v1, %v233_v2 }
  0xa8   :  { %6709 = vmatpush3.bf16.msra.mxu0 %v7450_v4  ;;  %v234_v4 = vld [vmem:[%s10283_s0 + $0x6a8] sm:$0xff] }
  0xa9   :  { %6773 = vmatpush3.bf16.msra.mxu1 %v7452_v6  ;;  %6710 = vmatprep.subr.bf16.mxu0 %v7453_v11  ;;  %v5980_v6 = vcombine.low %v186_v55, %v202_v56  ;;  %v6013_v8 = vcombine.high %v218_v3, %v234_v4  ;;  %v250_v11 = vld [vmem:[%s10283_s0 + $0x728] sm:$0xff] }
  0xaa   :  { %6774 = vmatprep.subr.bf16.mxu1 %v7455_v12  ;;  %v266_v12 = vld [vmem:[%s10283_s0 + $0x7a8] sm:$0xff] }
  0xab   :  { %4130 = vmatmul.mubr.bf16.gmra.mxu0 %v5850_v13  ;;  %v6010_v13 = vcombine.low %v217_v1, %v233_v2  ;;  %v7488_v1 = vld [vmem:[%s10282_s1 + $0x4a8] sm:$0xff]   ;;  %v7489_v2 = vld [vmem:[%s10282_s1 + $0x460] sm:$0xff]  }
  0xac   :  { %4227 = vmatmul.mubr.bf16.gmra.mxu1 %v5852_v14  ;;  %4137 = vmatprep.mubr.bf16.mxu0 %v5883_v15  ;;  %v6012_v14 = vcombine.low %v218_v3, %v234_v4  ;;  %v6043_v15 = vcombine.high %v249_v9, %v265_v10 }
  0xad   :  { %4234 = vmatprep.mubr.bf16.mxu1 %v5885_v16  ;;  %6711 = vmatpush3.bf16.msra.mxu0 %v7454_v17  ;;  %v6045_v16 = vcombine.high %v250_v11, %v266_v12  ;;  %v27_v17 = vld [vmem:[%s10283_s0 + $0x30] sm:$0xff] }
  0xae   :  { %6775 = vmatpush3.bf16.msra.mxu1 %v7456_v18  ;;  %6712 = vmatprep.subr.bf16.mxu0 %v7457_v19  ;;  %v43_v18 = vld [vmem:[%s10283_s0 + $0xb0] sm:$0xff]  ;;  %v28_v19 = vld [vmem:[%s10283_s0 + $0x38] sm:$0xff] }
  0xaf   :  { %6776 = vmatprep.subr.bf16.mxu1 %v7459_v22  ;;  %v6044_v22 = vcombine.low %v250_v11, %v266_v12  ;;  %v5823_v23 = vcombine.high %v27_v17, %v43_v18  ;;  %v5825_v24 = vcombine.high %v28_v19, %v44_v20  ;;  %v8505_v11 = vld [vmem:[%s10283_s0 + $0x338] sm:$0xff] }
  0xb0   :  { %v8510_v12 = vld [vmem:[%s10283_s0 + $0x3b8] sm:$0xff] }
  0xb1   :  { %6713 = vmatpush3.bf16.msra.mxu0 %v7458_v25  ;;  %v59_v25 = vld [vmem:[%s10283_s0 + $0x130] sm:$0xff] }
  0xb2   :  { %6777 = vmatpush3.bf16.msra.mxu1 %v7460_v26  ;;  %6714 = vmatprep.subr.bf16.mxu0 %v7461_v27  ;;  %v75_v26 = vld [vmem:[%s10283_s0 + $0x1b0] sm:$0xff]  ;;  %v5822_v27 = vcombine.low %v27_v17, %v43_v18 }
  0xb3   :  { %4138 = vmatmul.mubr.bf16.gmra.mxu0 %v5882_v28  ;;  %6778 = vmatprep.subr.bf16.mxu1 %v7463_v29  ;;  %v7478_v28 = vld [vmem:[%s10282_s1 + $0x438] sm:$0xff]   ;;  %v5854_v53 = vcombine.low %v59_v25, %v75_v26 }
  0xb4   :  { %4235 = vmatmul.mubr.bf16.gmra.mxu1 %v5884_v30  ;;  %4145 = vmatprep.mubr.bf16.mxu0 %v5915_v31  ;;  %v60_v29 = vld [vmem:[%s10283_s0 + $0x138] sm:$0xff]  ;;  %v5824_v31 = vcombine.low %v28_v19, %v44_v20 }
  0xb5   :  { %4242 = vmatprep.mubr.bf16.mxu1 %v5917_v33  ;;  %6715 = vmatpush3.bf16.msra.mxu0 %v7462_v32  ;;  %v76_v30 = vld [vmem:[%s10283_s0 + $0x1b8] sm:$0xff]  ;;  %v5855_v33 = vcombine.high %v59_v25, %v75_v26 }
  0xb6   :  { %6779 = vmatpush3.bf16.msra.mxu1 %v7464_v34  ;;  %6716 = vmatprep.subr.bf16.mxu0 %v7465_v35  ;;  %v7480_v32 = vld [vmem:[%s10282_s1 + $0x4b8] sm:$0xff]   ;;  %v7481_v34 = vld [vmem:[%s10282_s1 + $0x470] sm:$0xff]   ;;  %v5857_v35 = vcombine.high %v60_v29, %v76_v30  ;;  %v5856_v56 = vcombine.low %v60_v29, %v76_v30 }
  0xb7   :  { %6780 = vmatprep.subr.bf16.mxu1 %v7467_v37  ;;  %v7483_v37 = vld [vmem:[%s10282_s1 + $0x4f0] sm:$0xff]   ;;  %v7493_v19 = vld [vmem:[%s10282_s1 + $0x458] sm:$0xff]  }
  0xb9   :  { %6717 = vmatpush3.bf16.msra.mxu0 %v7466_v41 }
  0xba   :  { %6781 = vmatpush3.bf16.msra.mxu1 %v7468_v42  ;;  %6718 = vmatprep.subr.bf16.mxu0 %v7469_v43  ;;  %v8451_v42 = vld [vmem:[%s10283_s0 + $0x230] sm:$0xff] }
  0xbb   :  { %4146 = vmatmul.mubr.bf16.gmra.mxu0 %v5914_v44  ;;  %6782 = vmatprep.subr.bf16.mxu1 %v7471_v45  ;;  %v8456_v43 = vld [vmem:[%s10283_s0 + $0x2b0] sm:$0xff]  ;;  %v8461_v44 = vld [vmem:[%s10283_s0 + $0x238] sm:$0xff] }
  0xbc   :  { %4243 = vmatmul.mubr.bf16.gmra.mxu1 %v5916_v46  ;;  %4153 = vmatprep.mubr.bf16.mxu0 %v5947_v47  ;;  %v8466_v46 = vld [vmem:[%s10283_s0 + $0x2b8] sm:$0xff]  ;;  %v7485_v47 = vld [vmem:[%s10282_s1 + $0x468] sm:$0xff]  }
  0xbd   :  { %4250 = vmatprep.mubr.bf16.mxu1 %v5949_v48  ;;  %6719 = vmatpush3.bf16.msra.mxu0 %v7470_v49  ;;  %v5888_v26 = vcombine.low %v8461_v44, %v8466_v46 }
  0xbe   :  { %6783 = vmatpush3.bf16.msra.mxu1 %v7472_v50  ;;  %6720 = vmatprep.subr.bf16.mxu0 %v7473_v51  ;;  %v7487_v50 = vld [vmem:[%s10282_s1 + $0x4e8] sm:$0xff]  }
  0xbf   :  { %6784 = vmatprep.subr.bf16.mxu1 %v7475_v54 }
  0xc1   :  { %6721 = vmatpush3.bf16.msra.mxu0 %v7474_v57  ;;  %v5887_v57 = vcombine.high %v8451_v42, %v8456_v43 }
  0xc2   :  { %6785 = vmatpush3.bf16.msra.mxu1 %v7476_v58  ;;  %6834 = vmatprep.subr.bf16.mxu0 %v7477_v59  ;;  %v813_v59 = vpop.permute.xlu0 %812 }
  0xc3   :  { %4154 = vmatmul.mubr.bf16.gmra.mxu0 %v5946_v60  ;;  %6898 = vmatprep.subr.bf16.mxu1 %v7479_v61  ;;  %v5889_v60 = vcombine.high %v8461_v44, %v8466_v46  ;;  %v7486_v61 = vld [vmem:[%s10282_s1 + $0x428] sm:$0xff]   ;;  %v8561_v44 = vld [vmem:[%s10283_s0 + $0x438] sm:$0xff] }
  0xc4   :  { %4251 = vmatmul.mubr.bf16.gmra.mxu1 %v5948_v62  ;;  %4161 = vmatprep.mubr.bf16.mxu0 %v5979_v63 }
  0xc5   :  { %4258 = vmatprep.mubr.bf16.mxu1 %v5981_v0 }
  0xcb   :  { %4162 = vmatmul.mubr.bf16.gmra.mxu0 %v5978_v5  ;;  %v818_v5 = vpop.permute.xlu1 %817 }
  0xcc   :  { %4259 = vmatmul.mubr.bf16.gmra.mxu1 %v5980_v6  ;;  %4169 = vmatprep.mubr.bf16.mxu0 %v6011_v7  ;;  %v8492_v6 = vld [vmem:[%s10283_s0 + $0x330] sm:$0xff] }
  0xcd   :  { %4266 = vmatprep.mubr.bf16.mxu1 %v6013_v8  ;;  %v8497_v7 = vld [vmem:[%s10283_s0 + $0x3b0] sm:$0xff]  ;;  %v7491_v8 = vld [vmem:[%s10282_s1 + $0x4e0] sm:$0xff]  }
  0xcf   :  { %v823_v30 = vpop.permute.xlu1 %822 }
  0xd3   :  { %4170 = vmatmul.mubr.bf16.gmra.mxu0 %v6010_v13  ;;  %v7490_v13 = vld [vmem:[%s10282_s1 + $0x420] sm:$0xff]  }
  0xd4   :  { %4267 = vmatmul.mubr.bf16.gmra.mxu1 %v6012_v14  ;;  %4177 = vmatprep.mubr.bf16.mxu0 %v6043_v15  ;;  %v7492_v15 = vld [vmem:[%s10282_s1 + $0x4a0] sm:$0xff]  }
  0xd5   :  { %4274 = vmatprep.mubr.bf16.mxu1 %v6045_v16 }
  0xdb   :  { %4178 = vmatmul.mubr.bf16.gmra.mxu0 %v6042_v21 }
  0xdc   :  { %4275 = vmatmul.mubr.bf16.gmra.mxu1 %v6044_v22  ;;  %4315 = vmatprep.mubr.bf16.mxu0 %v5823_v23  ;;  %v5886_v22 = vcombine.low %v8451_v42, %v8456_v43  ;;  %v7495_v23 = vld [vmem:[%s10282_s1 + $0x4d8] sm:$0xff]   ;;  %v8556_v43 = vld [vmem:[%s10283_s0 + $0x4b0] sm:$0xff] }
  0xdd   :  { %4412 = vmatprep.mubr.bf16.mxu1 %v5825_v24 }
  0xe3   :  { %v6338_v38 = vpop.f32.mrf.mxu0  ;;  %4316 = vmatmul.mubr.bf16.vlgmr.msra.gmra.mxu0 %v5822_v27  ;;  %v5919_v27 = vcombine.high %v8492_v6, %v8497_v7 }
  0xe4   :  { %v6402_v41 = vpop.f32.mrf.mxu1  ;;  %4413 = vmatmul.mubr.bf16.vlgmr.msra.gmra.mxu1 %v5824_v31  ;;  %6835 = vmatpush3.bf16.msra.mxu0 %v7478_v28  ;;  %v7494_v28 = vld [vmem:[%s10282_s1 + $0x418] sm:$0xff]   ;;  %v5921_v31 = vcombine.high %v8505_v11, %v8510_v12 }
  0xe5   :  { %v6339_v45 = vpop.f32.mrf.mxu0  ;;  %6899 = vmatpush3.bf16.msra.mxu1 %v7480_v32  ;;  %4323 = vmatprep.mubr.bf16.mxu0 %v5855_v33  ;;  %v7496_v32 = vld [vmem:[%s10282_s1 + $0x498] sm:$0xff]  }
  0xe6   :  { %v6340_v48 = vadd.f32 %v6339_v45, %v6338_v38  ;;  %v6403_v49 = vpop.f32.mrf.mxu1  ;;  %4420 = vmatprep.mubr.bf16.mxu1 %v5857_v35  ;;  %6836 = vmatprep.subr.bf16.mxu0 %v7481_v34  ;;  %v8566_v45 = vld [vmem:[%s10283_s0 + $0x4b8] sm:$0xff] }
  0xe7   :  { %v6404_v51 = vadd.f32 %v6403_v49, %v6402_v41  ;;  %v6341_v52 = vpop.f32.mrf.mxu0  ;;  %6900 = vmatprep.subr.bf16.mxu1 %v7483_v37  ;;  %v7500_v49 = vld [vmem:[%s10282_s1 + $0x490] sm:$0xff]  }
  0xe8   :  { %v3736_v54 = vadd.f32 %v6340_v48, %v808_v39  ;;  %v6405_v55 = vpop.f32.mrf.mxu1  ;;  %6837 = vmatpush3.bf16.msra.mxu0 %v7482_v36  ;;  %v7497_v36 = vld [vmem:[%s10282_s1 + $0x450] sm:$0xff]  }
  0xe9   :  { %v6342_v58 = vpop.f32.mrf.mxu0  ;;  %6901 = vmatpush3.bf16.msra.mxu1 %v7484_v40  ;;  %6838 = vmatprep.subr.bf16.mxu0 %v7485_v47  ;;  %v8548_v39 = vld [vmem:[%s10283_s0 + $0x430] sm:$0xff]  ;;  %v828_v47 = vpop.permute.xlu0 %827 }
  0xea   :  { %v8481_v62 = vadd.f32 %v6404_v51, %v3736_v54  ;;  %v6343_v63 = vadd.f32 %v6342_v58, %v6341_v52  ;;  %v6406_v0 = vpop.f32.mrf.mxu1  ;;  %6902 = vmatprep.subr.bf16.mxu1 %v7487_v50  ;;  %v7499_v40 = vld [vmem:[%s10282_s1 + $0x4d0] sm:$0xff]  }
  0xeb   :  { %v6407_v3 = vadd.f32 %v6406_v0, %v6405_v55  ;;  %v6344_v4 = vpop.f32.mrf.mxu0  ;;  %4324 = vmatmul.mubr.bf16.gmra.mxu0 %v5854_v53  ;;  %v7498_v48 = vld [vmem:[%s10282_s1 + $0x410] sm:$0xff]   ;;  %v7501_v53 = vld [vmem:[%s10282_s1 + $0x448] sm:$0xff]   ;;  %v833_v0 = vpop.permute.xlu1 %832 }
  0xec   :  { %v3739_v9 = vadd.f32 %v6343_v63, %v813_v59  ;;  %v6408_v10 = vpop.f32.mrf.mxu1  ;;  %4421 = vmatmul.mubr.bf16.gmra.mxu1 %v5856_v56  ;;  %4331 = vmatprep.mubr.bf16.mxu0 %v5887_v57  ;;  %v5918_v56 = vcombine.low %v8492_v6, %v8497_v7  ;;  %v7503_v57 = vld [vmem:[%s10282_s1 + $0x4c8] sm:$0xff]   ;;  %v7505_v7 = vld [vmem:[%s10282_s1 + $0x440] sm:$0xff]  }
  0xed   :  { %v6345_v14 = vpop.f32.mrf.mxu0  ;;  %4428 = vmatprep.mubr.bf16.mxu1 %v5889_v60  ;;  %6839 = vmatpush3.bf16.msra.mxu0 %v7486_v61  ;;  %v5920_v60 = vcombine.low %v8505_v11, %v8510_v12  ;;  %v5951_v61 = vcombine.high %v8548_v39, %v8556_v43  ;;  %v7504_v6 = vld [vmem:[%s10282_s1 + $0x488] sm:$0xff]   ;;  %v8609_v11 = vld [vmem:[%s10283_s0 + $0x5b0] sm:$0xff]  ;;  %v7507_v12 = vld [vmem:[%s10282_s1 + $0x4c0] sm:$0xff]  }
  0xee   :  { %v8518_v16 = vadd.f32 %v6407_v3, %v3739_v9  ;;  %v6346_v17 = vadd.f32 %v6345_v14, %v6344_v4  ;;  %v6409_v18 = vpop.f32.mrf.mxu1  ;;  %6903 = vmatpush3.bf16.msra.mxu1 %v7488_v1  ;;  %6840 = vmatprep.subr.bf16.mxu0 %v7489_v2  ;;  %v5953_v1 = vcombine.high %v8561_v44, %v8566_v45  ;;  %v7502_v2 = vld [vmem:[%s10282_s1 + $0x408] sm:$0xff]  }
  0xef   :  { %v6410_v20 = vadd.f32 %v6409_v18, %v6408_v10  ;;  %v6347_v21 = vpop.f32.mrf.mxu0  ;;  %6904 = vmatprep.subr.bf16.mxu1 %v7491_v8  ;;  %v8604_v10 = vld [vmem:[%s10283_s0 + $0x530] sm:$0xff]  ;;  %v7506_v18 = vld [vmem:[%s10282_s1 + $0x400] sm:$0xff]  }
  0xf0   :  { %v3744_v24 = vadd.f32 %v6346_v17, %v818_v5  ;;  %v6411_v25 = vpop.f32.mrf.mxu1  ;;  %v8622_v17 = vld [vmem:[%s10283_s0 + $0x5b8] sm:$0xff] }
  0xf1   :  { %v6348_v29 = vpop.f32.mrf.mxu0  ;;  %6841 = vmatpush3.bf16.msra.mxu0 %v7490_v13 }
  0xf2   :  { %v8540_v33 = vadd.f32 %v6410_v20, %v3744_v24  ;;  %v6349_v34 = vadd.f32 %v6348_v29, %v6347_v21  ;;  %v6412_v35 = vpop.f32.mrf.mxu1  ;;  %6905 = vmatpush3.bf16.msra.mxu1 %v7492_v15  ;;  %6842 = vmatprep.subr.bf16.mxu0 %v7493_v19  ;;  %v8617_v15 = vld [vmem:[%s10283_s0 + $0x538] sm:$0xff]  ;;  %v838_v20 = vpop.permute.xlu0 %837  ;;  %v7508_v21 = vld [vmem:[%s10282_s1 + $0x480] sm:$0xff]  }
  0xf3   :  { %v6413_v37 = vadd.f32 %v6412_v35, %v6411_v25  ;;  %v6350_v38 = vpop.f32.mrf.mxu0  ;;  %4332 = vmatmul.mubr.bf16.gmra.mxu0 %v5886_v22  ;;  %6906 = vmatprep.subr.bf16.mxu1 %v7495_v23  ;;  %v7509_v25 = vld [vmem:[%s10282_s1 + $0x578] sm:$0xff]  }
  0xf4   :  { %v3747_v41 = vadd.f32 %v6349_v34, %v823_v30  ;;  %v6414_v42 = vpop.f32.mrf.mxu1  ;;  %4429 = vmatmul.mubr.bf16.gmra.mxu1 %v5888_v26  ;;  %4339 = vmatprep.mubr.bf16.mxu0 %v5919_v27  ;;  %v7511_v29 = vld [vmem:[%s10282_s1 + $0x5f8] sm:$0xff]   ;;  %v5983_v34 = vcombine.high %v8604_v10, %v8609_v11 }
  0xf5   :  { %v6351_v46 = vpop.f32.mrf.mxu0  ;;  %4436 = vmatprep.mubr.bf16.mxu1 %v5921_v31  ;;  %6843 = vmatpush3.bf16.msra.mxu0 %v7494_v28  ;;  %v5950_v28 = vcombine.low %v8548_v39, %v8556_v43 }
  0xf6   :  { %v8574_v50 = vadd.f32 %v6413_v37, %v3747_v41  ;;  %v6352_v51 = vadd.f32 %v6351_v46, %v6350_v38  ;;  %v6415_v52 = vpop.f32.mrf.mxu1  ;;  %6907 = vmatpush3.bf16.msra.mxu1 %v7496_v32  ;;  %6844 = vmatprep.subr.bf16.mxu0 %v7497_v36  ;;  %v5952_v32 = vcombine.low %v8561_v44, %v8566_v45  ;;  %v843_v36 = vpop.permute.xlu1 %842  ;;  %v219_v45 = vld [vmem:[%s10283_s0 + $0x630] sm:$0xff] }
  0xf7   :  { %v6416_v54 = vadd.f32 %v6415_v52, %v6414_v42  ;;  %v6353_v55 = vpop.f32.mrf.mxu0  ;;  %6908 = vmatprep.subr.bf16.mxu1 %v7499_v40  ;;  %v5985_v37 = vcombine.high %v8617_v15, %v8622_v17 }
  0xf8   :  { %v3752_v58 = vadd.f32 %v6352_v51, %v828_v47  ;;  %v6417_v59 = vpop.f32.mrf.mxu1  ;;  %v848_v47 = vpop.permute.xlu0 %847 }
  0xf9   :  { %v6354_v63 = vpop.f32.mrf.mxu0  ;;  %6845 = vmatpush3.bf16.msra.mxu0 %v7498_v48  ;;  %v235_v48 = vld [vmem:[%s10283_s0 + $0x6b0] sm:$0xff] }
  0xfa   :  { %v8593_v3 = vadd.f32 %v6416_v54, %v3752_v58  ;;  %v6355_v4 = vadd.f32 %v6354_v63, %v6353_v55  ;;  %v6418_v5 = vpop.f32.mrf.mxu1  ;;  %6909 = vmatpush3.bf16.msra.mxu1 %v7500_v49  ;;  %6846 = vmatprep.subr.bf16.mxu0 %v7501_v53  ;;  %v220_v49 = vld [vmem:[%s10283_s0 + $0x638] sm:$0xff] }
  0xfb   :  { %v6419_v8 = vadd.f32 %v6418_v5, %v6417_v59  ;;  %v6356_v9 = vpop.f32.mrf.mxu0  ;;  %4340 = vmatmul.mubr.bf16.gmra.mxu0 %v5918_v56  ;;  %6910 = vmatprep.subr.bf16.mxu1 %v7503_v57  ;;  %v236_v54 = vld [vmem:[%s10283_s0 + $0x6b8] sm:$0xff]  ;;  %v5982_v57 = vcombine.low %v8604_v10, %v8609_v11  ;;  %v267_v11 = vld [vmem:[%s10283_s0 + $0x7b0] sm:$0xff] }
  0xfc   :  { %v3755_v13 = vadd.f32 %v6355_v4, %v833_v0  ;;  %v6420_v14 = vpop.f32.mrf.mxu1  ;;  %4437 = vmatmul.mubr.bf16.gmra.mxu1 %v5920_v60  ;;  %4347 = vmatprep.mubr.bf16.mxu0 %v5951_v61  ;;  %v5984_v60 = vcombine.low %v8617_v15, %v8622_v17  ;;  %v6015_v61 = vcombine.high %v219_v45, %v235_v48  ;;  %v853_v0 = vpop.permute.xlu1 %852 }
  0xfd   :  { %v6357_v19 = vpop.f32.mrf.mxu0  ;;  %4444 = vmatprep.mubr.bf16.mxu1 %v5953_v1  ;;  %6847 = vmatpush3.bf16.msra.mxu0 %v7502_v2  ;;  %v6017_v1 = vcombine.high %v220_v49, %v236_v54 }
  0xfe   :  { %v8630_v22 = vadd.f32 %v6419_v8, %v3755_v13  ;;  %v6358_v23 = vadd.f32 %v6357_v19, %v6356_v9  ;;  %v6421_v24 = vpop.f32.mrf.mxu1  ;;  %6911 = vmatpush3.bf16.msra.mxu1 %v7504_v6  ;;  %6848 = vmatprep.subr.bf16.mxu0 %v7505_v7  ;;  %v251_v8 = vld [vmem:[%s10283_s0 + $0x730] sm:$0xff]  ;;  %v858_v13 = vpop.permute.xlu0 %857  ;;  %v268_v19 = vld [vmem:[%s10283_s0 + $0x7b8] sm:$0xff] }
  0xff   :  { %v6422_v26 = vadd.f32 %v6421_v24, %v6420_v14  ;;  %v6359_v27 = vpop.f32.mrf.mxu0  ;;  %6912 = vmatprep.subr.bf16.mxu1 %v7507_v12  ;;  %v252_v14 = vld [vmem:[%s10283_s0 + $0x738] sm:$0xff] }
 0x100   :  { %v3760_v30 = vadd.f32 %v6358_v23, %v838_v20  ;;  %v6423_v31 = vpop.f32.mrf.mxu1  ;;  %v6014_v23 = vcombine.low %v219_v45, %v235_v48  ;;  %v46_v48 = vld [vmem:[%s10283_s0 + $0xc8] sm:$0xff] }
 0x101   :  { %v6360_v35 = vpop.f32.mrf.mxu0  ;;  %6849 = vmatpush3.bf16.msra.mxu0 %v7506_v18 }
 0x102   :  { %v8646_v38 = vadd.f32 %v6422_v26, %v3760_v30  ;;  %v6361_v39 = vadd.f32 %v6360_v35, %v6359_v27  ;;  %v6424_v40 = vpop.f32.mrf.mxu1  ;;  %6913 = vmatpush3.bf16.msra.mxu1 %v7508_v21  ;;  %6962 = vmatprep.subr.bf16.mxu0 %v7509_v25  ;;  %v6016_v26 = vcombine.low %v220_v49, %v236_v54 }
 0x103   :  { %v6425_v41 = vadd.f32 %v6424_v40, %v6423_v31  ;;  %v6362_v42 = vpop.f32.mrf.mxu0  ;;  %4348 = vmatmul.mubr.bf16.gmra.mxu0 %v5950_v28  ;;  %7026 = vmatprep.subr.bf16.mxu1 %v7511_v29  ;;  %v6047_v27 = vcombine.high %v251_v8, %v267_v11  ;;  %v863_v29 = vpop.permute.xlu1 %862  ;;  %v6049_v30 = vcombine.high %v252_v14, %v268_v19  ;;  %v29_v40 = vld [vmem:[%s10283_s0 + $0x40] sm:$0xff] }
 0x104   :  { %v3763_v43 = vadd.f32 %v6361_v39, %v843_v36  ;;  %v6426_v44 = vpop.f32.mrf.mxu1  ;;  %4445 = vmatmul.mubr.bf16.gmra.mxu1 %v5952_v32  ;;  %4355 = vmatprep.mubr.bf16.mxu0 %v5983_v34 }
 0x105   :  { %v6363_v46 = vpop.f32.mrf.mxu0  ;;  %4452 = vmatprep.mubr.bf16.mxu1 %v5985_v37 }
 0x106   :  { %v8657_v51 = vadd.f32 %v6425_v41, %v3763_v43  ;;  %v6364_v52 = vadd.f32 %v6363_v46, %v6362_v42  ;;  %v6427_v53 = vpop.f32.mrf.mxu1  ;;  %v868_v42 = vpop.permute.xlu0 %867  ;;  %v45_v43 = vld [vmem:[%s10283_s0 + $0xc0] sm:$0xff] }
 0x107   :  { %v6428_v55 = vadd.f32 %v6427_v53, %v6426_v44  ;;  %v6365_v56 = vpop.f32.mrf.mxu0  ;;  %v30_v44 = vld [vmem:[%s10283_s0 + $0x48] sm:$0xff]  ;;  %v6046_v53 = vcombine.low %v251_v8, %v267_v11 }
 0x108   :  { %v3768_v58 = vadd.f32 %v6364_v52, %v848_v47  ;;  %v6429_v59 = vpop.f32.mrf.mxu1 }
 0x109   :  { %v6366_v63 = vpop.f32.mrf.mxu0 }
 0x10a   :  { %v8666_v2 = vadd.f32 %v6428_v55, %v3768_v58  ;;  %v6367_v4 = vadd.f32 %v6366_v63, %v6365_v56  ;;  %v6430_v5 = vpop.f32.mrf.mxu1  ;;  %v6048_v56 = vcombine.low %v252_v14, %v268_v19  ;;  %v878_v8 = vpop.permute.xlu0 %877  ;;  %v7510_v19 = vld [vmem:[%s10282_s1 + $0x538] sm:$0xff]  }
 0x10b   :  { %v6431_v6 = vadd.f32 %v6430_v5, %v6429_v59  ;;  %v6368_v7 = vpop.f32.mrf.mxu0  ;;  %4356 = vmatmul.mubr.bf16.gmra.mxu0 %v5982_v57  ;;  %v5827_v57 = vcombine.high %v29_v40, %v45_v43  ;;  %v873_v59 = vpop.permute.xlu1 %872 }
 0x10c   :  { %v3771_v9 = vadd.f32 %v6367_v4, %v853_v0  ;;  %v6432_v10 = vpop.f32.mrf.mxu1  ;;  %4453 = vmatmul.mubr.bf16.gmra.mxu1 %v5984_v60  ;;  %4363 = vmatprep.mubr.bf16.mxu0 %v6015_v61  ;;  %v5829_v60 = vcombine.high %v30_v44, %v46_v48 }
 0x10d   :  { %v6369_v12 = vpop.f32.mrf.mxu0  ;;  %4460 = vmatprep.mubr.bf16.mxu1 %v6017_v1 }
 0x10e   :  { %v8677_v15 = vadd.f32 %v6431_v6, %v3771_v9  ;;  %v6370_v17 = vadd.f32 %v6369_v12, %v6368_v7  ;;  %v6433_v18 = vpop.f32.mrf.mxu1  ;;  %v8703_v9 = vld [vmem:[%s10283_s0 + $0x140] sm:$0xff] }
 0x10f   :  { %v6434_v20 = vadd.f32 %v6433_v18, %v6432_v10  ;;  %v6371_v21 = vpop.f32.mrf.mxu0  ;;  %v5826_v18 = vcombine.low %v29_v40, %v45_v43 }
 0x110   :  { %v3776_v24 = vadd.f32 %v6370_v17, %v858_v13  ;;  %v6435_v25 = vpop.f32.mrf.mxu1  ;;  %v8710_v13 = vld [vmem:[%s10283_s0 + $0x1c0] sm:$0xff] }
 0x111   :  { %v6372_v28 = vpop.f32.mrf.mxu0 }
 0x112   :  { %v8682_v31 = vadd.f32 %v6434_v20, %v3776_v24  ;;  %v6373_v32 = vadd.f32 %v6372_v28, %v6371_v21  ;;  %v6436_v34 = vpop.f32.mrf.mxu1  ;;  %v8718_v20 = vld [vmem:[%s10283_s0 + $0x148] sm:$0xff]  ;;  %v883_v28 = vpop.permute.xlu1 %882 }
 0x113   :  { %v6437_v35 = vadd.f32 %v6436_v34, %v6435_v25  ;;  %v6374_v36 = vpop.f32.mrf.mxu0  ;;  %4364 = vmatmul.mubr.bf16.gmra.mxu0 %v6014_v23  ;;  %v8723_v21 = vld [vmem:[%s10283_s0 + $0x1c8] sm:$0xff]  ;;  %v5828_v25 = vcombine.low %v30_v44, %v46_v48 }
 0x114   :  { %v3779_v37 = vadd.f32 %v6373_v32, %v863_v29  ;;  %v6438_v39 = vpop.f32.mrf.mxu1  ;;  %4461 = vmatmul.mubr.bf16.gmra.mxu1 %v6016_v26  ;;  %4371 = vmatprep.mubr.bf16.mxu0 %v6047_v27  ;;  %v7512_v26 = vld [vmem:[%s10282_s1 + $0x5b8] sm:$0xff]   ;;  %v5859_v29 = vcombine.high %v8703_v9, %v8710_v13  ;;  %v8759_v48 = vld [vmem:[%s10283_s0 + $0x248] sm:$0xff] }
 0x115   :  { %v6375_v41 = vpop.f32.mrf.mxu0  ;;  %4468 = vmatprep.mubr.bf16.mxu1 %v6049_v30  ;;  %v7513_v30 = vld [vmem:[%s10282_s1 + $0x570] sm:$0xff]  }
 0x116   :  { %v8693_v45 = vadd.f32 %v6437_v35, %v3779_v37  ;;  %v6376_v46 = vadd.f32 %v6375_v41, %v6374_v36  ;;  %v6439_v47 = vpop.f32.mrf.mxu1  ;;  %v5861_v36 = vcombine.high %v8718_v20, %v8723_v21  ;;  %v7514_v37 = vld [vmem:[%s10282_s1 + $0x530] sm:$0xff]  }
 0x117   :  { %v6440_v49 = vadd.f32 %v6439_v47, %v6438_v39  ;;  %v6377_v52 = vpop.f32.mrf.mxu0  ;;  %v7515_v39 = vld [vmem:[%s10282_s1 + $0x5f0] sm:$0xff]   ;;  %v8754_v47 = vld [vmem:[%s10283_s0 + $0x2c0] sm:$0xff] }
 0x118   :  { %v3784_v54 = vadd.f32 %v6376_v46, %v868_v42  ;;  %v6441_v55 = vpop.f32.mrf.mxu1  ;;  %v7516_v42 = vld [vmem:[%s10282_s1 + $0x5b0] sm:$0xff]   ;;  %v8749_v46 = vld [vmem:[%s10283_s0 + $0x240] sm:$0xff] }
 0x119   :  { %v6378_v58 = vpop.f32.mrf.mxu0 }
 0x11a   :  { %v8698_v61 = vadd.f32 %v6440_v49, %v3784_v54  ;;  %v6379_v63 = vadd.f32 %v6378_v58, %v6377_v52  ;;  %v6442_v0 = vpop.f32.mrf.mxu1  ;;  %v8764_v52 = vld [vmem:[%s10283_s0 + $0x2c8] sm:$0xff] }
 0x11b   :  { %v6443_v1 = vadd.f32 %v6442_v0, %v6441_v55  ;;  %v6380_v4 = vpop.f32.mrf.mxu0  ;;  %4372 = vmatmul.mubr.bf16.gmra.mxu0 %v6046_v53  ;;  %v7517_v53 = vld [vmem:[%s10282_s1 + $0x568] sm:$0xff]  }
 0x11c   :  { %v3787_v5 = vadd.f32 %v6379_v63, %v873_v59  ;;  %v6444_v6 = vpop.f32.mrf.mxu1  ;;  %4469 = vmatmul.mubr.bf16.gmra.mxu1 %v6048_v56  ;;  %4509 = vmatprep.mubr.bf16.mxu0 %v5827_v57  ;;  %v7519_v57 = vld [vmem:[%s10282_s1 + $0x5e8] sm:$0xff]  }
 0x11d   :  { %v6381_v7 = vpop.f32.mrf.mxu0  ;;  %4606 = vmatprep.mubr.bf16.mxu1 %v5829_v60  ;;  %v5858_v60 = vcombine.low %v8703_v9, %v8710_v13  ;;  %v7523_v13 = vld [vmem:[%s10282_s1 + $0x5e0] sm:$0xff]  }
 0x11e   :  { %v8705_v10 = vadd.f32 %v6443_v1, %v3787_v5  ;;  %v6382_v11 = vadd.f32 %v6381_v7, %v6380_v4  ;;  %v6445_v12 = vpop.f32.mrf.mxu1  ;;  %v5860_v1 = vcombine.low %v8718_v20, %v8723_v21  ;;  %v5891_v4 = vcombine.high %v8749_v46, %v8754_v47  ;;  %v7518_v7 = vld [vmem:[%s10282_s1 + $0x528] sm:$0xff]   ;;  %v7522_v20 = vld [vmem:[%s10282_s1 + $0x520] sm:$0xff]  }
 0x11f   :  { %v6446_v14 = vadd.f32 %v6445_v12, %v6444_v6  ;;  %v6383_v17 = vpop.f32.mrf.mxu0  ;;  %v5893_v6 = vcombine.high %v8759_v48, %v8764_v52  ;;  %v7521_v12 = vld [vmem:[%s10282_s1 + $0x560] sm:$0xff]  }
 0x120   :  { %v3792_v23 = vadd.f32 %v6382_v11, %v878_v8  ;;  %v6447_v24 = vpop.f32.mrf.mxu1  ;;  %v7520_v11 = vld [vmem:[%s10282_s1 + $0x5a8] sm:$0xff]  }
 0x121   :  { %v6384_v27 = vpop.f32.mrf.mxu0 }
 0x122   :  { %v8733_v32 = vadd.f32 %v6446_v14, %v3792_v23  ;;  %v6385_v34 = vadd.f32 %v6384_v27, %v6383_v17  ;;  %v6448_v35 = vpop.f32.mrf.mxu1 }
 0x123   :  { %v6449_v40 = vadd.f32 %v6448_v35, %v6447_v24  ;;  %v6466_v41 = vpop.f32.mrf.mxu0  ;;  %4510 = vmatmul.mubr.bf16.vlgmr.msra.gmra.mxu0 %v5826_v18  ;;  %v8800_v18 = vld [vmem:[%s10283_s0 + $0x340] sm:$0xff]  ;;  %v8814_v24 = vld [vmem:[%s10283_s0 + $0x348] sm:$0xff] }
 0x124   :  { %v3795_v43 = vadd.f32 %v6385_v34, %v883_v28  ;;  %v6530_v44 = vpop.f32.mrf.mxu1  ;;  %4607 = vmatmul.mubr.bf16.vlgmr.msra.gmra.mxu1 %v5828_v25  ;;  %6963 = vmatpush3.bf16.msra.mxu0 %v7510_v19  ;;  %v8805_v19 = vld [vmem:[%s10283_s0 + $0x3c0] sm:$0xff]  ;;  %v8819_v25 = vld [vmem:[%s10283_s0 + $0x3c8] sm:$0xff]  ;;  %v7527_v34 = vld [vmem:[%s10282_s1 + $0x5d8] sm:$0xff]  }
 0x125   :  { %v6467_v49 = vpop.f32.mrf.mxu0  ;;  %7027 = vmatpush3.bf16.msra.mxu1 %v7512_v26  ;;  %4517 = vmatprep.mubr.bf16.mxu0 %v5859_v29  ;;  %v7524_v26 = vld [vmem:[%s10282_s1 + $0x5a0] sm:$0xff]  }
 0x126   :  { %v8769_v54 = vadd.f32 %v6449_v40, %v3795_v43  ;;  %v6468_v55 = vadd.f32 %v6467_v49, %v6466_v41  ;;  %v6531_v56 = vpop.f32.mrf.mxu1  ;;  %4614 = vmatprep.mubr.bf16.mxu1 %v5861_v36  ;;  %6964 = vmatprep.subr.bf16.mxu0 %v7513_v30  ;;  %v7525_v30 = vld [vmem:[%s10282_s1 + $0x558] sm:$0xff]   ;;  %v5892_v41 = vcombine.low %v8759_v48, %v8764_v52  ;;  %v7529_v52 = vld [vmem:[%s10282_s1 + $0x550] sm:$0xff]  }
 0x127   :  { %v6532_v58 = vadd.f32 %v6531_v56, %v6530_v44  ;;  %v6469_v59 = vpop.f32.mrf.mxu0  ;;  %7028 = vmatprep.subr.bf16.mxu1 %v7515_v39  ;;  %v7526_v43 = vld [vmem:[%s10282_s1 + $0x518] sm:$0xff]   ;;  %v5925_v49 = vcombine.high %v8814_v24, %v8819_v25 }
 0x128   :  { %v3930_v63 = vadd.f32 %v6468_v55, %v8481_v62  ;;  %v6533_v0 = vpop.f32.mrf.mxu1  ;;  %6965 = vmatpush3.bf16.msra.mxu0 %v7514_v37  ;;  %v5890_v37 = vcombine.low %v8749_v46, %v8754_v47 }
 0x129   :  { %v6470_v5 = vpop.f32.mrf.mxu0  ;;  %7029 = vmatpush3.bf16.msra.mxu1 %v7516_v42  ;;  %6966 = vmatprep.subr.bf16.mxu0 %v7517_v53  ;;  %v5923_v42 = vcombine.high %v8800_v18, %v8805_v19  ;;  %v7531_v53 = vld [vmem:[%s10282_s1 + $0x5d0] sm:$0xff]  }
 0x12a   :  { %v8786_v8 = vadd.f32 %v6532_v58, %v3930_v63  ;;  %v6471_v62 = vadd.f32 %v6470_v5, %v6469_v59  ;;  %v6534_v9 = vpop.f32.mrf.mxu1  ;;  %7030 = vmatprep.subr.bf16.mxu1 %v7519_v57  ;;  %v8858_v57 = vld [vmem:[%s10283_s0 + $0x440] sm:$0xff]  ;;  %v7530_v59 = vld [vmem:[%s10282_s1 + $0x510] sm:$0xff]  }
 0x12b   :  { %v6535_v14 = vadd.f32 %v6534_v9, %v6533_v0  ;;  %v6472_v17 = vpop.f32.mrf.mxu0  ;;  %4518 = vmatmul.mubr.bf16.gmra.mxu0 %v5858_v60  ;;  %v8863_v58 = vld [vmem:[%s10283_s0 + $0x4c0] sm:$0xff]  ;;  %v8872_v0 = vld [vmem:[%s10283_s0 + $0x448] sm:$0xff] }
 0x12c   :  { %v3933_v21 = vadd.f32 %v6471_v62, %v8518_v16  ;;  %v6536_v23 = vpop.f32.mrf.mxu1  ;;  %4615 = vmatmul.mubr.bf16.gmra.mxu1 %v5860_v1  ;;  %4525 = vmatprep.mubr.bf16.mxu0 %v5891_v4  ;;  %v8877_v1 = vld [vmem:[%s10283_s0 + $0x4c8] sm:$0xff]  ;;  %v7532_v4 = vld [vmem:[%s10282_s1 + $0x590] sm:$0xff]  }
 0x12d   :  { %v6473_v27 = vpop.f32.mrf.mxu0  ;;  %4622 = vmatprep.mubr.bf16.mxu1 %v5893_v6  ;;  %6967 = vmatpush3.bf16.msra.mxu0 %v7518_v7  ;;  %v7533_v62 = vld [vmem:[%s10282_s1 + $0x548] sm:$0xff]  }
 0x12e   :  { %v8824_v16 = vadd.f32 %v6535_v14, %v3933_v21  ;;  %v6474_v28 = vadd.f32 %v6473_v27, %v6472_v17  ;;  %v6537_v29 = vpop.f32.mrf.mxu1  ;;  %7031 = vmatpush3.bf16.msra.mxu1 %v7520_v11  ;;  %6968 = vmatprep.subr.bf16.mxu0 %v7521_v12  ;;  %v7535_v9 = vld [vmem:[%s10282_s1 + $0x5c8] sm:$0xff]   ;;  %v5955_v21 = vcombine.high %v8858_v57, %v8863_v58 }
 0x12f   :  { %v6538_v35 = vadd.f32 %v6537_v29, %v6536_v23  ;;  %v6475_v36 = vpop.f32.mrf.mxu0  ;;  %7032 = vmatprep.subr.bf16.mxu1 %v7523_v13  ;;  %v5922_v13 = vcombine.low %v8800_v18, %v8805_v19  ;;  %v7534_v23 = vld [vmem:[%s10282_s1 + $0x508] sm:$0xff]   ;;  %v5957_v27 = vcombine.high %v8872_v0, %v8877_v1 }
 0x130   :  { %v3938_v39 = vadd.f32 %v6474_v28, %v8540_v33  ;;  %v6539_v40 = vpop.f32.mrf.mxu1  ;;  %v7528_v33 = vld [vmem:[%s10282_s1 + $0x598] sm:$0xff]   ;;  %v7539_v28 = vld [vmem:[%s10282_s1 + $0x5c0] sm:$0xff]  }
 0x131   :  { %v6476_v44 = vpop.f32.mrf.mxu0  ;;  %6969 = vmatpush3.bf16.msra.mxu0 %v7522_v20  ;;  %v5924_v20 = vcombine.low %v8814_v24, %v8819_v25  ;;  %v7537_v25 = vld [vmem:[%s10282_s1 + $0x540] sm:$0xff]  }
 0x132   :  { %v8847_v46 = vadd.f32 %v6538_v35, %v3938_v39  ;;  %v6477_v47 = vadd.f32 %v6476_v44, %v6475_v36  ;;  %v6540_v48 = vpop.f32.mrf.mxu1  ;;  %7033 = vmatpush3.bf16.msra.mxu1 %v7524_v26  ;;  %6970 = vmatprep.subr.bf16.mxu0 %v7525_v30  ;;  %v8921_v35 = vld [vmem:[%s10283_s0 + $0x5c0] sm:$0xff] }
 0x133   :  { %v6541_v55 = vadd.f32 %v6540_v48, %v6539_v40  ;;  %v6478_v56 = vpop.f32.mrf.mxu0  ;;  %4526 = vmatmul.mubr.bf16.gmra.mxu0 %v5890_v37  ;;  %7034 = vmatprep.subr.bf16.mxu1 %v7527_v34  ;;  %v8916_v34 = vld [vmem:[%s10283_s0 + $0x540] sm:$0xff]  ;;  %v8930_v40 = vld [vmem:[%s10283_s0 + $0x548] sm:$0xff] }
 0x134   :  { %v3941_v60 = vadd.f32 %v6477_v47, %v8574_v50  ;;  %v6542_v63 = vpop.f32.mrf.mxu1  ;;  %4623 = vmatmul.mubr.bf16.gmra.mxu1 %v5892_v41  ;;  %4533 = vmatprep.mubr.bf16.mxu0 %v5923_v42  ;;  %v7538_v36 = vld [vmem:[%s10282_s1 + $0x500] sm:$0xff]   ;;  %v206_v41 = vld [vmem:[%s10283_s0 + $0x5c8] sm:$0xff]  ;;  %v7543_v47 = vld [vmem:[%s10282_s1 + $0x6f8] sm:$0xff]  }
 0x135   :  { %v6479_v5 = vpop.f32.mrf.mxu0  ;;  %4630 = vmatprep.mubr.bf16.mxu1 %v5925_v49  ;;  %6971 = vmatpush3.bf16.msra.mxu0 %v7526_v43  ;;  %v7540_v42 = vld [vmem:[%s10282_s1 + $0x580] sm:$0xff]  }
 0x136   :  { %v8882_v50 = vadd.f32 %v6541_v55, %v3941_v60  ;;  %v6480_v6 = vadd.f32 %v6479_v5, %v6478_v56  ;;  %v6543_v7 = vpop.f32.mrf.mxu1  ;;  %7035 = vmatpush3.bf16.msra.mxu1 %v7528_v33  ;;  %6972 = vmatprep.subr.bf16.mxu0 %v7529_v52  ;;  %v7541_v33 = vld [vmem:[%s10282_s1 + $0x678] sm:$0xff]   ;;  %v5987_v60 = vcombine.high %v8916_v34, %v8921_v35 }
 0x137   :  { %v6544_v11 = vadd.f32 %v6543_v7, %v6542_v63  ;;  %v6481_v12 = vpop.f32.mrf.mxu0  ;;  %7036 = vmatprep.subr.bf16.mxu1 %v7531_v53  ;;  %v5954_v53 = vcombine.low %v8858_v57, %v8863_v58 }
 0x138   :  { %v3946_v14 = vadd.f32 %v6480_v6, %v8593_v3  ;;  %v6545_v17 = vpop.f32.mrf.mxu1  ;;  %v7536_v3 = vld [vmem:[%s10282_s1 + $0x588] sm:$0xff]  }
 0x139   :  { %v6482_v26 = vpop.f32.mrf.mxu0  ;;  %6973 = vmatpush3.bf16.msra.mxu0 %v7530_v59  ;;  %v5956_v59 = vcombine.low %v8872_v0, %v8877_v1 }
 0x13a   :  { %v8905_v18 = vadd.f32 %v6544_v11, %v3946_v14  ;;  %v6483_v19 = vadd.f32 %v6482_v26, %v6481_v12  ;;  %v6546_v24 = vpop.f32.mrf.mxu1  ;;  %7037 = vmatpush3.bf16.msra.mxu1 %v7532_v4  ;;  %6974 = vmatprep.subr.bf16.mxu0 %v7533_v62  ;;  %v5989_v4 = vcombine.high %v8930_v40, %v206_v41  ;;  %v222_v14 = vld [vmem:[%s10283_s0 + $0x648] sm:$0xff] }
 0x13b   :  { %v6547_v29 = vadd.f32 %v6546_v24, %v6545_v17  ;;  %v6484_v30 = vpop.f32.mrf.mxu0  ;;  %4534 = vmatmul.mubr.bf16.gmra.mxu0 %v5922_v13  ;;  %7038 = vmatprep.subr.bf16.mxu1 %v7535_v9  ;;  %v237_v9 = vld [vmem:[%s10283_s0 + $0x6c0] sm:$0xff] }
 0x13c   :  { %v3949_v37 = vadd.f32 %v6483_v19, %v8630_v22  ;;  %v6548_v39 = vpop.f32.mrf.mxu1  ;;  %4631 = vmatmul.mubr.bf16.gmra.mxu1 %v5924_v20  ;;  %4541 = vmatprep.mubr.bf16.mxu0 %v5955_v21  ;;  %v5986_v21 = vcombine.low %v8916_v34, %v8921_v35  ;;  %v269_v35 = vld [vmem:[%s10283_s0 + $0x7c0] sm:$0xff] }
 0x13d   :  { %v6485_v43 = vpop.f32.mrf.mxu0  ;;  %4638 = vmatprep.mubr.bf16.mxu1 %v5957_v27  ;;  %6975 = vmatpush3.bf16.msra.mxu0 %v7534_v23  ;;  %v5988_v27 = vcombine.low %v8930_v40, %v206_v41 }
 0x13e   :  { %v8938_v22 = vadd.f32 %v6547_v29, %v3949_v37  ;;  %v6486_v44 = vadd.f32 %v6485_v43, %v6484_v30  ;;  %v6549_v49 = vpop.f32.mrf.mxu1  ;;  %7039 = vmatpush3.bf16.msra.mxu1 %v7536_v3  ;;  %6976 = vmatprep.subr.bf16.mxu0 %v7537_v25  ;;  %v270_v43 = vld [vmem:[%s10283_s0 + $0x7c8] sm:$0xff] }
 0x13f   :  { %v6550_v48 = vadd.f32 %v6549_v49, %v6548_v39  ;;  %v6487_v52 = vpop.f32.mrf.mxu0  ;;  %7040 = vmatprep.subr.bf16.mxu1 %v7539_v28 }
 0x140   :  { %v3954_v55 = vadd.f32 %v6486_v44, %v8646_v38  ;;  %v6551_v56 = vpop.f32.mrf.mxu1  ;;  %v221_v38 = vld [vmem:[%s10283_s0 + $0x640] sm:$0xff] }
 0x141   :  { %v6488_v63 = vpop.f32.mrf.mxu0  ;;  %6977 = vmatpush3.bf16.msra.mxu0 %v7538_v36  ;;  %v6019_v3 = vcombine.high %v221_v38, %v237_v9 }
 0x142   :  { %v8954_v5 = vadd.f32 %v6550_v48, %v3954_v55  ;;  %v6489_v6 = vadd.f32 %v6488_v63, %v6487_v52  ;;  %v6552_v7 = vpop.f32.mrf.mxu1  ;;  %7041 = vmatpush3.bf16.msra.mxu1 %v7540_v42  ;;  %7090 = vmatprep.subr.bf16.mxu0 %v7541_v33  ;;  %v6018_v33 = vcombine.low %v221_v38, %v237_v9  ;;  %v47_v38 = vld [vmem:[%s10283_s0 + $0xd0] sm:$0xff]  ;;  %v48_v9 = vld [vmem:[%s10283_s0 + $0xd8] sm:$0xff] }
 0x143   :  { %v6553_v57 = vadd.f32 %v6552_v7, %v6551_v56  ;;  %v6490_v58 = vpop.f32.mrf.mxu0  ;;  %4542 = vmatmul.mubr.bf16.gmra.mxu0 %v5954_v53  ;;  %7154 = vmatprep.subr.bf16.mxu1 %v7543_v47 }
 0x144   :  { %v3957_v0 = vadd.f32 %v6489_v6, %v8657_v51  ;;  %v6554_v1 = vpop.f32.mrf.mxu1  ;;  %4639 = vmatmul.mubr.bf16.gmra.mxu1 %v5956_v59  ;;  %4549 = vmatprep.mubr.bf16.mxu0 %v5987_v60  ;;  %v238_v51 = vld [vmem:[%s10283_s0 + $0x6c8] sm:$0xff] }
 0x145   :  { %v6491_v62 = vpop.f32.mrf.mxu0  ;;  %4646 = vmatprep.mubr.bf16.mxu1 %v5989_v4  ;;  %v6021_v24 = vcombine.high %v222_v14, %v238_v51  ;;  %v6020_v52 = vcombine.low %v222_v14, %v238_v51 }
 0x146   :  { %v8963_v11 = vadd.f32 %v6553_v57, %v3957_v0  ;;  %v6492_v12 = vadd.f32 %v6491_v62, %v6490_v58  ;;  %v6555_v13 = vpop.f32.mrf.mxu1 }
 0x147   :  { %v6556_v17 = vadd.f32 %v6555_v13, %v6554_v1  ;;  %v6493_v20 = vpop.f32.mrf.mxu0 }
 0x148   :  { %v3962_v23 = vadd.f32 %v6492_v12, %v8666_v2  ;;  %v6557_v26 = vpop.f32.mrf.mxu1  ;;  %v253_v2 = vld [vmem:[%s10283_s0 + $0x740] sm:$0xff] }
 0x149   :  { %v6494_v19 = vpop.f32.mrf.mxu0  ;;  %v6051_v53 = vcombine.high %v253_v2, %v269_v35  ;;  %v6050_v14 = vcombine.low %v253_v2, %v269_v35  ;;  %v9024_v2 = vld [vmem:[%s10283_s0 + $0x1d0] sm:$0xff] }
 0x14a   :  { %v8975_v25 = vadd.f32 %v6556_v17, %v3962_v23  ;;  %v6495_v28 = vadd.f32 %v6494_v19, %v6493_v20  ;;  %v6558_v29 = vpop.f32.mrf.mxu1 }
 0x14b   :  { %v6559_v30 = vadd.f32 %v6558_v29, %v6557_v26  ;;  %v6496_v36 = vpop.f32.mrf.mxu0  ;;  %4550 = vmatmul.mubr.bf16.gmra.mxu0 %v5986_v21 }
 0x14c   :  { %v3965_v37 = vadd.f32 %v6495_v28, %v8677_v15  ;;  %v6560_v39 = vpop.f32.mrf.mxu1  ;;  %4647 = vmatmul.mubr.bf16.gmra.mxu1 %v5988_v27  ;;  %4557 = vmatprep.mubr.bf16.mxu0 %v6019_v3  ;;  %v254_v15 = vld [vmem:[%s10283_s0 + $0x748] sm:$0xff] }
 0x14d   :  { %v6497_v34 = vpop.f32.mrf.mxu0  ;;  %4654 = vmatprep.mubr.bf16.mxu1 %v6021_v24  ;;  %v6053_v56 = vcombine.high %v254_v15, %v270_v43  ;;  %v6052_v20 = vcombine.low %v254_v15, %v270_v43  ;;  %v9034_v15 = vld [vmem:[%s10283_s0 + $0x1d8] sm:$0xff] }
 0x14e   :  { %v8984_v40 = vadd.f32 %v6559_v30, %v3965_v37  ;;  %v6498_v41 = vadd.f32 %v6497_v34, %v6496_v36  ;;  %v6561_v42 = vpop.f32.mrf.mxu1  ;;  %v9019_v34 = vld [vmem:[%s10283_s0 + $0x150] sm:$0xff] }
 0x14f   :  { %v6562_v44 = vadd.f32 %v6561_v42, %v6560_v39  ;;  %v6499_v49 = vpop.f32.mrf.mxu0  ;;  %v9029_v42 = vld [vmem:[%s10283_s0 + $0x158] sm:$0xff] }
 0x150   :  { %v3970_v47 = vadd.f32 %v6498_v41, %v8682_v31  ;;  %v6563_v48 = vpop.f32.mrf.mxu1  ;;  %v31_v31 = vld [vmem:[%s10283_s0 + $0x50] sm:$0xff] }
 0x151   :  { %v6500_v55 = vpop.f32.mrf.mxu0  ;;  %v5831_v21 = vcombine.high %v31_v31, %v47_v38  ;;  %v5830_v41 = vcombine.low %v31_v31, %v47_v38  ;;  %v7548_v31 = vld [vmem:[%s10282_s1 + $0x6b0] sm:$0xff]  }
 0x152   :  { %v8993_v59 = vadd.f32 %v6562_v44, %v3970_v47  ;;  %v6501_v60 = vadd.f32 %v6500_v55, %v6499_v49  ;;  %v6564_v63 = vpop.f32.mrf.mxu1 }
 0x153   :  { %v6565_v4 = vadd.f32 %v6564_v63, %v6563_v48  ;;  %v6502_v6 = vpop.f32.mrf.mxu0  ;;  %4558 = vmatmul.mubr.bf16.gmra.mxu0 %v6018_v33  ;;  %v7542_v33 = vld [vmem:[%s10282_s1 + $0x638] sm:$0xff]  }
 0x154   :  { %v3973_v7 = vadd.f32 %v6501_v60, %v8693_v45  ;;  %v6566_v57 = vpop.f32.mrf.mxu1  ;;  %4655 = vmatmul.mubr.bf16.gmra.mxu1 %v6020_v52  ;;  %4565 = vmatprep.mubr.bf16.mxu0 %v6051_v53  ;;  %v32_v45 = vld [vmem:[%s10283_s0 + $0x58] sm:$0xff]  ;;  %v5863_v52 = vcombine.high %v9019_v34, %v9024_v2  ;;  %v7545_v60 = vld [vmem:[%s10282_s1 + $0x670] sm:$0xff]  }
 0x155   :  { %v6503_v58 = vpop.f32.mrf.mxu0  ;;  %4662 = vmatprep.mubr.bf16.mxu1 %v6053_v56  ;;  %v5833_v26 = vcombine.high %v32_v45, %v48_v9  ;;  %v5832_v49 = vcombine.low %v32_v45, %v48_v9  ;;  %v7544_v48 = vld [vmem:[%s10282_s1 + $0x6b8] sm:$0xff]  }
 0x156   :  { %v9002_v0 = vadd.f32 %v6565_v4, %v3973_v7  ;;  %v6504_v1 = vadd.f32 %v6503_v58, %v6502_v6  ;;  %v6567_v62 = vpop.f32.mrf.mxu1  ;;  %v7547_v6 = vld [vmem:[%s10282_s1 + $0x6f0] sm:$0xff]  }
 0x157   :  { %v6568_v12 = vadd.f32 %v6567_v62, %v6566_v57  ;;  %v6505_v13 = vpop.f32.mrf.mxu0  ;;  %v7546_v58 = vld [vmem:[%s10282_s1 + $0x630] sm:$0xff]   ;;  %v7549_v62 = vld [vmem:[%s10282_s1 + $0x668] sm:$0xff]  }
 0x158   :  { %v3978_v51 = vadd.f32 %v6504_v1, %v8698_v61  ;;  %v6569_v17 = vpop.f32.mrf.mxu1  ;;  %v9065_v1 = vld [vmem:[%s10283_s0 + $0x250] sm:$0xff] }
 0x159   :  { %v6506_v23 = vpop.f32.mrf.mxu0 }
 0x15a   :  { %v9011_v27 = vadd.f32 %v6568_v12, %v3978_v51  ;;  %v6507_v3 = vadd.f32 %v6506_v23, %v6505_v13  ;;  %v6570_v19 = vpop.f32.mrf.mxu1  ;;  %v9080_v13 = vld [vmem:[%s10283_s0 + $0x258] sm:$0xff]  ;;  %v7551_v51 = vld [vmem:[%s10282_s1 + $0x6e8] sm:$0xff]  }
 0x15b   :  { %v6571_v24 = vadd.f32 %v6570_v19, %v6569_v17  ;;  %v6508_v28 = vpop.f32.mrf.mxu0  ;;  %4566 = vmatmul.mubr.bf16.gmra.mxu0 %v6050_v14  ;;  %v9085_v14 = vld [vmem:[%s10283_s0 + $0x2d8] sm:$0xff] }
 0x15c   :  { %v3981_v29 = vadd.f32 %v6507_v3, %v8705_v10  ;;  %v6572_v30 = vpop.f32.mrf.mxu1  ;;  %4663 = vmatmul.mubr.bf16.gmra.mxu1 %v6052_v20  ;;  %4703 = vmatprep.mubr.bf16.mxu0 %v5831_v21  ;;  %v5862_v21 = vcombine.low %v9019_v34, %v9024_v2  ;;  %v5864_v3 = vcombine.low %v9029_v42, %v9034_v15 }
 0x15d   :  { %v6509_v36 = vpop.f32.mrf.mxu0  ;;  %4800 = vmatprep.mubr.bf16.mxu1 %v5833_v26 }
 0x15e   :  { %v9014_v61 = vadd.f32 %v6571_v24, %v3981_v29  ;;  %v6510_v37 = vadd.f32 %v6509_v36, %v6508_v28  ;;  %v6573_v39 = vpop.f32.mrf.mxu1  ;;  %v5897_v28 = vcombine.high %v9080_v13, %v9085_v14  ;;  %v7550_v29 = vld [vmem:[%s10282_s1 + $0x628] sm:$0xff]  }
 0x15f   :  { %v6574_v10 = vadd.f32 %v6573_v39, %v6572_v30  ;;  %v6511_v35 = vpop.f32.mrf.mxu0  ;;  %v7553_v39 = vld [vmem:[%s10282_s1 + $0x660] sm:$0xff]  }
 0x160   :  { %v3986_v43 = vadd.f32 %v6510_v37, %v8733_v32  ;;  %v6575_v44 = vpop.f32.mrf.mxu1  ;;  %v5865_v32 = vcombine.high %v9029_v42, %v9034_v15  ;;  %v7552_v37 = vld [vmem:[%s10282_s1 + $0x6a8] sm:$0xff]   ;;  %v9117_v42 = vld [vmem:[%s10283_s0 + $0x350] sm:$0xff] }
 0x161   :  { %v6512_v47 = vpop.f32.mrf.mxu0 }
 0x162   :  { %v9045_v53 = vadd.f32 %v6574_v10, %v3986_v43  ;;  %v6513_v55 = vadd.f32 %v6512_v47, %v6511_v35  ;;  %v6576_v56 = vpop.f32.mrf.mxu1  ;;  %v7555_v10 = vld [vmem:[%s10282_s1 + $0x6e0] sm:$0xff]   ;;  %v9122_v43 = vld [vmem:[%s10283_s0 + $0x3d0] sm:$0xff] }
 0x163   :  { %v6577_v63 = vadd.f32 %v6576_v56, %v6575_v44  ;;  %v6594_v4 = vpop.f32.mrf.mxu0  ;;  %4704 = vmatmul.mubr.bf16.vlgmr.msra.gmra.mxu0 %v5830_v41  ;;  %v7554_v44 = vld [vmem:[%s10282_s1 + $0x620] sm:$0xff]  }
 0x164   :  { %v3989_v7 = vadd.f32 %v6513_v55, %v8769_v54  ;;  %v6658_v57 = vpop.f32.mrf.mxu1  ;;  %4801 = vmatmul.mubr.bf16.vlgmr.msra.gmra.mxu1 %v5832_v49  ;;  %7091 = vmatpush3.bf16.msra.mxu0 %v7542_v33  ;;  %v9070_v54 = vld [vmem:[%s10283_s0 + $0x2d0] sm:$0xff]  ;;  %v7557_v55 = vld [vmem:[%s10282_s1 + $0x658] sm:$0xff]  }
 0x165   :  { %v6595_v38 = vpop.f32.mrf.mxu0  ;;  %7155 = vmatpush3.bf16.msra.mxu1 %v7544_v48  ;;  %4711 = vmatprep.mubr.bf16.mxu0 %v5863_v52  ;;  %v5895_v19 = vcombine.high %v9065_v1, %v9070_v54  ;;  %v9137_v48 = vld [vmem:[%s10283_s0 + $0x3d8] sm:$0xff]  ;;  %v7556_v52 = vld [vmem:[%s10282_s1 + $0x6a0] sm:$0xff]  }
 0x166   :  { %v9075_v45 = vadd.f32 %v6577_v63, %v3989_v7  ;;  %v6596_v9 = vadd.f32 %v6595_v38, %v6594_v4  ;;  %v6659_v12 = vpop.f32.mrf.mxu1  ;;  %4808 = vmatprep.mubr.bf16.mxu1 %v5865_v32  ;;  %7092 = vmatprep.subr.bf16.mxu0 %v7545_v60  ;;  %v5894_v60 = vcombine.low %v9065_v1, %v9070_v54  ;;  %v7559_v63 = vld [vmem:[%s10282_s1 + $0x6d8] sm:$0xff]  }
 0x167   :  { %v6660_v17 = vadd.f32 %v6659_v12, %v6658_v57  ;;  %v6597_v20 = vpop.f32.mrf.mxu0  ;;  %7156 = vmatprep.subr.bf16.mxu1 %v7547_v6  ;;  %v5896_v7 = vcombine.low %v9080_v13, %v9085_v14  ;;  %v5927_v57 = vcombine.high %v9117_v42, %v9122_v43  ;;  %v7558_v38 = vld [vmem:[%s10282_s1 + $0x618] sm:$0xff]   ;;  %v7563_v14 = vld [vmem:[%s10282_s1 + $0x6d0] sm:$0xff]  }
 0x168   :  { %v4124_v23 = vadd.f32 %v6596_v9, %v8786_v8  ;;  %v6661_v26 = vpop.f32.mrf.mxu1  ;;  %7093 = vmatpush3.bf16.msra.mxu0 %v7546_v58  ;;  %v7561_v9 = vld [vmem:[%s10282_s1 + $0x650] sm:$0xff]  }
 0x169   :  { %v6598_v24 = vpop.f32.mrf.mxu0  ;;  %7157 = vmatpush3.bf16.msra.mxu1 %v7548_v31  ;;  %7094 = vmatprep.subr.bf16.mxu0 %v7549_v62  ;;  %v7560_v62 = vld [vmem:[%s10282_s1 + $0x698] sm:$0xff]  }
 0x16a   :  { %v9102_v30 = vadd.f32 %v6660_v17, %v4124_v23  ;;  %v6599_v8 = vadd.f32 %v6598_v24, %v6597_v20  ;;  %v6662_v36 = vpop.f32.mrf.mxu1  ;;  %7158 = vmatprep.subr.bf16.mxu1 %v7551_v51  ;;  %v9175_v20 = vld [vmem:[%s10283_s0 + $0x450] sm:$0xff] }
 0x16b   :  { %v6663_v34 = vadd.f32 %v6662_v36, %v6661_v26  ;;  %v6600_v2 = vpop.f32.mrf.mxu0  ;;  %4712 = vmatmul.mubr.bf16.gmra.mxu0 %v5862_v21  ;;  %v9180_v23 = vld [vmem:[%s10283_s0 + $0x4d0] sm:$0xff]  ;;  %v9185_v26 = vld [vmem:[%s10283_s0 + $0x458] sm:$0xff] }
 0x16c   :  { %v4127_v35 = vadd.f32 %v6599_v8, %v8824_v16  ;;  %v6664_v41 = vpop.f32.mrf.mxu1  ;;  %4809 = vmatmul.mubr.bf16.gmra.mxu1 %v5864_v3  ;;  %4719 = vmatprep.mubr.bf16.mxu0 %v5895_v19  ;;  %v9127_v16 = vld [vmem:[%s10283_s0 + $0x358] sm:$0xff]  ;;  %v7565_v8 = vld [vmem:[%s10282_s1 + $0x648] sm:$0xff]  }
 0x16d   :  { %v6601_v15 = vpop.f32.mrf.mxu0  ;;  %4816 = vmatprep.mubr.bf16.mxu1 %v5897_v28  ;;  %7095 = vmatpush3.bf16.msra.mxu0 %v7550_v29  ;;  %v5929_v31 = vcombine.high %v9127_v16, %v9137_v48  ;;  %v9195_v28 = vld [vmem:[%s10283_s0 + $0x4d8] sm:$0xff]  ;;  %v7564_v29 = vld [vmem:[%s10282_s1 + $0x690] sm:$0xff]  }
 0x16e   :  { %v9132_v49 = vadd.f32 %v6663_v34, %v4127_v35  ;;  %v6602_v33 = vadd.f32 %v6601_v15, %v6600_v2  ;;  %v6665_v47 = vpop.f32.mrf.mxu1  ;;  %7159 = vmatpush3.bf16.msra.mxu1 %v7552_v37  ;;  %7096 = vmatprep.subr.bf16.mxu0 %v7553_v39  ;;  %v5926_v39 = vcombine.low %v9117_v42, %v9122_v43  ;;  %v7567_v34 = vld [vmem:[%s10282_s1 + $0x6c8] sm:$0xff]  }
 0x16f   :  { %v6666_v56 = vadd.f32 %v6665_v47, %v6664_v41  ;;  %v6603_v32 = vpop.f32.mrf.mxu0  ;;  %7160 = vmatprep.subr.bf16.mxu1 %v7555_v10  ;;  %v5928_v35 = vcombine.low %v9127_v16, %v9137_v48  ;;  %v5959_v41 = vcombine.high %v9175_v20, %v9180_v23  ;;  %v7566_v42 = vld [vmem:[%s10282_s1 + $0x608] sm:$0xff]   ;;  %v7569_v47 = vld [vmem:[%s10282_s1 + $0x640] sm:$0xff]  }
 0x170   :  { %v4132_v4 = vadd.f32 %v6602_v33, %v8847_v46  ;;  %v6667_v6 = vpop.f32.mrf.mxu1  ;;  %v7568_v16 = vld [vmem:[%s10282_s1 + $0x688] sm:$0xff]  }
 0x171   :  { %v6604_v58 = vpop.f32.mrf.mxu0  ;;  %7097 = vmatpush3.bf16.msra.mxu0 %v7554_v44  ;;  %v5961_v44 = vcombine.high %v9185_v26, %v9195_v28 }
 0x172   :  { %v9160_v1 = vadd.f32 %v6666_v56, %v4132_v4  ;;  %v6605_v54 = vadd.f32 %v6604_v58, %v6603_v32  ;;  %v6668_v46 = vpop.f32.mrf.mxu1  ;;  %7161 = vmatpush3.bf16.msra.mxu1 %v7556_v52  ;;  %7098 = vmatprep.subr.bf16.mxu0 %v7557_v55  ;;  %v7571_v55 = vld [vmem:[%s10282_s1 + $0x6c0] sm:$0xff]   ;;  %v207_v4 = vld [vmem:[%s10283_s0 + $0x5d0] sm:$0xff] }
 0x173   :  { %v6669_v12 = vadd.f32 %v6668_v46, %v6667_v6  ;;  %v6606_v13 = vpop.f32.mrf.mxu0  ;;  %4720 = vmatmul.mubr.bf16.gmra.mxu0 %v5894_v60  ;;  %7162 = vmatprep.subr.bf16.mxu1 %v7559_v63  ;;  %v9233_v60 = vld [vmem:[%s10283_s0 + $0x550] sm:$0xff]  ;;  %v192_v6 = vld [vmem:[%s10283_s0 + $0x558] sm:$0xff] }
 0x174   :  { %v4135_v51 = vadd.f32 %v6605_v54, %v8882_v50  ;;  %v6670_v17 = vpop.f32.mrf.mxu1  ;;  %4817 = vmatmul.mubr.bf16.gmra.mxu1 %v5896_v7  ;;  %4727 = vmatprep.mubr.bf16.mxu0 %v5927_v57  ;;  %v7562_v50 = vld [vmem:[%s10282_s1 + $0x610] sm:$0xff]   ;;  %v7573_v54 = vld [vmem:[%s10282_s1 + $0x778] sm:$0xff]  }
 0x175   :  { %v6607_v21 = vpop.f32.mrf.mxu0  ;;  %4824 = vmatprep.mubr.bf16.mxu1 %v5929_v31  ;;  %7099 = vmatpush3.bf16.msra.mxu0 %v7558_v38  ;;  %v208_v31 = vld [vmem:[%s10283_s0 + $0x5d8] sm:$0xff]  ;;  %v7572_v38 = vld [vmem:[%s10282_s1 + $0x680] sm:$0xff]  }
 0x176   :  { %v9190_v3 = vadd.f32 %v6669_v12, %v4135_v51  ;;  %v6608_v19 = vadd.f32 %v6607_v21, %v6606_v13  ;;  %v6671_v24 = vpop.f32.mrf.mxu1  ;;  %7163 = vmatpush3.bf16.msra.mxu1 %v7560_v62  ;;  %7100 = vmatprep.subr.bf16.mxu0 %v7561_v9  ;;  %v5958_v9 = vcombine.low %v9175_v20, %v9180_v23  ;;  %v7575_v12 = vld [vmem:[%s10282_s1 + $0x7f8] sm:$0xff]  }
 0x177   :  { %v6672_v36 = vadd.f32 %v6671_v24, %v6670_v17  ;;  %v6609_v37 = vpop.f32.mrf.mxu0  ;;  %7164 = vmatprep.subr.bf16.mxu1 %v7563_v14  ;;  %v5960_v51 = vcombine.low %v9185_v26, %v9195_v28  ;;  %v5991_v17 = vcombine.high %v9233_v60, %v207_v4  ;;  %v223_v28 = vld [vmem:[%s10283_s0 + $0x650] sm:$0xff] }
 0x178   :  { %v4140_v2 = vadd.f32 %v6608_v19, %v8905_v18  ;;  %v6673_v10 = vpop.f32.mrf.mxu1 }
 0x179   :  { %v6610_v15 = vpop.f32.mrf.mxu0  ;;  %7101 = vmatpush3.bf16.msra.mxu0 %v7562_v50  ;;  %v5993_v50 = vcombine.high %v192_v6, %v208_v31 }
 0x17a   :  { %v9218_v43 = vadd.f32 %v6672_v36, %v4140_v2  ;;  %v6611_v33 = vadd.f32 %v6610_v15, %v6609_v37  ;;  %v6674_v18 = vpop.f32.mrf.mxu1  ;;  %7165 = vmatpush3.bf16.msra.mxu1 %v7564_v29  ;;  %7102 = vmatprep.subr.bf16.mxu0 %v7565_v8  ;;  %v239_v36 = vld [vmem:[%s10283_s0 + $0x6d0] sm:$0xff]  ;;  %v240_v2 = vld [vmem:[%s10283_s0 + $0x6d8] sm:$0xff] }
 0x17b   :  { %v6675_v48 = vadd.f32 %v6674_v18, %v6673_v10  ;;  %v6612_v52 = vpop.f32.mrf.mxu0  ;;  %4728 = vmatmul.mubr.bf16.gmra.mxu0 %v5926_v39  ;;  %7166 = vmatprep.subr.bf16.mxu1 %v7567_v34 }
 0x17c   :  { %v4143_v56 = vadd.f32 %v6611_v33, %v8938_v22  ;;  %v6676_v32 = vpop.f32.mrf.mxu1  ;;  %4825 = vmatmul.mubr.bf16.gmra.mxu1 %v5928_v35  ;;  %4735 = vmatprep.mubr.bf16.mxu0 %v5959_v41  ;;  %v7570_v22 = vld [vmem:[%s10282_s1 + $0x600] sm:$0xff]   ;;  %v5990_v41 = vcombine.low %v9233_v60, %v207_v4  ;;  %v6023_v33 = vcombine.high %v223_v28, %v239_v36  ;;  %v271_v4 = vld [vmem:[%s10283_s0 + $0x7d0] sm:$0xff] }
 0x17d   :  { %v6613_v63 = vpop.f32.mrf.mxu0  ;;  %4832 = vmatprep.mubr.bf16.mxu1 %v5961_v44  ;;  %7103 = vmatpush3.bf16.msra.mxu0 %v7566_v42  ;;  %v5992_v42 = vcombine.low %v192_v6, %v208_v31 }
 0x17e   :  { %v9244_v7 = vadd.f32 %v6675_v48, %v4143_v56  ;;  %v6614_v57 = vadd.f32 %v6613_v63, %v6612_v52  ;;  %v6677_v58 = vpop.f32.mrf.mxu1  ;;  %7167 = vmatpush3.bf16.msra.mxu1 %v7568_v16  ;;  %7104 = vmatprep.subr.bf16.mxu0 %v7569_v47 }
 0x17f   :  { %v6678_v46 = vadd.f32 %v6677_v58, %v6676_v32  ;;  %v6615_v62 = vpop.f32.mrf.mxu0  ;;  %7168 = vmatprep.subr.bf16.mxu1 %v7571_v55  ;;  %v272_v58 = vld [vmem:[%s10283_s0 + $0x7d8] sm:$0xff] }
 0x180   :  { %v4148_v13 = vadd.f32 %v6614_v57, %v8954_v5  ;;  %v6679_v14 = vpop.f32.mrf.mxu1 }
 0x181   :  { %v6616_v21 = vpop.f32.mrf.mxu0  ;;  %7105 = vmatpush3.bf16.msra.mxu0 %v7570_v22 }
 0x182   :  { %v9264_v19 = vadd.f32 %v6678_v46, %v4148_v13  ;;  %v6617_v24 = vadd.f32 %v6616_v21, %v6615_v62  ;;  %v6680_v20 = vpop.f32.mrf.mxu1  ;;  %7169 = vmatpush3.bf16.msra.mxu1 %v7572_v38  ;;  %7218 = vmatprep.subr.bf16.mxu0 %v7573_v54  ;;  %v6022_v54 = vcombine.low %v223_v28, %v239_v36  ;;  %v50_v36 = vld [vmem:[%s10283_s0 + $0xe8] sm:$0xff] }
 0x183   :  { %v6681_v23 = vadd.f32 %v6680_v20, %v6679_v14  ;;  %v6618_v29 = vpop.f32.mrf.mxu0  ;;  %4736 = vmatmul.mubr.bf16.gmra.mxu0 %v5958_v9  ;;  %7282 = vmatprep.subr.bf16.mxu1 %v7575_v12 }
 0x184   :  { %v4151_v5 = vadd.f32 %v6617_v24, %v8963_v11  ;;  %v6682_v8 = vpop.f32.mrf.mxu1  ;;  %4833 = vmatmul.mubr.bf16.gmra.mxu1 %v5960_v51  ;;  %4743 = vmatprep.mubr.bf16.mxu0 %v5991_v17  ;;  %v224_v11 = vld [vmem:[%s10283_s0 + $0x658] sm:$0xff] }
 0x185   :  { %v6619_v26 = vpop.f32.mrf.mxu0  ;;  %4840 = vmatprep.mubr.bf16.mxu1 %v5993_v50  ;;  %v6025_v16 = vcombine.high %v224_v11, %v240_v2  ;;  %v6024_v9 = vcombine.low %v224_v11, %v240_v2 }
 0x186   :  { %v9273_v37 = vadd.f32 %v6681_v23, %v4151_v5  ;;  %v6620_v39 = vadd.f32 %v6619_v26, %v6618_v29  ;;  %v6683_v34 = vpop.f32.mrf.mxu1  ;;  %v49_v5 = vld [vmem:[%s10283_s0 + $0xe0] sm:$0xff] }
 0x187   :  { %v6684_v10 = vadd.f32 %v6683_v34, %v6682_v8  ;;  %v6621_v35 = vpop.f32.mrf.mxu0 }
 0x188   :  { %v4156_v15 = vadd.f32 %v6620_v39, %v8975_v25  ;;  %v6685_v44 = vpop.f32.mrf.mxu1  ;;  %v255_v25 = vld [vmem:[%s10283_s0 + $0x750] sm:$0xff] }
 0x189   :  { %v6622_v18 = vpop.f32.mrf.mxu0  ;;  %v6055_v12 = vcombine.high %v255_v25, %v271_v4  ;;  %v6054_v11 = vcombine.low %v255_v25, %v271_v4  ;;  %v9332_v25 = vld [vmem:[%s10283_s0 + $0x1e0] sm:$0xff] }
 0x18a   :  { %v9283_v47 = vadd.f32 %v6684_v10, %v4156_v15  ;;  %v6623_v48 = vadd.f32 %v6622_v18, %v6621_v35  ;;  %v6686_v52 = vpop.f32.mrf.mxu1 }
 0x18b   :  { %v6687_v55 = vadd.f32 %v6686_v52, %v6685_v44  ;;  %v6624_v56 = vpop.f32.mrf.mxu0  ;;  %4744 = vmatmul.mubr.bf16.gmra.mxu0 %v5990_v41 }
 0x18c   :  { %v4159_v32 = vadd.f32 %v6623_v48, %v8984_v40  ;;  %v6688_v63 = vpop.f32.mrf.mxu1  ;;  %4841 = vmatmul.mubr.bf16.gmra.mxu1 %v5992_v42  ;;  %4751 = vmatprep.mubr.bf16.mxu0 %v6023_v33  ;;  %v256_v40 = vld [vmem:[%s10283_s0 + $0x758] sm:$0xff] }
 0x18d   :  { %v6625_v60 = vpop.f32.mrf.mxu0  ;;  %4848 = vmatprep.mubr.bf16.mxu1 %v6025_v16  ;;  %v6057_v14 = vcombine.high %v256_v40, %v272_v58  ;;  %v6056_v35 = vcombine.low %v256_v40, %v272_v58  ;;  %v9342_v40 = vld [vmem:[%s10283_s0 + $0x1e8] sm:$0xff] }
 0x18e   :  { %v9292_v6 = vadd.f32 %v6687_v55, %v4159_v32  ;;  %v6626_v22 = vadd.f32 %v6625_v60, %v6624_v56  ;;  %v6689_v57 = vpop.f32.mrf.mxu1  ;;  %v9327_v60 = vld [vmem:[%s10283_s0 + $0x160] sm:$0xff] }
 0x18f   :  { %v6690_v31 = vadd.f32 %v6689_v57, %v6688_v63  ;;  %v6627_v38 = vpop.f32.mrf.mxu0  ;;  %v9337_v57 = vld [vmem:[%s10283_s0 + $0x168] sm:$0xff] }
 0x190   :  { %v4164_v46 = vadd.f32 %v6626_v22, %v8993_v59  ;;  %v6691_v62 = vpop.f32.mrf.mxu1  ;;  %v33_v59 = vld [vmem:[%s10283_s0 + $0x60] sm:$0xff] }
 0x191   :  { %v6628_v13 = vpop.f32.mrf.mxu0  ;;  %v5835_v41 = vcombine.high %v33_v59, %v49_v5  ;;  %v5834_v22 = vcombine.low %v33_v59, %v49_v5  ;;  %v9370_v59 = vld [vmem:[%s10283_s0 + $0x260] sm:$0xff] }
 0x192   :  { %v9301_v51 = vadd.f32 %v6690_v31, %v4164_v46  ;;  %v6629_v17 = vadd.f32 %v6628_v13, %v6627_v38  ;;  %v6692_v21 = vpop.f32.mrf.mxu1 }
 0x193   :  { %v6693_v50 = vadd.f32 %v6692_v21, %v6691_v62  ;;  %v6630_v24 = vpop.f32.mrf.mxu0  ;;  %4752 = vmatmul.mubr.bf16.gmra.mxu0 %v6022_v54  ;;  %v7574_v54 = vld [vmem:[%s10282_s1 + $0x738] sm:$0xff]  }
 0x194   :  { %v4167_v20 = vadd.f32 %v6629_v17, %v9002_v0  ;;  %v6694_v23 = vpop.f32.mrf.mxu1  ;;  %4849 = vmatmul.mubr.bf16.gmra.mxu1 %v6024_v9  ;;  %4759 = vmatprep.mubr.bf16.mxu0 %v6055_v12  ;;  %v34_v0 = vld [vmem:[%s10283_s0 + $0x68] sm:$0xff]  ;;  %v7576_v62 = vld [vmem:[%s10282_s1 + $0x7b8] sm:$0xff]   ;;  %v5867_v9 = vcombine.high %v9327_v60, %v9332_v25  ;;  %v7577_v17 = vld [vmem:[%s10282_s1 + $0x770] sm:$0xff]  }
 0x195   :  { %v6631_v29 = vpop.f32.mrf.mxu0  ;;  %4856 = vmatprep.mubr.bf16.mxu1 %v6057_v14  ;;  %v5837_v44 = vcombine.high %v34_v0, %v50_v36  ;;  %v5836_v38 = vcombine.low %v34_v0, %v50_v36 }
 0x196   :  { %v9310_v8 = vadd.f32 %v6693_v50, %v4167_v20  ;;  %v6632_v26 = vadd.f32 %v6631_v29, %v6630_v24  ;;  %v6695_v28 = vpop.f32.mrf.mxu1  ;;  %v7579_v24 = vld [vmem:[%s10282_s1 + $0x7f0] sm:$0xff]  }
 0x197   :  { %v6696_v39 = vadd.f32 %v6695_v28, %v6694_v23  ;;  %v6633_v34 = vpop.f32.mrf.mxu0  ;;  %v7578_v29 = vld [vmem:[%s10282_s1 + $0x730] sm:$0xff]   ;;  %v7581_v28 = vld [vmem:[%s10282_s1 + $0x768] sm:$0xff]  }
 0x198   :  { %v4172_v2 = vadd.f32 %v6632_v26, %v9011_v27  ;;  %v6697_v10 = vpop.f32.mrf.mxu1  ;;  %v7580_v26 = vld [vmem:[%s10282_s1 + $0x7b0] sm:$0xff]  }
 0x199   :  { %v6634_v15 = vpop.f32.mrf.mxu0 }
 0x19a   :  { %v9319_v42 = vadd.f32 %v6696_v39, %v4172_v2  ;;  %v6635_v33 = vadd.f32 %v6634_v15, %v6633_v34  ;;  %v6698_v18 = vpop.f32.mrf.mxu1  ;;  %v9388_v34 = vld [vmem:[%s10283_s0 + $0x268] sm:$0xff] }
 0x19b   :  { %v6699_v16 = vadd.f32 %v6698_v18, %v6697_v10  ;;  %v6636_v48 = vpop.f32.mrf.mxu0  ;;  %4760 = vmatmul.mubr.bf16.gmra.mxu0 %v6054_v11  ;;  %v9393_v11 = vld [vmem:[%s10283_s0 + $0x2e8] sm:$0xff] }
 0x19c   :  { %v4175_v52 = vadd.f32 %v6635_v33, %v9014_v61  ;;  %v6700_v55 = vpop.f32.mrf.mxu1  ;;  %4857 = vmatmul.mubr.bf16.gmra.mxu1 %v6056_v35  ;;  %4897 = vmatprep.mubr.bf16.mxu0 %v5835_v41  ;;  %v7583_v2 = vld [vmem:[%s10282_s1 + $0x7e8] sm:$0xff]   ;;  %v5866_v41 = vcombine.low %v9327_v60, %v9332_v25  ;;  %v5868_v33 = vcombine.low %v9337_v57, %v9342_v40 }
 0x19d   :  { %v6637_v56 = vpop.f32.mrf.mxu0  ;;  %4994 = vmatprep.mubr.bf16.mxu1 %v5837_v44 }
 0x19e   :  { %v9322_v27 = vadd.f32 %v6699_v16, %v4175_v52  ;;  %v6638_v32 = vadd.f32 %v6637_v56, %v6636_v48  ;;  %v6701_v63 = vpop.f32.mrf.mxu1  ;;  %v5901_v48 = vcombine.high %v9388_v34, %v9393_v11  ;;  %v7582_v52 = vld [vmem:[%s10282_s1 + $0x728] sm:$0xff]  }
 0x19f   :  { %v6702_v61 = vadd.f32 %v6701_v63, %v6700_v55  ;;  %v6639_v4 = vpop.f32.mrf.mxu0  ;;  %v7585_v63 = vld [vmem:[%s10282_s1 + $0x760] sm:$0xff]  }
 0x1a0   :  { %v4180_v58 = vadd.f32 %v6638_v32, %v9045_v53  ;;  %v6703_v31 = vpop.f32.mrf.mxu1  ;;  %v5869_v53 = vcombine.high %v9337_v57, %v9342_v40  ;;  %v7584_v32 = vld [vmem:[%s10282_s1 + $0x7a8] sm:$0xff]   ;;  %v9425_v57 = vld [vmem:[%s10283_s0 + $0x360] sm:$0xff] }
 0x1a1   :  { %v6640_v46 = vpop.f32.mrf.mxu0 }
 0x1a2   :  { %v9353_v12 = vadd.f32 %v6702_v61, %v4180_v58  ;;  %v6641_v13 = vadd.f32 %v6640_v46, %v6639_v4  ;;  %v6704_v14 = vpop.f32.mrf.mxu1  ;;  %v7587_v61 = vld [vmem:[%s10282_s1 + $0x7e0] sm:$0xff]  }
 0x1a3   :  { %v6705_v21 = vadd.f32 %v6704_v14, %v6703_v31  ;;  %v6722_v50 = vpop.f32.mrf.mxu0  ;;  %4898 = vmatmul.mubr.bf16.vlgmr.msra.gmra.mxu0 %v5834_v22  ;;  %v9430_v58 = vld [vmem:[%s10283_s0 + $0x3e0] sm:$0xff] }
 0x1a4   :  { %v4183_v20 = vadd.f32 %v6641_v13, %v9075_v45  ;;  %v6786_v23 = vpop.f32.mrf.mxu1  ;;  %4995 = vmatmul.mubr.bf16.vlgmr.msra.gmra.mxu1 %v5836_v38  ;;  %7219 = vmatpush3.bf16.msra.mxu0 %v7574_v54  ;;  %v9378_v45 = vld [vmem:[%s10283_s0 + $0x2e0] sm:$0xff]  ;;  %v7589_v13 = vld [vmem:[%s10282_s1 + $0x758] sm:$0xff]  }
 0x1a5   :  { %v6723_v5 = vpop.f32.mrf.mxu0  ;;  %7283 = vmatpush3.bf16.msra.mxu1 %v7576_v62  ;;  %4905 = vmatprep.mubr.bf16.mxu0 %v5867_v9  ;;  %v5899_v18 = vcombine.high %v9370_v59, %v9378_v45  ;;  %v7586_v31 = vld [vmem:[%s10282_s1 + $0x720] sm:$0xff]   ;;  %v9445_v62 = vld [vmem:[%s10283_s0 + $0x3e8] sm:$0xff] }
 0x1a6   :  { %v9383_v0 = vadd.f32 %v6705_v21, %v4183_v20  ;;  %v6724_v36 = vadd.f32 %v6723_v5, %v6722_v50  ;;  %v6787_v39 = vpop.f32.mrf.mxu1  ;;  %5002 = vmatprep.mubr.bf16.mxu1 %v5869_v53  ;;  %7220 = vmatprep.subr.bf16.mxu0 %v7577_v17  ;;  %v7588_v9 = vld [vmem:[%s10282_s1 + $0x7a0] sm:$0xff]   ;;  %v5898_v17 = vcombine.low %v9370_v59, %v9378_v45  ;;  %v7591_v21 = vld [vmem:[%s10282_s1 + $0x7d8] sm:$0xff]  }
 0x1a7   :  { %v6788_v10 = vadd.f32 %v6787_v39, %v6786_v23  ;;  %v6725_v35 = vpop.f32.mrf.mxu0  ;;  %7284 = vmatprep.subr.bf16.mxu1 %v7579_v24  ;;  %v5900_v20 = vcombine.low %v9388_v34, %v9393_v11  ;;  %v5931_v23 = vcombine.high %v9425_v57, %v9430_v58  ;;  %v7590_v59 = vld [vmem:[%s10282_s1 + $0x718] sm:$0xff]   ;;  %v7595_v11 = vld [vmem:[%s10282_s1 + $0x7d0] sm:$0xff]  }
 0x1a8   :  { %v4318_v15 = vadd.f32 %v6724_v36, %v9102_v30  ;;  %v6789_v44 = vpop.f32.mrf.mxu1  ;;  %7221 = vmatpush3.bf16.msra.mxu0 %v7578_v29  ;;  %v7593_v36 = vld [vmem:[%s10282_s1 + $0x750] sm:$0xff]  }
 0x1a9   :  { %v6726_v16 = vpop.f32.mrf.mxu0  ;;  %7285 = vmatpush3.bf16.msra.mxu1 %v7580_v26  ;;  %7222 = vmatprep.subr.bf16.mxu0 %v7581_v28  ;;  %v7592_v28 = vld [vmem:[%s10282_s1 + $0x798] sm:$0xff]  }
 0x1aa   :  { %v9410_v55 = vadd.f32 %v6788_v10, %v4318_v15  ;;  %v6727_v30 = vadd.f32 %v6726_v16, %v6725_v35  ;;  %v6790_v56 = vpop.f32.mrf.mxu1  ;;  %7286 = vmatprep.subr.bf16.mxu1 %v7583_v2  ;;  %v9483_v35 = vld [vmem:[%s10283_s0 + $0x460] sm:$0xff] }
 0x1ab   :  { %v6791_v60 = vadd.f32 %v6790_v56, %v6789_v44  ;;  %v6728_v25 = vpop.f32.mrf.mxu0  ;;  %4906 = vmatmul.mubr.bf16.gmra.mxu0 %v5866_v41  ;;  %v9488_v15 = vld [vmem:[%s10283_s0 + $0x4e0] sm:$0xff]  ;;  %v9493_v44 = vld [vmem:[%s10283_s0 + $0x468] sm:$0xff] }
 0x1ac   :  { %v4321_v4 = vadd.f32 %v6727_v30, %v9132_v49  ;;  %v6792_v22 = vpop.f32.mrf.mxu1  ;;  %5003 = vmatmul.mubr.bf16.gmra.mxu1 %v5868_v33  ;;  %4913 = vmatprep.mubr.bf16.mxu0 %v5899_v18  ;;  %v9435_v49 = vld [vmem:[%s10283_s0 + $0x368] sm:$0xff] }
 0x1ad   :  { %v6729_v40 = vpop.f32.mrf.mxu0  ;;  %5010 = vmatprep.mubr.bf16.mxu1 %v5901_v48  ;;  %7223 = vmatpush3.bf16.msra.mxu0 %v7582_v52  ;;  %v5933_v5 = vcombine.high %v9435_v49, %v9445_v62  ;;  %v9503_v48 = vld [vmem:[%s10283_s0 + $0x4e8] sm:$0xff]  ;;  %v7596_v52 = vld [vmem:[%s10282_s1 + $0x790] sm:$0xff]  }
 0x1ae   :  { %v9440_v38 = vadd.f32 %v6791_v60, %v4321_v4  ;;  %v6730_v54 = vadd.f32 %v6729_v40, %v6728_v25  ;;  %v6793_v46 = vpop.f32.mrf.mxu1  ;;  %7287 = vmatpush3.bf16.msra.mxu1 %v7584_v32  ;;  %7224 = vmatprep.subr.bf16.mxu0 %v7585_v63  ;;  %v7597_v30 = vld [vmem:[%s10282_s1 + $0x748] sm:$0xff]   ;;  %v5930_v63 = vcombine.low %v9425_v57, %v9430_v58 }
 0x1af   :  { %v6794_v14 = vadd.f32 %v6793_v46, %v6792_v22  ;;  %v6731_v53 = vpop.f32.mrf.mxu0  ;;  %7288 = vmatprep.subr.bf16.mxu1 %v7587_v61  ;;  %v7599_v60 = vld [vmem:[%s10282_s1 + $0x7c8] sm:$0xff]   ;;  %v5932_v4 = vcombine.low %v9435_v49, %v9445_v62  ;;  %v5963_v22 = vcombine.high %v9483_v35, %v9488_v15  ;;  %v7601_v46 = vld [vmem:[%s10282_s1 + $0x740] sm:$0xff]  }
 0x1b0   :  { %v4326_v50 = vadd.f32 %v6730_v54, %v9160_v1  ;;  %v6795_v24 = vpop.f32.mrf.mxu1  ;;  %v7598_v57 = vld [vmem:[%s10282_s1 + $0x708] sm:$0xff]  }
 0x1b1   :  { %v6732_v29 = vpop.f32.mrf.mxu0  ;;  %7225 = vmatpush3.bf16.msra.mxu0 %v7586_v31  ;;  %v5965_v31 = vcombine.high %v9493_v44, %v9503_v48  ;;  %v7600_v49 = vld [vmem:[%s10282_s1 + $0x788] sm:$0xff]  }
 0x1b2   :  { %v9468_v26 = vadd.f32 %v6794_v14, %v4326_v50  ;;  %v6733_v45 = vadd.f32 %v6732_v29, %v6731_v53  ;;  %v6796_v1 = vpop.f32.mrf.mxu1  ;;  %7289 = vmatpush3.bf16.msra.mxu1 %v7588_v9  ;;  %7226 = vmatprep.subr.bf16.mxu0 %v7589_v13  ;;  %v7603_v13 = vld [vmem:[%s10282_s1 + $0x7c0] sm:$0xff]   ;;  %v194_v29 = vld [vmem:[%s10283_s0 + $0x568] sm:$0xff] }
 0x1b3   :  { %v6797_v39 = vadd.f32 %v6796_v1, %v6795_v24  ;;  %v6734_v34 = vpop.f32.mrf.mxu0  ;;  %4914 = vmatmul.mubr.bf16.gmra.mxu0 %v5898_v17  ;;  %7290 = vmatprep.subr.bf16.mxu1 %v7591_v21  ;;  %v193_v21 = vld [vmem:[%s10283_s0 + $0x560] sm:$0xff] }
 0x1b4   :  { %v4329_v2 = vadd.f32 %v6733_v45, %v9190_v3  ;;  %v6798_v10 = vpop.f32.mrf.mxu1  ;;  %5011 = vmatmul.mubr.bf16.gmra.mxu1 %v5900_v20  ;;  %4921 = vmatprep.mubr.bf16.mxu0 %v5931_v23  ;;  %v7594_v3 = vld [vmem:[%s10282_s1 + $0x710] sm:$0xff]   ;;  %v209_v50 = vld [vmem:[%s10283_s0 + $0x5e0] sm:$0xff] }
 0x1b5   :  { %v6735_v41 = vpop.f32.mrf.mxu0  ;;  %5018 = vmatprep.mubr.bf16.mxu1 %v5933_v5  ;;  %7227 = vmatpush3.bf16.msra.mxu0 %v7590_v59  ;;  %v7602_v24 = vld [vmem:[%s10282_s1 + $0x700] sm:$0xff]   ;;  %v210_v5 = vld [vmem:[%s10283_s0 + $0x5e8] sm:$0xff] }
 0x1b6   :  { %v9498_v33 = vadd.f32 %v6797_v39, %v4329_v2  ;;  %v6736_v18 = vadd.f32 %v6735_v41, %v6734_v34  ;;  %v6799_v16 = vpop.f32.mrf.mxu1  ;;  %7291 = vmatpush3.bf16.msra.mxu1 %v7592_v28  ;;  %7228 = vmatprep.subr.bf16.mxu0 %v7593_v36  ;;  %v7604_v59 = vld [vmem:[%s10282_s1 + $0x780] sm:$0xff]   ;;  %v5962_v28 = vcombine.low %v9483_v35, %v9488_v15 }
 0x1b7   :  { %v6800_v56 = vadd.f32 %v6799_v16, %v6798_v10  ;;  %v6737_v32 = vpop.f32.mrf.mxu0  ;;  %7292 = vmatprep.subr.bf16.mxu1 %v7595_v11  ;;  %v5964_v34 = vcombine.low %v9493_v44, %v9503_v48  ;;  %v5995_v11 = vcombine.high %v193_v21, %v209_v50  ;;  %v5997_v10 = vcombine.high %v194_v29, %v210_v5  ;;  %v225_v44 = vld [vmem:[%s10283_s0 + $0x660] sm:$0xff] }
 0x1b8   :  { %v4334_v25 = vadd.f32 %v6736_v18, %v9218_v43  ;;  %v6801_v61 = vpop.f32.mrf.mxu1  ;;  %v241_v48 = vld [vmem:[%s10283_s0 + $0x6e0] sm:$0xff] }
 0x1b9   :  { %v6738_v40 = vpop.f32.mrf.mxu0  ;;  %7229 = vmatpush3.bf16.msra.mxu0 %v7594_v3 }
 0x1ba   :  { %v9526_v58 = vadd.f32 %v6800_v56, %v4334_v25  ;;  %v6739_v54 = vadd.f32 %v6738_v40, %v6737_v32  ;;  %v6802_v43 = vpop.f32.mrf.mxu1  ;;  %7293 = vmatpush3.bf16.msra.mxu1 %v7596_v52  ;;  %7230 = vmatprep.subr.bf16.mxu0 %v7597_v30  ;;  %v5996_v40 = vcombine.low %v194_v29, %v210_v5 }
 0x1bb   :  { %v6803_v62 = vadd.f32 %v6802_v43, %v6801_v61  ;;  %v6740_v9 = vpop.f32.mrf.mxu0  ;;  %4922 = vmatmul.mubr.bf16.gmra.mxu0 %v5930_v63  ;;  %7294 = vmatprep.subr.bf16.mxu1 %v7599_v60  ;;  %v242_v63 = vld [vmem:[%s10283_s0 + $0x6e8] sm:$0xff]  ;;  %v5994_v61 = vcombine.low %v193_v21, %v209_v50  ;;  %v6026_v5 = vcombine.low %v225_v44, %v241_v48 }
 0x1bc   :  { %v4337_v14 = vadd.f32 %v6739_v54, %v9244_v7  ;;  %v6804_v53 = vpop.f32.mrf.mxu1  ;;  %5019 = vmatmul.mubr.bf16.gmra.mxu1 %v5932_v4  ;;  %4929 = vmatprep.mubr.bf16.mxu0 %v5963_v22 }
 0x1bd   :  { %v6741_v17 = vpop.f32.mrf.mxu0  ;;  %5026 = vmatprep.mubr.bf16.mxu1 %v5965_v31  ;;  %7231 = vmatpush3.bf16.msra.mxu0 %v7598_v57  ;;  %v6027_v31 = vcombine.high %v225_v44, %v241_v48  ;;  %v52_v48 = vld [vmem:[%s10283_s0 + $0xf8] sm:$0xff] }
 0x1be   :  { %v9547_v20 = vadd.f32 %v6803_v62, %v4337_v14  ;;  %v6742_v7 = vadd.f32 %v6741_v17, %v6740_v9  ;;  %v6805_v23 = vpop.f32.mrf.mxu1  ;;  %7295 = vmatpush3.bf16.msra.mxu1 %v7600_v49  ;;  %7232 = vmatprep.subr.bf16.mxu0 %v7601_v46  ;;  %v273_v17 = vld [vmem:[%s10283_s0 + $0x7e0] sm:$0xff] }
 0x1bf   :  { %v6806_v45 = vadd.f32 %v6805_v23, %v6804_v53  ;;  %v6743_v1 = vpop.f32.mrf.mxu0  ;;  %7296 = vmatprep.subr.bf16.mxu1 %v7603_v13 }
 0x1c0   :  { %v4342_v36 = vadd.f32 %v6742_v7, %v9264_v19  ;;  %v6807_v39 = vpop.f32.mrf.mxu1  ;;  %v274_v7 = vld [vmem:[%s10283_s0 + $0x7e8] sm:$0xff] }
 0x1c1   :  { %v6744_v2 = vpop.f32.mrf.mxu0  ;;  %7233 = vmatpush3.bf16.msra.mxu0 %v7602_v24 }
 0x1c2   :  { %v9563_v41 = vadd.f32 %v6806_v45, %v4342_v36  ;;  %v6745_v3 = vadd.f32 %v6744_v2, %v6743_v1  ;;  %v6808_v18 = vpop.f32.mrf.mxu1  ;;  %7297 = vmatpush3.bf16.msra.mxu1 %v7604_v59 }
 0x1c3   :  { %v6809_v16 = vadd.f32 %v6808_v18, %v6807_v39  ;;  %v6746_v52 = vpop.f32.mrf.mxu0  ;;  %4930 = vmatmul.mubr.bf16.gmra.mxu0 %v5962_v28 }
 0x1c4   :  { %v4345_v35 = vadd.f32 %v6745_v3, %v9273_v37  ;;  %v6810_v15 = vpop.f32.mrf.mxu1  ;;  %5027 = vmatmul.mubr.bf16.gmra.mxu1 %v5964_v34  ;;  %4937 = vmatprep.mubr.bf16.mxu0 %v5995_v11  ;;  %v226_v37 = vld [vmem:[%s10283_s0 + $0x668] sm:$0xff] }
 0x1c5   :  { %v6747_v19 = vpop.f32.mrf.mxu0  ;;  %5034 = vmatprep.mubr.bf16.mxu1 %v5997_v10  ;;  %v6029_v54 = vcombine.high %v226_v37, %v242_v63  ;;  %v6028_v1 = vcombine.low %v226_v37, %v242_v63 }
 0x1c6   :  { %v9572_v30 = vadd.f32 %v6809_v16, %v4345_v35  ;;  %v6748_v56 = vadd.f32 %v6747_v19, %v6746_v52  ;;  %v6811_v32 = vpop.f32.mrf.mxu1  ;;  %v51_v35 = vld [vmem:[%s10283_s0 + $0xf0] sm:$0xff] }
 0x1c7   :  { %v6812_v60 = vadd.f32 %v6811_v32, %v6810_v15  ;;  %v6749_v25 = vpop.f32.mrf.mxu0 }
 0x1c8   :  { %v4350_v4 = vadd.f32 %v6748_v56, %v9283_v47  ;;  %v6813_v22 = vpop.f32.mrf.mxu1  ;;  %v257_v47 = vld [vmem:[%s10283_s0 + $0x760] sm:$0xff] }
 0x1c9   :  { %v6750_v57 = vpop.f32.mrf.mxu0  ;;  %v6059_v28 = vcombine.high %v257_v47, %v273_v17  ;;  %v6058_v37 = vcombine.low %v257_v47, %v273_v17  ;;  %v84_v17 = vld [vmem:[%s10283_s0 + $0x1f8] sm:$0xff] }
 0x1ca   :  { %v9581_v43 = vadd.f32 %v6812_v60, %v4350_v4  ;;  %v6751_v49 = vadd.f32 %v6750_v57, %v6749_v25  ;;  %v6814_v46 = vpop.f32.mrf.mxu1 }
 0x1cb   :  { %v6815_v62 = vadd.f32 %v6814_v46, %v6813_v22  ;;  %v6752_v9 = vpop.f32.mrf.mxu0  ;;  %4938 = vmatmul.mubr.bf16.gmra.mxu0 %v5994_v61 }
 0x1cc   :  { %v4353_v13 = vadd.f32 %v6751_v49, %v9292_v6  ;;  %v6816_v14 = vpop.f32.mrf.mxu1  ;;  %5035 = vmatmul.mubr.bf16.gmra.mxu1 %v5996_v40  ;;  %4945 = vmatprep.mubr.bf16.mxu0 %v6027_v31  ;;  %v258_v6 = vld [vmem:[%s10283_s0 + $0x768] sm:$0xff] }
 0x1cd   :  { %v6753_v53 = vpop.f32.mrf.mxu0  ;;  %5042 = vmatprep.mubr.bf16.mxu1 %v6029_v54  ;;  %v6061_v39 = vcombine.high %v258_v6, %v274_v7  ;;  %v6060_v25 = vcombine.low %v258_v6, %v274_v7 }
 0x1ce   :  { %v9590_v21 = vadd.f32 %v6815_v62, %v4353_v13  ;;  %v6754_v50 = vadd.f32 %v6753_v53, %v6752_v9  ;;  %v6817_v24 = vpop.f32.mrf.mxu1  ;;  %v83_v13 = vld [vmem:[%s10283_s0 + $0x1f0] sm:$0xff] }
 0x1cf   :  { %v6818_v23 = vadd.f32 %v6817_v24, %v6816_v14  ;;  %v6755_v29 = vpop.f32.mrf.mxu0 }
 0x1d0   :  { %v4358_v59 = vadd.f32 %v6754_v50, %v9301_v51  ;;  %v6819_v45 = vpop.f32.mrf.mxu1  ;;  %v35_v51 = vld [vmem:[%s10283_s0 + $0x70] sm:$0xff] }
 0x1d1   :  { %v6756_v36 = vpop.f32.mrf.mxu0  ;;  %v5839_v61 = vcombine.high %v35_v51, %v51_v35  ;;  %v5838_v6 = vcombine.low %v35_v51, %v51_v35  ;;  %v116_v35 = vld [vmem:[%s10283_s0 + $0x2f8] sm:$0xff] }
 0x1d2   :  { %v9599_v34 = vadd.f32 %v6818_v23, %v4358_v59  ;;  %v6757_v11 = vadd.f32 %v6756_v36, %v6755_v29  ;;  %v6820_v2 = vpop.f32.mrf.mxu1 }
 0x1d3   :  { %v6821_v10 = vadd.f32 %v6820_v2, %v6819_v45  ;;  %v6758_v3 = vpop.f32.mrf.mxu0  ;;  %4946 = vmatmul.mubr.bf16.gmra.mxu0 %v6026_v5 }
 0x1d4   :  { %v4361_v18 = vadd.f32 %v6757_v11, %v9310_v8  ;;  %v6822_v16 = vpop.f32.mrf.mxu1  ;;  %5043 = vmatmul.mubr.bf16.gmra.mxu1 %v6028_v1  ;;  %4953 = vmatprep.mubr.bf16.mxu0 %v6059_v28  ;;  %v36_v8 = vld [vmem:[%s10283_s0 + $0x78] sm:$0xff] }
 0x1d5   :  { %v6759_v52 = vpop.f32.mrf.mxu0  ;;  %5050 = vmatprep.mubr.bf16.mxu1 %v6061_v39  ;;  %v5841_v22 = vcombine.high %v36_v8, %v52_v48  ;;  %v5840_v29 = vcombine.low %v36_v8, %v52_v48 }
 0x1d6   :  { %v9608_v15 = vadd.f32 %v6821_v10, %v4361_v18  ;;  %v6760_v19 = vadd.f32 %v6759_v52, %v6758_v3  ;;  %v6823_v44 = vpop.f32.mrf.mxu1  ;;  %v115_v18 = vld [vmem:[%s10283_s0 + $0x2f0] sm:$0xff] }
 0x1d7   :  { %v6824_v56 = vadd.f32 %v6823_v44, %v6822_v16  ;;  %v6761_v32 = vpop.f32.mrf.mxu0 }
 0x1d8   :  { %v4366_v63 = vadd.f32 %v6760_v19, %v9319_v42  ;;  %v6825_v60 = vpop.f32.mrf.mxu1  ;;  %v67_v42 = vld [vmem:[%s10283_s0 + $0x170] sm:$0xff] }
 0x1d9   :  { %v6762_v4 = vpop.f32.mrf.mxu0  ;;  %v5871_v5 = vcombine.high %v67_v42, %v83_v13  ;;  %v5870_v8 = vcombine.low %v67_v42, %v83_v13  ;;  %v148_v13 = vld [vmem:[%s10283_s0 + $0x3f8] sm:$0xff] }
 0x1da   :  { %v9617_v40 = vadd.f32 %v6824_v56, %v4366_v63  ;;  %v6763_v31 = vadd.f32 %v6762_v4, %v6761_v32  ;;  %v6826_v57 = vpop.f32.mrf.mxu1 }
 0x1db   :  { %v6827_v54 = vadd.f32 %v6826_v57, %v6825_v60  ;;  %v6764_v49 = vpop.f32.mrf.mxu0  ;;  %4954 = vmatmul.mubr.bf16.gmra.mxu0 %v6058_v37 }
 0x1dc   :  { %v4369_v46 = vadd.f32 %v6763_v31, %v9322_v27  ;;  %v6828_v62 = vpop.f32.mrf.mxu1  ;;  %5051 = vmatmul.mubr.bf16.gmra.mxu1 %v6060_v25  ;;  %5091 = vmatprep.mubr.bf16.mxu0 %v5839_v61  ;;  %v68_v27 = vld [vmem:[%s10283_s0 + $0x178] sm:$0xff] }
 0x1dd   :  { %v6765_v9 = vpop.f32.mrf.mxu0  ;;  %5188 = vmatprep.mubr.bf16.mxu1 %v5841_v22  ;;  %v5873_v45 = vcombine.high %v68_v27, %v84_v17  ;;  %v5872_v32 = vcombine.low %v68_v27, %v84_v17 }
 0x1de   :  { %v9626_v14 = vadd.f32 %v6827_v54, %v4369_v46  ;;  %v6766_v53 = vadd.f32 %v6765_v9, %v6764_v49  ;;  %v6829_v47 = vpop.f32.mrf.mxu1  ;;  %v147_v46 = vld [vmem:[%s10283_s0 + $0x3f0] sm:$0xff] }
 0x1df   :  { %v6830_v50 = vadd.f32 %v6829_v47, %v6828_v62  ;;  %v6767_v24 = vpop.f32.mrf.mxu0 }
 0x1e0   :  { %v4374_v7 = vadd.f32 %v6766_v53, %v9353_v12  ;;  %v6831_v23 = vpop.f32.mrf.mxu1  ;;  %v99_v12 = vld [vmem:[%s10283_s0 + $0x270] sm:$0xff] }
 0x1e1   :  { %v6768_v59 = vpop.f32.mrf.mxu0  ;;  %v5903_v37 = vcombine.high %v99_v12, %v115_v18  ;;  %v5902_v27 = vcombine.low %v99_v12, %v115_v18  ;;  %v180_v18 = vld [vmem:[%s10283_s0 + $0x4f8] sm:$0xff] }
 0x1e2   :  { %v9635_v1 = vadd.f32 %v6830_v50, %v4374_v7  ;;  %v6769_v28 = vadd.f32 %v6768_v59, %v6767_v24  ;;  %v6832_v36 = vpop.f32.mrf.mxu1 }
 0x1e3   :  { %v6833_v39 = vadd.f32 %v6832_v36, %v6831_v23  ;;  %v6850_v11 = vpop.f32.mrf.mxu0  ;;  %5092 = vmatmul.mubr.bf16.vlgmr.msra.gmra.mxu0 %v5838_v6 }
 0x1e4   :  { %v4377_v2 = vadd.f32 %v6769_v28, %v9383_v0  ;;  %v6914_v10 = vpop.f32.mrf.mxu1  ;;  %5189 = vmatmul.mubr.bf16.vlgmr.msra.gmra.mxu1 %v5840_v29  ;;  %5099 = vmatprep.mubr.bf16.mxu0 %v5871_v5  ;;  %v100_v0 = vld [vmem:[%s10283_s0 + $0x278] sm:$0xff] }
 0x1e5   :  { %v6851_v3 = vpop.f32.mrf.mxu0  ;;  %5196 = vmatprep.mubr.bf16.mxu1 %v5873_v45  ;;  %v5905_v60 = vcombine.high %v100_v0, %v116_v35  ;;  %v5904_v24 = vcombine.low %v100_v0, %v116_v35 }
 0x1e6   :  { %v9644_v16 = vadd.f32 %v6833_v39, %v4377_v2  ;;  %v6852_v52 = vadd.f32 %v6851_v3, %v6850_v11  ;;  %v6915_v51 = vpop.f32.mrf.mxu1  ;;  %v179_v2 = vld [vmem:[%s10283_s0 + $0x4f0] sm:$0xff] }
 0x1e7   :  { %v6916_v19 = vadd.f32 %v6915_v51, %v6914_v10  ;;  %v6853_v44 = vpop.f32.mrf.mxu0 }
 0x1e8   :  { %v4512_v48 = vadd.f32 %v6852_v52, %v9410_v55  ;;  %v6917_v56 = vpop.f32.mrf.mxu1  ;;  %v131_v55 = vld [vmem:[%s10283_s0 + $0x370] sm:$0xff] }
 0x1e9   :  { %v6854_v63 = vpop.f32.mrf.mxu0  ;;  %v5935_v6 = vcombine.high %v131_v55, %v147_v46  ;;  %v5934_v0 = vcombine.low %v131_v55, %v147_v46  ;;  %v212_v46 = vld [vmem:[%s10283_s0 + $0x5f8] sm:$0xff] }
 0x1ea   :  { %v9653_v25 = vadd.f32 %v6916_v19, %v4512_v48  ;;  %v6855_v61 = vadd.f32 %v6854_v63, %v6853_v44  ;;  %v6918_v4 = vpop.f32.mrf.mxu1 }
 0x1eb   :  { %v6919_v22 = vadd.f32 %v6918_v4, %v6917_v56  ;;  %v6856_v31 = vpop.f32.mrf.mxu0  ;;  %5100 = vmatmul.mubr.bf16.gmra.mxu0 %v5870_v8 }
 0x1ec   :  { %v4515_v57 = vadd.f32 %v6855_v61, %v9440_v38  ;;  %v6920_v54 = vpop.f32.mrf.mxu1  ;;  %5197 = vmatmul.mubr.bf16.gmra.mxu1 %v5872_v32  ;;  %5107 = vmatprep.mubr.bf16.mxu0 %v5903_v37  ;;  %v132_v38 = vld [vmem:[%s10283_s0 + $0x378] sm:$0xff] }
 0x1ed   :  { %v6857_v49 = vpop.f32.mrf.mxu0  ;;  %5204 = vmatprep.mubr.bf16.mxu1 %v5905_v60  ;;  %v5937_v23 = vcombine.high %v132_v38, %v148_v13  ;;  %v5936_v44 = vcombine.low %v132_v38, %v148_v13 }
 0x1ee   :  { %v9662_v62 = vadd.f32 %v6919_v22, %v4515_v57  ;;  %v6858_v9 = vadd.f32 %v6857_v49, %v6856_v31  ;;  %v6921_v42 = vpop.f32.mrf.mxu1  ;;  %v211_v57 = vld [vmem:[%s10283_s0 + $0x5f0] sm:$0xff] }
 0x1ef   :  { %v6922_v53 = vadd.f32 %v6921_v42, %v6920_v54  ;;  %v6859_v47 = vpop.f32.mrf.mxu0 }
 0x1f0   :  { %v4520_v17 = vadd.f32 %v6858_v9, %v9468_v26  ;;  %v6923_v50 = vpop.f32.mrf.mxu1  ;;  %v163_v26 = vld [vmem:[%s10283_s0 + $0x470] sm:$0xff] }
 0x1f1   :  { %v6860_v7 = vpop.f32.mrf.mxu0  ;;  %v5967_v8 = vcombine.high %v163_v26, %v179_v2  ;;  %v5966_v38 = vcombine.low %v163_v26, %v179_v2  ;;  %v244_v2 = vld [vmem:[%s10283_s0 + $0x6f8] sm:$0xff] }
 0x1f2   :  { %v9671_v29 = vadd.f32 %v6922_v53, %v4520_v17  ;;  %v6861_v5 = vadd.f32 %v6860_v7, %v6859_v47  ;;  %v6924_v59 = vpop.f32.mrf.mxu1 }
 0x1f3   :  { %v6925_v45 = vadd.f32 %v6924_v59, %v6923_v50  ;;  %v6862_v28 = vpop.f32.mrf.mxu0  ;;  %5108 = vmatmul.mubr.bf16.gmra.mxu0 %v5902_v27 }
 0x1f4   :  { %v4523_v36 = vadd.f32 %v6861_v5, %v9498_v33  ;;  %v6926_v39 = vpop.f32.mrf.mxu1  ;;  %5205 = vmatmul.mubr.bf16.gmra.mxu1 %v5904_v24  ;;  %5115 = vmatprep.mubr.bf16.mxu0 %v5935_v6  ;;  %v164_v33 = vld [vmem:[%s10283_s0 + $0x478] sm:$0xff] }
 0x1f5   :  { %v6863_v11 = vpop.f32.mrf.mxu0  ;;  %5212 = vmatprep.mubr.bf16.mxu1 %v5937_v23  ;;  %v5969_v56 = vcombine.high %v164_v33, %v180_v18  ;;  %v5968_v47 = vcombine.low %v164_v33, %v180_v18 }
 0x1f6   :  { %v9680_v10 = vadd.f32 %v6925_v45, %v4523_v36  ;;  %v6864_v3 = vadd.f32 %v6863_v11, %v6862_v28  ;;  %v6927_v12 = vpop.f32.mrf.mxu1  ;;  %v243_v36 = vld [vmem:[%s10283_s0 + $0x6f0] sm:$0xff] }
 0x1f7   :  { %v6928_v52 = vadd.f32 %v6927_v12, %v6926_v39  ;;  %v6865_v51 = vpop.f32.mrf.mxu0 }
 0x1f8   :  { %v4528_v35 = vadd.f32 %v6864_v3, %v9526_v58  ;;  %v6929_v19 = vpop.f32.mrf.mxu1  ;;  %v195_v58 = vld [vmem:[%s10283_s0 + $0x570] sm:$0xff] }
 0x1f9   :  { %v6866_v48 = vpop.f32.mrf.mxu0  ;;  %v5999_v27 = vcombine.high %v195_v58, %v211_v57  ;;  %v5998_v33 = vcombine.low %v195_v58, %v211_v57  ;;  %v276_v57 = vld [vmem:[%s10283_s0 + $0x7f8] sm:$0xff] }
 0x1fa   :  { %v9689_v32 = vadd.f32 %v6928_v52, %v4528_v35  ;;  %v6867_v37 = vadd.f32 %v6866_v48, %v6865_v51  ;;  %v6930_v63 = vpop.f32.mrf.mxu1 }
 0x1fb   :  { %v6931_v60 = vadd.f32 %v6930_v63, %v6929_v19  ;;  %v6868_v61 = vpop.f32.mrf.mxu0  ;;  %5116 = vmatmul.mubr.bf16.gmra.mxu0 %v5934_v0 }
 0x1fc   :  { %v4531_v4 = vadd.f32 %v6867_v37, %v9547_v20  ;;  %v6932_v22 = vpop.f32.mrf.mxu1  ;;  %5213 = vmatmul.mubr.bf16.gmra.mxu1 %v5936_v44  ;;  %5123 = vmatprep.mubr.bf16.mxu0 %v5967_v8  ;;  %v196_v20 = vld [vmem:[%s10283_s0 + $0x578] sm:$0xff] }
 0x1fd   :  { %v6869_v31 = vpop.f32.mrf.mxu0  ;;  %5220 = vmatprep.mubr.bf16.mxu1 %v5969_v56  ;;  %v6001_v50 = vcombine.high %v196_v20, %v212_v46  ;;  %v6000_v51 = vcombine.low %v196_v20, %v212_v46 }
 0x1fe   :  { %v9698_v54 = vadd.f32 %v6931_v60, %v4531_v4  ;;  %v6870_v49 = vadd.f32 %v6869_v31, %v6868_v61  ;;  %v6933_v55 = vpop.f32.mrf.mxu1  ;;  %v275_v4 = vld [vmem:[%s10283_s0 + $0x7f0] sm:$0xff] }
 0x1ff   :  { %v6934_v9 = vadd.f32 %v6933_v55, %v6932_v22  ;;  %v6871_v42 = vpop.f32.mrf.mxu0 }
 0x200   :  { %v4536_v13 = vadd.f32 %v6870_v49, %v9563_v41  ;;  %v6935_v53 = vpop.f32.mrf.mxu1  ;;  %v227_v41 = vld [vmem:[%s10283_s0 + $0x670] sm:$0xff] }
 0x201   :  { %v6872_v17 = vpop.f32.mrf.mxu0  ;;  %v6031_v0 = vcombine.high %v227_v41, %v243_v36  ;;  %v6030_v20 = vcombine.low %v227_v41, %v243_v36 }
 0x202   :  { %v9707_v24 = vadd.f32 %v6934_v9, %v4536_v13  ;;  %v6873_v6 = vadd.f32 %v6872_v17, %v6871_v42  ;;  %v6936_v7 = vpop.f32.mrf.mxu1 }
 0x203   :  { %v6937_v23 = vadd.f32 %v6936_v7, %v6935_v53  ;;  %v6874_v5 = vpop.f32.mrf.mxu0  ;;  %5124 = vmatmul.mubr.bf16.gmra.mxu0 %v5966_v38 }
 0x204   :  { %v4539_v59 = vadd.f32 %v6873_v6, %v9572_v30  ;;  %v6938_v45 = vpop.f32.mrf.mxu1  ;;  %5221 = vmatmul.mubr.bf16.gmra.mxu1 %v5968_v47  ;;  %5131 = vmatprep.mubr.bf16.mxu0 %v5999_v27  ;;  %v228_v30 = vld [vmem:[%s10283_s0 + $0x678] sm:$0xff] }
 0x205   :  { %v6875_v28 = vpop.f32.mrf.mxu0  ;;  %5228 = vmatprep.mubr.bf16.mxu1 %v6001_v50  ;;  %v6033_v19 = vcombine.high %v228_v30, %v244_v2  ;;  %v6032_v42 = vcombine.low %v228_v30, %v244_v2 }
 0x206   :  { %v9716_v39 = vadd.f32 %v6937_v23, %v4539_v59  ;;  %v6876_v11 = vadd.f32 %v6875_v28, %v6874_v5  ;;  %v6939_v26 = vpop.f32.mrf.mxu1 }
 0x207   :  { %v6940_v3 = vadd.f32 %v6939_v26, %v6938_v45  ;;  %v6877_v12 = vpop.f32.mrf.mxu0 }
 0x208   :  { %v4544_v18 = vadd.f32 %v6876_v11, %v9581_v43  ;;  %v6941_v52 = vpop.f32.mrf.mxu1  ;;  %v259_v43 = vld [vmem:[%s10283_s0 + $0x770] sm:$0xff] }
 0x209   :  { %v6878_v35 = vpop.f32.mrf.mxu0  ;;  %v6063_v38 = vcombine.high %v259_v43, %v275_v4  ;;  %v6062_v36 = vcombine.low %v259_v43, %v275_v4 }
 0x20a   :  { %v9725_v44 = vadd.f32 %v6940_v3, %v4544_v18  ;;  %v6879_v8 = vadd.f32 %v6878_v35, %v6877_v12  ;;  %v6942_v48 = vpop.f32.mrf.mxu1 }
 0x20b   :  { %v6943_v56 = vadd.f32 %v6942_v48, %v6941_v52  ;;  %v6880_v37 = vpop.f32.mrf.mxu0  ;;  %5132 = vmatmul.mubr.bf16.gmra.mxu0 %v5998_v33 }
 0x20c   :  { %v4547_v63 = vadd.f32 %v6879_v8, %v9590_v21  ;;  %v6944_v60 = vpop.f32.mrf.mxu1  ;;  %5229 = vmatmul.mubr.bf16.gmra.mxu1 %v6000_v51  ;;  %5139 = vmatprep.mubr.bf16.mxu0 %v6031_v0  ;;  %v260_v21 = vld [vmem:[%s10283_s0 + $0x778] sm:$0xff] }
 0x20d   :  { %v6881_v61 = vpop.f32.mrf.mxu0  ;;  %5236 = vmatprep.mubr.bf16.mxu1 %v6033_v19  ;;  %v6065_v53 = vcombine.high %v260_v21, %v276_v57  ;;  %v6064_v30 = vcombine.low %v260_v21, %v276_v57 }
 0x20e   :  { %v9734_v22 = vadd.f32 %v6943_v56, %v4547_v63  ;;  %v6882_v31 = vadd.f32 %v6881_v61, %v6880_v37  ;;  %v6945_v58 = vpop.f32.mrf.mxu1 }
 0x20f   :  { %v6946_v49 = vadd.f32 %v6945_v58, %v6944_v60  ;;  %v6883_v55 = vpop.f32.mrf.mxu0 }
 0x210   :  { %v4552_v46 = vadd.f32 %v6882_v31, %v9599_v34  ;;  %v6947_v9 = vpop.f32.mrf.mxu1 }
 0x211   :  { %v6884_v13 = vpop.f32.mrf.mxu0 }
 0x212   :  { %v9743_v47 = vadd.f32 %v6946_v49, %v4552_v46  ;;  %v6885_v27 = vadd.f32 %v6884_v13, %v6883_v55  ;;  %v6948_v17 = vpop.f32.mrf.mxu1 }
 0x213   :  { %v6949_v50 = vadd.f32 %v6948_v17, %v6947_v9  ;;  %v6886_v6 = vpop.f32.mrf.mxu0  ;;  %5140 = vmatmul.mubr.bf16.gmra.mxu0 %v6030_v20 }
 0x214   :  { %v4555_v7 = vadd.f32 %v6885_v27, %v9608_v15  ;;  %v6950_v23 = vpop.f32.mrf.mxu1  ;;  %5237 = vmatmul.mubr.bf16.gmra.mxu1 %v6032_v42  ;;  %5147 = vmatprep.mubr.bf16.mxu0 %v6063_v38 }
 0x215   :  { %v6887_v5 = vpop.f32.mrf.mxu0  ;;  %5244 = vmatprep.mubr.bf16.mxu1 %v6065_v53 }
 0x216   :  { %v9746_v34 = vadd.f32 %v6949_v50, %v4555_v7  ;;  %v6888_v59 = vadd.f32 %v6887_v5, %v6886_v6  ;;  %v6951_v45 = vpop.f32.mrf.mxu1 }
 0x217   :  { %v6952_v28 = vadd.f32 %v6951_v45, %v6950_v23  ;;  %v6889_v41 = vpop.f32.mrf.mxu0 }
 0x218   :  { %v4560_v11 = vadd.f32 %v6888_v59, %v9617_v40  ;;  %v6953_v26 = vpop.f32.mrf.mxu1 }
 0x219   :  { %v6890_v2 = vpop.f32.mrf.mxu0 }
 0x21a   :  { %v9749_v3 = vadd.f32 %v6952_v28, %v4560_v11  ;;  %v6891_v15 = vadd.f32 %v6890_v2, %v6889_v41  ;;  %v6954_v12 = vpop.f32.mrf.mxu1 }
 0x21b   :  { %v6955_v33 = vadd.f32 %v6954_v12, %v6953_v26  ;;  %v6892_v18 = vpop.f32.mrf.mxu0  ;;  %5148 = vmatmul.mubr.bf16.gmra.mxu0 %v6062_v36 }
 0x21c   :  { %v4563_v52 = vadd.f32 %v6891_v15, %v9626_v14  ;;  %v6956_v51 = vpop.f32.mrf.mxu1  ;;  %5245 = vmatmul.mubr.bf16.gmra.mxu1 %v6064_v30 }
 0x21d   :  { %v6893_v0 = vpop.f32.mrf.mxu0 }
 0x21e   :  { %v9752_v35 = vadd.f32 %v6955_v33, %v4563_v52  ;;  %v6894_v19 = vadd.f32 %v6893_v0, %v6892_v18  ;;  %v6957_v8 = vpop.f32.mrf.mxu1 }
 0x21f   :  { %v6958_v40 = vadd.f32 %v6957_v8, %v6956_v51  ;;  %v6895_v48 = vpop.f32.mrf.mxu0 }
 0x220   :  { %v4568_v56 = vadd.f32 %v6894_v19, %v9635_v1  ;;  %v6959_v37 = vpop.f32.mrf.mxu1 }
 0x221   :  { %v6896_v63 = vpop.f32.mrf.mxu0 }
 0x222   :  { %v9755_v60 = vadd.f32 %v6958_v40, %v4568_v56  ;;  %v6897_v61 = vadd.f32 %v6896_v63, %v6895_v48  ;;  %v6960_v43 = vpop.f32.mrf.mxu1 }
 0x223   :  { %v6961_v4 = vadd.f32 %v6960_v43, %v6959_v37  ;;  %v6978_v31 = vpop.f32.mrf.mxu0 }
 0x224   :  { %v4571_v14 = vadd.f32 %v6897_v61, %v9644_v16  ;;  %v7042_v58 = vpop.f32.mrf.mxu1 }
 0x225   :  { %v6979_v21 = vpop.f32.mrf.mxu0 }
 0x226   :  { %v9758_v57 = vadd.f32 %v6961_v4, %v4571_v14  ;;  %v6980_v49 = vadd.f32 %v6979_v21, %v6978_v31  ;;  %v7043_v55 = vpop.f32.mrf.mxu1 }
 0x227   :  { %v7044_v20 = vadd.f32 %v7043_v55, %v7042_v58  ;;  %v6981_v46 = vpop.f32.mrf.mxu0 }
 0x228   :  { %v4706_v1 = vadd.f32 %v6980_v49, %v9653_v25  ;;  %v7045_v9 = vpop.f32.mrf.mxu1 }
 0x229   :  { %v6982_v42 = vpop.f32.mrf.mxu0 }
 0x22a   :  { %v9761_v38 = vadd.f32 %v7044_v20, %v4706_v1  ;;  %v6983_v13 = vadd.f32 %v6982_v42, %v6981_v46  ;;  %v7046_v53 = vpop.f32.mrf.mxu1 }
 0x22b   :  { %v7047_v27 = vadd.f32 %v7046_v53, %v7045_v9  ;;  %v6984_v17 = vpop.f32.mrf.mxu0 }
 0x22c   :  { %v4709_v16 = vadd.f32 %v6983_v13, %v9662_v62  ;;  %v7048_v50 = vpop.f32.mrf.mxu1 }
 0x22d   :  { %v6985_v6 = vpop.f32.mrf.mxu0 }
 0x22e   :  { %v9764_v7 = vadd.f32 %v7047_v27, %v4709_v16  ;;  %v6986_v23 = vadd.f32 %v6985_v6, %v6984_v17  ;;  %v7049_v5 = vpop.f32.mrf.mxu1 }
 0x22f   :  { %v7050_v59 = vadd.f32 %v7049_v5, %v7048_v50  ;;  %v6987_v45 = vpop.f32.mrf.mxu0 }
 0x230   :  { %v4714_v25 = vadd.f32 %v6986_v23, %v9671_v29  ;;  %v7051_v28 = vpop.f32.mrf.mxu1 }
 0x231   :  { %v6988_v41 = vpop.f32.mrf.mxu0 }
 0x232   :  { %v9767_v36 = vadd.f32 %v7050_v59, %v4714_v25  ;;  %v6989_v11 = vadd.f32 %v6988_v41, %v6987_v45  ;;  %v7052_v26 = vpop.f32.mrf.mxu1 }
 0x233   :  { %v7053_v30 = vadd.f32 %v7052_v26, %v7051_v28  ;;  %v6990_v2 = vpop.f32.mrf.mxu0 }
 0x234   :  { %v4717_v62 = vadd.f32 %v6989_v11, %v9680_v10  ;;  %v7054_v15 = vpop.f32.mrf.mxu1 }
 0x235   :  { %v6991_v12 = vpop.f32.mrf.mxu0 }
 0x236   :  { %v9770_v33 = vadd.f32 %v7053_v30, %v4717_v62  ;;  %v6992_v18 = vadd.f32 %v6991_v12, %v6990_v2  ;;  %v7055_v52 = vpop.f32.mrf.mxu1 }
 0x237   :  { %v7056_v51 = vadd.f32 %v7055_v52, %v7054_v15  ;;  %v6993_v0 = vpop.f32.mrf.mxu0 }
 0x238   :  { %v4722_v29 = vadd.f32 %v6992_v18, %v9689_v32  ;;  %v7057_v19 = vpop.f32.mrf.mxu1 }
 0x239   :  { %v6994_v8 = vpop.f32.mrf.mxu0 }
 0x23a   :  { %v9773_v40 = vadd.f32 %v7056_v51, %v4722_v29  ;;  %v6995_v48 = vadd.f32 %v6994_v8, %v6993_v0  ;;  %v7058_v56 = vpop.f32.mrf.mxu1 }
 0x23b   :  { %v7059_v37 = vadd.f32 %v7058_v56, %v7057_v19  ;;  %v6996_v63 = vpop.f32.mrf.mxu0 }
 0x23c   :  { %v4725_v10 = vadd.f32 %v6995_v48, %v9698_v54  ;;  %v7060_v61 = vpop.f32.mrf.mxu1 }
 0x23d   :  { %v6997_v43 = vpop.f32.mrf.mxu0 }
 0x23e   :  { %v9776_v4 = vadd.f32 %v7059_v37, %v4725_v10  ;;  %v6998_v31 = vadd.f32 %v6997_v43, %v6996_v63  ;;  %v7061_v14 = vpop.f32.mrf.mxu1 }
 0x23f   :  { %v7062_v58 = vadd.f32 %v7061_v14, %v7060_v61  ;;  %v6999_v21 = vpop.f32.mrf.mxu0 }
 0x240   :  { %v4730_v32 = vadd.f32 %v6998_v31, %v9707_v24  ;;  %v7063_v49 = vpop.f32.mrf.mxu1 }
 0x241   :  { %v7000_v55 = vpop.f32.mrf.mxu0 }
 0x242   :  { %v9779_v20 = vadd.f32 %v7062_v58, %v4730_v32  ;;  %v7001_v46 = vadd.f32 %v7000_v55, %v6999_v21  ;;  %v7064_v1 = vpop.f32.mrf.mxu1 }
 0x243   :  { %v7065_v9 = vadd.f32 %v7064_v1, %v7063_v49  ;;  %v7002_v42 = vpop.f32.mrf.mxu0 }
 0x244   :  { %v4733_v54 = vadd.f32 %v7001_v46, %v9716_v39  ;;  %v7066_v13 = vpop.f32.mrf.mxu1 }
 0x245   :  { %v7003_v53 = vpop.f32.mrf.mxu0 }
 0x246   :  { %v9782_v27 = vadd.f32 %v7065_v9, %v4733_v54  ;;  %v7004_v17 = vadd.f32 %v7003_v53, %v7002_v42  ;;  %v7067_v16 = vpop.f32.mrf.mxu1 }
 0x247   :  { %v7068_v50 = vadd.f32 %v7067_v16, %v7066_v13  ;;  %v7005_v6 = vpop.f32.mrf.mxu0 }
 0x248   :  { %v4738_v24 = vadd.f32 %v7004_v17, %v9725_v44  ;;  %v7069_v23 = vpop.f32.mrf.mxu1 }
 0x249   :  { %v7006_v5 = vpop.f32.mrf.mxu0 }
 0x24a   :  { %v9785_v59 = vadd.f32 %v7068_v50, %v4738_v24  ;;  %v7007_v45 = vadd.f32 %v7006_v5, %v7005_v6  ;;  %v7070_v25 = vpop.f32.mrf.mxu1 }
 0x24b   :  { %v7071_v28 = vadd.f32 %v7070_v25, %v7069_v23  ;;  %v7008_v41 = vpop.f32.mrf.mxu0 }
 0x24c   :  { %v4741_v39 = vadd.f32 %v7007_v45, %v9734_v22  ;;  %v7072_v11 = vpop.f32.mrf.mxu1 }
 0x24d   :  { %v7009_v26 = vpop.f32.mrf.mxu0 }
 0x24e   :  { %v9788_v30 = vadd.f32 %v7071_v28, %v4741_v39  ;;  %v7010_v2 = vadd.f32 %v7009_v26, %v7008_v41  ;;  %v7073_v62 = vpop.f32.mrf.mxu1 }
 0x24f   :  { %v7074_v15 = vadd.f32 %v7073_v62, %v7072_v11  ;;  %v7011_v12 = vpop.f32.mrf.mxu0 }
 0x250   :  { %v4746_v44 = vadd.f32 %v7010_v2, %v9743_v47  ;;  %v7075_v18 = vpop.f32.mrf.mxu1 }
 0x251   :  { %v7012_v52 = vpop.f32.mrf.mxu0 }
 0x252   :  { %v9791_v51 = vadd.f32 %v7074_v15, %v4746_v44  ;;  %v7013_v0 = vadd.f32 %v7012_v52, %v7011_v12  ;;  %v7076_v29 = vpop.f32.mrf.mxu1 }
 0x253   :  { %v7077_v19 = vadd.f32 %v7076_v29, %v7075_v18  ;;  %v7014_v8 = vpop.f32.mrf.mxu0 }
 0x254   :  { %10288 = vst [vmem:[#allocation2_spill] sm:$0xff] %v9791_v51  ;;  %v4749_v22 = vadd.f32 %v7013_v0, %v9746_v34  ;;  %v7078_v48 = vpop.f32.mrf.mxu1 }
 0x255   :  { %v7015_v56 = vpop.f32.mrf.mxu0 }
 0x256   :  { %v9794_v37 = vadd.f32 %v7077_v19, %v4749_v22  ;;  %v7016_v63 = vadd.f32 %v7015_v56, %v7014_v8  ;;  %v7079_v10 = vpop.f32.mrf.mxu1 }
 0x257   :  { %v7080_v61 = vadd.f32 %v7079_v10, %v7078_v48  ;;  %v7017_v43 = vpop.f32.mrf.mxu0 }
 0x258   :  { %10289 = vst [vmem:[#allocation3_spill] sm:$0xff] %v9794_v37  ;;  %v4754_v47 = vadd.f32 %v7016_v63, %v9749_v3  ;;  %v7081_v31 = vpop.f32.mrf.mxu1 }
 0x259   :  { %v7018_v14 = vpop.f32.mrf.mxu0 }
 0x25a   :  { %v9797_v58 = vadd.f32 %v7080_v61, %v4754_v47  ;;  %v7019_v21 = vadd.f32 %v7018_v14, %v7017_v43  ;;  %v7082_v32 = vpop.f32.mrf.mxu1 }
 0x25b   :  { %v7083_v49 = vadd.f32 %v7082_v32, %v7081_v31  ;;  %v7020_v55 = vpop.f32.mrf.mxu0 }
 0x25c   :  { %10290 = vst [vmem:[#allocation4_spill] sm:$0xff] %v9797_v58  ;;  %v4757_v34 = vadd.f32 %v7019_v21, %v9752_v35  ;;  %v7084_v46 = vpop.f32.mrf.mxu1 }
 0x25d   :  { %v7021_v1 = vpop.f32.mrf.mxu0 }
 0x25e   :  { %v9800_v9 = vadd.f32 %v7083_v49, %v4757_v34  ;;  %v7022_v42 = vadd.f32 %v7021_v1, %v7020_v55  ;;  %v7085_v54 = vpop.f32.mrf.mxu1 }
 0x25f   :  { %v7086_v13 = vadd.f32 %v7085_v54, %v7084_v46  ;;  %v7023_v53 = vpop.f32.mrf.mxu0 }
 0x260   :  { %10291 = vst [vmem:[#allocation5_spill] sm:$0xff] %v9800_v9  ;;  %v4762_v3 = vadd.f32 %v7022_v42, %v9755_v60  ;;  %v7087_v17 = vpop.f32.mrf.mxu1 }
 0x261   :  { %v7024_v16 = vpop.f32.mrf.mxu0 }
 0x262   :  { %v9803_v50 = vadd.f32 %v7086_v13, %v4762_v3  ;;  %v7025_v6 = vadd.f32 %v7024_v16, %v7023_v53  ;;  %v7088_v24 = vpop.f32.mrf.mxu1 }
 0x263   :  { %v7089_v23 = vadd.f32 %v7088_v24, %v7087_v17  ;;  %v7106_v5 = vpop.f32.mrf.mxu0 }
 0x264   :  { %10292 = vst [vmem:[#allocation6_spill] sm:$0xff] %v9803_v50  ;;  %v4765_v35 = vadd.f32 %v7025_v6, %v9758_v57  ;;  %v9806_v45 = vpop.f32.mrf.mxu1 }
 0x265   :  { %v7107_v25 = vpop.f32.mrf.mxu0 }
 0x266   :  { %v9808_v28 = vadd.f32 %v7089_v23, %v4765_v35  ;;  %v9810_v41 = vpop.f32.mrf.mxu1 }
 0x267   :  { %v7109_v39 = vpop.f32.mrf.mxu0 }
 0x268   :  { %10293 = vst [vmem:[#allocation7_spill] sm:$0xff] %v9808_v28  ;;  %v9812_v11 = vpop.f32.mrf.mxu1 }
 0x269   :  { %v7110_v60 = vpop.f32.mrf.mxu0 }
 0x26a   :  { %v9814_v26 = vpop.f32.mrf.mxu1 }
 0x26b   :  { %v9816_v2 = vpop.f32.mrf.mxu0 }
 0x26c   :  { %v9818_v62 = vpop.f32.mrf.mxu1 }
 0x26d   :  { %v9820_v15 = vpop.f32.mrf.mxu0 }
 0x26e   :  { %v9822_v57 = vpop.f32.mrf.mxu1 }
 0x26f   :  { %v9824_v12 = vpop.f32.mrf.mxu0 }
 0x270   :  { %v9826_v44 = vpop.f32.mrf.mxu1 }
 0x271   :  { %v9828_v18 = vpop.f32.mrf.mxu0 }
 0x272   :  { %v9830_v52 = vpop.f32.mrf.mxu1 }
 0x273   :  { %v9832_v0 = vpop.f32.mrf.mxu0 }
 0x274   :  { %v9834_v29 = vpop.f32.mrf.mxu1 }
 0x275   :  { %v9836_v19 = vpop.f32.mrf.mxu0 }
 0x276   :  { %v9838_v8 = vpop.f32.mrf.mxu1 }
 0x277   :  { %v9840_v22 = vpop.f32.mrf.mxu0 }
 0x278   :  { %v9842_v48 = vpop.f32.mrf.mxu1 }
 0x279   :  { %v9844_v56 = vpop.f32.mrf.mxu0 }
 0x27a   :  { %v9846_v63 = vpop.f32.mrf.mxu1 }
 0x27b   :  { %v9848_v10 = vpop.f32.mrf.mxu0 }
 0x27c   :  { %v9850_v61 = vpop.f32.mrf.mxu1 }
 0x27d   :  { %v9852_v43 = vpop.f32.mrf.mxu0 }
 0x27e   :  { %v9854_v47 = vpop.f32.mrf.mxu1 }
 0x27f   :  { %v9856_v31 = vpop.f32.mrf.mxu0 }
 0x280   :  { %v9858_v14 = vpop.f32.mrf.mxu1 }
 0x281   :  { %v9860_v21 = vpop.f32.mrf.mxu0 }
 0x282   :  { %v9862_v32 = vpop.f32.mrf.mxu1 }
 0x283   :  { %v9864_v49 = vpop.f32.mrf.mxu0 }
 0x284   :  { %v9866_v55 = vpop.f32.mrf.mxu1 }
 0x285   :  { %v9868_v34 = vpop.f32.mrf.mxu0 }
 0x286   :  { %v9870_v46 = vpop.f32.mrf.mxu1 }
 0x287   :  { %v9872_v1 = vpop.f32.mrf.mxu0 }
 0x288   :  { %v9874_v42 = vpop.f32.mrf.mxu1 }
 0x289   :  { %v9876_v54 = vpop.f32.mrf.mxu0 }
 0x28a   :  { %v9878_v13 = vpop.f32.mrf.mxu1 }
 0x28b   :  { %10294 = vst [vmem:[#allocation8_spill] sm:$0xff] %v9878_v13  ;;  %v9880_v53 = vpop.f32.mrf.mxu0 }
 0x28c   :  { %v9882_v3 = vpop.f32.mrf.mxu1 }
 0x28d   :  { %10295 = vst [vmem:[#allocation9_spill] sm:$0xff] %v9882_v3  ;;  %v9884_v17 = vpop.f32.mrf.mxu0 }
 0x28e   :  { %v9886_v16 = vpop.f32.mrf.mxu1 }
 0x28f   :  { %10296 = vst [vmem:[#allocation10_spill] sm:$0xff] %v9886_v16  ;;  %v9888_v6 = vpop.f32.mrf.mxu0 }
 0x290   :  { %10297 = vst [vmem:[#allocation11_spill] sm:$0xff] %v9888_v6  ;;  %v9890_v24 = vpop.f32.mrf.mxu1 }
 0x291   :  { %10298 = vst [vmem:[#allocation12_spill] sm:$0xff] %v9890_v24  ;;  %v9892_v23 = vpop.f32.mrf.mxu0 }
 0x292   :  { %10299 = vst [vmem:[#allocation13_spill] sm:$0xff] %v9892_v23  ;;  %v9894_v35 = vpop.f32.mrf.mxu1 }
 0x293   :  { %10300 = vst [vmem:[#allocation14_spill] sm:$0xff] %v9894_v35  ;;  %v9896_v28 = vpop.f32.mrf.mxu0 }
 0x294   :  { %10301 = vst [vmem:[#allocation15_spill] sm:$0xff] %v9896_v28  ;;  %v9898_v50 = vpop.f32.mrf.mxu1  ;;  %v7108_v28 = vadd.f32 %v7107_v25, %v7106_v5 }
 0x295   :  { %10302 = vst [vmem:[#allocation16_spill] sm:$0xff] %v9898_v50  ;;  %v9900_v9 = vpop.f32.mrf.mxu0 }
 0x296   :  { %10303 = vst [vmem:[#allocation17_spill] sm:$0xff] %v9900_v9  ;;  %v9902_v58 = vpop.f32.mrf.mxu1 }
 0x297   :  { %10304 = vst [vmem:[#allocation18_spill] sm:$0xff] %v9902_v58  ;;  %v9904_v37 = vpop.f32.mrf.mxu0 }
 0x298   :  { %10305 = vst [vmem:[#allocation19_spill] sm:$0xff] %v9904_v37  ;;  %v9906_v3 = vpop.f32.mrf.mxu1  ;;  %v7111_v37 = vadd.f32 %v7110_v60, %v7109_v39  ;;  %v7114_v39 = vadd.f32 %v9820_v15, %v9816_v2 }
 0x299   :  { %10306 = vst [vmem:[#allocation20_spill] sm:$0xff] %v9906_v3  ;;  %v9908_v16 = vpop.f32.mrf.mxu0  ;;  %v5285_v3 = vlaneseq }
 0x29a   :  { %10307 = vst [vmem:[#allocation21_spill] sm:$0xff] %v9908_v16  ;;  %v9910_v6 = vpop.f32.mrf.mxu1  ;;  %v4900_v16 = vadd.f32 %v7108_v28, %v9761_v38  ;;  %v4903_v5 = vadd.f32 %v7111_v37, %v9764_v7  ;;  %v7175_v38 = vadd.f32 %v9814_v26, %v9812_v11  ;;  %v4908_v7 = vadd.f32 %v7114_v39, %v9767_v36 }
 0x29b   :  { %10308 = vst [vmem:[#allocation22_spill] sm:$0xff] %v9910_v6  ;;  %v9912_v24 = vpop.f32.mrf.mxu0  ;;  %v7117_v37 = vadd.f32 %v9828_v18, %v9824_v12  ;;  %v7178_v11 = vadd.f32 %v9822_v57, %v9818_v62  ;;  %v7120_v36 = vadd.f32 %v9836_v19, %v9832_v0 }
 0x29c   :  { %10309 = vst [vmem:[#allocation23_spill] sm:$0xff] %v9912_v24  ;;  %v9914_v23 = vpop.f32.mrf.mxu1 }
 0x29d   :  { %10310 = vst [vmem:[#allocation24_spill] sm:$0xff] %v9914_v23  ;;  %v9916_v35 = vpop.f32.mrf.mxu0  ;;  %v7172_v23 = vadd.f32 %v9810_v41, %v9806_v45  ;;  %v5000_v45 = vadd.f32 %v7175_v38, %v4903_v5  ;;  %v5005_v12 = vadd.f32 %v7178_v11, %v4908_v7  ;;  %v7181_v5 = vadd.f32 %v9830_v52, %v9826_v44 }
 0x29e   :  { %10311 = vst [vmem:[#allocation25_spill] sm:$0xff] %v9916_v35  ;;  %v9918_v50 = vpop.f32.mrf.mxu1  ;;  %v4916_v19 = vadd.f32 %v7120_v36, %v9773_v40  ;;  %v7123_v38 = vadd.f32 %v9844_v56, %v9840_v22  ;;  %v7184_v44 = vadd.f32 %v9838_v8, %v9834_v29  ;;  %v7126_v56 = vadd.f32 %v9852_v43, %v9848_v10 }
 0x29f   :  { %10312 = vst [vmem:[#allocation26_spill] sm:$0xff] %v9918_v50  ;;  %v9920_v9 = vpop.f32.mrf.mxu0  ;;  %v9932_v50 = vand.u32 127, %v5285_v3  ;;  %v7187_v36 = vadd.f32 %v9846_v63, %v9842_v48 }
 0x2a0   :  { %10313 = vst [vmem:[#allocation27_spill] sm:$0xff] %v9920_v9  ;;  %v9922_v58 = vpop.f32.mrf.mxu1  ;;  %v4997_v9 = vadd.f32 %v7172_v23, %v4900_v16  ;;  %v4919_v22 = vadd.f32 %v7123_v38, %v9776_v4  ;;  %v7129_v4 = vadd.f32 %v9860_v21, %v9856_v31 }
 0x2a1   :  { %10314 = vst [vmem:[#allocation28_spill] sm:$0xff] %v9922_v58  ;;  %v9924_v51 = vpop.f32.mrf.mxu0  ;;  %vm5287_vm0 = vcmp.lt.s32.totalorder %v9932_v50, 2 }
 0x2a2   :  { %10315 = vst [vmem:[#allocation29_spill] sm:$0xff] %v9924_v51  ;;  %v9927_v6 = vpop.f32.mrf.mxu1  ;;  %v5016_v43 = vadd.f32 %v7187_v36, %v4919_v22  ;;  %v4927_v21 = vadd.f32 %v7129_v4, %v9782_v27 }
 0x2a3   :  { %10316 = vst [vmem:[#allocation30_spill] sm:$0xff] %v9927_v6  ;;  %v7234_v24 = vpop.f32.mrf.mxu0 }
 0x2a4   :  { %v7298_v35 = vpop.f32.mrf.mxu1 }
 0x2a5   :  { %v7235_v25 = vpop.f32.mrf.mxu0 }
 0x2a6   :  { %v7236_v60 = vadd.f32 %v7235_v25, %v7234_v24  ;;  %v7299_v58 = vpop.f32.mrf.mxu1 }
 0x2a7   :  { %v7237_v28 = vpop.f32.mrf.mxu0  ;;  %v7300_v51 = vadd.f32 %v7299_v58, %v7298_v35 }
 0x2a8   :  { %v5094_v6 = vadd.f32 %v7236_v60, %v4997_v9  ;;  %v7301_v13 = vpop.f32.mrf.mxu1 }
 0x2a9   :  { %v7238_v41 = vpop.f32.mrf.mxu0 }
 0x2aa   :  { %v7239_v3 = vadd.f32 %v7238_v41, %v7237_v28  ;;  %v7302_v2 = vpop.f32.mrf.mxu1  ;;  %v9942_v15 = vadd.f32 %v7300_v51, %v5094_v6  ;;  %v4911_v51 = vadd.f32 %v7117_v37, %v9770_v33 }
 0x2ab   :  { %v7240_v16 = vpop.f32.mrf.mxu0  ;;  %v7303_v58 = vadd.f32 %v7302_v2, %v7301_v13 }
 0x2ac   :  { %v5097_v9 = vadd.f32 %v7239_v3, %v5000_v45  ;;  %v7304_v26 = vpop.f32.mrf.mxu1  ;;  %v5288_v24 = vsel %vm5287_vm0, %v9942_v15, 0.0  ;;  %v5008_v33 = vadd.f32 %v7181_v5, %v4911_v51 }
 0x2ad   :  { %v7241_v23 = vpop.f32.mrf.mxu0  ;;  %5304 = vadd.xlane.f32.xlu0 %v5288_v24  ;;  %v5352_v13 = vmul.f32 %v5288_v24, %v5288_v24 }
 0x2ae   :  { %v7242_v18 = vadd.f32 %v7241_v23, %v7240_v16  ;;  %v7305_v6 = vpop.f32.mrf.mxu1  ;;  %v9952_v35 = vadd.f32 %v7303_v58, %v5097_v9  ;;  %v5013_v16 = vadd.f32 %v7184_v44, %v4916_v19  ;;  %v7132_v19 = vadd.f32 %v9868_v34, %v9864_v49 }
 0x2af   :  { %v7306_v62 = vadd.f32 %v7305_v6, %v7304_v26  ;;  %v7243_v57 = vpop.f32.mrf.mxu0  ;;  %v7135_v34 = vadd.f32 %v9876_v54, %v9872_v1 }
 0x2b0   :  { %v5102_v25 = vadd.f32 %v7242_v18, %v5005_v12  ;;  %v7307_v39 = vpop.f32.mrf.mxu1  ;;  %v5289_v0 = vsel %vm5287_vm0, %v9952_v35, 0.0  ;;  %v4924_v18 = vadd.f32 %v7126_v56, %v9779_v20  ;;  %v4932_v49 = vadd.f32 %v7132_v19, %v9785_v59 }
 0x2b1   :  { %v7244_v60 = vpop.f32.mrf.mxu0  ;;  %5306 = vadd.xlane.f32.xlu1 %v5289_v0  ;;  %5368 = vadd.xlane.f32.xlu0 %v5352_v13  ;;  %v5353_v7 = vmul.f32 %v5289_v0, %v5289_v0  ;;  %v7190_v13 = vadd.f32 %v9854_v47, %v9850_v61  ;;  %v7193_v61 = vadd.f32 %v9862_v32, %v9858_v14 }
 0x2b2   :  { %v7245_v28 = vadd.f32 %v7244_v60, %v7243_v57  ;;  %v7308_v45 = vpop.f32.mrf.mxu1  ;;  %v9962_v41 = vadd.f32 %v7306_v62, %v5102_v25  ;;  %v7138_v59 = vadd.f32 %v9884_v17, %v9880_v53  ;;  %v10318_v17 = vld [vmem:[#allocation2_spill] sm:$0xff] }
 0x2b3   :  { %v7246_v52 = vpop.f32.mrf.mxu0  ;;  %v7309_v3 = vadd.f32 %v7308_v45, %v7307_v39  ;;  %v5021_v20 = vadd.f32 %v7190_v13, %v4924_v18  ;;  %v10319_v18 = vld [vmem:[#allocation11_spill] sm:$0xff] }
 0x2b4   :  { %v5105_v37 = vadd.f32 %v7245_v28, %v5008_v33  ;;  %v7310_v2 = vpop.f32.mrf.mxu1  ;;  %v5290_v40 = vsel %vm5287_vm0, %v9962_v41, 0.0 }
 0x2b5   :  { %v7247_v11 = vpop.f32.mrf.mxu0  ;;  %5370 = vadd.xlane.f32.xlu1 %v5353_v7  ;;  %5308 = vadd.xlane.f32.xlu0 %v5290_v40  ;;  %v5354_v24 = vmul.f32 %v5290_v40, %v5290_v40  ;;  %v5024_v7 = vadd.f32 %v7193_v61, %v4927_v21  ;;  %v10323_v61 = vld [vmem:[#allocation3_spill] sm:$0xff] }
 0x2b6   :  { %v7248_v9 = vadd.f32 %v7247_v11, %v7246_v52  ;;  %v7311_v29 = vpop.f32.mrf.mxu1  ;;  %v9972_v8 = vadd.f32 %v7309_v3, %v5105_v37 }
 0x2b7   :  { %v7312_v58 = vadd.f32 %v7311_v29, %v7310_v2  ;;  %v7249_v26 = vpop.f32.mrf.mxu0  ;;  %v4935_v29 = vadd.f32 %v7135_v34, %v9788_v30 }
 0x2b8   :  { %v5110_v23 = vadd.f32 %v7248_v9, %v5013_v16  ;;  %v7313_v12 = vpop.f32.mrf.mxu1  ;;  %v5291_v51 = vsel %vm5287_vm0, %v9972_v8, 0.0  ;;  %v7196_v16 = vadd.f32 %v9870_v46, %v9866_v55 }
 0x2b9   :  { %v7250_v10 = vpop.f32.mrf.mxu0  ;;  %5372 = vadd.xlane.f32.xlu1 %v5354_v24  ;;  %5310 = vadd.xlane.f32.xlu0 %v5291_v51  ;;  %v5355_v63 = vmul.f32 %v5291_v51, %v5291_v51 }
 0x2ba   :  { %v7251_v6 = vadd.f32 %v7250_v10, %v7249_v26  ;;  %v7314_v62 = vpop.f32.mrf.mxu1  ;;  %v9982_v57 = vadd.f32 %v7312_v58, %v5110_v23  ;;  %v5029_v54 = vadd.f32 %v7196_v16, %v4932_v49  ;;  %v10317_v23 = vld [vmem:[#allocation8_spill] sm:$0xff]  ;;  %v4940_v10 = vadd.f32 %v7138_v59, %v10318_v17 }
 0x2bb   :  { %v7252_v48 = vpop.f32.mrf.mxu0  ;;  %v7315_v25 = vadd.f32 %v7314_v62, %v7313_v12  ;;  %v7199_v12 = vadd.f32 %v10317_v23, %v9874_v42  ;;  %v10321_v42 = vld [vmem:[#allocation9_spill] sm:$0xff]  ;;  %v10331_v23 = vld [vmem:[#allocation16_spill] sm:$0xff] }
 0x2bc   :  { %v5113_v5 = vadd.f32 %v7251_v6, %v5016_v43  ;;  %v7316_v39 = vpop.f32.mrf.mxu1  ;;  %v5292_v31 = vsel %vm5287_vm0, %v9982_v57, 0.0  ;;  %v10320_v6 = vld [vmem:[#allocation13_spill] sm:$0xff] }
 0x2bd   :  { %v7253_v0 = vpop.f32.mrf.mxu0  ;;  %5374 = vadd.xlane.f32.xlu1 %v5355_v63  ;;  %5312 = vadd.xlane.f32.xlu0 %v5292_v31  ;;  %v5356_v45 = vmul.f32 %v5292_v31, %v5292_v31  ;;  %v5032_v30 = vadd.f32 %v7199_v12, %v4935_v29  ;;  %v7141_v62 = vadd.f32 %v10320_v6, %v10319_v18  ;;  %v10332_v12 = vld [vmem:[#allocation18_spill] sm:$0xff] }
 0x2be   :  { %v7254_v60 = vadd.f32 %v7253_v0, %v7252_v48  ;;  %v7317_v33 = vpop.f32.mrf.mxu1  ;;  %v9992_v38 = vadd.f32 %v7315_v25, %v5113_v5  ;;  %v10322_v5 = vld [vmem:[#allocation10_spill] sm:$0xff] }
 0x2bf   :  { %v7318_v47 = vadd.f32 %v7317_v33, %v7316_v39  ;;  %v7255_v28 = vpop.f32.mrf.mxu0  ;;  %v7202_v25 = vadd.f32 %v10322_v5, %v10321_v42 }
 0x2c0   :  { %v5118_v44 = vadd.f32 %v7254_v60, %v5021_v20  ;;  %v7319_v52 = vpop.f32.mrf.mxu1  ;;  %v5293_v27 = vsel %vm5287_vm0, %v9992_v38, 0.0 }
 0x2c1   :  { %v7256_v37 = vpop.f32.mrf.mxu0  ;;  %5376 = vadd.xlane.f32.xlu1 %v5356_v45  ;;  %5314 = vadd.xlane.f32.xlu0 %v5293_v27  ;;  %v5357_v40 = vmul.f32 %v5293_v27, %v5293_v27  ;;  %v5037_v60 = vadd.f32 %v7202_v25, %v4940_v10  ;;  %v10325_v45 = vld [vmem:[#allocation17_spill] sm:$0xff] }
 0x2c2   :  { %v7257_v3 = vadd.f32 %v7256_v37, %v7255_v28  ;;  %v7320_v14 = vpop.f32.mrf.mxu1  ;;  %v10002_v32 = vadd.f32 %v7318_v47, %v5118_v44  ;;  %v4943_v47 = vadd.f32 %v7141_v62, %v10323_v61  ;;  %v10324_v28 = vld [vmem:[#allocation15_spill] sm:$0xff] }
 0x2c3   :  { %v7258_v2 = vpop.f32.mrf.mxu0  ;;  %v7321_v22 = vadd.f32 %v7320_v14, %v7319_v52  ;;  %v7144_v44 = vadd.f32 %v10325_v45, %v10324_v28  ;;  %v10327_v14 = vld [vmem:[#allocation14_spill] sm:$0xff]  ;;  %v10334_v62 = vld [vmem:[#allocation23_spill] sm:$0xff] }
 0x2c4   :  { %v5121_v11 = vadd.f32 %v7257_v3, %v5024_v7  ;;  %v7322_v56 = vpop.f32.mrf.mxu1  ;;  %v5294_v9 = vsel %vm5287_vm0, %v10002_v32, 0.0  ;;  %v10326_v3 = vld [vmem:[#allocation12_spill] sm:$0xff]  ;;  %v10338_v45 = vld [vmem:[#allocation6_spill] sm:$0xff] }
 0x2c5   :  { %v7259_v1 = vpop.f32.mrf.mxu0  ;;  %5378 = vadd.xlane.f32.xlu1 %v5357_v40  ;;  %5316 = vadd.xlane.f32.xlu0 %v5294_v9  ;;  %v5358_v36 = vmul.f32 %v5294_v9, %v5294_v9 }
 0x2c6   :  { %v7260_v58 = vadd.f32 %v7259_v1, %v7258_v2  ;;  %v7323_v26 = vpop.f32.mrf.mxu1  ;;  %v10012_v24 = vadd.f32 %v7321_v22, %v5121_v11  ;;  %v7205_v2 = vadd.f32 %v10327_v14, %v10326_v3  ;;  %v10328_v22 = vld [vmem:[#allocation19_spill] sm:$0xff] }
 0x2c7   :  { %v7324_v55 = vadd.f32 %v7323_v26, %v7322_v56  ;;  %v7261_v46 = vpop.f32.mrf.mxu0  ;;  %v10329_v56 = vld [vmem:[#allocation21_spill] sm:$0xff] }
 0x2c8   :  { %v5126_v51 = vadd.f32 %v7260_v58, %v5029_v54  ;;  %v7325_v4 = vpop.f32.mrf.mxu1  ;;  %v5295_v53 = vsel %vm5287_vm0, %v10012_v24, 0.0  ;;  %v7147_v9 = vadd.f32 %v10329_v56, %v10328_v22  ;;  %v5040_v1 = vadd.f32 %v7205_v2, %v4943_v47  ;;  %v10330_v54 = vld [vmem:[#allocation4_spill] sm:$0xff] }
 0x2c9   :  { %v7262_v43 = vpop.f32.mrf.mxu0  ;;  %5380 = vadd.xlane.f32.xlu1 %v5358_v36  ;;  %5318 = vadd.xlane.f32.xlu0 %v5295_v53  ;;  %v5359_v31 = vmul.f32 %v5295_v53, %v5295_v53  ;;  %v4948_v29 = vadd.f32 %v7144_v44, %v10330_v54 }
 0x2ca   :  { %v7263_v48 = vadd.f32 %v7262_v43, %v7261_v46  ;;  %v7326_v63 = vpop.f32.mrf.mxu1  ;;  %v10022_v13 = vadd.f32 %v7324_v55, %v5126_v51  ;;  %v7208_v51 = vadd.f32 %v10332_v12, %v10331_v23  ;;  %v10333_v43 = vld [vmem:[#allocation5_spill] sm:$0xff] }
 0x2cb   :  { %v7264_v39 = vpop.f32.mrf.mxu0  ;;  %v7327_v0 = vadd.f32 %v7326_v63, %v7325_v4 }
 0x2cc   :  { %v5129_v21 = vadd.f32 %v7263_v48, %v5032_v30  ;;  %v7328_v20 = vpop.f32.mrf.mxu1  ;;  %v5296_v19 = vsel %vm5287_vm0, %v10022_v13, 0.0  ;;  %v4951_v30 = vadd.f32 %v7147_v9, %v10333_v43  ;;  %v5045_v6 = vadd.f32 %v7208_v51, %v4948_v29  ;;  %v10335_v48 = vld [vmem:[#allocation25_spill] sm:$0xff]  ;;  %v10343_v29 = vld [vmem:[#allocation7_spill] sm:$0xff] }
 0x2cd   :  { %v7265_v33 = vpop.f32.mrf.mxu0  ;;  %5382 = vadd.xlane.f32.xlu1 %v5359_v31  ;;  %5320 = vadd.xlane.f32.xlu0 %v5296_v19  ;;  %v5360_v34 = vmul.f32 %v5296_v19, %v5296_v19  ;;  %v7150_v63 = vadd.f32 %v10335_v48, %v10334_v62  ;;  %v10337_v31 = vld [vmem:[#allocation22_spill] sm:$0xff] }
 0x2ce   :  { %v7266_v52 = vadd.f32 %v7265_v33, %v7264_v39  ;;  %v7329_v27 = vpop.f32.mrf.mxu1  ;;  %v10032_v7 = vadd.f32 %v7327_v0, %v5129_v21  ;;  %v10336_v39 = vld [vmem:[#allocation20_spill] sm:$0xff] }
 0x2cf   :  { %v7330_v37 = vadd.f32 %v7329_v27, %v7328_v20  ;;  %v7267_v49 = vpop.f32.mrf.mxu0  ;;  %v7211_v21 = vadd.f32 %v10337_v31, %v10336_v39  ;;  %v4956_v44 = vadd.f32 %v7150_v63, %v10338_v45  ;;  %v10340_v27 = vld [vmem:[#allocation29_spill] sm:$0xff] }
 0x2d0   :  { %v5134_v40 = vadd.f32 %v7266_v52, %v5037_v60  ;;  %v7331_v16 = vpop.f32.mrf.mxu1  ;;  %v5297_v11 = vsel %vm5287_vm0, %v10032_v7, 0.0  ;;  %v10339_v52 = vld [vmem:[#allocation27_spill] sm:$0xff] }
 0x2d1   :  { %v7268_v59 = vpop.f32.mrf.mxu0  ;;  %5384 = vadd.xlane.f32.xlu1 %v5360_v34  ;;  %5322 = vadd.xlane.f32.xlu0 %v5297_v11  ;;  %v5361_v36 = vmul.f32 %v5297_v11, %v5297_v11  ;;  %v5048_v47 = vadd.f32 %v7211_v21, %v4951_v30 }
 0x2d2   :  { %v7269_v58 = vadd.f32 %v7268_v59, %v7267_v49  ;;  %v7332_v26 = vpop.f32.mrf.mxu1  ;;  %v10042_v55 = vadd.f32 %v7330_v37, %v5134_v40  ;;  %v7153_v37 = vadd.f32 %v10340_v27, %v10339_v52  ;;  %v10341_v40 = vld [vmem:[#allocation24_spill] sm:$0xff] }
 0x2d3   :  { %v7270_v46 = vpop.f32.mrf.mxu0  ;;  %v7333_v53 = vadd.f32 %v7332_v26, %v7331_v16  ;;  %v10342_v16 = vld [vmem:[#allocation26_spill] sm:$0xff] }
 0x2d4   :  { %v5137_v4 = vadd.f32 %v7269_v58, %v5040_v1  ;;  %v7334_v17 = vpop.f32.mrf.mxu1  ;;  %v5298_v10 = vsel %vm5287_vm0, %v10042_v55, 0.0  ;;  %v7214_v11 = vadd.f32 %v10342_v16, %v10341_v40  ;;  %v4959_v58 = vadd.f32 %v7153_v37, %v10343_v29 }
 0x2d5   :  { %v7271_v18 = vpop.f32.mrf.mxu0  ;;  %5386 = vadd.xlane.f32.xlu1 %v5361_v36  ;;  %5324 = vadd.xlane.f32.xlu0 %v5298_v10  ;;  %v5362_v19 = vmul.f32 %v5298_v10, %v5298_v10 }
 0x2d6   :  { %v7272_v42 = vadd.f32 %v7271_v18, %v7270_v46  ;;  %v7335_v5 = vpop.f32.mrf.mxu1  ;;  %v10052_v25 = vadd.f32 %v7333_v53, %v5137_v4  ;;  %v5053_v54 = vadd.f32 %v7214_v11, %v4956_v44  ;;  %v10344_v4 = vld [vmem:[#allocation28_spill] sm:$0xff]  ;;  %v10345_v53 = vld [vmem:[#allocation30_spill] sm:$0xff] }
 0x2d7   :  { %v7336_v0 = vadd.f32 %v7335_v5, %v7334_v17  ;;  %v7273_v20 = vpop.f32.mrf.mxu0  ;;  %v7217_v17 = vadd.f32 %v10345_v53, %v10344_v4 }
 0x2d8   :  { %v5142_v60 = vadd.f32 %v7272_v42, %v5045_v6  ;;  %v7337_v33 = vpop.f32.mrf.mxu1  ;;  %v5299_v61 = vsel %vm5287_vm0, %v10052_v25, 0.0 }
 0x2d9   :  { %v7274_v28 = vpop.f32.mrf.mxu0  ;;  %5388 = vadd.xlane.f32.xlu1 %v5362_v19  ;;  %5326 = vadd.xlane.f32.xlu0 %v5299_v61  ;;  %v5363_v2 = vmul.f32 %v5299_v61, %v5299_v61  ;;  %v5056_v6 = vadd.f32 %v7217_v17, %v4959_v58 }
 0x2da   :  { %v7275_v49 = vadd.f32 %v7274_v28, %v7273_v20  ;;  %v7338_v34 = vpop.f32.mrf.mxu1  ;;  %v10062_v3 = vadd.f32 %v7336_v0, %v5142_v60 }
 0x2db   :  { %v7276_v14 = vpop.f32.mrf.mxu0  ;;  %v7339_v56 = vadd.f32 %v7338_v34, %v7337_v33 }
 0x2dc   :  { %v5145_v22 = vadd.f32 %v7275_v49, %v5048_v47  ;;  %v7340_v9 = vpop.f32.mrf.mxu1  ;;  %v5300_v59 = vsel %vm5287_vm0, %v10062_v3, 0.0 }
 0x2dd   :  { %v7277_v1 = vpop.f32.mrf.mxu0  ;;  %5390 = vadd.xlane.f32.xlu1 %v5363_v2  ;;  %5328 = vadd.xlane.f32.xlu0 %v5300_v59  ;;  %v5364_v51 = vmul.f32 %v5300_v59, %v5300_v59 }
 0x2de   :  { %v7278_v26 = vadd.f32 %v7277_v1, %v7276_v14  ;;  %v7341_v46 = vpop.f32.mrf.mxu1  ;;  %v10070_v36 = vadd.f32 %v7339_v56, %v5145_v22 }
 0x2df   :  { %v7342_v23 = vadd.f32 %v7341_v46, %v7340_v9  ;;  %v7279_v12 = vpop.f32.mrf.mxu0 }
 0x2e0   :  { %v5150_v10 = vadd.f32 %v7278_v26, %v5053_v54  ;;  %v7343_v43 = vpop.f32.mrf.mxu1  ;;  %v5301_v30 = vsel %vm5287_vm0, %v10070_v36, 0.0 }
 0x2e1   :  { %v7280_v18 = vpop.f32.mrf.mxu0  ;;  %5392 = vadd.xlane.f32.xlu1 %v5364_v51  ;;  %5330 = vadd.xlane.f32.xlu0 %v5301_v30  ;;  %v5365_v42 = vmul.f32 %v5301_v30, %v5301_v30 }
 0x2e2   :  { %v7281_v62 = vadd.f32 %v7280_v18, %v7279_v12  ;;  %v7344_v48 = vpop.f32.mrf.mxu1  ;;  %v10077_v63 = vadd.f32 %v7342_v23, %v5150_v10 }
 0x2e3   :  { %v7345_v39 = vadd.f32 %v7344_v48, %v7343_v43 }
 0x2e4   :  { %v5153_v5 = vadd.f32 %v7281_v62, %v5056_v6  ;;  %v5302_v31 = vsel %vm5287_vm0, %v10077_v63, 0.0 }
 0x2e5   :  { %5394 = vadd.xlane.f32.xlu1 %v5365_v42  ;;  %5332 = vadd.xlane.f32.xlu0 %v5302_v31  ;;  %v5366_v0 = vmul.f32 %v5302_v31, %v5302_v31 }
 0x2e6   :  { %v10082_v21 = vadd.f32 %v7345_v39, %v5153_v5  ;;  %v5253_v39 = vld [vmem:[%s10285_s3] sm:$0xff] }
 0x2e8   :  { %v5303_v20 = vsel %vm5287_vm0, %v10082_v21, 0.0 }
 0x2e9   :  { %5396 = vadd.xlane.f32.xlu1 %v5366_v0  ;;  %5334 = vadd.xlane.f32.xlu0 %v5303_v20  ;;  %v5367_v19 = vmul.f32 %v5303_v20, %v5303_v20 }
 0x2ed   :  { %5398 = vadd.xlane.f32.xlu0 %v5367_v19 }
 0x336   :  { %v5305_v60 = vpop.xlane.xlu0 %5304 }
 0x337   :  { %v10087_v33 = vmul.f32 0.5, %v5305_v60 }
 0x339   :  { %v5416_v28 = vmul.f32 %v10087_v33, %v10087_v33 }
 0x33a   :  { %v5307_v61 = vpop.xlane.xlu1 %5306  ;;  %v5369_v47 = vpop.xlane.xlu0 %5368 }
 0x33b   :  { %v10091_v45 = vmul.f32 0.5, %v5307_v61  ;;  %v5400_v44 = vmul.f32 0.5, %v5369_v47 }
 0x33d   :  { %v5432_v52 = vsub.f32 %v5400_v44, %v5416_v28  ;;  %v5417_v50 = vmul.f32 %v10091_v45, %v10091_v45 }
 0x33e   :  { %v5371_v27 = vpop.xlane.xlu1 %5370  ;;  %v5309_v37 = vpop.xlane.xlu0 %5308 }
 0x33f   :  { %v5448_v49 = vmax.f32 %v5432_v52, 0.0  ;;  %v5401_v34 = vmul.f32 0.5, %v5371_v27  ;;  %v10095_v14 = vmul.f32 0.5, %v5309_v37  ;;  %v5254_v27 = vld [vmem:[%s10285_s3 + $0x8] sm:$0xff] }
 0x341   :  { %v5464_v2 = vadd.f32 1e-05, %v5448_v49  ;;  %v5433_v40 = vsub.f32 %v5401_v34, %v5417_v50  ;;  %v5418_v16 = vmul.f32 %v10095_v14, %v10095_v14  ;;  %v5269_v34 = vld [vmem:[%s10286_s4] sm:$0xff] }
 0x342   :  { %v5373_v11 = vpop.xlane.xlu1 %5372  ;;  %v5311_v22 = vpop.xlane.xlu0 %5310 }
 0x343   :  { %7605 = vrsqrt.f32 %v5464_v2  ;;  %v5449_v56 = vmax.f32 %v5433_v40, 0.0  ;;  %v5402_v9 = vmul.f32 0.5, %v5373_v11  ;;  %v10099_v59 = vmul.f32 0.5, %v5311_v22 }
 0x345   :  { %v5465_v1 = vadd.f32 1e-05, %v5449_v56  ;;  %v5434_v54 = vsub.f32 %v5402_v9, %v5418_v16  ;;  %v5419_v29 = vmul.f32 %v10099_v59, %v10099_v59 }
 0x346   :  { %v5375_v58 = vpop.xlane.xlu1 %5374  ;;  %v5313_v26 = vpop.xlane.xlu0 %5312 }
 0x347   :  { %7607 = vrsqrt.f32 %v5465_v1  ;;  %v5450_v46 = vmax.f32 %v5434_v54, 0.0  ;;  %v5403_v23 = vmul.f32 0.5, %v5375_v58  ;;  %v10103_v12 = vmul.f32 0.5, %v5313_v26 }
 0x349   :  { %v5466_v51 = vadd.f32 1e-05, %v5450_v46  ;;  %v5435_v4 = vsub.f32 %v5403_v23, %v5419_v29  ;;  %v5420_v53 = vmul.f32 %v10103_v12, %v10103_v12  ;;  %v5255_v29 = vld [vmem:[%s10285_s3 + $0x10] sm:$0xff] }
 0x34a   :  { %v5377_v17 = vpop.xlane.xlu1 %5376  ;;  %v5315_v10 = vpop.xlane.xlu0 %5314 }
 0x34b   :  { %7609 = vrsqrt.f32 %v5466_v51  ;;  %v5451_v43 = vmax.f32 %v5435_v4, 0.0  ;;  %v5404_v30 = vmul.f32 0.5, %v5377_v17  ;;  %v10107_v18 = vmul.f32 0.5, %v5315_v10 }
 0x34d   :  { %v5467_v6 = vadd.f32 1e-05, %v5451_v43  ;;  %v5436_v62 = vsub.f32 %v5404_v30, %v5420_v53  ;;  %v5421_v48 = vmul.f32 %v10107_v18, %v10107_v18 }
 0x34e   :  { %v5379_v42 = vpop.xlane.xlu1 %5378  ;;  %v5317_v5 = vpop.xlane.xlu0 %5316 }
 0x34f   :  { %7611 = vrsqrt.f32 %v5467_v6  ;;  %v5452_v31 = vmax.f32 %v5436_v62, 0.0  ;;  %v5405_v0 = vmul.f32 0.5, %v5379_v42  ;;  %v10114_v20 = vmul.f32 0.5, %v5317_v5  ;;  %v5256_v62 = vld [vmem:[%s10285_s3 + $0x18] sm:$0xff] }
 0x350   :  { %v7606_v19 = vpop.eup %7605 }
 0x351   :  { %v5468_v60 = vadd.f32 1e-05, %v5452_v31  ;;  %v5437_v61 = vsub.f32 %v5405_v0, %v5421_v48  ;;  %v5496_v47 = vmul.f32 %v7606_v19, %v5253_v39  ;;  %v5422_v28 = vmul.f32 %v10114_v20, %v10114_v20 }
 0x352   :  { %v5381_v44 = vpop.xlane.xlu1 %5380  ;;  %v5319_v52 = vpop.xlane.xlu0 %5318 }
 0x353   :  { %7613 = vrsqrt.f32 %v5468_v60  ;;  %v5453_v37 = vmax.f32 %v5437_v61, 0.0  ;;  %v5406_v50 = vmul.f32 0.5, %v5381_v44  ;;  %v10121_v49 = vmul.f32 0.5, %v5319_v52  ;;  %5546 = vperm.xlu1 %7348, %v5496_v47  }
 0x354   :  { %v7608_v2 = vpop.eup %7607  ;;  %v5512_v40 = vmul.f32 %v5496_v47, %v10087_v33  ;;  %v5270_v33 = vld [vmem:[%s10286_s4 + $0x8] sm:$0xff] }
 0x355   :  { %v5469_v16 = vadd.f32 1e-05, %v5453_v37  ;;  %v5438_v11 = vsub.f32 %v5406_v50, %v5422_v28  ;;  %v5497_v22 = vmul.f32 %v7608_v2, %v5254_v27  ;;  %v5423_v56 = vmul.f32 %v10121_v49, %v10121_v49  ;;  %v5257_v28 = vld [vmem:[%s10285_s3 + $0x20] sm:$0xff]  ;;  %v5271_v37 = vld [vmem:[%s10286_s4 + $0x10] sm:$0xff] }
 0x356   :  { %v5383_v9 = vpop.xlane.xlu1 %5382  ;;  %v5321_v1 = vpop.xlane.xlu0 %5320  ;;  %v5528_v54 = vsub.f32 %v5269_v34, %v5512_v40 }
 0x357   :  { %7615 = vrsqrt.f32 %v5469_v16  ;;  %v5454_v58 = vmax.f32 %v5438_v11, 0.0  ;;  %v5407_v26 = vmul.f32 0.5, %v5383_v9  ;;  %v10132_v46 = vmul.f32 0.5, %v5321_v1  ;;  %5551 = vperm.xlu0 %7347, %v5497_v22   ;;  %v5272_v9 = vld [vmem:[%s10286_s4 + $0x18] sm:$0xff]  ;;  %v5258_v1 = vld [vmem:[%s10285_s3 + $0x28] sm:$0xff] }
 0x358   :  { %v7610_v23 = vpop.eup %7609  ;;  %5642 = vperm.xlu1 %7348, %v5528_v54   ;;  %v5513_v51 = vmul.f32 %v5497_v22, %v10091_v45 }
 0x359   :  { %v5470_v4 = vadd.f32 1e-05, %v5454_v58  ;;  %v5439_v53 = vsub.f32 %v5407_v26, %v5423_v56  ;;  %v5498_v17 = vmul.f32 %v7610_v23, %v5255_v29  ;;  %v5424_v10 = vmul.f32 %v10132_v46, %v10132_v46 }
 0x35a   :  { %v5385_v43 = vpop.xlane.xlu1 %5384  ;;  %v5323_v30 = vpop.xlane.xlu0 %5322  ;;  %v5529_v6 = vsub.f32 %v5270_v33, %v5513_v51 }
 0x35b   :  { %7617 = vrsqrt.f32 %v5470_v4  ;;  %v5455_v48 = vmax.f32 %v5439_v53, 0.0  ;;  %v5408_v42 = vmul.f32 0.5, %v5385_v43  ;;  %v10143_v5 = vmul.f32 0.5, %v5323_v30  ;;  %v5273_v53 = vld [vmem:[%s10286_s4 + $0x20] sm:$0xff]  ;;  %v5259_v30 = vld [vmem:[%s10285_s3 + $0x30] sm:$0xff] }
 0x35c   :  { %v7612_v39 = vpop.eup %7611  ;;  %5647 = vperm.xlu0 %7347, %v5529_v6   ;;  %5556 = vperm.xlu1 %7348, %v5498_v17   ;;  %v5514_v47 = vmul.f32 %v5498_v17, %v10095_v14 }
 0x35d   :  { %v5471_v45 = vadd.f32 1e-05, %v5455_v48  ;;  %v5440_v31 = vsub.f32 %v5408_v42, %v5424_v10  ;;  %v5499_v0 = vmul.f32 %v7612_v39, %v5256_v62  ;;  %v5425_v19 = vmul.f32 %v10143_v5, %v10143_v5 }
 0x35e   :  { %v5387_v60 = vpop.xlane.xlu1 %5386  ;;  %v5325_v61 = vpop.xlane.xlu0 %5324  ;;  %v5530_v56 = vsub.f32 %v5271_v37, %v5514_v47  ;;  %v5274_v47 = vld [vmem:[%s10286_s4 + $0x28] sm:$0xff] }
 0x35f   :  { %7619 = vrsqrt.f32 %v5471_v45  ;;  %v5456_v44 = vmax.f32 %v5440_v31, 0.0  ;;  %v5409_v52 = vmul.f32 0.5, %v5387_v60  ;;  %v10151_v27 = vmul.f32 0.5, %v5325_v61 }
 0x360   :  { %v7614_v50 = vpop.eup %7613  ;;  %5561 = vperm.xlu1 %7348, %v5499_v0   ;;  %v5515_v14 = vmul.f32 %v5499_v0, %v10099_v59 }
 0x361   :  { %v5472_v34 = vadd.f32 1e-05, %v5456_v44  ;;  %v5441_v2 = vsub.f32 %v5409_v52, %v5425_v19  ;;  %v5500_v40 = vmul.f32 %v7614_v50, %v5257_v28  ;;  %v5426_v16 = vmul.f32 %v10151_v27, %v10151_v27  ;;  %v5260_v28 = vld [vmem:[%s10285_s3 + $0x38] sm:$0xff] }
 0x362   :  { %v5389_v11 = vpop.xlane.xlu1 %5388  ;;  %v5327_v22 = vpop.xlane.xlu0 %5326  ;;  %v5531_v51 = vsub.f32 %v5272_v9, %v5515_v14  ;;  %v5261_v9 = vld [vmem:[%s10285_s3 + $0x40] sm:$0xff] }
 0x363   :  { %7621 = vrsqrt.f32 %v5472_v34  ;;  %v5457_v54 = vmax.f32 %v5441_v2, 0.0  ;;  %v5410_v29 = vmul.f32 0.5, %v5389_v11  ;;  %v10165_v58 = vmul.f32 0.5, %v5327_v22  ;;  %5566 = vperm.xlu0 %7347, %v5500_v40  }
 0x364   :  { %v7616_v59 = vpop.eup %7615  ;;  %5652 = vperm.xlu1 %7348, %v5530_v56   ;;  %v5516_v26 = vmul.f32 %v5500_v40, %v10103_v12 }
 0x365   :  { %v5473_v33 = vadd.f32 1e-05, %v5457_v54  ;;  %v5442_v23 = vsub.f32 %v5410_v29, %v5426_v16  ;;  %v5501_v4 = vmul.f32 %v7616_v59, %v5258_v1  ;;  %v5427_v17 = vmul.f32 %v10165_v58, %v10165_v58  ;;  %v5275_v16 = vld [vmem:[%s10286_s4 + $0x30] sm:$0xff] }
 0x366   :  { %v5391_v10 = vpop.xlane.xlu1 %5390  ;;  %v5329_v43 = vpop.xlane.xlu0 %5328  ;;  %v5532_v42 = vsub.f32 %v5273_v53, %v5516_v26 }
 0x367   :  { %7623 = vrsqrt.f32 %v5473_v33  ;;  %v5458_v6 = vmax.f32 %v5442_v23, 0.0  ;;  %v5411_v12 = vmul.f32 0.5, %v5391_v10  ;;  %v10176_v62 = vmul.f32 0.5, %v5329_v43  ;;  %5657 = vperm.xlu0 %7347, %v5531_v51   ;;  %v5276_v10 = vld [vmem:[%s10286_s4 + $0x38] sm:$0xff]  ;;  %v5262_v43 = vld [vmem:[%s10285_s3 + $0x48] sm:$0xff] }
 0x368   :  { %v7618_v48 = vpop.eup %7617  ;;  %5571 = vperm.xlu1 %7348, %v5501_v4   ;;  %v5517_v0 = vmul.f32 %v5501_v4, %v10107_v18 }
 0x369   :  { %v5474_v39 = vadd.f32 1e-05, %v5458_v6  ;;  %v5443_v45 = vsub.f32 %v5411_v12, %v5427_v17  ;;  %v5502_v31 = vmul.f32 %v7618_v48, %v5259_v30  ;;  %v5428_v19 = vmul.f32 %v10176_v62, %v10176_v62 }
 0x36a   :  { %v5393_v60 = vpop.xlane.xlu1 %5392  ;;  %v5331_v61 = vpop.xlane.xlu0 %5330  ;;  %v5533_v40 = vsub.f32 %v5274_v47, %v5517_v0  ;;  %v5277_v0 = vld [vmem:[%s10286_s4 + $0x40] sm:$0xff] }
 0x36b   :  { %7625 = vrsqrt.f32 %v5474_v39  ;;  %v5459_v44 = vmax.f32 %v5443_v45, 0.0  ;;  %v5412_v52 = vmul.f32 0.5, %v5393_v60  ;;  %v10187_v37 = vmul.f32 0.5, %v5331_v61  ;;  %5662 = vperm.xlu0 %7347, %v5532_v42   ;;  %v5263_v60 = vld [vmem:[%s10285_s3 + $0x50] sm:$0xff] }
 0x36c   :  { %v7620_v18 = vpop.eup %7619  ;;  %5576 = vperm.xlu1 %7348, %v5502_v31   ;;  %v5518_v50 = vmul.f32 %v5502_v31, %v10114_v20 }
 0x36d   :  { %v5475_v34 = vadd.f32 1e-05, %v5459_v44  ;;  %v5444_v2 = vsub.f32 %v5412_v52, %v5428_v19  ;;  %v5503_v14 = vmul.f32 %v7620_v18, %v5260_v28  ;;  %v5429_v11 = vmul.f32 %v10187_v37, %v10187_v37 }
 0x36e   :  { %v5395_v22 = vpop.xlane.xlu1 %5394  ;;  %v5333_v56 = vpop.xlane.xlu0 %5332  ;;  %v5534_v59 = vsub.f32 %v5275_v16, %v5518_v50 }
 0x36f   :  { %7627 = vrsqrt.f32 %v5475_v34  ;;  %v5460_v1 = vmax.f32 %v5444_v2, 0.0  ;;  %v5413_v20 = vmul.f32 0.5, %v5395_v22  ;;  %v10198_v54 = vmul.f32 0.5, %v5333_v56  ;;  %5667 = vperm.xlu0 %7347, %v5533_v40   ;;  %v5278_v2 = vld [vmem:[%s10286_s4 + $0x48] sm:$0xff]  ;;  %v5264_v40 = vld [vmem:[%s10285_s3 + $0x58] sm:$0xff] }
 0x370   :  { %v7622_v29 = vpop.eup %7621  ;;  %5581 = vperm.xlu1 %7348, %v5503_v14   ;;  %v5519_v51 = vmul.f32 %v5503_v14, %v10121_v49 }
 0x371   :  { %v5476_v26 = vadd.f32 1e-05, %v5460_v1  ;;  %v5445_v33 = vsub.f32 %v5413_v20, %v5429_v11  ;;  %v5504_v23 = vmul.f32 %v7622_v29, %v5261_v9  ;;  %v5430_v4 = vmul.f32 %v10198_v54, %v10198_v54  ;;  %v5265_v1 = vld [vmem:[%s10285_s3 + $0x60] sm:$0xff] }
 0x372   :  { %v5397_v53 = vpop.xlane.xlu1 %5396  ;;  %v5335_v17 = vpop.xlane.xlu0 %5334  ;;  %v5535_v45 = vsub.f32 %v5276_v10, %v5519_v51 }
 0x373   :  { %7629 = vrsqrt.f32 %v5476_v26  ;;  %v5461_v30 = vmax.f32 %v5445_v33, 0.0  ;;  %v5414_v6 = vmul.f32 0.5, %v5397_v53  ;;  %v10209_v12 = vmul.f32 0.5, %v5335_v17  ;;  %5672 = vperm.xlu0 %7347, %v5534_v59   ;;  %v5266_v33 = vld [vmem:[%s10285_s3 + $0x68] sm:$0xff]  ;;  %v5281_v17 = vld [vmem:[%s10286_s4 + $0x60] sm:$0xff] }
 0x374   :  { %v7624_v49 = vpop.eup %7623  ;;  %5586 = vperm.xlu1 %7348, %v5504_v23   ;;  %v5520_v48 = vmul.f32 %v5504_v23, %v10132_v46 }
 0x375   :  { %v5477_v42 = vadd.f32 1e-05, %v5461_v30  ;;  %v5446_v39 = vsub.f32 %v5414_v6, %v5430_v4  ;;  %v5505_v31 = vmul.f32 %v7624_v49, %v5262_v43  ;;  %v5431_v47 = vmul.f32 %v10209_v12, %v10209_v12  ;;  %v5282_v49 = vld [vmem:[%s10286_s4 + $0x68] sm:$0xff] }
 0x376   :  { %v5399_v19 = vpop.xlane.xlu0 %5398  ;;  %v5536_v44 = vsub.f32 %v5277_v0, %v5520_v48 }
 0x377   :  { %7631 = vrsqrt.f32 %v5477_v42  ;;  %v5462_v61 = vmax.f32 %v5446_v39, 0.0  ;;  %v5415_v28 = vmul.f32 0.5, %v5399_v19  ;;  %5677 = vperm.xlu0 %7347, %v5535_v45   ;;  %v5521_v34 = vmul.f32 %v5505_v31, %v10143_v5  ;;  %v5279_v5 = vld [vmem:[%s10286_s4 + $0x50] sm:$0xff] }
 0x378   :  { %v7626_v46 = vpop.eup %7625  ;;  %5591 = vperm.xlu1 %7348, %v5505_v31   ;;  %v5283_v31 = vld [vmem:[%s10286_s4 + $0x70] sm:$0xff] }
 0x379   :  { %v5478_v52 = vadd.f32 1e-05, %v5462_v61  ;;  %v5447_v18 = vsub.f32 %v5415_v28, %v5431_v47  ;;  %v5506_v50 = vmul.f32 %v7626_v46, %v5263_v60  ;;  %v5537_v22 = vsub.f32 %v5278_v2, %v5521_v34 }
 0x37b   :  { %7633 = vrsqrt.f32 %v5478_v52  ;;  %v5463_v14 = vmax.f32 %v5447_v18, 0.0  ;;  %5682 = vperm.xlu0 %7347, %v5536_v44   ;;  %v5522_v9 = vmul.f32 %v5506_v50, %v10151_v27  ;;  %v5280_v27 = vld [vmem:[%s10286_s4 + $0x58] sm:$0xff] }
 0x37c   :  { %v7628_v16 = vpop.eup %7627  ;;  %5596 = vperm.xlu1 %7348, %v5506_v50  }
 0x37d   :  { %v5479_v11 = vadd.f32 1e-05, %v5463_v14  ;;  %v5507_v56 = vmul.f32 %v7628_v16, %v5264_v40  ;;  %v5538_v29 = vsub.f32 %v5279_v5, %v5522_v9 }
 0x37f   :  { %7635 = vrsqrt.f32 %v5479_v11  ;;  %5687 = vperm.xlu0 %7347, %v5537_v22   ;;  %v5523_v26 = vmul.f32 %v5507_v56, %v10165_v58  ;;  %v5267_v58 = vld [vmem:[%s10285_s3 + $0x70] sm:$0xff] }
 0x380   :  { %v7630_v20 = vpop.eup %7629  ;;  %5601 = vperm.xlu1 %7348, %v5507_v56  }
 0x381   :  { %v5508_v59 = vmul.f32 %v7630_v20, %v5265_v1  ;;  %v5539_v51 = vsub.f32 %v5280_v27, %v5523_v26 }
 0x383   :  { %5692 = vperm.xlu0 %7347, %v5538_v29   ;;  %v5524_v53 = vmul.f32 %v5508_v59, %v10176_v62  ;;  %v5268_v62 = vld [vmem:[%s10285_s3 + $0x78] sm:$0xff] }
 0x384   :  { %v7632_v23 = vpop.eup %7631  ;;  %5606 = vperm.xlu1 %7348, %v5508_v59  }
 0x385   :  { %v5509_v4 = vmul.f32 %v7632_v23, %v5266_v33  ;;  %v5540_v43 = vsub.f32 %v5281_v17, %v5524_v53 }
 0x387   :  { %5697 = vperm.xlu0 %7347, %v5539_v51   ;;  %v5525_v6 = vmul.f32 %v5509_v4, %v10187_v37  ;;  %v5284_v37 = vld [vmem:[%s10286_s4 + $0x78] sm:$0xff] }
 0x388   :  { %v7634_v10 = vpop.eup %7633  ;;  %5611 = vperm.xlu1 %7348, %v5509_v4  }
 0x389   :  { %v5510_v30 = vmul.f32 %v7634_v10, %v5267_v58  ;;  %v5541_v42 = vsub.f32 %v5282_v49, %v5525_v6 }
 0x38b   :  { %5702 = vperm.xlu0 %7347, %v5540_v43   ;;  %v5526_v45 = vmul.f32 %v5510_v30, %v10198_v54 }
 0x38c   :  { %v7636_v48 = vpop.eup %7635  ;;  %5616 = vperm.xlu1 %7348, %v5510_v30  }
 0x38d   :  { %v5511_v39 = vmul.f32 %v7636_v48, %v5268_v62  ;;  %v5542_v19 = vsub.f32 %v5283_v31, %v5526_v45 }
 0x38f   :  { %5707 = vperm.xlu0 %7347, %v5541_v42   ;;  %v5527_v0 = vmul.f32 %v5511_v39, %v10209_v12 }
 0x390   :  { %5621 = vperm.xlu1 %7348, %v5511_v39  }
 0x391   :  { %v5543_v60 = vsub.f32 %v5284_v37, %v5527_v0 }
 0x393   :  { %5712 = vperm.xlu0 %7347, %v5542_v19  }
 0x394   :  { %5717 = vperm.xlu1 %7348, %v5543_v60  }
 0x3ce   :  { %v5547_v61 = vpop.permute.xlu1 %5546 }
 0x3cf   :  { %v5624_v11 = vmul.f32 %v5547_v61, %v9942_v15 }
 0x3d2   :  { %v5552_v28 = vpop.permute.xlu0 %5551 }
 0x3d3   :  { %v5643_v47 = vpop.permute.xlu1 %5642  ;;  %v5625_v12 = vmul.f32 %v5552_v28, %v9952_v35 }
 0x3d4   :  { %v5720_v1 = vadd.f32 %v5643_v47, %v5624_v11 }
 0x3d6   :  { %v5752_v51 = vmul.f32 0.01, %v5720_v1  ;;  %vm5736_vm2 = vcmp.ge.f32.partialorder %v5720_v1, 0.0 }
 0x3d7   :  { %v5557_v54 = vpop.permute.xlu1 %5556  ;;  %v5648_v46 = vpop.permute.xlu0 %5647 }
 0x3d8   :  { %v5626_v56 = vmul.f32 %v5557_v54, %v9962_v41  ;;  %v5721_v9 = vadd.f32 %v5648_v46, %v5625_v12  ;;  %v5768_v43 = vsel %vm5736_vm2, %v5720_v1, %v5752_v51 }
 0x3da   :  { %v5753_v26 = vmul.f32 0.01, %v5721_v9  ;;  %vm5737_vm1 = vcmp.ge.f32.partialorder %v5721_v9, 0.0 }
 0x3db   :  { %v5562_v44 = vpop.permute.xlu1 %5561 }
 0x3dc   :  { %v5627_v20 = vmul.f32 %v5562_v44, %v9972_v8  ;;  %v5769_v53 = vsel %vm5737_vm1, %v5721_v9, %v5753_v26 }
 0x3dd   :  { %v5784_v62 = vadd.f32 %v5769_v53, %v5768_v43 }
 0x3de   :  { %v5567_v52 = vpop.permute.xlu0 %5566 }
 0x3df   :  { %v5653_v18 = vpop.permute.xlu1 %5652  ;;  %v5628_v27 = vmul.f32 %v5567_v52, %v9982_v57 }
 0x3e0   :  { %v5722_v29 = vadd.f32 %v5653_v18, %v5626_v56 }
 0x3e2   :  { %v5658_v50 = vpop.permute.xlu0 %5657  ;;  %v5754_v35 = vmul.f32 0.01, %v5722_v29  ;;  %vm5738_vm3 = vcmp.ge.f32.partialorder %v5722_v29, 0.0 }
 0x3e3   :  { %v5572_v34 = vpop.permute.xlu1 %5571  ;;  %v5723_v33 = vadd.f32 %v5658_v50, %v5627_v20 }
 0x3e4   :  { %v5629_v15 = vmul.f32 %v5572_v34, %v9992_v38  ;;  %v5770_v57 = vsel %vm5738_vm3, %v5722_v29, %v5754_v35 }
 0x3e5   :  { %v5755_v17 = vmul.f32 0.01, %v5723_v33  ;;  %vm5739_vm4 = vcmp.ge.f32.partialorder %v5723_v33, 0.0  ;;  %v5785_v37 = vadd.f32 %v5784_v62, %v5770_v57 }
 0x3e6   :  { %v5663_v2 = vpop.permute.xlu0 %5662 }
 0x3e7   :  { %v5577_v40 = vpop.permute.xlu1 %5576  ;;  %v5724_v4 = vadd.f32 %v5663_v2, %v5628_v27  ;;  %v5771_v38 = vsel %vm5739_vm4, %v5723_v33, %v5755_v17 }
 0x3e8   :  { %v5630_v8 = vmul.f32 %v5577_v40, %v10002_v32  ;;  %v5786_v61 = vadd.f32 %v5785_v37, %v5771_v38 }
 0x3e9   :  { %v5756_v30 = vmul.f32 0.01, %v5724_v4  ;;  %vm5740_vm5 = vcmp.ge.f32.partialorder %v5724_v4, 0.0 }
 0x3ea   :  { %v5668_v14 = vpop.permute.xlu0 %5667 }
 0x3eb   :  { %v5582_v16 = vpop.permute.xlu1 %5581  ;;  %v5725_v58 = vadd.f32 %v5668_v14, %v5629_v15  ;;  %v5772_v32 = vsel %vm5740_vm5, %v5724_v4, %v5756_v30 }
 0x3ec   :  { %v5631_v6 = vmul.f32 %v5582_v16, %v10012_v24  ;;  %v5787_v52 = vadd.f32 %v5786_v61, %v5772_v32 }
 0x3ed   :  { %v5757_v42 = vmul.f32 0.01, %v5725_v58  ;;  %vm5741_vm6 = vcmp.ge.f32.partialorder %v5725_v58, 0.0 }
 0x3ee   :  { %v5673_v22 = vpop.permute.xlu0 %5672 }
 0x3ef   :  { %v5587_v5 = vpop.permute.xlu1 %5586  ;;  %v5726_v49 = vadd.f32 %v5673_v22, %v5630_v8  ;;  %v5773_v47 = vsel %vm5741_vm6, %v5725_v58, %v5757_v42 }
 0x3f0   :  { %v5632_v39 = vmul.f32 %v5587_v5, %v10022_v13  ;;  %v5788_v2 = vadd.f32 %v5787_v52, %v5773_v47 }
 0x3f1   :  { %v5758_v0 = vmul.f32 0.01, %v5726_v49  ;;  %vm5742_vm7 = vcmp.ge.f32.partialorder %v5726_v49, 0.0 }
 0x3f2   :  { %v5678_v59 = vpop.permute.xlu0 %5677 }
 0x3f3   :  { %v5592_v23 = vpop.permute.xlu1 %5591  ;;  %v5727_v45 = vadd.f32 %v5678_v59, %v5631_v6  ;;  %v5774_v13 = vsel %vm5742_vm7, %v5726_v49, %v5758_v0 }
 0x3f4   :  { %v5633_v19 = vmul.f32 %v5592_v23, %v10032_v7  ;;  %v5789_v11 = vadd.f32 %v5788_v2, %v5774_v13 }
 0x3f5   :  { %v5759_v28 = vmul.f32 0.01, %v5727_v45  ;;  %vm5743_vm8 = vcmp.ge.f32.partialorder %v5727_v45, 0.0 }
 0x3f6   :  { %v5683_v41 = vpop.permute.xlu0 %5682 }
 0x3f7   :  { %v5597_v10 = vpop.permute.xlu1 %5596  ;;  %v5728_v60 = vadd.f32 %v5683_v41, %v5632_v39  ;;  %v5775_v40 = vsel %vm5743_vm8, %v5727_v45, %v5759_v28 }
 0x3f8   :  { %v5634_v54 = vmul.f32 %v5597_v10, %v10042_v55  ;;  %v5790_v9 = vadd.f32 %v5789_v11, %v5775_v40 }
 0x3f9   :  { %v5760_v18 = vmul.f32 0.01, %v5728_v60  ;;  %vm5744_vm9 = vcmp.ge.f32.partialorder %v5728_v60, 0.0 }
 0x3fa   :  { %v5688_v48 = vpop.permute.xlu0 %5687 }
 0x3fb   :  { %v5602_v31 = vpop.permute.xlu1 %5601  ;;  %v5729_v46 = vadd.f32 %v5688_v48, %v5633_v19  ;;  %v5776_v22 = vsel %vm5744_vm9, %v5728_v60, %v5760_v18 }
 0x3fc   :  { %v5635_v50 = vmul.f32 %v5602_v31, %v10052_v25  ;;  %v5791_v59 = vadd.f32 %v5790_v9, %v5776_v22 }
 0x3fd   :  { %v5761_v14 = vmul.f32 0.01, %v5729_v46  ;;  %vm5745_vm10 = vcmp.ge.f32.partialorder %v5729_v46, 0.0 }
 0x3fe   :  { %v5693_v24 = vpop.permute.xlu0 %5692 }
 0x3ff   :  { %v5607_v44 = vpop.permute.xlu1 %5606  ;;  %v5730_v34 = vadd.f32 %v5693_v24, %v5634_v54  ;;  %v5777_v1 = vsel %vm5745_vm10, %v5729_v46, %v5761_v14 }
 0x400   :  { %v5636_v55 = vmul.f32 %v5607_v44, %v10062_v3  ;;  %v5792_v23 = vadd.f32 %v5791_v59, %v5777_v1 }
 0x401   :  { %v5762_v56 = vmul.f32 0.01, %v5730_v34  ;;  %vm5746_vm11 = vcmp.ge.f32.partialorder %v5730_v34, 0.0 }
 0x402   :  { %v5698_v7 = vpop.permute.xlu0 %5697 }
 0x403   :  { %v5612_v16 = vpop.permute.xlu1 %5611  ;;  %v5731_v12 = vadd.f32 %v5698_v7, %v5635_v50  ;;  %v5778_v26 = vsel %vm5746_vm11, %v5730_v34, %v5762_v56 }
 0x404   :  { %v5637_v27 = vmul.f32 %v5612_v16, %v10070_v36  ;;  %v5793_v4 = vadd.f32 %v5792_v23, %v5778_v26 }
 0x405   :  { %v5763_v20 = vmul.f32 0.01, %v5731_v12  ;;  %vm5747_vm12 = vcmp.ge.f32.partialorder %v5731_v12, 0.0 }
 0x406   :  { %v5703_v5 = vpop.permute.xlu0 %5702 }
 0x407   :  { %v5617_v25 = vpop.permute.xlu1 %5616  ;;  %v5732_v29 = vadd.f32 %v5703_v5, %v5636_v55  ;;  %v5779_v35 = vsel %vm5747_vm12, %v5731_v12, %v5763_v20 }
 0x408   :  { %v5638_v41 = vmul.f32 %v5617_v25, %v10077_v63  ;;  %v5794_v8 = vadd.f32 %v5793_v4, %v5779_v35 }
 0x409   :  { %v5764_v33 = vmul.f32 0.01, %v5732_v29  ;;  %vm5748_vm13 = vcmp.ge.f32.partialorder %v5732_v29, 0.0 }
 0x40a   :  { %v5708_v51 = vpop.permute.xlu0 %5707 }
 0x40b   :  { %v5622_v15 = vpop.permute.xlu1 %5621  ;;  %v5733_v3 = vadd.f32 %v5708_v51, %v5637_v27  ;;  %v5780_v53 = vsel %vm5748_vm13, %v5732_v29, %v5764_v33 }
 0x40c   :  { %v5639_v58 = vmul.f32 %v5622_v15, %v10082_v21  ;;  %v5795_v30 = vadd.f32 %v5794_v8, %v5780_v53 }
 0x40d   :  { %vm5749_vm14 = vcmp.ge.f32.partialorder %v5733_v3, 0.0  ;;  %v5765_v17 = vmul.f32 0.01, %v5733_v3 }
 0x40e   :  { %v5713_v10 = vpop.permute.xlu0 %5712 }
 0x40f   :  { %v5781_v43 = vsel %vm5749_vm14, %v5733_v3, %v5765_v17  ;;  %v5718_v57 = vpop.permute.xlu1 %5717  ;;  %v5734_v36 = vadd.f32 %v5713_v10, %v5638_v41 }
 0x410   :  { %v5735_v6 = vadd.f32 %v5718_v57, %v5639_v58  ;;  %v5796_v62 = vadd.f32 %v5795_v30, %v5781_v43 }
 0x411   :  { %vm5750_vm15 = vcmp.ge.f32.partialorder %v5734_v36, 0.0  ;;  %v5766_v49 = vmul.f32 0.01, %v5734_v36 }
 0x412   :  { %vm5751_vm0 = vcmp.ge.f32.partialorder %v5735_v6, 0.0  ;;  %v5767_v48 = vmul.f32 0.01, %v5735_v6 }
 0x413   :  { %v5782_v38 = vsel %vm5750_vm15, %v5734_v36, %v5766_v49 }
 0x414   :  { %v5797_v42 = vadd.f32 %v5796_v62, %v5782_v38  ;;  %v5783_v63 = vsel %vm5751_vm0, %v5735_v6, %v5767_v48 }
 0x416   :  { %v5798_v39 = vadd.f32 %v5797_v42, %v5783_v63 }
 0x418   :  { %v5799_v45 = vrot.slane %v5798_v39, 4 }
 0x41a   :  { %v5800_v31 = vadd.f32 %v5799_v45, %v5798_v39 }
 0x41c   :  { %v5801_v37 = vrot.slane %v5800_v31, 2 }
 0x41e   :  { %v5802_v32 = vadd.f32 %v5801_v37, %v5800_v31 }
 0x420   :  { %v5803_v21 = vrot.slane %v5802_v32, 1 }
 0x422   :  { %v5804_v0 = vadd.f32 %v5803_v21, %v5802_v32 }
 0x424   :  { %5805 = vst [vmem:[%s10287_s5] sm:$0x1] %v5804_v0 }

</bundles_post_ra>
